<compile_context>
chip_gen: v7x
topology: tpu7x:2x2x1
jax: 0.10.0
libtpu: 0.0.40
codegen_flags: <defaults>
</compile_context>

<pallas_src>
import jax
import jax.numpy as jnp
from jax.experimental import pallas as pl
from jax.experimental.pallas import tpu as pltpu

UPSCALE = 2
C_IN = 128                 # conv1 input channels
C1, C2 = 64, 32            # real conv1 / conv2 output channels
C3 = 16 * UPSCALE ** 2     # 64 real conv3 output channels
CP = 128                   # lane width used inside the kernel

# (taps_per_group, n_groups, chunk_groups) describing each conv's packed
# im2col K layout (group = one 128-lane column block of the slab):
#   conv1: Cin=128 -> 1 tap / group, 9 groups (K = 1152)
#   conv2: Cin=64  -> 2 taps / group, 5 groups (K =  640)
#   conv3: Cin=32  -> 4 taps / group, 3 groups (K =  384)
_CONV1 = (1, 9, 3)
_CONV2 = (2, 5, 2)
_CONV3 = (4, 3, 2)


def _sr_kernel(x_ref, w1_ref, b1_ref, w2_ref, b2_ref, w3_ref, b3_ref,
               out_ref, col_ref, buf0_ref, buf1_ref):
    # x_ref : (Bc, H, W, 128) bf16 unpadded input tile
    # w*    : packed im2col weights (K, 128) bf16; b*: (1, 128) f32
    # out   : (Bc, H*W, 128) bf16 (real 64 channels + zero lanes; wrapper slices)
    # col   : (Bc*H*W, 1152) bf16 im2col slab (conv2/conv3 use a prefix)
    # buf0  : padded bf16 scratch, holds x then conv2's activation
    # buf1  : padded bf16 scratch, holds conv1's activation
    Bc, H, W, _ = x_ref.shape
    HW = H * W

    lane = jax.lax.broadcasted_iota(jnp.int32, (HW, CP), 1)

    # Zero only the 1-px halo border of the padded scratches (O(perimeter));
    # redone every grid step so the kernel carries no cross-iteration scratch
    # state (safe under a megacore "parallel" batch axis).
    zrow = jnp.zeros((Bc, 1, W + 2, CP), jnp.bfloat16)
    zcol = jnp.zeros((Bc, H + 2, 1, CP), jnp.bfloat16)
    for buf in (buf0_ref, buf1_ref):
        buf[:, 0:1, :, :] = zrow
        buf[:, H + 1:H + 2, :, :] = zrow
        buf[:, :, 0:1, :] = zcol
        buf[:, :, W + 1:W + 2, :] = zcol

    # In-kernel halo synthesis (replaces the wrapper-side jnp.pad).
    buf0_ref[:, 1:1 + H, 1:1 + W, :] = x_ref[...]

    def win(src, b, t):
        dy, dx = t // 3, t % 3
        return src[b, dy:dy + H, dx:dx + W, :].reshape(HW, CP)

    def group(src, b, g, tpg):
        # One 128-lane im2col group packing `tpg` taps of (128 // tpg) real
        # channels each.  The source activations carry their real channels
        # duplicated tpg times across the 128 lanes, so a lane-range select
        # (pure VPU) builds the packed group and the store stays unmasked.
        if tpg == 1:
            return win(src, b, g)
        span = CP // tpg
        res = None
        for q in range(tpg):
            t = g * tpg + q
            if t >= 9:
                break
            sel = (lane >= span * q) & (lane < span * (q + 1))
            v = win(src, b, t)
            res = jnp.where(sel, v, jnp.zeros_like(v) if res is None else res)
        return res

    def conv(src, cfg, w_ref, b_ref):
        # K split into chunks; dot on chunk i can overlap the im2col build of
        # chunk i+1 (disjoint col_ref columns).  bf16 operands, f32 accum.
        tpg, n_groups, chunk = cfg
        acc = None
        for c0 in range(0, n_groups, chunk):
            c1 = min(c0 + chunk, n_groups)
            for b in range(Bc):
                r0 = b * HW
                for g in range(c0, c1):
                    col_ref[r0:r0 + HW, g * CP:(g + 1) * CP] = group(src, b, g, tpg)
            part = jnp.dot(col_ref[:, c0 * CP:c1 * CP],
                           w_ref[c0 * CP:c1 * CP, :],
                           preferred_element_type=jnp.float32)
            acc = part if acc is None else acc + part
        return acc + b_ref[...]

    # conv1 + ReLU (real Cout=64, duplicated 2x across lanes for conv2 packing)
    a1 = jnp.maximum(conv(buf0_ref, _CONV1, w1_ref, b1_ref), 0.0)
    buf1_ref[:, 1:1 + H, 1:1 + W, :] = a1.astype(jnp.bfloat16).reshape(Bc, H, W, CP)

    # conv2 + ReLU (real Cout=32, duplicated 4x for conv3 packing); overwrites
    # buf0's interior (the staged input is no longer needed).
    a2 = jnp.maximum(conv(buf1_ref, _CONV2, w2_ref, b2_ref), 0.0)
    buf0_ref[:, 1:1 + H, 1:1 + W, :] = a2.astype(jnp.bfloat16).reshape(Bc, H, W, CP)

    # conv3 (no ReLU); lanes 64..127 are exactly zero (zero weight/bias cols).
    a3 = conv(buf0_ref, _CONV3, w3_ref, b3_ref)
    out_ref[...] = a3.astype(jnp.bfloat16).reshape(Bc, HW, CP)


def _prep_params(params):
    """HWIO conv weights/biases -> packed im2col form matching _sr_kernel.

    conv1: (1152, 128) bf16, output channels duplicated 2x (cols [0:64]==[64:128]).
    conv2: ( 640, 128) bf16, K packs 2 taps/group, output duplicated 4x.
    conv3: ( 384, 128) bf16, K packs 4 taps/group, output cols 64..127 exactly 0
           (the wrapper slices them off, so they must stay zero).
    """
    w1, b1, w2, b2, w3, b3 = params
    f32, bf16 = jnp.float32, jnp.bfloat16

    # conv1: Cin = 128 fills a full 128-lane group per tap.
    w1k = w1.astype(f32).reshape(9 * C_IN, C1)                      # (1152, 64)
    w1f = jnp.concatenate([w1k, w1k], axis=1)                       # dup out 2x
    b1f = jnp.tile(b1.reshape(1, C1).astype(f32), (1, 2))

    # conv2: 2 taps x 64 channels per group (5 groups, last half-empty).
    w2r = w2.astype(f32).reshape(9, C1, C2)
    rows = []
    for g in range(5):
        t0 = 2 * g
        blk0 = w2r[t0]
        blk1 = w2r[t0 + 1] if t0 + 1 < 9 else jnp.zeros((C1, C2), f32)
        rows.append(jnp.concatenate([blk0, blk1], axis=0))
    w2k = jnp.concatenate(rows, axis=0)                             # (640, 32)
    w2f = jnp.tile(w2k, (1, 4))                                     # dup out 4x
    b2f = jnp.tile(b2.reshape(1, C2).astype(f32), (1, 4))

    # conv3: 4 taps x 32 channels per group (3 groups, last 3/4 empty).
    w3r = w3.astype(f32).reshape(9, C2, C3)
    rows = []
    for g in range(3):
        for q in range(4):
            t = 4 * g + q
            rows.append(w3r[t] if t < 9 else jnp.zeros((C2, C3), f32))
    w3k = jnp.concatenate(rows, axis=0)                             # (384, 64)
    w3f = jnp.concatenate([w3k, jnp.zeros((384, CP - C3), f32)], axis=1)
    b3f = jnp.concatenate([b3.reshape(1, C3).astype(f32),
                           jnp.zeros((1, CP - C3), f32)], axis=1)

    return (w1f.astype(bf16), b1f, w2f.astype(bf16), b2f, w3f.astype(bf16), b3f)


def _vmem_budget_bytes():
    try:
        cap = pltpu.get_tpu_info().vmem_capacity_bytes
    except Exception:
        cap = 64 * 2 ** 20          # conservative fallback (v7x per-core size)
    return int(cap * 0.82)          # ~52 MiB on v7x, ~105 MiB on v5e/v6e


def _footprint_bytes(bc, H, W):
    bf2, f4 = 2, 4
    HW = H * W
    x_blk = bc * HW * C_IN * bf2
    out_blk = bc * HW * CP * bf2
    w_all = (9 * C_IN + 5 * CP + 3 * CP) * CP * bf2 + 3 * CP * f4
    col = bc * HW * 9 * CP * bf2
    bufs = 2 * bc * (H + 2) * (W + 2) * CP * bf2
    # x / weight / output blocks are double-buffered by the pipeline.
    return 2 * (x_blk + out_blk + w_all) + col + bufs


def _pick_block_batch(B, H, W, budget):
    """Largest divisor of B that fits VMEM, stopping once M = Bc*H*W >= 512."""
    HW = H * W
    best = 1
    for bc in range(1, B + 1):
        if B % bc:
            continue
        if _footprint_bytes(bc, H, W) > budget:
            break
        best = bc
        if bc * HW >= 512:
            break
    return best


def _pixel_shuffle_nchw(y, r):
    B, C, H, W = y.shape
    c = C // (r * r)
    y = y.reshape(B, c, r, r, H, W)
    y = jnp.transpose(y, (0, 1, 4, 2, 5, 3))
    return y.reshape(B, c, H * r, W * r)


def super_resolution_forward(x_nchw, params):
    """x_nchw: (B, 128, H, W) feature map (post-ViT). Returns (B, 16, 2H, 2W) f32."""
    w1f, b1f, w2f, b2f, w3f, b3f = _prep_params(params)
    B, C, H, W = x_nchw.shape
    assert C == C_IN
    HW = H * W

    budget = _vmem_budget_bytes()
    Bc = _pick_block_batch(B, H, W, budget)
    # TODO(synk): for very large H*W (footprint > budget even at Bc=1) this
    # needs spatial strip tiling with a 1-row halo instead of whole images.
    vmem_limit = int(min(max(int(1.3 * _footprint_bytes(Bc, H, W)), 16 * 2 ** 20),
                         budget))

    # NCHW -> NHWC bf16; no wrapper-side padding (halo built in-kernel).
    x = jnp.transpose(x_nchw, (0, 2, 3, 1)).astype(jnp.bfloat16)

    # TODO(synk): weights/biases are grid-constant; pipeline_mode=pl.Buffered(1)
    # on their specs would save ~0.6 MB more VMEM (kept default for robustness).
    const = lambda i: (0, 0)
    conv_out = pl.pallas_call(
        _sr_kernel,
        out_shape=jax.ShapeDtypeStruct((B, HW, CP), jnp.bfloat16),
        grid_spec=pltpu.PrefetchScalarGridSpec(
            num_scalar_prefetch=0,
            grid=(B // Bc,),
            in_specs=[
                pl.BlockSpec((Bc, H, W, C_IN), lambda i: (i, 0, 0, 0)),
                pl.BlockSpec((9 * C_IN, CP), const),
                pl.BlockSpec((1, CP), const),
                pl.BlockSpec((5 * CP, CP), const),
                pl.BlockSpec((1, CP), const),
                pl.BlockSpec((3 * CP, CP), const),
                pl.BlockSpec((1, CP), const),
            ],
            out_specs=pl.BlockSpec((Bc, HW, CP), lambda i: (i, 0, 0)),
            scratch_shapes=[
                pltpu.VMEM((Bc * HW, 9 * CP), jnp.bfloat16),        # im2col slab
                pltpu.VMEM((Bc, H + 2, W + 2, CP), jnp.bfloat16),   # x / conv2 act
                pltpu.VMEM((Bc, H + 2, W + 2, CP), jnp.bfloat16),   # conv1 act
            ],
        ),
        compiler_params=pltpu.CompilerParams(
            dimension_semantics=("parallel",),
            vmem_limit_bytes=vmem_limit),
    )(x, w1f, b1f, w2f, b2f, w3f, b3f)

    # Drop the lane padding / duplicates, PixelShuffle(2) (PyTorch semantics).
    y = conv_out[:, :, :C3].astype(jnp.float32).reshape(B, H, W, C3)
    y = jnp.transpose(y, (0, 3, 1, 2))                        # (B, 64, H, W)
    return _pixel_shuffle_nchw(y, UPSCALE)


def _reference_forward(x_nchw, params):
    """Pure-JAX f32 reference (lax.conv) for conv1..conv3 + pixel shuffle."""
    w1, b1, w2, b2, w3, b3 = params
    dn = ('NHWC', 'HWIO', 'NHWC')

    def conv(x, w, b):
        y = jax.lax.conv_general_dilated(x, w, (1, 1), 'SAME',
                                         dimension_numbers=dn)
        return y + b.reshape(1, 1, 1, -1)

    x = jnp.transpose(x_nchw, (0, 2, 3, 1)).astype(jnp.float32)
    y = jax.nn.relu(conv(x, w1, b1))
    y = jax.nn.relu(conv(y, w2, b2))
    y = conv(y, w3, b3)
    y = jnp.transpose(y, (0, 3, 1, 2))
    return _pixel_shuffle_nchw(y, UPSCALE)


def init_params(key):
    """Deterministic synthetic conv weights (HWIO) and biases, fan-in scaled."""
    ks = jax.random.split(key, 6)

    def conv_w(k, cin, cout):
        scale = 1.0 / jnp.sqrt(cin * 9.0)
        return jax.random.normal(k, (3, 3, cin, cout), jnp.float32) * scale

    def conv_b(k, cout):
        return jax.random.normal(k, (1, cout), jnp.float32) * 0.01

    w1 = conv_w(ks[0], C_IN, C1); b1 = conv_b(ks[1], C1)
    w2 = conv_w(ks[2], C1, C2);   b2 = conv_b(ks[3], C2)
    w3 = conv_w(ks[4], C2, C3);   b3 = conv_b(ks[5], C3)
    return (w1, b1, w2, b2, w3, b3)


if __name__ == "__main__":
    key = jax.random.PRNGKey(0)
    k_x, k_p = jax.random.split(key)

    B, H, W = 2, 8, 8
    x = jax.random.normal(k_x, (B, C_IN, H, W), jnp.float32)  # NCHW feature map
    params = init_params(k_p)

    fwd = jax.jit(super_resolution_forward)
    out = jax.block_until_ready(fwd(x, params))
    assert out.shape == (B, 16, H * UPSCALE, W * UPSCALE), out.shape
    assert bool(jnp.all(jnp.isfinite(out)))

    # bf16 operands / f32 accumulation vs an f32 lax.conv reference.
    ref = _reference_forward(x, params)
    err = float(jnp.max(jnp.abs(out - ref)))
    assert err < 0.1, f"max abs error vs reference: {err}"
    print("KERNEL_OK")
</pallas_src>

<mosaic_0001>
module attributes {stable_mosaic.version = 11 : i64} {
  func.func @_sr_kernel(%arg0: i32, %arg1: memref<2x8x8x128xbf16, #tpu.memory_space<vmem>>, %arg2: memref<1152x128xbf16, #tpu.memory_space<vmem>>, %arg3: memref<1x128xf32, #tpu.memory_space<vmem>>, %arg4: memref<640x128xbf16, #tpu.memory_space<vmem>>, %arg5: memref<1x128xf32, #tpu.memory_space<vmem>>, %arg6: memref<384x128xbf16, #tpu.memory_space<vmem>>, %arg7: memref<1x128xf32, #tpu.memory_space<vmem>>, %arg8: memref<2x64x128xbf16, #tpu.memory_space<vmem>>, %arg9: memref<128x1152xbf16, #tpu.memory_space<vmem>>, %arg10: memref<2x10x10x128xbf16, #tpu.memory_space<vmem>>, %arg11: memref<2x10x10x128xbf16, #tpu.memory_space<vmem>>) attributes {dimension_semantics = [#tpu.dimension_semantics<parallel>], iteration_bounds = array<i64: 1>, scalar_prefetch = 0 : i64, scratch_operands = 3 : i64, tpu.core_type = #tpu.core_type<tc>, window_params = [{transform_indices = @transform_0, window_bounds = array<i64: 2, 8, 8, 128>}, {pipeline_mode = #tpu.pipeline_mode<synchronous>, transform_indices = @transform_1, window_bounds = array<i64: 1152, 128>}, {pipeline_mode = #tpu.pipeline_mode<synchronous>, transform_indices = @transform_2, window_bounds = array<i64: 1, 128>}, {pipeline_mode = #tpu.pipeline_mode<synchronous>, transform_indices = @transform_3, window_bounds = array<i64: 640, 128>}, {pipeline_mode = #tpu.pipeline_mode<synchronous>, transform_indices = @transform_4, window_bounds = array<i64: 1, 128>}, {pipeline_mode = #tpu.pipeline_mode<synchronous>, transform_indices = @transform_5, window_bounds = array<i64: 384, 128>}, {pipeline_mode = #tpu.pipeline_mode<synchronous>, transform_indices = @transform_6, window_bounds = array<i64: 1, 128>}, {transform_indices = @transform_7, window_bounds = array<i64: 2, 64, 128>}]} {
    %0 = tpu.iota {dimensions = array<i32: 1>} : vector<64x128xi32>
    %cst = arith.constant 0.000000e+00 : bf16
    %1 = vector.broadcast %cst : bf16 to vector<2x1x10x128xbf16>
    %cst_0 = arith.constant 0.000000e+00 : bf16
    %2 = vector.broadcast %cst_0 : bf16 to vector<2x10x1x128xbf16>
    %c0 = arith.constant 0 : index
    %c0_1 = arith.constant 0 : index
    %c0_2 = arith.constant 0 : index
    %c0_3 = arith.constant 0 : index
    %3 = vector.load %arg10[%c0, %c0_1, %c0_2, %c0_3] : memref<2x10x10x128xbf16, #tpu.memory_space<vmem>>, vector<2x1x10x128xbf16>
    tpu.vector_store %arg10[%c0, %c0_1, %c0_2, %c0_3], %1 {strides = array<i32>} : memref<2x10x10x128xbf16, #tpu.memory_space<vmem>>, vector<2x1x10x128xbf16>,
    %c0_4 = arith.constant 0 : index
    %c9 = arith.constant 9 : index
    %c0_5 = arith.constant 0 : index
    %c0_6 = arith.constant 0 : index
    %4 = vector.load %arg10[%c0_4, %c9, %c0_5, %c0_6] : memref<2x10x10x128xbf16, #tpu.memory_space<vmem>>, vector<2x1x10x128xbf16>
    tpu.vector_store %arg10[%c0_4, %c9, %c0_5, %c0_6], %1 {strides = array<i32>} : memref<2x10x10x128xbf16, #tpu.memory_space<vmem>>, vector<2x1x10x128xbf16>,
    %c0_7 = arith.constant 0 : index
    %c0_8 = arith.constant 0 : index
    %c0_9 = arith.constant 0 : index
    %c0_10 = arith.constant 0 : index
    %5 = vector.load %arg10[%c0_7, %c0_8, %c0_9, %c0_10] : memref<2x10x10x128xbf16, #tpu.memory_space<vmem>>, vector<2x10x1x128xbf16>
    tpu.vector_store %arg10[%c0_7, %c0_8, %c0_9, %c0_10], %2 {strides = array<i32>} : memref<2x10x10x128xbf16, #tpu.memory_space<vmem>>, vector<2x10x1x128xbf16>,
    %c0_11 = arith.constant 0 : index
    %c0_12 = arith.constant 0 : index
    %c9_13 = arith.constant 9 : index
    %c0_14 = arith.constant 0 : index
    %6 = vector.load %arg10[%c0_11, %c0_12, %c9_13, %c0_14] : memref<2x10x10x128xbf16, #tpu.memory_space<vmem>>, vector<2x10x1x128xbf16>
    tpu.vector_store %arg10[%c0_11, %c0_12, %c9_13, %c0_14], %2 {strides = array<i32>} : memref<2x10x10x128xbf16, #tpu.memory_space<vmem>>, vector<2x10x1x128xbf16>,
    %c0_15 = arith.constant 0 : index
    %c0_16 = arith.constant 0 : index
    %c0_17 = arith.constant 0 : index
    %c0_18 = arith.constant 0 : index
    %7 = vector.load %arg11[%c0_15, %c0_16, %c0_17, %c0_18] : memref<2x10x10x128xbf16, #tpu.memory_space<vmem>>, vector<2x1x10x128xbf16>
    tpu.vector_store %arg11[%c0_15, %c0_16, %c0_17, %c0_18], %1 {strides = array<i32>} : memref<2x10x10x128xbf16, #tpu.memory_space<vmem>>, vector<2x1x10x128xbf16>,
    %c0_19 = arith.constant 0 : index
    %c9_20 = arith.constant 9 : index
    %c0_21 = arith.constant 0 : index
    %c0_22 = arith.constant 0 : index
    %8 = vector.load %arg11[%c0_19, %c9_20, %c0_21, %c0_22] : memref<2x10x10x128xbf16, #tpu.memory_space<vmem>>, vector<2x1x10x128xbf16>
    tpu.vector_store %arg11[%c0_19, %c9_20, %c0_21, %c0_22], %1 {strides = array<i32>} : memref<2x10x10x128xbf16, #tpu.memory_space<vmem>>, vector<2x1x10x128xbf16>,
    %c0_23 = arith.constant 0 : index
    %c0_24 = arith.constant 0 : index
    %c0_25 = arith.constant 0 : index
    %c0_26 = arith.constant 0 : index
    %9 = vector.load %arg11[%c0_23, %c0_24, %c0_25, %c0_26] : memref<2x10x10x128xbf16, #tpu.memory_space<vmem>>, vector<2x10x1x128xbf16>
    tpu.vector_store %arg11[%c0_23, %c0_24, %c0_25, %c0_26], %2 {strides = array<i32>} : memref<2x10x10x128xbf16, #tpu.memory_space<vmem>>, vector<2x10x1x128xbf16>,
    %c0_27 = arith.constant 0 : index
    %c0_28 = arith.constant 0 : index
    %c9_29 = arith.constant 9 : index
    %c0_30 = arith.constant 0 : index
    %10 = vector.load %arg11[%c0_27, %c0_28, %c9_29, %c0_30] : memref<2x10x10x128xbf16, #tpu.memory_space<vmem>>, vector<2x10x1x128xbf16>
    tpu.vector_store %arg11[%c0_27, %c0_28, %c9_29, %c0_30], %2 {strides = array<i32>} : memref<2x10x10x128xbf16, #tpu.memory_space<vmem>>, vector<2x10x1x128xbf16>,
    %c0_31 = arith.constant 0 : index
    %c0_32 = arith.constant 0 : index
    %c0_33 = arith.constant 0 : index
    %c0_34 = arith.constant 0 : index
    %11 = vector.load %arg1[%c0_31, %c0_32, %c0_33, %c0_34] : memref<2x8x8x128xbf16, #tpu.memory_space<vmem>>, vector<2x8x8x128xbf16>
    %c0_35 = arith.constant 0 : index
    %c1 = arith.constant 1 : index
    %c1_36 = arith.constant 1 : index
    %c0_37 = arith.constant 0 : index
    %12 = vector.load %arg10[%c0_35, %c1, %c1_36, %c0_37] : memref<2x10x10x128xbf16, #tpu.memory_space<vmem>>, vector<2x8x8x128xbf16>
    tpu.vector_store %arg10[%c0_35, %c1, %c1_36, %c0_37], %11 {strides = array<i32>} : memref<2x10x10x128xbf16, #tpu.memory_space<vmem>>, vector<2x8x8x128xbf16>,
    %c0_38 = arith.constant 0 : index
    %c0_39 = arith.constant 0 : index
    %c0_40 = arith.constant 0 : index
    %c0_41 = arith.constant 0 : index
    %13 = vector.load %arg10[%c0_38, %c0_39, %c0_40, %c0_41] : memref<2x10x10x128xbf16, #tpu.memory_space<vmem>>, vector<1x8x8x128xbf16>
    %14 = vector.shape_cast %13 : vector<1x8x8x128xbf16> to vector<8x8x128xbf16>
    %15 = vector.shape_cast %14 : vector<8x8x128xbf16> to vector<64x128xbf16>
    %c0_42 = arith.constant 0 : index
    %c0_43 = arith.constant 0 : index
    %16 = vector.load %arg9[%c0_42, %c0_43] : memref<128x1152xbf16, #tpu.memory_space<vmem>>, vector<64x128xbf16>
    tpu.vector_store %arg9[%c0_42, %c0_43], %15 {strides = array<i32>} : memref<128x1152xbf16, #tpu.memory_space<vmem>>, vector<64x128xbf16>,
    %c0_44 = arith.constant 0 : index
    %c0_45 = arith.constant 0 : index
    %c1_46 = arith.constant 1 : index
    %c0_47 = arith.constant 0 : index
    %17 = vector.load %arg10[%c0_44, %c0_45, %c1_46, %c0_47] : memref<2x10x10x128xbf16, #tpu.memory_space<vmem>>, vector<1x8x8x128xbf16>
    %18 = vector.shape_cast %17 : vector<1x8x8x128xbf16> to vector<8x8x128xbf16>
    %19 = vector.shape_cast %18 : vector<8x8x128xbf16> to vector<64x128xbf16>
    %c0_48 = arith.constant 0 : index
    %c128 = arith.constant 128 : index
    %20 = vector.load %arg9[%c0_48, %c128] : memref<128x1152xbf16, #tpu.memory_space<vmem>>, vector<64x128xbf16>
    tpu.vector_store %arg9[%c0_48, %c128], %19 {strides = array<i32>} : memref<128x1152xbf16, #tpu.memory_space<vmem>>, vector<64x128xbf16>,
    %c0_49 = arith.constant 0 : index
    %c0_50 = arith.constant 0 : index
    %c2 = arith.constant 2 : index
    %c0_51 = arith.constant 0 : index
    %21 = vector.load %arg10[%c0_49, %c0_50, %c2, %c0_51] : memref<2x10x10x128xbf16, #tpu.memory_space<vmem>>, vector<1x8x8x128xbf16>
    %22 = vector.shape_cast %21 : vector<1x8x8x128xbf16> to vector<8x8x128xbf16>
    %23 = vector.shape_cast %22 : vector<8x8x128xbf16> to vector<64x128xbf16>
    %c0_52 = arith.constant 0 : index
    %c256 = arith.constant 256 : index
    %24 = vector.load %arg9[%c0_52, %c256] : memref<128x1152xbf16, #tpu.memory_space<vmem>>, vector<64x128xbf16>
    tpu.vector_store %arg9[%c0_52, %c256], %23 {strides = array<i32>} : memref<128x1152xbf16, #tpu.memory_space<vmem>>, vector<64x128xbf16>,
    %c1_53 = arith.constant 1 : index
    %c0_54 = arith.constant 0 : index
    %c0_55 = arith.constant 0 : index
    %c0_56 = arith.constant 0 : index
    %25 = vector.load %arg10[%c1_53, %c0_54, %c0_55, %c0_56] : memref<2x10x10x128xbf16, #tpu.memory_space<vmem>>, vector<1x8x8x128xbf16>
    %26 = vector.shape_cast %25 : vector<1x8x8x128xbf16> to vector<8x8x128xbf16>
    %27 = vector.shape_cast %26 : vector<8x8x128xbf16> to vector<64x128xbf16>
    %c64 = arith.constant 64 : index
    %c0_57 = arith.constant 0 : index
    %28 = vector.load %arg9[%c64, %c0_57] : memref<128x1152xbf16, #tpu.memory_space<vmem>>, vector<64x128xbf16>
    tpu.vector_store %arg9[%c64, %c0_57], %27 {strides = array<i32>} : memref<128x1152xbf16, #tpu.memory_space<vmem>>, vector<64x128xbf16>,
    %c1_58 = arith.constant 1 : index
    %c0_59 = arith.constant 0 : index
    %c1_60 = arith.constant 1 : index
    %c0_61 = arith.constant 0 : index
    %29 = vector.load %arg10[%c1_58, %c0_59, %c1_60, %c0_61] : memref<2x10x10x128xbf16, #tpu.memory_space<vmem>>, vector<1x8x8x128xbf16>
    %30 = vector.shape_cast %29 : vector<1x8x8x128xbf16> to vector<8x8x128xbf16>
    %31 = vector.shape_cast %30 : vector<8x8x128xbf16> to vector<64x128xbf16>
    %c64_62 = arith.constant 64 : index
    %c128_63 = arith.constant 128 : index
    %32 = vector.load %arg9[%c64_62, %c128_63] : memref<128x1152xbf16, #tpu.memory_space<vmem>>, vector<64x128xbf16>
    tpu.vector_store %arg9[%c64_62, %c128_63], %31 {strides = array<i32>} : memref<128x1152xbf16, #tpu.memory_space<vmem>>, vector<64x128xbf16>,
    %c1_64 = arith.constant 1 : index
    %c0_65 = arith.constant 0 : index
    %c2_66 = arith.constant 2 : index
    %c0_67 = arith.constant 0 : index
    %33 = vector.load %arg10[%c1_64, %c0_65, %c2_66, %c0_67] : memref<2x10x10x128xbf16, #tpu.memory_space<vmem>>, vector<1x8x8x128xbf16>
    %34 = vector.shape_cast %33 : vector<1x8x8x128xbf16> to vector<8x8x128xbf16>
    %35 = vector.shape_cast %34 : vector<8x8x128xbf16> to vector<64x128xbf16>
    %c64_68 = arith.constant 64 : index
    %c256_69 = arith.constant 256 : index
    %36 = vector.load %arg9[%c64_68, %c256_69] : memref<128x1152xbf16, #tpu.memory_space<vmem>>, vector<64x128xbf16>
    tpu.vector_store %arg9[%c64_68, %c256_69], %35 {strides = array<i32>} : memref<128x1152xbf16, #tpu.memory_space<vmem>>, vector<64x128xbf16>,
    %c0_70 = arith.constant 0 : index
    %c0_71 = arith.constant 0 : index
    %37 = vector.load %arg9[%c0_70, %c0_71] : memref<128x1152xbf16, #tpu.memory_space<vmem>>, vector<128x384xbf16>
    %c0_72 = arith.constant 0 : index
    %c0_73 = arith.constant 0 : index
    %38 = vector.load %arg2[%c0_72, %c0_73] : memref<1152x128xbf16, #tpu.memory_space<vmem>>, vector<384x128xbf16>
    %cst_74 = arith.constant dense<0.000000e+00> : vector<128x128xf32>
    %39 = tpu.matmul %37, %38, %cst_74 {dimension_numbers = #tpu.dot_dimension_numbers<[1], [0], [0], [1], [0, 0, 1, 1], [], []>} : vector<128x384xbf16>, vector<384x128xbf16>, vector<128x128xf32> -> vector<128x128xf32>
    %c0_75 = arith.constant 0 : index
    %c1_76 = arith.constant 1 : index
    %c0_77 = arith.constant 0 : index
    %c0_78 = arith.constant 0 : index
    %40 = vector.load %arg10[%c0_75, %c1_76, %c0_77, %c0_78] : memref<2x10x10x128xbf16, #tpu.memory_space<vmem>>, vector<1x8x8x128xbf16>
    %41 = vector.shape_cast %40 : vector<1x8x8x128xbf16> to vector<8x8x128xbf16>
    %42 = vector.shape_cast %41 : vector<8x8x128xbf16> to vector<64x128xbf16>
    %c0_79 = arith.constant 0 : index
    %c384 = arith.constant 384 : index
    %43 = vector.load %arg9[%c0_79, %c384] : memref<128x1152xbf16, #tpu.memory_space<vmem>>, vector<64x128xbf16>
    tpu.vector_store %arg9[%c0_79, %c384], %42 {strides = array<i32>} : memref<128x1152xbf16, #tpu.memory_space<vmem>>, vector<64x128xbf16>,
    %c0_80 = arith.constant 0 : index
    %c1_81 = arith.constant 1 : index
    %c1_82 = arith.constant 1 : index
    %c0_83 = arith.constant 0 : index
    %44 = vector.load %arg10[%c0_80, %c1_81, %c1_82, %c0_83] : memref<2x10x10x128xbf16, #tpu.memory_space<vmem>>, vector<1x8x8x128xbf16>
    %45 = vector.shape_cast %44 : vector<1x8x8x128xbf16> to vector<8x8x128xbf16>
    %46 = vector.shape_cast %45 : vector<8x8x128xbf16> to vector<64x128xbf16>
    %c0_84 = arith.constant 0 : index
    %c512 = arith.constant 512 : index
    %47 = vector.load %arg9[%c0_84, %c512] : memref<128x1152xbf16, #tpu.memory_space<vmem>>, vector<64x128xbf16>
    tpu.vector_store %arg9[%c0_84, %c512], %46 {strides = array<i32>} : memref<128x1152xbf16, #tpu.memory_space<vmem>>, vector<64x128xbf16>,
    %c0_85 = arith.constant 0 : index
    %c1_86 = arith.constant 1 : index
    %c2_87 = arith.constant 2 : index
    %c0_88 = arith.constant 0 : index
    %48 = vector.load %arg10[%c0_85, %c1_86, %c2_87, %c0_88] : memref<2x10x10x128xbf16, #tpu.memory_space<vmem>>, vector<1x8x8x128xbf16>
    %49 = vector.shape_cast %48 : vector<1x8x8x128xbf16> to vector<8x8x128xbf16>
    %50 = vector.shape_cast %49 : vector<8x8x128xbf16> to vector<64x128xbf16>
    %c0_89 = arith.constant 0 : index
    %c640 = arith.constant 640 : index
    %51 = vector.load %arg9[%c0_89, %c640] : memref<128x1152xbf16, #tpu.memory_space<vmem>>, vector<64x128xbf16>
    tpu.vector_store %arg9[%c0_89, %c640], %50 {strides = array<i32>} : memref<128x1152xbf16, #tpu.memory_space<vmem>>, vector<64x128xbf16>,
    %c1_90 = arith.constant 1 : index
    %c1_91 = arith.constant 1 : index
    %c0_92 = arith.constant 0 : index
    %c0_93 = arith.constant 0 : index
    %52 = vector.load %arg10[%c1_90, %c1_91, %c0_92, %c0_93] : memref<2x10x10x128xbf16, #tpu.memory_space<vmem>>, vector<1x8x8x128xbf16>
    %53 = vector.shape_cast %52 : vector<1x8x8x128xbf16> to vector<8x8x128xbf16>
    %54 = vector.shape_cast %53 : vector<8x8x128xbf16> to vector<64x128xbf16>
    %c64_94 = arith.constant 64 : index
    %c384_95 = arith.constant 384 : index
    %55 = vector.load %arg9[%c64_94, %c384_95] : memref<128x1152xbf16, #tpu.memory_space<vmem>>, vector<64x128xbf16>
    tpu.vector_store %arg9[%c64_94, %c384_95], %54 {strides = array<i32>} : memref<128x1152xbf16, #tpu.memory_space<vmem>>, vector<64x128xbf16>,
    %c1_96 = arith.constant 1 : index
    %c1_97 = arith.constant 1 : index
    %c1_98 = arith.constant 1 : index
    %c0_99 = arith.constant 0 : index
    %56 = vector.load %arg10[%c1_96, %c1_97, %c1_98, %c0_99] : memref<2x10x10x128xbf16, #tpu.memory_space<vmem>>, vector<1x8x8x128xbf16>
    %57 = vector.shape_cast %56 : vector<1x8x8x128xbf16> to vector<8x8x128xbf16>
    %58 = vector.shape_cast %57 : vector<8x8x128xbf16> to vector<64x128xbf16>
    %c64_100 = arith.constant 64 : index
    %c512_101 = arith.constant 512 : index
    %59 = vector.load %arg9[%c64_100, %c512_101] : memref<128x1152xbf16, #tpu.memory_space<vmem>>, vector<64x128xbf16>
    tpu.vector_store %arg9[%c64_100, %c512_101], %58 {strides = array<i32>} : memref<128x1152xbf16, #tpu.memory_space<vmem>>, vector<64x128xbf16>,
    %c1_102 = arith.constant 1 : index
    %c1_103 = arith.constant 1 : index
    %c2_104 = arith.constant 2 : index
    %c0_105 = arith.constant 0 : index
    %60 = vector.load %arg10[%c1_102, %c1_103, %c2_104, %c0_105] : memref<2x10x10x128xbf16, #tpu.memory_space<vmem>>, vector<1x8x8x128xbf16>
    %61 = vector.shape_cast %60 : vector<1x8x8x128xbf16> to vector<8x8x128xbf16>
    %62 = vector.shape_cast %61 : vector<8x8x128xbf16> to vector<64x128xbf16>
    %c64_106 = arith.constant 64 : index
    %c640_107 = arith.constant 640 : index
    %63 = vector.load %arg9[%c64_106, %c640_107] : memref<128x1152xbf16, #tpu.memory_space<vmem>>, vector<64x128xbf16>
    tpu.vector_store %arg9[%c64_106, %c640_107], %62 {strides = array<i32>} : memref<128x1152xbf16, #tpu.memory_space<vmem>>, vector<64x128xbf16>,
    %c0_108 = arith.constant 0 : index
    %c384_109 = arith.constant 384 : index
    %64 = vector.load %arg9[%c0_108, %c384_109] : memref<128x1152xbf16, #tpu.memory_space<vmem>>, vector<128x384xbf16>
    %c384_110 = arith.constant 384 : index
    %c0_111 = arith.constant 0 : index
    %65 = vector.load %arg2[%c384_110, %c0_111] : memref<1152x128xbf16, #tpu.memory_space<vmem>>, vector<384x128xbf16>
    %cst_112 = arith.constant dense<0.000000e+00> : vector<128x128xf32>
    %66 = tpu.matmul %64, %65, %cst_112 {dimension_numbers = #tpu.dot_dimension_numbers<[1], [0], [0], [1], [0, 0, 1, 1], [], []>} : vector<128x384xbf16>, vector<384x128xbf16>, vector<128x128xf32> -> vector<128x128xf32>
    %67 = arith.addf %39, %66 : vector<128x128xf32>
    %c0_113 = arith.constant 0 : index
    %c2_114 = arith.constant 2 : index
    %c0_115 = arith.constant 0 : index
    %c0_116 = arith.constant 0 : index
    %68 = vector.load %arg10[%c0_113, %c2_114, %c0_115, %c0_116] : memref<2x10x10x128xbf16, #tpu.memory_space<vmem>>, vector<1x8x8x128xbf16>
    %69 = vector.shape_cast %68 : vector<1x8x8x128xbf16> to vector<8x8x128xbf16>
    %70 = vector.shape_cast %69 : vector<8x8x128xbf16> to vector<64x128xbf16>
    %c0_117 = arith.constant 0 : index
    %c768 = arith.constant 768 : index
    %71 = vector.load %arg9[%c0_117, %c768] : memref<128x1152xbf16, #tpu.memory_space<vmem>>, vector<64x128xbf16>
    tpu.vector_store %arg9[%c0_117, %c768], %70 {strides = array<i32>} : memref<128x1152xbf16, #tpu.memory_space<vmem>>, vector<64x128xbf16>,
    %c0_118 = arith.constant 0 : index
    %c2_119 = arith.constant 2 : index
    %c1_120 = arith.constant 1 : index
    %c0_121 = arith.constant 0 : index
    %72 = vector.load %arg10[%c0_118, %c2_119, %c1_120, %c0_121] : memref<2x10x10x128xbf16, #tpu.memory_space<vmem>>, vector<1x8x8x128xbf16>
    %73 = vector.shape_cast %72 : vector<1x8x8x128xbf16> to vector<8x8x128xbf16>
    %74 = vector.shape_cast %73 : vector<8x8x128xbf16> to vector<64x128xbf16>
    %c0_122 = arith.constant 0 : index
    %c896 = arith.constant 896 : index
    %75 = vector.load %arg9[%c0_122, %c896] : memref<128x1152xbf16, #tpu.memory_space<vmem>>, vector<64x128xbf16>
    tpu.vector_store %arg9[%c0_122, %c896], %74 {strides = array<i32>} : memref<128x1152xbf16, #tpu.memory_space<vmem>>, vector<64x128xbf16>,
    %c0_123 = arith.constant 0 : index
    %c2_124 = arith.constant 2 : index
    %c2_125 = arith.constant 2 : index
    %c0_126 = arith.constant 0 : index
    %76 = vector.load %arg10[%c0_123, %c2_124, %c2_125, %c0_126] : memref<2x10x10x128xbf16, #tpu.memory_space<vmem>>, vector<1x8x8x128xbf16>
    %77 = vector.shape_cast %76 : vector<1x8x8x128xbf16> to vector<8x8x128xbf16>
    %78 = vector.shape_cast %77 : vector<8x8x128xbf16> to vector<64x128xbf16>
    %c0_127 = arith.constant 0 : index
    %c1024 = arith.constant 1024 : index
    %79 = vector.load %arg9[%c0_127, %c1024] : memref<128x1152xbf16, #tpu.memory_space<vmem>>, vector<64x128xbf16>
    tpu.vector_store %arg9[%c0_127, %c1024], %78 {strides = array<i32>} : memref<128x1152xbf16, #tpu.memory_space<vmem>>, vector<64x128xbf16>,
    %c1_128 = arith.constant 1 : index
    %c2_129 = arith.constant 2 : index
    %c0_130 = arith.constant 0 : index
    %c0_131 = arith.constant 0 : index
    %80 = vector.load %arg10[%c1_128, %c2_129, %c0_130, %c0_131] : memref<2x10x10x128xbf16, #tpu.memory_space<vmem>>, vector<1x8x8x128xbf16>
    %81 = vector.shape_cast %80 : vector<1x8x8x128xbf16> to vector<8x8x128xbf16>
    %82 = vector.shape_cast %81 : vector<8x8x128xbf16> to vector<64x128xbf16>
    %c64_132 = arith.constant 64 : index
    %c768_133 = arith.constant 768 : index
    %83 = vector.load %arg9[%c64_132, %c768_133] : memref<128x1152xbf16, #tpu.memory_space<vmem>>, vector<64x128xbf16>
    tpu.vector_store %arg9[%c64_132, %c768_133], %82 {strides = array<i32>} : memref<128x1152xbf16, #tpu.memory_space<vmem>>, vector<64x128xbf16>,
    %c1_134 = arith.constant 1 : index
    %c2_135 = arith.constant 2 : index
    %c1_136 = arith.constant 1 : index
    %c0_137 = arith.constant 0 : index
    %84 = vector.load %arg10[%c1_134, %c2_135, %c1_136, %c0_137] : memref<2x10x10x128xbf16, #tpu.memory_space<vmem>>, vector<1x8x8x128xbf16>
    %85 = vector.shape_cast %84 : vector<1x8x8x128xbf16> to vector<8x8x128xbf16>
    %86 = vector.shape_cast %85 : vector<8x8x128xbf16> to vector<64x128xbf16>
    %c64_138 = arith.constant 64 : index
    %c896_139 = arith.constant 896 : index
    %87 = vector.load %arg9[%c64_138, %c896_139] : memref<128x1152xbf16, #tpu.memory_space<vmem>>, vector<64x128xbf16>
    tpu.vector_store %arg9[%c64_138, %c896_139], %86 {strides = array<i32>} : memref<128x1152xbf16, #tpu.memory_space<vmem>>, vector<64x128xbf16>,
    %c1_140 = arith.constant 1 : index
    %c2_141 = arith.constant 2 : index
    %c2_142 = arith.constant 2 : index
    %c0_143 = arith.constant 0 : index
    %88 = vector.load %arg10[%c1_140, %c2_141, %c2_142, %c0_143] : memref<2x10x10x128xbf16, #tpu.memory_space<vmem>>, vector<1x8x8x128xbf16>
    %89 = vector.shape_cast %88 : vector<1x8x8x128xbf16> to vector<8x8x128xbf16>
    %90 = vector.shape_cast %89 : vector<8x8x128xbf16> to vector<64x128xbf16>
    %c64_144 = arith.constant 64 : index
    %c1024_145 = arith.constant 1024 : index
    %91 = vector.load %arg9[%c64_144, %c1024_145] : memref<128x1152xbf16, #tpu.memory_space<vmem>>, vector<64x128xbf16>
    tpu.vector_store %arg9[%c64_144, %c1024_145], %90 {strides = array<i32>} : memref<128x1152xbf16, #tpu.memory_space<vmem>>, vector<64x128xbf16>,
    %c0_146 = arith.constant 0 : index
    %c768_147 = arith.constant 768 : index
    %92 = vector.load %arg9[%c0_146, %c768_147] : memref<128x1152xbf16, #tpu.memory_space<vmem>>, vector<128x384xbf16>
    %c768_148 = arith.constant 768 : index
    %c0_149 = arith.constant 0 : index
    %93 = vector.load %arg2[%c768_148, %c0_149] : memref<1152x128xbf16, #tpu.memory_space<vmem>>, vector<384x128xbf16>
    %cst_150 = arith.constant dense<0.000000e+00> : vector<128x128xf32>
    %94 = tpu.matmul %92, %93, %cst_150 {dimension_numbers = #tpu.dot_dimension_numbers<[1], [0], [0], [1], [0, 0, 1, 1], [], []>} : vector<128x384xbf16>, vector<384x128xbf16>, vector<128x128xf32> -> vector<128x128xf32>
    %95 = arith.addf %67, %94 : vector<128x128xf32>
    %c0_151 = arith.constant 0 : index
    %c0_152 = arith.constant 0 : index
    %96 = vector.load %arg3[%c0_151, %c0_152] : memref<1x128xf32, #tpu.memory_space<vmem>>, vector<1x128xf32>
    %97 = vector.broadcast %96 : vector<1x128xf32> to vector<128x128xf32>
    %98 = arith.addf %95, %97 : vector<128x128xf32>
    %cst_153 = arith.constant 0.000000e+00 : f32
    %99 = vector.broadcast %cst_153 : f32 to vector<128x128xf32>
    %100 = arith.maximumf %98, %99 : vector<128x128xf32>
    %101 = arith.truncf %100 : vector<128x128xf32> to vector<128x128xbf16>
    %102 = vector.shape_cast %101 : vector<128x128xbf16> to vector<2x8x8x128xbf16>
    %c0_154 = arith.constant 0 : index
    %c1_155 = arith.constant 1 : index
    %c1_156 = arith.constant 1 : index
    %c0_157 = arith.constant 0 : index
    %103 = vector.load %arg11[%c0_154, %c1_155, %c1_156, %c0_157] : memref<2x10x10x128xbf16, #tpu.memory_space<vmem>>, vector<2x8x8x128xbf16>
    tpu.vector_store %arg11[%c0_154, %c1_155, %c1_156, %c0_157], %102 {strides = array<i32>} : memref<2x10x10x128xbf16, #tpu.memory_space<vmem>>, vector<2x8x8x128xbf16>,
    %c0_i32 = arith.constant 0 : i32
    %104 = vector.broadcast %c0_i32 : i32 to vector<64x128xi32>
    %105 = arith.cmpi sge, %0, %104 : vector<64x128xi32>
    %c64_i32 = arith.constant 64 : i32
    %106 = vector.broadcast %c64_i32 : i32 to vector<64x128xi32>
    %107 = arith.cmpi slt, %0, %106 : vector<64x128xi32>
    %108 = arith.andi %105, %107 : vector<64x128xi1>
    %c0_158 = arith.constant 0 : index
    %c0_159 = arith.constant 0 : index
    %c0_160 = arith.constant 0 : index
    %c0_161 = arith.constant 0 : index
    %109 = vector.load %arg11[%c0_158, %c0_159, %c0_160, %c0_161] : memref<2x10x10x128xbf16, #tpu.memory_space<vmem>>, vector<1x8x8x128xbf16>
    %110 = vector.shape_cast %109 : vector<1x8x8x128xbf16> to vector<8x8x128xbf16>
    %111 = vector.shape_cast %110 : vector<8x8x128xbf16> to vector<64x128xbf16>
    %cst_162 = arith.constant 0.000000e+00 : bf16
    %112 = vector.broadcast %cst_162 : bf16 to vector<64x128xbf16>
    %113 = arith.select %108, %111, %112 : vector<64x128xi1>, vector<64x128xbf16>
    %c64_i32_163 = arith.constant 64 : i32
    %114 = vector.broadcast %c64_i32_163 : i32 to vector<64x128xi32>
    %115 = arith.cmpi sge, %0, %114 : vector<64x128xi32>
    %c128_i32 = arith.constant 128 : i32
    %116 = vector.broadcast %c128_i32 : i32 to vector<64x128xi32>
    %117 = arith.cmpi slt, %0, %116 : vector<64x128xi32>
    %118 = arith.andi %115, %117 : vector<64x128xi1>
    %c0_164 = arith.constant 0 : index
    %c0_165 = arith.constant 0 : index
    %c1_166 = arith.constant 1 : index
    %c0_167 = arith.constant 0 : index
    %119 = vector.load %arg11[%c0_164, %c0_165, %c1_166, %c0_167] : memref<2x10x10x128xbf16, #tpu.memory_space<vmem>>, vector<1x8x8x128xbf16>
    %120 = vector.shape_cast %119 : vector<1x8x8x128xbf16> to vector<8x8x128xbf16>
    %121 = vector.shape_cast %120 : vector<8x8x128xbf16> to vector<64x128xbf16>
    %122 = arith.select %118, %121, %113 : vector<64x128xi1>, vector<64x128xbf16>
    %c0_168 = arith.constant 0 : index
    %c0_169 = arith.constant 0 : index
    %123 = vector.load %arg9[%c0_168, %c0_169] : memref<128x1152xbf16, #tpu.memory_space<vmem>>, vector<64x128xbf16>
    tpu.vector_store %arg9[%c0_168, %c0_169], %122 {strides = array<i32>} : memref<128x1152xbf16, #tpu.memory_space<vmem>>, vector<64x128xbf16>,
    %c0_i32_170 = arith.constant 0 : i32
    %124 = vector.broadcast %c0_i32_170 : i32 to vector<64x128xi32>
    %125 = arith.cmpi sge, %0, %124 : vector<64x128xi32>
    %c64_i32_171 = arith.constant 64 : i32
    %126 = vector.broadcast %c64_i32_171 : i32 to vector<64x128xi32>
    %127 = arith.cmpi slt, %0, %126 : vector<64x128xi32>
    %128 = arith.andi %125, %127 : vector<64x128xi1>
    %c0_172 = arith.constant 0 : index
    %c0_173 = arith.constant 0 : index
    %c2_174 = arith.constant 2 : index
    %c0_175 = arith.constant 0 : index
    %129 = vector.load %arg11[%c0_172, %c0_173, %c2_174, %c0_175] : memref<2x10x10x128xbf16, #tpu.memory_space<vmem>>, vector<1x8x8x128xbf16>
    %130 = vector.shape_cast %129 : vector<1x8x8x128xbf16> to vector<8x8x128xbf16>
    %131 = vector.shape_cast %130 : vector<8x8x128xbf16> to vector<64x128xbf16>
    %cst_176 = arith.constant 0.000000e+00 : bf16
    %132 = vector.broadcast %cst_176 : bf16 to vector<64x128xbf16>
    %133 = arith.select %128, %131, %132 : vector<64x128xi1>, vector<64x128xbf16>
    %c64_i32_177 = arith.constant 64 : i32
    %134 = vector.broadcast %c64_i32_177 : i32 to vector<64x128xi32>
    %135 = arith.cmpi sge, %0, %134 : vector<64x128xi32>
    %c128_i32_178 = arith.constant 128 : i32
    %136 = vector.broadcast %c128_i32_178 : i32 to vector<64x128xi32>
    %137 = arith.cmpi slt, %0, %136 : vector<64x128xi32>
    %138 = arith.andi %135, %137 : vector<64x128xi1>
    %c0_179 = arith.constant 0 : index
    %c1_180 = arith.constant 1 : index
    %c0_181 = arith.constant 0 : index
    %c0_182 = arith.constant 0 : index
    %139 = vector.load %arg11[%c0_179, %c1_180, %c0_181, %c0_182] : memref<2x10x10x128xbf16, #tpu.memory_space<vmem>>, vector<1x8x8x128xbf16>
    %140 = vector.shape_cast %139 : vector<1x8x8x128xbf16> to vector<8x8x128xbf16>
    %141 = vector.shape_cast %140 : vector<8x8x128xbf16> to vector<64x128xbf16>
    %142 = arith.select %138, %141, %133 : vector<64x128xi1>, vector<64x128xbf16>
    %c0_183 = arith.constant 0 : index
    %c128_184 = arith.constant 128 : index
    %143 = vector.load %arg9[%c0_183, %c128_184] : memref<128x1152xbf16, #tpu.memory_space<vmem>>, vector<64x128xbf16>
    tpu.vector_store %arg9[%c0_183, %c128_184], %142 {strides = array<i32>} : memref<128x1152xbf16, #tpu.memory_space<vmem>>, vector<64x128xbf16>,
    %c0_i32_185 = arith.constant 0 : i32
    %144 = vector.broadcast %c0_i32_185 : i32 to vector<64x128xi32>
    %145 = arith.cmpi sge, %0, %144 : vector<64x128xi32>
    %c64_i32_186 = arith.constant 64 : i32
    %146 = vector.broadcast %c64_i32_186 : i32 to vector<64x128xi32>
    %147 = arith.cmpi slt, %0, %146 : vector<64x128xi32>
    %148 = arith.andi %145, %147 : vector<64x128xi1>
    %c1_187 = arith.constant 1 : index
    %c0_188 = arith.constant 0 : index
    %c0_189 = arith.constant 0 : index
    %c0_190 = arith.constant 0 : index
    %149 = vector.load %arg11[%c1_187, %c0_188, %c0_189, %c0_190] : memref<2x10x10x128xbf16, #tpu.memory_space<vmem>>, vector<1x8x8x128xbf16>
    %150 = vector.shape_cast %149 : vector<1x8x8x128xbf16> to vector<8x8x128xbf16>
    %151 = vector.shape_cast %150 : vector<8x8x128xbf16> to vector<64x128xbf16>
    %cst_191 = arith.constant 0.000000e+00 : bf16
    %152 = vector.broadcast %cst_191 : bf16 to vector<64x128xbf16>
    %153 = arith.select %148, %151, %152 : vector<64x128xi1>, vector<64x128xbf16>
    %c64_i32_192 = arith.constant 64 : i32
    %154 = vector.broadcast %c64_i32_192 : i32 to vector<64x128xi32>
    %155 = arith.cmpi sge, %0, %154 : vector<64x128xi32>
    %c128_i32_193 = arith.constant 128 : i32
    %156 = vector.broadcast %c128_i32_193 : i32 to vector<64x128xi32>
    %157 = arith.cmpi slt, %0, %156 : vector<64x128xi32>
    %158 = arith.andi %155, %157 : vector<64x128xi1>
    %c1_194 = arith.constant 1 : index
    %c0_195 = arith.constant 0 : index
    %c1_196 = arith.constant 1 : index
    %c0_197 = arith.constant 0 : index
    %159 = vector.load %arg11[%c1_194, %c0_195, %c1_196, %c0_197] : memref<2x10x10x128xbf16, #tpu.memory_space<vmem>>, vector<1x8x8x128xbf16>
    %160 = vector.shape_cast %159 : vector<1x8x8x128xbf16> to vector<8x8x128xbf16>
    %161 = vector.shape_cast %160 : vector<8x8x128xbf16> to vector<64x128xbf16>
    %162 = arith.select %158, %161, %153 : vector<64x128xi1>, vector<64x128xbf16>
    %c64_198 = arith.constant 64 : index
    %c0_199 = arith.constant 0 : index
    %163 = vector.load %arg9[%c64_198, %c0_199] : memref<128x1152xbf16, #tpu.memory_space<vmem>>, vector<64x128xbf16>
    tpu.vector_store %arg9[%c64_198, %c0_199], %162 {strides = array<i32>} : memref<128x1152xbf16, #tpu.memory_space<vmem>>, vector<64x128xbf16>,
    %c0_i32_200 = arith.constant 0 : i32
    %164 = vector.broadcast %c0_i32_200 : i32 to vector<64x128xi32>
    %165 = arith.cmpi sge, %0, %164 : vector<64x128xi32>
    %c64_i32_201 = arith.constant 64 : i32
    %166 = vector.broadcast %c64_i32_201 : i32 to vector<64x128xi32>
    %167 = arith.cmpi slt, %0, %166 : vector<64x128xi32>
    %168 = arith.andi %165, %167 : vector<64x128xi1>
    %c1_202 = arith.constant 1 : index
    %c0_203 = arith.constant 0 : index
    %c2_204 = arith.constant 2 : index
    %c0_205 = arith.constant 0 : index
    %169 = vector.load %arg11[%c1_202, %c0_203, %c2_204, %c0_205] : memref<2x10x10x128xbf16, #tpu.memory_space<vmem>>, vector<1x8x8x128xbf16>
    %170 = vector.shape_cast %169 : vector<1x8x8x128xbf16> to vector<8x8x128xbf16>
    %171 = vector.shape_cast %170 : vector<8x8x128xbf16> to vector<64x128xbf16>
    %cst_206 = arith.constant 0.000000e+00 : bf16
    %172 = vector.broadcast %cst_206 : bf16 to vector<64x128xbf16>
    %173 = arith.select %168, %171, %172 : vector<64x128xi1>, vector<64x128xbf16>
    %c64_i32_207 = arith.constant 64 : i32
    %174 = vector.broadcast %c64_i32_207 : i32 to vector<64x128xi32>
    %175 = arith.cmpi sge, %0, %174 : vector<64x128xi32>
    %c128_i32_208 = arith.constant 128 : i32
    %176 = vector.broadcast %c128_i32_208 : i32 to vector<64x128xi32>
    %177 = arith.cmpi slt, %0, %176 : vector<64x128xi32>
    %178 = arith.andi %175, %177 : vector<64x128xi1>
    %c1_209 = arith.constant 1 : index
    %c1_210 = arith.constant 1 : index
    %c0_211 = arith.constant 0 : index
    %c0_212 = arith.constant 0 : index
    %179 = vector.load %arg11[%c1_209, %c1_210, %c0_211, %c0_212] : memref<2x10x10x128xbf16, #tpu.memory_space<vmem>>, vector<1x8x8x128xbf16>
    %180 = vector.shape_cast %179 : vector<1x8x8x128xbf16> to vector<8x8x128xbf16>
    %181 = vector.shape_cast %180 : vector<8x8x128xbf16> to vector<64x128xbf16>
    %182 = arith.select %178, %181, %173 : vector<64x128xi1>, vector<64x128xbf16>
    %c64_213 = arith.constant 64 : index
    %c128_214 = arith.constant 128 : index
    %183 = vector.load %arg9[%c64_213, %c128_214] : memref<128x1152xbf16, #tpu.memory_space<vmem>>, vector<64x128xbf16>
    tpu.vector_store %arg9[%c64_213, %c128_214], %182 {strides = array<i32>} : memref<128x1152xbf16, #tpu.memory_space<vmem>>, vector<64x128xbf16>,
    %c0_215 = arith.constant 0 : index
    %c0_216 = arith.constant 0 : index
    %184 = vector.load %arg9[%c0_215, %c0_216] : memref<128x1152xbf16, #tpu.memory_space<vmem>>, vector<128x256xbf16>
    %c0_217 = arith.constant 0 : index
    %c0_218 = arith.constant 0 : index
    %185 = vector.load %arg4[%c0_217, %c0_218] : memref<640x128xbf16, #tpu.memory_space<vmem>>, vector<256x128xbf16>
    %cst_219 = arith.constant dense<0.000000e+00> : vector<128x128xf32>
    %186 = tpu.matmul %184, %185, %cst_219 {dimension_numbers = #tpu.dot_dimension_numbers<[1], [0], [0], [1], [0, 0, 1, 1], [], []>} : vector<128x256xbf16>, vector<256x128xbf16>, vector<128x128xf32> -> vector<128x128xf32>
    %c0_i32_220 = arith.constant 0 : i32
    %187 = vector.broadcast %c0_i32_220 : i32 to vector<64x128xi32>
    %188 = arith.cmpi sge, %0, %187 : vector<64x128xi32>
    %c64_i32_221 = arith.constant 64 : i32
    %189 = vector.broadcast %c64_i32_221 : i32 to vector<64x128xi32>
    %190 = arith.cmpi slt, %0, %189 : vector<64x128xi32>
    %191 = arith.andi %188, %190 : vector<64x128xi1>
    %c0_222 = arith.constant 0 : index
    %c1_223 = arith.constant 1 : index
    %c1_224 = arith.constant 1 : index
    %c0_225 = arith.constant 0 : index
    %192 = vector.load %arg11[%c0_222, %c1_223, %c1_224, %c0_225] : memref<2x10x10x128xbf16, #tpu.memory_space<vmem>>, vector<1x8x8x128xbf16>
    %193 = vector.shape_cast %192 : vector<1x8x8x128xbf16> to vector<8x8x128xbf16>
    %194 = vector.shape_cast %193 : vector<8x8x128xbf16> to vector<64x128xbf16>
    %cst_226 = arith.constant 0.000000e+00 : bf16
    %195 = vector.broadcast %cst_226 : bf16 to vector<64x128xbf16>
    %196 = arith.select %191, %194, %195 : vector<64x128xi1>, vector<64x128xbf16>
    %c64_i32_227 = arith.constant 64 : i32
    %197 = vector.broadcast %c64_i32_227 : i32 to vector<64x128xi32>
    %198 = arith.cmpi sge, %0, %197 : vector<64x128xi32>
    %c128_i32_228 = arith.constant 128 : i32
    %199 = vector.broadcast %c128_i32_228 : i32 to vector<64x128xi32>
    %200 = arith.cmpi slt, %0, %199 : vector<64x128xi32>
    %201 = arith.andi %198, %200 : vector<64x128xi1>
    %c0_229 = arith.constant 0 : index
    %c1_230 = arith.constant 1 : index
    %c2_231 = arith.constant 2 : index
    %c0_232 = arith.constant 0 : index
    %202 = vector.load %arg11[%c0_229, %c1_230, %c2_231, %c0_232] : memref<2x10x10x128xbf16, #tpu.memory_space<vmem>>, vector<1x8x8x128xbf16>
    %203 = vector.shape_cast %202 : vector<1x8x8x128xbf16> to vector<8x8x128xbf16>
    %204 = vector.shape_cast %203 : vector<8x8x128xbf16> to vector<64x128xbf16>
    %205 = arith.select %201, %204, %196 : vector<64x128xi1>, vector<64x128xbf16>
    %c0_233 = arith.constant 0 : index
    %c256_234 = arith.constant 256 : index
    %206 = vector.load %arg9[%c0_233, %c256_234] : memref<128x1152xbf16, #tpu.memory_space<vmem>>, vector<64x128xbf16>
    tpu.vector_store %arg9[%c0_233, %c256_234], %205 {strides = array<i32>} : memref<128x1152xbf16, #tpu.memory_space<vmem>>, vector<64x128xbf16>,
    %c0_i32_235 = arith.constant 0 : i32
    %207 = vector.broadcast %c0_i32_235 : i32 to vector<64x128xi32>
    %208 = arith.cmpi sge, %0, %207 : vector<64x128xi32>
    %c64_i32_236 = arith.constant 64 : i32
    %209 = vector.broadcast %c64_i32_236 : i32 to vector<64x128xi32>
    %210 = arith.cmpi slt, %0, %209 : vector<64x128xi32>
    %211 = arith.andi %208, %210 : vector<64x128xi1>
    %c0_237 = arith.constant 0 : index
    %c2_238 = arith.constant 2 : index
    %c0_239 = arith.constant 0 : index
    %c0_240 = arith.constant 0 : index
    %212 = vector.load %arg11[%c0_237, %c2_238, %c0_239, %c0_240] : memref<2x10x10x128xbf16, #tpu.memory_space<vmem>>, vector<1x8x8x128xbf16>
    %213 = vector.shape_cast %212 : vector<1x8x8x128xbf16> to vector<8x8x128xbf16>
    %214 = vector.shape_cast %213 : vector<8x8x128xbf16> to vector<64x128xbf16>
    %cst_241 = arith.constant 0.000000e+00 : bf16
    %215 = vector.broadcast %cst_241 : bf16 to vector<64x128xbf16>
    %216 = arith.select %211, %214, %215 : vector<64x128xi1>, vector<64x128xbf16>
    %c64_i32_242 = arith.constant 64 : i32
    %217 = vector.broadcast %c64_i32_242 : i32 to vector<64x128xi32>
    %218 = arith.cmpi sge, %0, %217 : vector<64x128xi32>
    %c128_i32_243 = arith.constant 128 : i32
    %219 = vector.broadcast %c128_i32_243 : i32 to vector<64x128xi32>
    %220 = arith.cmpi slt, %0, %219 : vector<64x128xi32>
    %221 = arith.andi %218, %220 : vector<64x128xi1>
    %c0_244 = arith.constant 0 : index
    %c2_245 = arith.constant 2 : index
    %c1_246 = arith.constant 1 : index
    %c0_247 = arith.constant 0 : index
    %222 = vector.load %arg11[%c0_244, %c2_245, %c1_246, %c0_247] : memref<2x10x10x128xbf16, #tpu.memory_space<vmem>>, vector<1x8x8x128xbf16>
    %223 = vector.shape_cast %222 : vector<1x8x8x128xbf16> to vector<8x8x128xbf16>
    %224 = vector.shape_cast %223 : vector<8x8x128xbf16> to vector<64x128xbf16>
    %225 = arith.select %221, %224, %216 : vector<64x128xi1>, vector<64x128xbf16>
    %c0_248 = arith.constant 0 : index
    %c384_249 = arith.constant 384 : index
    %226 = vector.load %arg9[%c0_248, %c384_249] : memref<128x1152xbf16, #tpu.memory_space<vmem>>, vector<64x128xbf16>
    tpu.vector_store %arg9[%c0_248, %c384_249], %225 {strides = array<i32>} : memref<128x1152xbf16, #tpu.memory_space<vmem>>, vector<64x128xbf16>,
    %c0_i32_250 = arith.constant 0 : i32
    %227 = vector.broadcast %c0_i32_250 : i32 to vector<64x128xi32>
    %228 = arith.cmpi sge, %0, %227 : vector<64x128xi32>
    %c64_i32_251 = arith.constant 64 : i32
    %229 = vector.broadcast %c64_i32_251 : i32 to vector<64x128xi32>
    %230 = arith.cmpi slt, %0, %229 : vector<64x128xi32>
    %231 = arith.andi %228, %230 : vector<64x128xi1>
    %c1_252 = arith.constant 1 : index
    %c1_253 = arith.constant 1 : index
    %c1_254 = arith.constant 1 : index
    %c0_255 = arith.constant 0 : index
    %232 = vector.load %arg11[%c1_252, %c1_253, %c1_254, %c0_255] : memref<2x10x10x128xbf16, #tpu.memory_space<vmem>>, vector<1x8x8x128xbf16>
    %233 = vector.shape_cast %232 : vector<1x8x8x128xbf16> to vector<8x8x128xbf16>
    %234 = vector.shape_cast %233 : vector<8x8x128xbf16> to vector<64x128xbf16>
    %cst_256 = arith.constant 0.000000e+00 : bf16
    %235 = vector.broadcast %cst_256 : bf16 to vector<64x128xbf16>
    %236 = arith.select %231, %234, %235 : vector<64x128xi1>, vector<64x128xbf16>
    %c64_i32_257 = arith.constant 64 : i32
    %237 = vector.broadcast %c64_i32_257 : i32 to vector<64x128xi32>
    %238 = arith.cmpi sge, %0, %237 : vector<64x128xi32>
    %c128_i32_258 = arith.constant 128 : i32
    %239 = vector.broadcast %c128_i32_258 : i32 to vector<64x128xi32>
    %240 = arith.cmpi slt, %0, %239 : vector<64x128xi32>
    %241 = arith.andi %238, %240 : vector<64x128xi1>
    %c1_259 = arith.constant 1 : index
    %c1_260 = arith.constant 1 : index
    %c2_261 = arith.constant 2 : index
    %c0_262 = arith.constant 0 : index
    %242 = vector.load %arg11[%c1_259, %c1_260, %c2_261, %c0_262] : memref<2x10x10x128xbf16, #tpu.memory_space<vmem>>, vector<1x8x8x128xbf16>
    %243 = vector.shape_cast %242 : vector<1x8x8x128xbf16> to vector<8x8x128xbf16>
    %244 = vector.shape_cast %243 : vector<8x8x128xbf16> to vector<64x128xbf16>
    %245 = arith.select %241, %244, %236 : vector<64x128xi1>, vector<64x128xbf16>
    %c64_263 = arith.constant 64 : index
    %c256_264 = arith.constant 256 : index
    %246 = vector.load %arg9[%c64_263, %c256_264] : memref<128x1152xbf16, #tpu.memory_space<vmem>>, vector<64x128xbf16>
    tpu.vector_store %arg9[%c64_263, %c256_264], %245 {strides = array<i32>} : memref<128x1152xbf16, #tpu.memory_space<vmem>>, vector<64x128xbf16>,
    %c0_i32_265 = arith.constant 0 : i32
    %247 = vector.broadcast %c0_i32_265 : i32 to vector<64x128xi32>
    %248 = arith.cmpi sge, %0, %247 : vector<64x128xi32>
    %c64_i32_266 = arith.constant 64 : i32
    %249 = vector.broadcast %c64_i32_266 : i32 to vector<64x128xi32>
    %250 = arith.cmpi slt, %0, %249 : vector<64x128xi32>
    %251 = arith.andi %248, %250 : vector<64x128xi1>
    %c1_267 = arith.constant 1 : index
    %c2_268 = arith.constant 2 : index
    %c0_269 = arith.constant 0 : index
    %c0_270 = arith.constant 0 : index
    %252 = vector.load %arg11[%c1_267, %c2_268, %c0_269, %c0_270] : memref<2x10x10x128xbf16, #tpu.memory_space<vmem>>, vector<1x8x8x128xbf16>
    %253 = vector.shape_cast %252 : vector<1x8x8x128xbf16> to vector<8x8x128xbf16>
    %254 = vector.shape_cast %253 : vector<8x8x128xbf16> to vector<64x128xbf16>
    %cst_271 = arith.constant 0.000000e+00 : bf16
    %255 = vector.broadcast %cst_271 : bf16 to vector<64x128xbf16>
    %256 = arith.select %251, %254, %255 : vector<64x128xi1>, vector<64x128xbf16>
    %c64_i32_272 = arith.constant 64 : i32
    %257 = vector.broadcast %c64_i32_272 : i32 to vector<64x128xi32>
    %258 = arith.cmpi sge, %0, %257 : vector<64x128xi32>
    %c128_i32_273 = arith.constant 128 : i32
    %259 = vector.broadcast %c128_i32_273 : i32 to vector<64x128xi32>
    %260 = arith.cmpi slt, %0, %259 : vector<64x128xi32>
    %261 = arith.andi %258, %260 : vector<64x128xi1>
    %c1_274 = arith.constant 1 : index
    %c2_275 = arith.constant 2 : index
    %c1_276 = arith.constant 1 : index
    %c0_277 = arith.constant 0 : index
    %262 = vector.load %arg11[%c1_274, %c2_275, %c1_276, %c0_277] : memref<2x10x10x128xbf16, #tpu.memory_space<vmem>>, vector<1x8x8x128xbf16>
    %263 = vector.shape_cast %262 : vector<1x8x8x128xbf16> to vector<8x8x128xbf16>
    %264 = vector.shape_cast %263 : vector<8x8x128xbf16> to vector<64x128xbf16>
    %265 = arith.select %261, %264, %256 : vector<64x128xi1>, vector<64x128xbf16>
    %c64_278 = arith.constant 64 : index
    %c384_279 = arith.constant 384 : index
    %266 = vector.load %arg9[%c64_278, %c384_279] : memref<128x1152xbf16, #tpu.memory_space<vmem>>, vector<64x128xbf16>
    tpu.vector_store %arg9[%c64_278, %c384_279], %265 {strides = array<i32>} : memref<128x1152xbf16, #tpu.memory_space<vmem>>, vector<64x128xbf16>,
    %c0_280 = arith.constant 0 : index
    %c256_281 = arith.constant 256 : index
    %267 = vector.load %arg9[%c0_280, %c256_281] : memref<128x1152xbf16, #tpu.memory_space<vmem>>, vector<128x256xbf16>
    %c256_282 = arith.constant 256 : index
    %c0_283 = arith.constant 0 : index
    %268 = vector.load %arg4[%c256_282, %c0_283] : memref<640x128xbf16, #tpu.memory_space<vmem>>, vector<256x128xbf16>
    %cst_284 = arith.constant dense<0.000000e+00> : vector<128x128xf32>
    %269 = tpu.matmul %267, %268, %cst_284 {dimension_numbers = #tpu.dot_dimension_numbers<[1], [0], [0], [1], [0, 0, 1, 1], [], []>} : vector<128x256xbf16>, vector<256x128xbf16>, vector<128x128xf32> -> vector<128x128xf32>
    %270 = arith.addf %186, %269 : vector<128x128xf32>
    %c0_i32_285 = arith.constant 0 : i32
    %271 = vector.broadcast %c0_i32_285 : i32 to vector<64x128xi32>
    %272 = arith.cmpi sge, %0, %271 : vector<64x128xi32>
    %c64_i32_286 = arith.constant 64 : i32
    %273 = vector.broadcast %c64_i32_286 : i32 to vector<64x128xi32>
    %274 = arith.cmpi slt, %0, %273 : vector<64x128xi32>
    %275 = arith.andi %272, %274 : vector<64x128xi1>
    %c0_287 = arith.constant 0 : index
    %c2_288 = arith.constant 2 : index
    %c2_289 = arith.constant 2 : index
    %c0_290 = arith.constant 0 : index
    %276 = vector.load %arg11[%c0_287, %c2_288, %c2_289, %c0_290] : memref<2x10x10x128xbf16, #tpu.memory_space<vmem>>, vector<1x8x8x128xbf16>
    %277 = vector.shape_cast %276 : vector<1x8x8x128xbf16> to vector<8x8x128xbf16>
    %278 = vector.shape_cast %277 : vector<8x8x128xbf16> to vector<64x128xbf16>
    %cst_291 = arith.constant 0.000000e+00 : bf16
    %279 = vector.broadcast %cst_291 : bf16 to vector<64x128xbf16>
    %280 = arith.select %275, %278, %279 : vector<64x128xi1>, vector<64x128xbf16>
    %c0_292 = arith.constant 0 : index
    %c512_293 = arith.constant 512 : index
    %281 = vector.load %arg9[%c0_292, %c512_293] : memref<128x1152xbf16, #tpu.memory_space<vmem>>, vector<64x128xbf16>
    tpu.vector_store %arg9[%c0_292, %c512_293], %280 {strides = array<i32>} : memref<128x1152xbf16, #tpu.memory_space<vmem>>, vector<64x128xbf16>,
    %c0_i32_294 = arith.constant 0 : i32
    %282 = vector.broadcast %c0_i32_294 : i32 to vector<64x128xi32>
    %283 = arith.cmpi sge, %0, %282 : vector<64x128xi32>
    %c64_i32_295 = arith.constant 64 : i32
    %284 = vector.broadcast %c64_i32_295 : i32 to vector<64x128xi32>
    %285 = arith.cmpi slt, %0, %284 : vector<64x128xi32>
    %286 = arith.andi %283, %285 : vector<64x128xi1>
    %c1_296 = arith.constant 1 : index
    %c2_297 = arith.constant 2 : index
    %c2_298 = arith.constant 2 : index
    %c0_299 = arith.constant 0 : index
    %287 = vector.load %arg11[%c1_296, %c2_297, %c2_298, %c0_299] : memref<2x10x10x128xbf16, #tpu.memory_space<vmem>>, vector<1x8x8x128xbf16>
    %288 = vector.shape_cast %287 : vector<1x8x8x128xbf16> to vector<8x8x128xbf16>
    %289 = vector.shape_cast %288 : vector<8x8x128xbf16> to vector<64x128xbf16>
    %cst_300 = arith.constant 0.000000e+00 : bf16
    %290 = vector.broadcast %cst_300 : bf16 to vector<64x128xbf16>
    %291 = arith.select %286, %289, %290 : vector<64x128xi1>, vector<64x128xbf16>
    %c64_301 = arith.constant 64 : index
    %c512_302 = arith.constant 512 : index
    %292 = vector.load %arg9[%c64_301, %c512_302] : memref<128x1152xbf16, #tpu.memory_space<vmem>>, vector<64x128xbf16>
    tpu.vector_store %arg9[%c64_301, %c512_302], %291 {strides = array<i32>} : memref<128x1152xbf16, #tpu.memory_space<vmem>>, vector<64x128xbf16>,
    %c0_303 = arith.constant 0 : index
    %c512_304 = arith.constant 512 : index
    %293 = vector.load %arg9[%c0_303, %c512_304] : memref<128x1152xbf16, #tpu.memory_space<vmem>>, vector<128x128xbf16>
    %c512_305 = arith.constant 512 : index
    %c0_306 = arith.constant 0 : index
    %294 = vector.load %arg4[%c512_305, %c0_306] : memref<640x128xbf16, #tpu.memory_space<vmem>>, vector<128x128xbf16>
    %cst_307 = arith.constant dense<0.000000e+00> : vector<128x128xf32>
    %295 = tpu.matmul %293, %294, %cst_307 {dimension_numbers = #tpu.dot_dimension_numbers<[1], [0], [0], [1], [0, 0, 1, 1], [], []>} : vector<128x128xbf16>, vector<128x128xbf16>, vector<128x128xf32> -> vector<128x128xf32>
    %296 = arith.addf %270, %295 : vector<128x128xf32>
    %c0_308 = arith.constant 0 : index
    %c0_309 = arith.constant 0 : index
    %297 = vector.load %arg5[%c0_308, %c0_309] : memref<1x128xf32, #tpu.memory_space<vmem>>, vector<1x128xf32>
    %298 = vector.broadcast %297 : vector<1x128xf32> to vector<128x128xf32>
    %299 = arith.addf %296, %298 : vector<128x128xf32>
    %cst_310 = arith.constant 0.000000e+00 : f32
    %300 = vector.broadcast %cst_310 : f32 to vector<128x128xf32>
    %301 = arith.maximumf %299, %300 : vector<128x128xf32>
    %302 = arith.truncf %301 : vector<128x128xf32> to vector<128x128xbf16>
    %303 = vector.shape_cast %302 : vector<128x128xbf16> to vector<2x8x8x128xbf16>
    %c0_311 = arith.constant 0 : index
    %c1_312 = arith.constant 1 : index
    %c1_313 = arith.constant 1 : index
    %c0_314 = arith.constant 0 : index
    %304 = vector.load %arg10[%c0_311, %c1_312, %c1_313, %c0_314] : memref<2x10x10x128xbf16, #tpu.memory_space<vmem>>, vector<2x8x8x128xbf16>
    tpu.vector_store %arg10[%c0_311, %c1_312, %c1_313, %c0_314], %303 {strides = array<i32>} : memref<2x10x10x128xbf16, #tpu.memory_space<vmem>>, vector<2x8x8x128xbf16>,
    %c0_i32_315 = arith.constant 0 : i32
    %305 = vector.broadcast %c0_i32_315 : i32 to vector<64x128xi32>
    %306 = arith.cmpi sge, %0, %305 : vector<64x128xi32>
    %c32_i32 = arith.constant 32 : i32
    %307 = vector.broadcast %c32_i32 : i32 to vector<64x128xi32>
    %308 = arith.cmpi slt, %0, %307 : vector<64x128xi32>
    %309 = arith.andi %306, %308 : vector<64x128xi1>
    %c0_316 = arith.constant 0 : index
    %c0_317 = arith.constant 0 : index
    %c0_318 = arith.constant 0 : index
    %c0_319 = arith.constant 0 : index
    %310 = vector.load %arg10[%c0_316, %c0_317, %c0_318, %c0_319] : memref<2x10x10x128xbf16, #tpu.memory_space<vmem>>, vector<1x8x8x128xbf16>
    %311 = vector.shape_cast %310 : vector<1x8x8x128xbf16> to vector<8x8x128xbf16>
    %312 = vector.shape_cast %311 : vector<8x8x128xbf16> to vector<64x128xbf16>
    %cst_320 = arith.constant 0.000000e+00 : bf16
    %313 = vector.broadcast %cst_320 : bf16 to vector<64x128xbf16>
    %314 = arith.select %309, %312, %313 : vector<64x128xi1>, vector<64x128xbf16>
    %c32_i32_321 = arith.constant 32 : i32
    %315 = vector.broadcast %c32_i32_321 : i32 to vector<64x128xi32>
    %316 = arith.cmpi sge, %0, %315 : vector<64x128xi32>
    %c64_i32_322 = arith.constant 64 : i32
    %317 = vector.broadcast %c64_i32_322 : i32 to vector<64x128xi32>
    %318 = arith.cmpi slt, %0, %317 : vector<64x128xi32>
    %319 = arith.andi %316, %318 : vector<64x128xi1>
    %c0_323 = arith.constant 0 : index
    %c0_324 = arith.constant 0 : index
    %c1_325 = arith.constant 1 : index
    %c0_326 = arith.constant 0 : index
    %320 = vector.load %arg10[%c0_323, %c0_324, %c1_325, %c0_326] : memref<2x10x10x128xbf16, #tpu.memory_space<vmem>>, vector<1x8x8x128xbf16>
    %321 = vector.shape_cast %320 : vector<1x8x8x128xbf16> to vector<8x8x128xbf16>
    %322 = vector.shape_cast %321 : vector<8x8x128xbf16> to vector<64x128xbf16>
    %323 = arith.select %319, %322, %314 : vector<64x128xi1>, vector<64x128xbf16>
    %c64_i32_327 = arith.constant 64 : i32
    %324 = vector.broadcast %c64_i32_327 : i32 to vector<64x128xi32>
    %325 = arith.cmpi sge, %0, %324 : vector<64x128xi32>
    %c96_i32 = arith.constant 96 : i32
    %326 = vector.broadcast %c96_i32 : i32 to vector<64x128xi32>
    %327 = arith.cmpi slt, %0, %326 : vector<64x128xi32>
    %328 = arith.andi %325, %327 : vector<64x128xi1>
    %c0_328 = arith.constant 0 : index
    %c0_329 = arith.constant 0 : index
    %c2_330 = arith.constant 2 : index
    %c0_331 = arith.constant 0 : index
    %329 = vector.load %arg10[%c0_328, %c0_329, %c2_330, %c0_331] : memref<2x10x10x128xbf16, #tpu.memory_space<vmem>>, vector<1x8x8x128xbf16>
    %330 = vector.shape_cast %329 : vector<1x8x8x128xbf16> to vector<8x8x128xbf16>
    %331 = vector.shape_cast %330 : vector<8x8x128xbf16> to vector<64x128xbf16>
    %332 = arith.select %328, %331, %323 : vector<64x128xi1>, vector<64x128xbf16>
    %c96_i32_332 = arith.constant 96 : i32
    %333 = vector.broadcast %c96_i32_332 : i32 to vector<64x128xi32>
    %334 = arith.cmpi sge, %0, %333 : vector<64x128xi32>
    %c128_i32_333 = arith.constant 128 : i32
    %335 = vector.broadcast %c128_i32_333 : i32 to vector<64x128xi32>
    %336 = arith.cmpi slt, %0, %335 : vector<64x128xi32>
    %337 = arith.andi %334, %336 : vector<64x128xi1>
    %c0_334 = arith.constant 0 : index
    %c1_335 = arith.constant 1 : index
    %c0_336 = arith.constant 0 : index
    %c0_337 = arith.constant 0 : index
    %338 = vector.load %arg10[%c0_334, %c1_335, %c0_336, %c0_337] : memref<2x10x10x128xbf16, #tpu.memory_space<vmem>>, vector<1x8x8x128xbf16>
    %339 = vector.shape_cast %338 : vector<1x8x8x128xbf16> to vector<8x8x128xbf16>
    %340 = vector.shape_cast %339 : vector<8x8x128xbf16> to vector<64x128xbf16>
    %341 = arith.select %337, %340, %332 : vector<64x128xi1>, vector<64x128xbf16>
    %c0_338 = arith.constant 0 : index
    %c0_339 = arith.constant 0 : index
    %342 = vector.load %arg9[%c0_338, %c0_339] : memref<128x1152xbf16, #tpu.memory_space<vmem>>, vector<64x128xbf16>
    tpu.vector_store %arg9[%c0_338, %c0_339], %341 {strides = array<i32>} : memref<128x1152xbf16, #tpu.memory_space<vmem>>, vector<64x128xbf16>,
    %c0_i32_340 = arith.constant 0 : i32
    %343 = vector.broadcast %c0_i32_340 : i32 to vector<64x128xi32>
    %344 = arith.cmpi sge, %0, %343 : vector<64x128xi32>
    %c32_i32_341 = arith.constant 32 : i32
    %345 = vector.broadcast %c32_i32_341 : i32 to vector<64x128xi32>
    %346 = arith.cmpi slt, %0, %345 : vector<64x128xi32>
    %347 = arith.andi %344, %346 : vector<64x128xi1>
    %c0_342 = arith.constant 0 : index
    %c1_343 = arith.constant 1 : index
    %c1_344 = arith.constant 1 : index
    %c0_345 = arith.constant 0 : index
    %348 = vector.load %arg10[%c0_342, %c1_343, %c1_344, %c0_345] : memref<2x10x10x128xbf16, #tpu.memory_space<vmem>>, vector<1x8x8x128xbf16>
    %349 = vector.shape_cast %348 : vector<1x8x8x128xbf16> to vector<8x8x128xbf16>
    %350 = vector.shape_cast %349 : vector<8x8x128xbf16> to vector<64x128xbf16>
    %cst_346 = arith.constant 0.000000e+00 : bf16
    %351 = vector.broadcast %cst_346 : bf16 to vector<64x128xbf16>
    %352 = arith.select %347, %350, %351 : vector<64x128xi1>, vector<64x128xbf16>
    %c32_i32_347 = arith.constant 32 : i32
    %353 = vector.broadcast %c32_i32_347 : i32 to vector<64x128xi32>
    %354 = arith.cmpi sge, %0, %353 : vector<64x128xi32>
    %c64_i32_348 = arith.constant 64 : i32
    %355 = vector.broadcast %c64_i32_348 : i32 to vector<64x128xi32>
    %356 = arith.cmpi slt, %0, %355 : vector<64x128xi32>
    %357 = arith.andi %354, %356 : vector<64x128xi1>
    %c0_349 = arith.constant 0 : index
    %c1_350 = arith.constant 1 : index
    %c2_351 = arith.constant 2 : index
    %c0_352 = arith.constant 0 : index
    %358 = vector.load %arg10[%c0_349, %c1_350, %c2_351, %c0_352] : memref<2x10x10x128xbf16, #tpu.memory_space<vmem>>, vector<1x8x8x128xbf16>
    %359 = vector.shape_cast %358 : vector<1x8x8x128xbf16> to vector<8x8x128xbf16>
    %360 = vector.shape_cast %359 : vector<8x8x128xbf16> to vector<64x128xbf16>
    %361 = arith.select %357, %360, %352 : vector<64x128xi1>, vector<64x128xbf16>
    %c64_i32_353 = arith.constant 64 : i32
    %362 = vector.broadcast %c64_i32_353 : i32 to vector<64x128xi32>
    %363 = arith.cmpi sge, %0, %362 : vector<64x128xi32>
    %c96_i32_354 = arith.constant 96 : i32
    %364 = vector.broadcast %c96_i32_354 : i32 to vector<64x128xi32>
    %365 = arith.cmpi slt, %0, %364 : vector<64x128xi32>
    %366 = arith.andi %363, %365 : vector<64x128xi1>
    %c0_355 = arith.constant 0 : index
    %c2_356 = arith.constant 2 : index
    %c0_357 = arith.constant 0 : index
    %c0_358 = arith.constant 0 : index
    %367 = vector.load %arg10[%c0_355, %c2_356, %c0_357, %c0_358] : memref<2x10x10x128xbf16, #tpu.memory_space<vmem>>, vector<1x8x8x128xbf16>
    %368 = vector.shape_cast %367 : vector<1x8x8x128xbf16> to vector<8x8x128xbf16>
    %369 = vector.shape_cast %368 : vector<8x8x128xbf16> to vector<64x128xbf16>
    %370 = arith.select %366, %369, %361 : vector<64x128xi1>, vector<64x128xbf16>
    %c96_i32_359 = arith.constant 96 : i32
    %371 = vector.broadcast %c96_i32_359 : i32 to vector<64x128xi32>
    %372 = arith.cmpi sge, %0, %371 : vector<64x128xi32>
    %c128_i32_360 = arith.constant 128 : i32
    %373 = vector.broadcast %c128_i32_360 : i32 to vector<64x128xi32>
    %374 = arith.cmpi slt, %0, %373 : vector<64x128xi32>
    %375 = arith.andi %372, %374 : vector<64x128xi1>
    %c0_361 = arith.constant 0 : index
    %c2_362 = arith.constant 2 : index
    %c1_363 = arith.constant 1 : index
    %c0_364 = arith.constant 0 : index
    %376 = vector.load %arg10[%c0_361, %c2_362, %c1_363, %c0_364] : memref<2x10x10x128xbf16, #tpu.memory_space<vmem>>, vector<1x8x8x128xbf16>
    %377 = vector.shape_cast %376 : vector<1x8x8x128xbf16> to vector<8x8x128xbf16>
    %378 = vector.shape_cast %377 : vector<8x8x128xbf16> to vector<64x128xbf16>
    %379 = arith.select %375, %378, %370 : vector<64x128xi1>, vector<64x128xbf16>
    %c0_365 = arith.constant 0 : index
    %c128_366 = arith.constant 128 : index
    %380 = vector.load %arg9[%c0_365, %c128_366] : memref<128x1152xbf16, #tpu.memory_space<vmem>>, vector<64x128xbf16>
    tpu.vector_store %arg9[%c0_365, %c128_366], %379 {strides = array<i32>} : memref<128x1152xbf16, #tpu.memory_space<vmem>>, vector<64x128xbf16>,
    %c0_i32_367 = arith.constant 0 : i32
    %381 = vector.broadcast %c0_i32_367 : i32 to vector<64x128xi32>
    %382 = arith.cmpi sge, %0, %381 : vector<64x128xi32>
    %c32_i32_368 = arith.constant 32 : i32
    %383 = vector.broadcast %c32_i32_368 : i32 to vector<64x128xi32>
    %384 = arith.cmpi slt, %0, %383 : vector<64x128xi32>
    %385 = arith.andi %382, %384 : vector<64x128xi1>
    %c1_369 = arith.constant 1 : index
    %c0_370 = arith.constant 0 : index
    %c0_371 = arith.constant 0 : index
    %c0_372 = arith.constant 0 : index
    %386 = vector.load %arg10[%c1_369, %c0_370, %c0_371, %c0_372] : memref<2x10x10x128xbf16, #tpu.memory_space<vmem>>, vector<1x8x8x128xbf16>
    %387 = vector.shape_cast %386 : vector<1x8x8x128xbf16> to vector<8x8x128xbf16>
    %388 = vector.shape_cast %387 : vector<8x8x128xbf16> to vector<64x128xbf16>
    %cst_373 = arith.constant 0.000000e+00 : bf16
    %389 = vector.broadcast %cst_373 : bf16 to vector<64x128xbf16>
    %390 = arith.select %385, %388, %389 : vector<64x128xi1>, vector<64x128xbf16>
    %c32_i32_374 = arith.constant 32 : i32
    %391 = vector.broadcast %c32_i32_374 : i32 to vector<64x128xi32>
    %392 = arith.cmpi sge, %0, %391 : vector<64x128xi32>
    %c64_i32_375 = arith.constant 64 : i32
    %393 = vector.broadcast %c64_i32_375 : i32 to vector<64x128xi32>
    %394 = arith.cmpi slt, %0, %393 : vector<64x128xi32>
    %395 = arith.andi %392, %394 : vector<64x128xi1>
    %c1_376 = arith.constant 1 : index
    %c0_377 = arith.constant 0 : index
    %c1_378 = arith.constant 1 : index
    %c0_379 = arith.constant 0 : index
    %396 = vector.load %arg10[%c1_376, %c0_377, %c1_378, %c0_379] : memref<2x10x10x128xbf16, #tpu.memory_space<vmem>>, vector<1x8x8x128xbf16>
    %397 = vector.shape_cast %396 : vector<1x8x8x128xbf16> to vector<8x8x128xbf16>
    %398 = vector.shape_cast %397 : vector<8x8x128xbf16> to vector<64x128xbf16>
    %399 = arith.select %395, %398, %390 : vector<64x128xi1>, vector<64x128xbf16>
    %c64_i32_380 = arith.constant 64 : i32
    %400 = vector.broadcast %c64_i32_380 : i32 to vector<64x128xi32>
    %401 = arith.cmpi sge, %0, %400 : vector<64x128xi32>
    %c96_i32_381 = arith.constant 96 : i32
    %402 = vector.broadcast %c96_i32_381 : i32 to vector<64x128xi32>
    %403 = arith.cmpi slt, %0, %402 : vector<64x128xi32>
    %404 = arith.andi %401, %403 : vector<64x128xi1>
    %c1_382 = arith.constant 1 : index
    %c0_383 = arith.constant 0 : index
    %c2_384 = arith.constant 2 : index
    %c0_385 = arith.constant 0 : index
    %405 = vector.load %arg10[%c1_382, %c0_383, %c2_384, %c0_385] : memref<2x10x10x128xbf16, #tpu.memory_space<vmem>>, vector<1x8x8x128xbf16>
    %406 = vector.shape_cast %405 : vector<1x8x8x128xbf16> to vector<8x8x128xbf16>
    %407 = vector.shape_cast %406 : vector<8x8x128xbf16> to vector<64x128xbf16>
    %408 = arith.select %404, %407, %399 : vector<64x128xi1>, vector<64x128xbf16>
    %c96_i32_386 = arith.constant 96 : i32
    %409 = vector.broadcast %c96_i32_386 : i32 to vector<64x128xi32>
    %410 = arith.cmpi sge, %0, %409 : vector<64x128xi32>
    %c128_i32_387 = arith.constant 128 : i32
    %411 = vector.broadcast %c128_i32_387 : i32 to vector<64x128xi32>
    %412 = arith.cmpi slt, %0, %411 : vector<64x128xi32>
    %413 = arith.andi %410, %412 : vector<64x128xi1>
    %c1_388 = arith.constant 1 : index
    %c1_389 = arith.constant 1 : index
    %c0_390 = arith.constant 0 : index
    %c0_391 = arith.constant 0 : index
    %414 = vector.load %arg10[%c1_388, %c1_389, %c0_390, %c0_391] : memref<2x10x10x128xbf16, #tpu.memory_space<vmem>>, vector<1x8x8x128xbf16>
    %415 = vector.shape_cast %414 : vector<1x8x8x128xbf16> to vector<8x8x128xbf16>
    %416 = vector.shape_cast %415 : vector<8x8x128xbf16> to vector<64x128xbf16>
    %417 = arith.select %413, %416, %408 : vector<64x128xi1>, vector<64x128xbf16>
    %c64_392 = arith.constant 64 : index
    %c0_393 = arith.constant 0 : index
    %418 = vector.load %arg9[%c64_392, %c0_393] : memref<128x1152xbf16, #tpu.memory_space<vmem>>, vector<64x128xbf16>
    tpu.vector_store %arg9[%c64_392, %c0_393], %417 {strides = array<i32>} : memref<128x1152xbf16, #tpu.memory_space<vmem>>, vector<64x128xbf16>,
    %c0_i32_394 = arith.constant 0 : i32
    %419 = vector.broadcast %c0_i32_394 : i32 to vector<64x128xi32>
    %420 = arith.cmpi sge, %0, %419 : vector<64x128xi32>
    %c32_i32_395 = arith.constant 32 : i32
    %421 = vector.broadcast %c32_i32_395 : i32 to vector<64x128xi32>
    %422 = arith.cmpi slt, %0, %421 : vector<64x128xi32>
    %423 = arith.andi %420, %422 : vector<64x128xi1>
    %c1_396 = arith.constant 1 : index
    %c1_397 = arith.constant 1 : index
    %c1_398 = arith.constant 1 : index
    %c0_399 = arith.constant 0 : index
    %424 = vector.load %arg10[%c1_396, %c1_397, %c1_398, %c0_399] : memref<2x10x10x128xbf16, #tpu.memory_space<vmem>>, vector<1x8x8x128xbf16>
    %425 = vector.shape_cast %424 : vector<1x8x8x128xbf16> to vector<8x8x128xbf16>
    %426 = vector.shape_cast %425 : vector<8x8x128xbf16> to vector<64x128xbf16>
    %cst_400 = arith.constant 0.000000e+00 : bf16
    %427 = vector.broadcast %cst_400 : bf16 to vector<64x128xbf16>
    %428 = arith.select %423, %426, %427 : vector<64x128xi1>, vector<64x128xbf16>
    %c32_i32_401 = arith.constant 32 : i32
    %429 = vector.broadcast %c32_i32_401 : i32 to vector<64x128xi32>
    %430 = arith.cmpi sge, %0, %429 : vector<64x128xi32>
    %c64_i32_402 = arith.constant 64 : i32
    %431 = vector.broadcast %c64_i32_402 : i32 to vector<64x128xi32>
    %432 = arith.cmpi slt, %0, %431 : vector<64x128xi32>
    %433 = arith.andi %430, %432 : vector<64x128xi1>
    %c1_403 = arith.constant 1 : index
    %c1_404 = arith.constant 1 : index
    %c2_405 = arith.constant 2 : index
    %c0_406 = arith.constant 0 : index
    %434 = vector.load %arg10[%c1_403, %c1_404, %c2_405, %c0_406] : memref<2x10x10x128xbf16, #tpu.memory_space<vmem>>, vector<1x8x8x128xbf16>
    %435 = vector.shape_cast %434 : vector<1x8x8x128xbf16> to vector<8x8x128xbf16>
    %436 = vector.shape_cast %435 : vector<8x8x128xbf16> to vector<64x128xbf16>
    %437 = arith.select %433, %436, %428 : vector<64x128xi1>, vector<64x128xbf16>
    %c64_i32_407 = arith.constant 64 : i32
    %438 = vector.broadcast %c64_i32_407 : i32 to vector<64x128xi32>
    %439 = arith.cmpi sge, %0, %438 : vector<64x128xi32>
    %c96_i32_408 = arith.constant 96 : i32
    %440 = vector.broadcast %c96_i32_408 : i32 to vector<64x128xi32>
    %441 = arith.cmpi slt, %0, %440 : vector<64x128xi32>
    %442 = arith.andi %439, %441 : vector<64x128xi1>
    %c1_409 = arith.constant 1 : index
    %c2_410 = arith.constant 2 : index
    %c0_411 = arith.constant 0 : index
    %c0_412 = arith.constant 0 : index
    %443 = vector.load %arg10[%c1_409, %c2_410, %c0_411, %c0_412] : memref<2x10x10x128xbf16, #tpu.memory_space<vmem>>, vector<1x8x8x128xbf16>
    %444 = vector.shape_cast %443 : vector<1x8x8x128xbf16> to vector<8x8x128xbf16>
    %445 = vector.shape_cast %444 : vector<8x8x128xbf16> to vector<64x128xbf16>
    %446 = arith.select %442, %445, %437 : vector<64x128xi1>, vector<64x128xbf16>
    %c96_i32_413 = arith.constant 96 : i32
    %447 = vector.broadcast %c96_i32_413 : i32 to vector<64x128xi32>
    %448 = arith.cmpi sge, %0, %447 : vector<64x128xi32>
    %c128_i32_414 = arith.constant 128 : i32
    %449 = vector.broadcast %c128_i32_414 : i32 to vector<64x128xi32>
    %450 = arith.cmpi slt, %0, %449 : vector<64x128xi32>
    %451 = arith.andi %448, %450 : vector<64x128xi1>
    %c1_415 = arith.constant 1 : index
    %c2_416 = arith.constant 2 : index
    %c1_417 = arith.constant 1 : index
    %c0_418 = arith.constant 0 : index
    %452 = vector.load %arg10[%c1_415, %c2_416, %c1_417, %c0_418] : memref<2x10x10x128xbf16, #tpu.memory_space<vmem>>, vector<1x8x8x128xbf16>
    %453 = vector.shape_cast %452 : vector<1x8x8x128xbf16> to vector<8x8x128xbf16>
    %454 = vector.shape_cast %453 : vector<8x8x128xbf16> to vector<64x128xbf16>
    %455 = arith.select %451, %454, %446 : vector<64x128xi1>, vector<64x128xbf16>
    %c64_419 = arith.constant 64 : index
    %c128_420 = arith.constant 128 : index
    %456 = vector.load %arg9[%c64_419, %c128_420] : memref<128x1152xbf16, #tpu.memory_space<vmem>>, vector<64x128xbf16>
    tpu.vector_store %arg9[%c64_419, %c128_420], %455 {strides = array<i32>} : memref<128x1152xbf16, #tpu.memory_space<vmem>>, vector<64x128xbf16>,
    %c0_421 = arith.constant 0 : index
    %c0_422 = arith.constant 0 : index
    %457 = vector.load %arg9[%c0_421, %c0_422] : memref<128x1152xbf16, #tpu.memory_space<vmem>>, vector<128x256xbf16>
    %c0_423 = arith.constant 0 : index
    %c0_424 = arith.constant 0 : index
    %458 = vector.load %arg6[%c0_423, %c0_424] : memref<384x128xbf16, #tpu.memory_space<vmem>>, vector<256x128xbf16>
    %cst_425 = arith.constant dense<0.000000e+00> : vector<128x128xf32>
    %459 = tpu.matmul %457, %458, %cst_425 {dimension_numbers = #tpu.dot_dimension_numbers<[1], [0], [0], [1], [0, 0, 1, 1], [], []>} : vector<128x256xbf16>, vector<256x128xbf16>, vector<128x128xf32> -> vector<128x128xf32>
    %c0_i32_426 = arith.constant 0 : i32
    %460 = vector.broadcast %c0_i32_426 : i32 to vector<64x128xi32>
    %461 = arith.cmpi sge, %0, %460 : vector<64x128xi32>
    %c32_i32_427 = arith.constant 32 : i32
    %462 = vector.broadcast %c32_i32_427 : i32 to vector<64x128xi32>
    %463 = arith.cmpi slt, %0, %462 : vector<64x128xi32>
    %464 = arith.andi %461, %463 : vector<64x128xi1>
    %c0_428 = arith.constant 0 : index
    %c2_429 = arith.constant 2 : index
    %c2_430 = arith.constant 2 : index
    %c0_431 = arith.constant 0 : index
    %465 = vector.load %arg10[%c0_428, %c2_429, %c2_430, %c0_431] : memref<2x10x10x128xbf16, #tpu.memory_space<vmem>>, vector<1x8x8x128xbf16>
    %466 = vector.shape_cast %465 : vector<1x8x8x128xbf16> to vector<8x8x128xbf16>
    %467 = vector.shape_cast %466 : vector<8x8x128xbf16> to vector<64x128xbf16>
    %cst_432 = arith.constant 0.000000e+00 : bf16
    %468 = vector.broadcast %cst_432 : bf16 to vector<64x128xbf16>
    %469 = arith.select %464, %467, %468 : vector<64x128xi1>, vector<64x128xbf16>
    %c0_433 = arith.constant 0 : index
    %c256_434 = arith.constant 256 : index
    %470 = vector.load %arg9[%c0_433, %c256_434] : memref<128x1152xbf16, #tpu.memory_space<vmem>>, vector<64x128xbf16>
    tpu.vector_store %arg9[%c0_433, %c256_434], %469 {strides = array<i32>} : memref<128x1152xbf16, #tpu.memory_space<vmem>>, vector<64x128xbf16>,
    %c0_i32_435 = arith.constant 0 : i32
    %471 = vector.broadcast %c0_i32_435 : i32 to vector<64x128xi32>
    %472 = arith.cmpi sge, %0, %471 : vector<64x128xi32>
    %c32_i32_436 = arith.constant 32 : i32
    %473 = vector.broadcast %c32_i32_436 : i32 to vector<64x128xi32>
    %474 = arith.cmpi slt, %0, %473 : vector<64x128xi32>
    %475 = arith.andi %472, %474 : vector<64x128xi1>
    %c1_437 = arith.constant 1 : index
    %c2_438 = arith.constant 2 : index
    %c2_439 = arith.constant 2 : index
    %c0_440 = arith.constant 0 : index
    %476 = vector.load %arg10[%c1_437, %c2_438, %c2_439, %c0_440] : memref<2x10x10x128xbf16, #tpu.memory_space<vmem>>, vector<1x8x8x128xbf16>
    %477 = vector.shape_cast %476 : vector<1x8x8x128xbf16> to vector<8x8x128xbf16>
    %478 = vector.shape_cast %477 : vector<8x8x128xbf16> to vector<64x128xbf16>
    %cst_441 = arith.constant 0.000000e+00 : bf16
    %479 = vector.broadcast %cst_441 : bf16 to vector<64x128xbf16>
    %480 = arith.select %475, %478, %479 : vector<64x128xi1>, vector<64x128xbf16>
    %c64_442 = arith.constant 64 : index
    %c256_443 = arith.constant 256 : index
    %481 = vector.load %arg9[%c64_442, %c256_443] : memref<128x1152xbf16, #tpu.memory_space<vmem>>, vector<64x128xbf16>
    tpu.vector_store %arg9[%c64_442, %c256_443], %480 {strides = array<i32>} : memref<128x1152xbf16, #tpu.memory_space<vmem>>, vector<64x128xbf16>,
    %c0_444 = arith.constant 0 : index
    %c256_445 = arith.constant 256 : index
    %482 = vector.load %arg9[%c0_444, %c256_445] : memref<128x1152xbf16, #tpu.memory_space<vmem>>, vector<128x128xbf16>
    %c256_446 = arith.constant 256 : index
    %c0_447 = arith.constant 0 : index
    %483 = vector.load %arg6[%c256_446, %c0_447] : memref<384x128xbf16, #tpu.memory_space<vmem>>, vector<128x128xbf16>
    %cst_448 = arith.constant dense<0.000000e+00> : vector<128x128xf32>
    %484 = tpu.matmul %482, %483, %cst_448 {dimension_numbers = #tpu.dot_dimension_numbers<[1], [0], [0], [1], [0, 0, 1, 1], [], []>} : vector<128x128xbf16>, vector<128x128xbf16>, vector<128x128xf32> -> vector<128x128xf32>
    %485 = arith.addf %459, %484 : vector<128x128xf32>
    %c0_449 = arith.constant 0 : index
    %c0_450 = arith.constant 0 : index
    %486 = vector.load %arg7[%c0_449, %c0_450] : memref<1x128xf32, #tpu.memory_space<vmem>>, vector<1x128xf32>
    %487 = vector.broadcast %486 : vector<1x128xf32> to vector<128x128xf32>
    %488 = arith.addf %485, %487 : vector<128x128xf32>
    %489 = arith.truncf %488 : vector<128x128xf32> to vector<128x128xbf16>
    %490 = vector.shape_cast %489 : vector<128x128xbf16> to vector<2x64x128xbf16>
    %c0_451 = arith.constant 0 : index
    %c0_452 = arith.constant 0 : index
    %c0_453 = arith.constant 0 : index
    %491 = vector.load %arg8[%c0_451, %c0_452, %c0_453] : memref<2x64x128xbf16, #tpu.memory_space<vmem>>, vector<2x64x128xbf16>
    tpu.vector_store %arg8[%c0_451, %c0_452, %c0_453], %490 {strides = array<i32>} : memref<2x64x128xbf16, #tpu.memory_space<vmem>>, vector<2x64x128xbf16>,
    return
  }
  func.func @transform_0(%arg0: i32) -> (i32, i32, i32, i32) {
    %c0_i32 = arith.constant 0 : i32
    %c0_i32_0 = arith.constant 0 : i32
    %c0_i32_1 = arith.constant 0 : i32
    %c0_i32_2 = arith.constant 0 : i32
    return %arg0, %c0_i32, %c0_i32_0, %c0_i32_1 : i32, i32, i32, i32
  }
  func.func @transform_1(%arg0: i32) -> (i32, i32) {
    %c0_i32 = arith.constant 0 : i32
    %c0_i32_0 = arith.constant 0 : i32
    %c0_i32_1 = arith.constant 0 : i32
    return %c0_i32, %c0_i32_0 : i32, i32
  }
  func.func @transform_2(%arg0: i32) -> (i32, i32) {
    %c0_i32 = arith.constant 0 : i32
    %c0_i32_0 = arith.constant 0 : i32
    %c0_i32_1 = arith.constant 0 : i32
    return %c0_i32, %c0_i32_0 : i32, i32
  }
  func.func @transform_3(%arg0: i32) -> (i32, i32) {
    %c0_i32 = arith.constant 0 : i32
    %c0_i32_0 = arith.constant 0 : i32
    %c0_i32_1 = arith.constant 0 : i32
    return %c0_i32, %c0_i32_0 : i32, i32
  }
  func.func @transform_4(%arg0: i32) -> (i32, i32) {
    %c0_i32 = arith.constant 0 : i32
    %c0_i32_0 = arith.constant 0 : i32
    %c0_i32_1 = arith.constant 0 : i32
    return %c0_i32, %c0_i32_0 : i32, i32
  }
  func.func @transform_5(%arg0: i32) -> (i32, i32) {
    %c0_i32 = arith.constant 0 : i32
    %c0_i32_0 = arith.constant 0 : i32
    %c0_i32_1 = arith.constant 0 : i32
    return %c0_i32, %c0_i32_0 : i32, i32
  }
  func.func @transform_6(%arg0: i32) -> (i32, i32) {
    %c0_i32 = arith.constant 0 : i32
    %c0_i32_0 = arith.constant 0 : i32
    %c0_i32_1 = arith.constant 0 : i32
    return %c0_i32, %c0_i32_0 : i32, i32
  }
  func.func @transform_7(%arg0: i32) -> (i32, i32, i32) {
    %c0_i32 = arith.constant 0 : i32
    %c0_i32_0 = arith.constant 0 : i32
    %c0_i32_1 = arith.constant 0 : i32
    return %arg0, %c0_i32, %c0_i32_0 : i32, i32, i32
  }
}

</mosaic_0001>

<bundles_post_ra>
// kernel: super_resolution_forward.1
= control target key start
LH: loop header
LB: loop body
LE: loop exit
PB: predicated region body
PF: predicated region fallthrough
CT: control target
= control target key end

     0   :  { %v10002_v4 = vmov 0   ;;  %vm39_vm0 = vsmask.f32 256  ;;  %v44_v20 = vld [vmem:[#allocation3 + $0x8] sm:$0x1]  ;;  %vm38_vm1 = vcmask 1040384   ;;  %s12747_s1 = inlined_call_operand.vmem [shape: bf16[1152,128], index: 1, kind: input, shape index: {}]   ;;  %s12748_s0 = inlined_call_operand.vmem [shape: bf16[2,8,8,128], index: 0, kind: input, shape index: {}]   ;;  %s12749_s3 = inlined_call_operand.vmem [shape: bf16[640,128], index: 3, kind: input, shape index: {}]   ;;  %s12750_s2 = inlined_call_operand.vmem [shape: f32[1,128], index: 2, kind: input, shape index: {}]   ;;  %s12751_s5 = inlined_call_operand.vmem [shape: bf16[384,128], index: 5, kind: input, shape index: {}]   ;;  %s12752_s4 = inlined_call_operand.vmem [shape: f32[1,128], index: 4, kind: input, shape index: {}]   ;;  %s12753_s6 = inlined_call_operand.vmem [shape: f32[1,128], index: 6, kind: input, shape index: {}]   ;;  %s12754_s7 = inlined_call_operand.vmem [shape: bf16[2,64,128], index: 7, kind: output, shape index: {}]  }
   0x1   :  { %v9825_v0 = vld [vmem:[%s12747_s1 + $0x100] sm:$0xff]   ;;  %v9828_v3 = vld [vmem:[%s12747_s1 + $0x108] sm:$0xff]   ;;  %29 = vst [vmem:[#allocation3] sm:$0xf] %v10002_v4  ;;  %30 = vst [vmem:[#allocation3 + $0x4] sm:$0x1] %v10002_v4 }
   0x2   :  { %v9826_v1 = vld [vmem:[%s12747_s1 + $0x140] sm:$0xff]   ;;  %9104 = vmatprep.subr.bf16.mxu0 %v9825_v0  ;;  %31 = vst [vmem:[#allocation3 + $0x50] sm:$0xf] %v10002_v4  ;;  %32 = vst [vmem:[#allocation3 + $0x54] sm:$0x1] %v10002_v4  ;;  %v9829_v5 = vld [vmem:[%s12747_s1 + $0x148] sm:$0xff]  }
   0x3   :  { %v9827_v2 = vld [vmem:[%s12747_s1 + $0xc0] sm:$0xff]   ;;  %9568 = vmatprep.subr.bf16.mxu1 %v9826_v1  ;;  %34 = vst [vmem:[#allocation3 + $0x48] sm:$0xf] %v10002_v4  ;;  %35 = vst [vmem:[#allocation3 + $0x4c] sm:$0x1] %v10002_v4  ;;  %v9830_v6 = vld [vmem:[%s12747_s1 + $0xc8] sm:$0xff]  }
   0x4   :  { %36 = vst [vmem:[#allocation3 + $0x98] sm:$0xf] %v10002_v4  ;;  %37 = vst [vmem:[#allocation3 + $0x9c] sm:$0x1] %v10002_v4  ;;  %9105 = vmatpush3.bf16.msra.mxu0 %v9827_v2  ;;  %9569 = vmatpush3.bf16.msra.mxu1 %v9826_v1  ;;  %v9831_v7 = vld [vmem:[%s12747_s1 + $0x110] sm:$0xff]   ;;  %v9834_v10 = vld [vmem:[%s12747_s1 + $0x118] sm:$0xff]  }
   0x5   :  { %163 = vst [vmem:[#allocation4] sm:$0xf] %v10002_v4  ;;  %164 = vst [vmem:[#allocation4 + $0x4] sm:$0x1] %v10002_v4  ;;  %9106 = vmatprep.subr.bf16.mxu0 %v9828_v3  ;;  %9570 = vmatprep.subr.bf16.mxu1 %v9829_v5  ;;  %v9832_v8 = vld [vmem:[%s12747_s1 + $0x150] sm:$0xff]   ;;  %v9835_v11 = vld [vmem:[%s12747_s1 + $0x158] sm:$0xff]  }
   0x6   :  { %165 = vst [vmem:[#allocation4 + $0x50] sm:$0xf] %v10002_v4  ;;  %166 = vst [vmem:[#allocation4 + $0x54] sm:$0x1] %v10002_v4  ;;  %v9833_v9 = vld [vmem:[%s12747_s1 + $0xd0] sm:$0xff]   ;;  %v9836_v12 = vld [vmem:[%s12747_s1 + $0xd8] sm:$0xff]  }
   0x7   :  { %168 = vst [vmem:[#allocation4 + $0x48] sm:$0xf] %v10002_v4  ;;  %169 = vst [vmem:[#allocation4 + $0x4c] sm:$0x1] %v10002_v4  ;;  %v9837_v13 = vld [vmem:[%s12747_s1 + $0x120] sm:$0xff]   ;;  %v9840_v16 = vld [vmem:[%s12747_s1 + $0x128] sm:$0xff]  }
   0x8   :  { %170 = vst [vmem:[#allocation4 + $0x98] sm:$0xf] %v10002_v4  ;;  %171 = vst [vmem:[#allocation4 + $0x9c] sm:$0x1] %v10002_v4  ;;  %9107 = vmatpush3.bf16.msra.mxu0 %v9830_v6  ;;  %9571 = vmatpush3.bf16.msra.mxu1 %v9829_v5  ;;  %v9838_v14 = vld [vmem:[%s12747_s1 + $0x160] sm:$0xff]   ;;  %v9841_v17 = vld [vmem:[%s12747_s1 + $0x168] sm:$0xff]  }
   0x9   :  { %9108 = vmatprep.subr.bf16.mxu0 %v9831_v7  ;;  %9572 = vmatprep.subr.bf16.mxu1 %v9832_v8  ;;  %v9839_v15 = vld [vmem:[%s12747_s1 + $0xe0] sm:$0xff]   ;;  %v9842_v18 = vld [vmem:[%s12747_s1 + $0xe8] sm:$0xff]   ;;  %v9843_v19 = vld [vmem:[%s12747_s1 + $0x130] sm:$0xff]   ;;  %vm101_vm3 = vsmask.f32 7938  ;;  %vm469_vm5 = vcmask 1043456  }
   0xa   :  { %v9844_v21 = vld [vmem:[%s12747_s1 + $0x170] sm:$0xff]   ;;  %v9846_v23 = vld [vmem:[%s12747_s1 + $0x138] sm:$0xff]   ;;  %vm10114_vm2 = vmand %vm38_vm1, %vm39_vm0  ;;  %vm786_vm7 = vcmask 1042432   ;;  %vm787_vm8 = vcmask 1046532   ;;  %vm619_vm9 = vsmask.f32 3328 }
   0xb   :  { %v9845_v22 = vld [vmem:[%s12747_s1 + $0xf0] sm:$0xff]   ;;  %v9847_v24 = vld [vmem:[%s12747_s1 + $0x178] sm:$0xff]   ;;  %v106_v27 = vld [vmem:[#allocation3 + $0xc] sm:$0x1]  ;;  %v45_v28 = vsel %vm10114_vm2, 0, %v44_v20 }
   0xc   :  { %9109 = vmatpush3.bf16.msra.mxu0 %v9833_v9  ;;  %9573 = vmatpush3.bf16.msra.mxu1 %v9832_v8  ;;  %v47_v26 = vld [vmem:[#allocation3 + $0x10] sm:$0x1]  ;;  %vm10124_vm4 = vmand %vm38_vm1, %vm101_vm3  ;;  %v109_v31 = vld [vmem:[#allocation3 + $0x14] sm:$0x1]  ;;  %46 = vst [vmem:[#allocation3 + $0x8] sm:$0x1] %v45_v28 }
   0xd   :  { %9110 = vmatprep.subr.bf16.mxu0 %v9834_v10  ;;  %9574 = vmatprep.subr.bf16.mxu1 %v9835_v11  ;;  %v48_v29 = vsel %vm10114_vm2, 0, %v47_v26  ;;  %v292_v32 = vld [vmem:[%s12748_s0] sm:$0xf]  ;;  %v107_v33 = vsel %vm10124_vm4, 0, %v106_v27  ;;  %v110_v34 = vsel %vm10124_vm4, 0, %v109_v31  ;;  %v9848_v40 = vld [vmem:[%s12747_s1 + $0xf8] sm:$0xff]   ;;  %vm10155_vm6 = vmand %vm469_vm5, %vm101_vm3 }
   0xe   :  { %49 = vst [vmem:[#allocation3 + $0x10] sm:$0x1] %v48_v29  ;;  %v293_v35 = vld [vmem:[%s12748_s0 + $0x4] sm:$0xf]  ;;  %v309_v36 = vshrl.u32 %v292_v32, 16  ;;  %v312_v37 = vshll.u32 %v292_v32, 16  ;;  %vm10195_vm11 = vmor %vm786_vm7, %vm787_vm8 }
   0xf   :  { %108 = vst [vmem:[#allocation3 + $0xc] sm:$0x1] %v107_v33  ;;  %111 = vst [vmem:[#allocation3 + $0x14] sm:$0x1] %v110_v34  ;;  %v317_v38 = vshrl.u32 %v293_v35, 16  ;;  %v320_v39 = vshll.u32 %v293_v35, 16 }
  0x10   :  { %9111 = vmatpush3.bf16.msra.mxu0 %v9836_v12  ;;  %9575 = vmatpush3.bf16.msra.mxu1 %v9835_v11  ;;  %v311_v41 = vrot.slane %v309_v36, 7  ;;  %v50_v42 = vld [vmem:[#allocation3 + $0x18] sm:$0x1]  ;;  %v53_v43 = vld [vmem:[#allocation3 + $0x20] sm:$0x1] }
  0x11   :  { %9112 = vmatprep.subr.bf16.mxu0 %v9837_v13  ;;  %9576 = vmatprep.subr.bf16.mxu1 %v9838_v14  ;;  %v319_v44 = vrot.slane %v317_v38, 7  ;;  %v51_v45 = vsel %vm10114_vm2, 0, %v50_v42  ;;  %v54_v46 = vsel %vm10114_vm2, 0, %v53_v43  ;;  %v112_v47 = vld [vmem:[#allocation3 + $0x1c] sm:$0x1]  ;;  %v9850_v48 = vld [vmem:[%s12747_s1 + $0x40] sm:$0xff]  }
  0x12   :  { %v314_v49 = vor.u32 %v312_v37, %v311_v41  ;;  %v315_v50 = vrot.slane %v311_v41, 4  ;;  %52 = vst [vmem:[#allocation3 + $0x18] sm:$0x1] %v51_v45  ;;  %55 = vst [vmem:[#allocation3 + $0x20] sm:$0x1] %v54_v46  ;;  %v113_v51 = vsel %vm10124_vm4, 0, %v112_v47 }
  0x13   :  { %v115_v52 = vld [vmem:[#allocation3 + $0x24] sm:$0x1]  ;;  %v294_v53 = vld [vmem:[%s12748_s0 + $0x8] sm:$0xf]  ;;  %v322_v54 = vor.u32 %v320_v39, %v319_v44  ;;  %v323_v55 = vrot.slane %v319_v44, 4 }
  0x14   :  { %9113 = vmatpush3.bf16.msra.mxu0 %v9839_v15  ;;  %9577 = vmatpush3.bf16.msra.mxu1 %v9838_v14  ;;  %114 = vst [vmem:[#allocation3 + $0x1c] sm:$0x1] %v113_v51  ;;  %v116_v57 = vsel %vm10124_vm4, 0, %v115_v52  ;;  %v295_v58 = vld [vmem:[%s12748_s0 + $0xc] sm:$0xf]  ;;  %v325_v59 = vshrl.u32 %v294_v53, 16 }
  0x15   :  { %9114 = vmatprep.subr.bf16.mxu0 %v9840_v16  ;;  %9578 = vmatprep.subr.bf16.mxu1 %v9841_v17  ;;  %117 = vst [vmem:[#allocation3 + $0x24] sm:$0x1] %v116_v57  ;;  %v328_v60 = vshll.u32 %v294_v53, 16  ;;  %v333_v61 = vshrl.u32 %v295_v58, 16  ;;  %v336_v62 = vshll.u32 %v295_v58, 16 }
  0x16   :  { %v471_v63 = vld [vmem:[#allocation3 + $0x8] sm:$0xf]  ;;  %v477_v0 = vld [vmem:[#allocation3 + $0x10] sm:$0xf]  ;;  %v327_v1 = vrot.slane %v325_v59, 7 }
  0x17   :  { %v472_v2 = vsel %vm10155_vm6, %v314_v49, %v471_v63  ;;  %v474_v3 = vld [vmem:[#allocation3 + $0xc] sm:$0x1]  ;;  %v478_v4 = vsel %vm10155_vm6, %v322_v54, %v477_v0  ;;  %v480_v5 = vld [vmem:[#allocation3 + $0x14] sm:$0x1]  ;;  %v335_v6 = vrot.slane %v333_v61, 7 }
  0x18   :  { %9115 = vmatpush3.bf16.msra.mxu0 %v9842_v18  ;;  %9579 = vmatpush3.bf16.msra.mxu1 %v9841_v17  ;;  %473 = vst [vmem:[#allocation3 + $0x8] sm:$0xf] %v472_v2  ;;  %v475_v7 = vsel %vm10114_vm2, %v315_v50, %v474_v3  ;;  %479 = vst [vmem:[#allocation3 + $0x10] sm:$0xf] %v478_v4  ;;  %v481_v8 = vsel %vm10114_vm2, %v323_v55, %v480_v5  ;;  %v331_v10 = vrot.slane %v327_v1, 4 }
  0x19   :  { %9116 = vmatprep.subr.bf16.mxu0 %v9843_v19  ;;  %9580 = vmatprep.subr.bf16.mxu1 %v9844_v21  ;;  %v330_v9 = vor.u32 %v328_v60, %v327_v1  ;;  %476 = vst [vmem:[#allocation3 + $0xc] sm:$0x1] %v475_v7  ;;  %482 = vst [vmem:[#allocation3 + $0x14] sm:$0x1] %v481_v8  ;;  %v338_v11 = vor.u32 %v336_v62, %v335_v6  ;;  %v339_v12 = vrot.slane %v335_v6, 4 }
  0x1a   :  { %v483_v13 = vld [vmem:[#allocation3 + $0x18] sm:$0xf]  ;;  %v489_v14 = vld [vmem:[#allocation3 + $0x20] sm:$0xf]  ;;  %v56_v20 = vld [vmem:[#allocation3 + $0x28] sm:$0x1] }
  0x1b   :  { %v484_v15 = vsel %vm10155_vm6, %v330_v9, %v483_v13  ;;  %v486_v16 = vld [vmem:[#allocation3 + $0x1c] sm:$0x1]  ;;  %v490_v17 = vsel %vm10155_vm6, %v338_v11, %v489_v14  ;;  %v118_v26 = vld [vmem:[#allocation3 + $0x2c] sm:$0x1]  ;;  %v121_v27 = vld [vmem:[#allocation3 + $0x34] sm:$0x1] }
  0x1c   :  { %9117 = vmatpush3.bf16.msra.mxu0 %v9845_v22  ;;  %9581 = vmatpush3.bf16.msra.mxu1 %v9844_v21  ;;  %485 = vst [vmem:[#allocation3 + $0x18] sm:$0xf] %v484_v15  ;;  %v487_v18 = vsel %vm10114_vm2, %v331_v10, %v486_v16  ;;  %491 = vst [vmem:[#allocation3 + $0x20] sm:$0xf] %v490_v17  ;;  %v492_v19 = vld [vmem:[#allocation3 + $0x24] sm:$0x1] }
  0x1d   :  { %9118 = vmatprep.subr.bf16.mxu0 %v9846_v23  ;;  %9582 = vmatprep.subr.bf16.mxu1 %v9847_v24  ;;  %v59_v21 = vld [vmem:[#allocation3 + $0x30] sm:$0x1]  ;;  %488 = vst [vmem:[#allocation3 + $0x1c] sm:$0x1] %v487_v18  ;;  %v493_v22 = vsel %vm10114_vm2, %v339_v12, %v492_v19  ;;  %v57_v23 = vsel %vm10114_vm2, 0, %v56_v20  ;;  %v119_v28 = vsel %vm10124_vm4, 0, %v118_v26 }
  0x1e   :  { %vm620_vm10 = vsmask.f32 7440  ;;  %494 = vst [vmem:[#allocation3 + $0x24] sm:$0x1] %v493_v22  ;;  %58 = vst [vmem:[#allocation3 + $0x28] sm:$0x1] %v57_v23 }
  0x1f   :  { %v122_v29 = vsel %vm10124_vm4, 0, %v121_v27  ;;  %v1218_v31 = vld [vmem:[#allocation3 + $0x8] sm:$0xf]  ;;  %v1220_v32 = vld [vmem:[#allocation3 + $0x10] sm:$0xf]  ;;  %vm10201_vm12 = vmor %vm619_vm9, %vm620_vm10 }
  0x20   :  { %9119 = vmatpush3.bf16.msra.mxu0 %v9848_v40  ;;  %9583 = vmatpush3.bf16.msra.mxu1 %v9847_v24  ;;  %v60_v24 = vsel %vm10114_vm2, 0, %v59_v21  ;;  %v1366_v33 = vld [vmem:[#allocation3 + $0x8] sm:$0xe]  ;;  %120 = vst [vmem:[#allocation3 + $0x2c] sm:$0x1] %v119_v28  ;;  %v1235_v36 = vshrl.u32 %v1218_v31, 16 }
  0x21   :  { %9184 = vmatprep.subr.bf16.mxu1 %v9850_v48  ;;  %61 = vst [vmem:[#allocation3 + $0x30] sm:$0x1] %v60_v24  ;;  %123 = vst [vmem:[#allocation3 + $0x34] sm:$0x1] %v122_v29  ;;  %v1219_v34 = vld [vmem:[#allocation3 + $0xc] sm:$0x1] }
  0x22   :  { %v1221_v35 = vld [vmem:[#allocation3 + $0x14] sm:$0x1]  ;;  %v1238_v37 = vshll.u32 %v1218_v31, 16  ;;  %v10191_v38 = vld [vmem:[%s12748_s0 + $0x10] sm:$0xf]  ;;  %v1244_v39 = vshll.u32 %v1219_v34, 16 }
  0x23   :  { %v1249_v40 = vshrl.u32 %v1220_v32, 16  ;;  %v1252_v41 = vshll.u32 %v1220_v32, 16  ;;  %v1258_v42 = vshll.u32 %v1221_v35, 16  ;;  %v1367_v43 = vld [vmem:[#allocation3 + $0xc] sm:$0x1]  ;;  %v1237_v44 = vrot.slane %v1235_v36, 4 }
  0x24   :  { %v1240_v45 = vrot.slane %v1238_v37, 5  ;;  %v1368_v46 = vld [vmem:[#allocation3 + $0x10] sm:$0xe]  ;;  %v1369_v47 = vld [vmem:[#allocation3 + $0x14] sm:$0x1]  ;;  %v1246_v48 = vrot.slane %v1244_v39, 5 }
  0x25   :  { %v1251_v49 = vrot.slane %v1249_v40, 4  ;;  %v1254_v50 = vrot.slane %v1252_v41, 5  ;;  %v8590_v53 = vrot.slane %v1366_v33, 9  ;;  %v1400_v54 = vrot.slane %v1367_v43, 5  ;;  %v1370_v61 = vld [vmem:[#allocation3 + $0x18] sm:$0xe] }
  0x26   :  { %v1241_v52 = vor.u32 %v1240_v45, %v1237_v44  ;;  %v8591_v55 = vrot.slane %v1368_v46, 9  ;;  %v1260_v59 = vrot.slane %v1258_v42, 5  ;;  %v1404_v60 = vrot.slane %v1369_v47, 5  ;;  %v1371_v1 = vld [vmem:[#allocation3 + $0x1c] sm:$0x1]  ;;  %v9851_v24 = vld [vmem:[%s12747_s1] sm:$0xff]  }
  0x27   :  { %v1255_v58 = vor.u32 %v1254_v50, %v1251_v49  ;;  %v341_v62 = vshrl.u32 %v10191_v38, 16  ;;  %v1401_v0 = vsel %vm10195_vm11, %v8590_v53, %v1400_v54  ;;  %v1372_v2 = vld [vmem:[#allocation3 + $0x20] sm:$0xe]  ;;  %v8592_v3 = vrot.slane %v1370_v61, 9  ;;  %v9849_v6 = vld [vmem:[#allocation3 + $0x8] ss:$8 sps:$4 sm:$0xff]  }
  0x28   :  { %v1242_v63 = vrot.slane %v1241_v52, 4  ;;  %v1405_v5 = vsel %vm10195_vm11, %v8591_v55, %v1404_v60  ;;  %v1373_v7 = vld [vmem:[#allocation3 + $0x24] sm:$0x1]  ;;  %v1408_v8 = vrot.slane %v1371_v1, 5  ;;  %v8593_v9 = vrot.slane %v1372_v2, 9  ;;  %v9852_v31 = vld [vmem:[%s12747_s1 + $0x48] sm:$0xff]  }
  0x29   :  { %v1256_v4 = vrot.slane %v1255_v58, 4  ;;  %v8598_v11 = vcombine.low %v1401_v0, %v1405_v5  ;;  %v1412_v12 = vrot.slane %v1373_v7, 5  ;;  %v1222_v13 = vld [vmem:[#allocation3 + $0x18] sm:$0xf]  ;;  %v1223_v14 = vld [vmem:[#allocation3 + $0x1c] sm:$0x1] }
  0x2a   :  { %v1247_v10 = vsel %vm10201_vm12, %v1242_v63, %v1246_v48  ;;  %v343_v15 = vrot.slane %v341_v62, 7  ;;  %v1409_v17 = vsel %vm10195_vm11, %v8592_v3, %v1408_v8  ;;  %v1224_v18 = vld [vmem:[#allocation3 + $0x20] sm:$0xf]  ;;  %v1225_v19 = vld [vmem:[#allocation3 + $0x24] sm:$0x1]  ;;  %v1263_v20 = vshrl.u32 %v1222_v13, 16 }
  0x2b   :  { %v1261_v16 = vsel %vm10201_vm12, %v1256_v4, %v1260_v59  ;;  %v1266_v21 = vshll.u32 %v1222_v13, 16  ;;  %9584 = vmatprep.mubr.bf16.mxu1 %v8598_v11  ;;  %v1413_v23 = vsel %vm10195_vm11, %v8593_v9, %v1412_v12  ;;  %v1272_v26 = vshll.u32 %v1223_v14, 16  ;;  %v297_v28 = vld [vmem:[%s12748_s0 + $0x14] sm:$0xf]  ;;  %v495_v35 = vld [vmem:[#allocation3 + $0x28] sm:$0xf] }
  0x2c   :  { %v8586_v22 = vcombine.low %v1247_v10, %v1261_v16  ;;  %v1277_v27 = vshrl.u32 %v1224_v18, 16  ;;  %v8599_v29 = vcombine.low %v1409_v17, %v1413_v23  ;;  %v1265_v32 = vrot.slane %v1263_v20, 4  ;;  %v9853_v36 = vld [vmem:[%s12747_s1 + $0x8] sm:$0xff]   ;;  %v9855_v47 = vld [vmem:[%s12747_s1 + $0x50] sm:$0xff]   ;;  %v62_v59 = vld [vmem:[#allocation3 + $0x38] sm:$0x1] }
  0x2d   :  { %v1268_v33 = vrot.slane %v1266_v21, 5  ;;  %v1280_v34 = vshll.u32 %v1224_v18, 16  ;;  %v1274_v37 = vrot.slane %v1272_v26, 5  ;;  %v1286_v40 = vshll.u32 %v1225_v19, 16  ;;  %v498_v42 = vld [vmem:[#allocation3 + $0x2c] sm:$0x1] }
  0x2e   :  { %1967 = vmatprep.mubr.bf16.mxu0 %v8586_v22  ;;  %v1279_v39 = vrot.slane %v1277_v27, 4  ;;  %v344_v41 = vshll.u32 %v10191_v38, 16  ;;  %9585 = vmatmul.mubr.bf16.vlgmr.msra.gmra.mrb[0].mxu1 %v8599_v29  ;;  %v347_v45 = vrot.slane %v343_v15, 4  ;;  %v349_v46 = vshrl.u32 %v297_v28, 16  ;;  %v501_v52 = vld [vmem:[#allocation3 + $0x30] sm:$0xf] }
  0x2f   :  { %1968 = vmatmul.mubr.bf16.vlgmr.msra.gmra.mrb[0].mxu0 %v9849_v6  ;;  %v1269_v43 = vor.u32 %v1268_v33, %v1265_v32  ;;  %v1282_v44 = vrot.slane %v1280_v34, 5  ;;  %9185 = vmatpush3.bf16.msra.mxu1 %v9851_v24  ;;  %v1288_v48 = vrot.slane %v1286_v40, 5  ;;  %v352_v50 = vshll.u32 %v297_v28, 16  ;;  %v504_v53 = vld [vmem:[#allocation3 + $0x34] sm:$0x1]  ;;  %v9857_v18 = vld [vmem:[%s12747_s1 + $0x58] sm:$0xff]  }
  0x30   :  { %v346_v49 = vor.u32 %v344_v41, %v343_v15  ;;  %9186 = vmatprep.subr.bf16.mxu1 %v9852_v31  ;;  %v351_v55 = vrot.slane %v349_v46, 7  ;;  %v499_v58 = vsel %vm10114_vm2, %v347_v45, %v498_v42  ;;  %v65_v60 = vld [vmem:[#allocation3 + $0x40] sm:$0x1]  ;;  %v63_v62 = vsel %vm10114_vm2, 0, %v62_v59  ;;  %v124_v0 = vld [vmem:[#allocation3 + $0x3c] sm:$0x1] }
  0x31   :  { %v1270_v54 = vrot.slane %v1269_v43, 4  ;;  %v1283_v38 = vor.u32 %v1282_v44, %v1279_v39  ;;  %500 = vst [vmem:[#allocation3 + $0x2c] sm:$0x1] %v499_v58  ;;  %v66_v63 = vsel %vm10114_vm2, 0, %v65_v60  ;;  %v127_v1 = vld [vmem:[#allocation3 + $0x44] sm:$0x1] }
  0x32   :  { %v496_v61 = vsel %vm10155_vm6, %v346_v49, %v495_v35  ;;  %v9856_v2 = vld [vmem:[%s12747_s1 + $0x10] sm:$0xff]   ;;  %v354_v5 = vor.u32 %v352_v50, %v351_v55  ;;  %v355_v6 = vrot.slane %v351_v55, 4  ;;  %v9854_v7 = vld [vmem:[#allocation3 + $0x18] ss:$8 sps:$4 sm:$0xff]   ;;  %64 = vst [vmem:[#allocation3 + $0x38] sm:$0x1] %v63_v62 }
  0x33   :  { %v1275_v3 = vsel %vm10201_vm12, %v1270_v54, %v1274_v37  ;;  %v1284_v4 = vrot.slane %v1283_v38, 4  ;;  %497 = vst [vmem:[#allocation3 + $0x28] sm:$0xf] %v496_v61  ;;  %67 = vst [vmem:[#allocation3 + $0x40] sm:$0x1] %v66_v63  ;;  %9187 = vmatpush3.bf16.msra.mxu1 %v9853_v36  ;;  %v125_v10 = vsel %vm10124_vm4, 0, %v124_v0 }
  0x34   :  { %v298_v8 = vld [vmem:[%s12748_s0 + $0x18] sm:$0xf]  ;;  %v299_v9 = vld [vmem:[%s12748_s0 + $0x1c] sm:$0xf]  ;;  %v128_v11 = vsel %vm10124_vm4, 0, %v127_v1  ;;  %v502_v15 = vsel %vm10155_vm6, %v354_v5, %v501_v52  ;;  %v505_v16 = vsel %vm10114_vm2, %v355_v6, %v504_v53  ;;  %9188 = vmatprep.subr.bf16.mxu1 %v9855_v47  ;;  %v9860_v28 = vld [vmem:[%s12747_s1 + $0x60] sm:$0xff]  }
  0x35   :  { %v357_v12 = vshrl.u32 %v298_v8, 16  ;;  %v360_v13 = vshll.u32 %v298_v8, 16  ;;  %v1289_v14 = vsel %vm10201_vm12, %v1284_v4, %v1288_v48  ;;  %126 = vst [vmem:[#allocation3 + $0x3c] sm:$0x1] %v125_v10  ;;  %129 = vst [vmem:[#allocation3 + $0x44] sm:$0x1] %v128_v11 }
  0x36   :  { %v365_v17 = vshrl.u32 %v299_v9, 16  ;;  %v8587_v19 = vcombine.low %v1275_v3, %v1289_v14  ;;  %503 = vst [vmem:[#allocation3 + $0x30] sm:$0xf] %v502_v15  ;;  %506 = vst [vmem:[#allocation3 + $0x34] sm:$0x1] %v505_v16  ;;  %v368_v21 = vshll.u32 %v299_v9, 16 }
  0x37   :  { %v359_v20 = vrot.slane %v357_v12, 7  ;;  %v9858_v23 = vld [vmem:[%s12747_s1 + $0x18] sm:$0xff]   ;;  %9189 = vmatpush3.bf16.msra.mxu1 %v9856_v2  ;;  %v9861_v39 = vld [vmem:[%s12747_s1 + $0x20] sm:$0xff]   ;;  %v9862_v45 = vld [vmem:[%s12747_s1 + $0x68] sm:$0xff]  }
  0x38   :  { %v367_v22 = vrot.slane %v365_v17, 7  ;;  %1975 = vmatprep.mubr.bf16.mxu0 %v8587_v19  ;;  %v74_v27 = vld [vmem:[#allocation3 + $0x58] sm:$0x1]  ;;  %v1375_v29 = vld [vmem:[#allocation3 + $0x2c] sm:$0x1]  ;;  %9190 = vmatprep.subr.bf16.mxu1 %v9857_v18  ;;  %v9865_v16 = vld [vmem:[%s12747_s1 + $0x70] sm:$0xff]  }
  0x39   :  { %v362_v24 = vor.u32 %v360_v13, %v359_v20  ;;  %v363_v26 = vrot.slane %v359_v20, 4  ;;  %1976 = vmatmul.mubr.bf16.gmra.mrb[4].mxu0 %v9854_v7  ;;  %v1227_v33 = vld [vmem:[#allocation3 + $0x2c] sm:$0x1]  ;;  %v75_v34 = vsel %vm10114_vm2, 0, %v74_v27  ;;  %v1416_v36 = vrot.slane %v1375_v29, 5  ;;  %v9867_v29 = vld [vmem:[%s12747_s1 + $0x78] sm:$0xff]  }
  0x3a   :  { %v370_v31 = vor.u32 %v368_v21, %v367_v22  ;;  %v371_v32 = vrot.slane %v367_v22, 4  ;;  %v1374_v35 = vld [vmem:[#allocation3 + $0x28] sm:$0xe]  ;;  %v507_v37 = vld [vmem:[#allocation3 + $0x38] sm:$0xf]  ;;  %v1300_v44 = vshll.u32 %v1227_v33, 16 }
  0x3b   :  { %76 = vst [vmem:[#allocation3 + $0x58] sm:$0x1] %v75_v34  ;;  %v8594_v40 = vrot.slane %v1374_v35, 9  ;;  %v508_v41 = vsel %vm10155_vm6, %v362_v24, %v507_v37  ;;  %v513_v42 = vld [vmem:[#allocation3 + $0x40] sm:$0xf]  ;;  %9191 = vmatpush3.bf16.msra.mxu1 %v9858_v23  ;;  %v9863_v4 = vld [vmem:[%s12747_s1 + $0x28] sm:$0xff]  }
  0x3c   :  { %v1226_v43 = vld [vmem:[#allocation3 + $0x28] sm:$0xf]  ;;  %509 = vst [vmem:[#allocation3 + $0x38] sm:$0xf] %v508_v41  ;;  %v510_v46 = vld [vmem:[#allocation3 + $0x3c] sm:$0x1]  ;;  %v514_v47 = vsel %vm10155_vm6, %v370_v31, %v513_v42  ;;  %9192 = vmatprep.subr.bf16.mxu1 %v9860_v28 }
  0x3d   :  { %v516_v48 = vld [vmem:[#allocation3 + $0x44] sm:$0x1]  ;;  %v1291_v49 = vshrl.u32 %v1226_v43, 16  ;;  %v1294_v50 = vshll.u32 %v1226_v43, 16  ;;  %v1376_v52 = vld [vmem:[#allocation3 + $0x30] sm:$0xe]  ;;  %v1417_v54 = vsel %vm10195_vm11, %v8594_v40, %v1416_v36  ;;  %v511_v38 = vsel %vm10114_vm2, %v363_v26, %v510_v46 }
  0x3e   :  { %v1377_v53 = vld [vmem:[#allocation3 + $0x34] sm:$0x1]  ;;  %515 = vst [vmem:[#allocation3 + $0x40] sm:$0xf] %v514_v47  ;;  %v517_v55 = vsel %vm10114_vm2, %v371_v32, %v516_v48  ;;  %v1228_v58 = vld [vmem:[#allocation3 + $0x30] sm:$0xf] }
  0x3f   :  { %v8595_v59 = vrot.slane %v1376_v52, 9  ;;  %v1420_v60 = vrot.slane %v1377_v53, 5  ;;  %512 = vst [vmem:[#allocation3 + $0x3c] sm:$0x1] %v511_v38  ;;  %518 = vst [vmem:[#allocation3 + $0x44] sm:$0x1] %v517_v55  ;;  %9193 = vmatpush3.bf16.msra.mxu1 %v9861_v39 }
  0x40   :  { %v1229_v61 = vld [vmem:[#allocation3 + $0x34] sm:$0x1]  ;;  %v1293_v62 = vrot.slane %v1291_v49, 4  ;;  %v1296_v63 = vrot.slane %v1294_v50, 5  ;;  %v1305_v0 = vshrl.u32 %v1228_v58, 16  ;;  %v1308_v1 = vshll.u32 %v1228_v58, 16  ;;  %9194 = vmatprep.subr.bf16.mxu1 %v9862_v45 }
  0x41   :  { %v1314_v2 = vshll.u32 %v1229_v61, 16  ;;  %v77_v3 = vld [vmem:[#allocation3 + $0x60] sm:$0x1]  ;;  %v1421_v5 = vsel %vm10195_vm11, %v8595_v59, %v1420_v60  ;;  %v1302_v7 = vrot.slane %v1300_v44, 5  ;;  %v136_v9 = vld [vmem:[#allocation3 + $0x5c] sm:$0x1] }
  0x42   :  { %v1297_v6 = vor.u32 %v1296_v63, %v1293_v62  ;;  %v78_v8 = vsel %vm10114_vm2, 0, %v77_v3  ;;  %v139_v10 = vld [vmem:[#allocation3 + $0x64] sm:$0x1]  ;;  %v8600_v11 = vcombine.low %v1417_v54, %v1421_v5  ;;  %v1307_v12 = vrot.slane %v1305_v0, 4  ;;  %v300_v15 = vld [vmem:[%s12748_s0 + $0x20] sm:$0xf] }
  0x43   :  { %v1310_v13 = vrot.slane %v1308_v1, 5  ;;  %v1316_v14 = vrot.slane %v1314_v2, 5  ;;  %79 = vst [vmem:[#allocation3 + $0x60] sm:$0x1] %v78_v8  ;;  %v137_v18 = vsel %vm10124_vm4, 0, %v136_v9  ;;  %v140_v19 = vsel %vm10124_vm4, 0, %v139_v10  ;;  %9195 = vmatpush3.bf16.msra.mxu1 %v9863_v4 }
  0x44   :  { %v1298_v17 = vrot.slane %v1297_v6, 4  ;;  %v301_v20 = vld [vmem:[%s12748_s0 + $0x24] sm:$0xf]  ;;  %v373_v21 = vshrl.u32 %v300_v15, 16  ;;  %v9866_v22 = vld [vmem:[%s12747_s1 + $0x30] sm:$0xff]   ;;  %9588 = vmatprep.mubr.bf16.mxu1 %v8600_v11  ;;  %v376_v26 = vshll.u32 %v300_v15, 16  ;;  %9196 = vmatprep.subr.bf16.mxu1 %v9865_v16 }
  0x45   :  { %v1378_v23 = vld [vmem:[#allocation3 + $0x38] sm:$0xe]  ;;  %v1311_v24 = vor.u32 %v1310_v13, %v1307_v12  ;;  %138 = vst [vmem:[#allocation3 + $0x5c] sm:$0x1] %v137_v18  ;;  %141 = vst [vmem:[#allocation3 + $0x64] sm:$0x1] %v140_v19 }
  0x46   :  { %v381_v27 = vshrl.u32 %v301_v20, 16  ;;  %v384_v28 = vshll.u32 %v301_v20, 16  ;;  %v9872_v31 = vld [vmem:[%s12747_s1 + $0x1c0] sm:$0xff]   ;;  %v8596_v33 = vrot.slane %v1378_v23, 9  ;;  %v375_v34 = vrot.slane %v373_v21, 7  ;;  %v9868_v46 = vld [vmem:[%s12747_s1 + $0x38] sm:$0xff]  }
  0x47   :  { %v1380_v32 = vld [vmem:[#allocation3 + $0x40] sm:$0xe]  ;;  %v519_v35 = vld [vmem:[#allocation3 + $0x58] sm:$0xf]  ;;  %v1379_v36 = vld [vmem:[#allocation3 + $0x3c] sm:$0x1]  ;;  %v1303_v40 = vsel %vm10201_vm12, %v1298_v17, %v1302_v7  ;;  %9264 = vmatprep.subr.bf16.mxu0 %v9872_v31  ;;  %9197 = vmatpush3.bf16.msra.mxu1 %v9866_v22 }
  0x48   :  { %v1381_v37 = vld [vmem:[#allocation3 + $0x44] sm:$0x1]  ;;  %v8597_v39 = vrot.slane %v1380_v32, 9  ;;  %v1312_v41 = vrot.slane %v1311_v24, 4  ;;  %v1424_v42 = vrot.slane %v1379_v36, 5  ;;  %v378_v44 = vor.u32 %v376_v26, %v375_v34  ;;  %v9874_v53 = vld [vmem:[%s12747_s1 + $0x1c8] sm:$0xff]   ;;  %9198 = vmatprep.subr.bf16.mxu1 %v9867_v29 }
  0x49   :  { %v1428_v43 = vrot.slane %v1381_v37, 5  ;;  %v379_v45 = vrot.slane %v375_v34, 4  ;;  %v9873_v47 = vld [vmem:[%s12747_s1 + $0x180] sm:$0xff]   ;;  %v383_v49 = vrot.slane %v381_v27, 7  ;;  %v9859_v50 = vld [vmem:[#allocation3 + $0x28] ss:$8 sps:$4 sm:$0xff]  }
  0x4a   :  { %v1317_v48 = vsel %vm10201_vm12, %v1312_v41, %v1316_v14  ;;  %v10332_v52 = vld [vmem:[%s12747_s1 + $0x80] sm:$0xff]   ;;  %v1425_v54 = vsel %vm10195_vm11, %v8596_v33, %v1424_v42  ;;  %v520_v58 = vsel %vm10155_vm6, %v378_v44, %v519_v35  ;;  %v80_v60 = vld [vmem:[#allocation3 + $0x68] sm:$0x1]  ;;  %v83_v61 = vld [vmem:[#allocation3 + $0x70] sm:$0x1]  ;;  %9265 = vmatpush3.bf16.msra.mxu0 %v9873_v47 }
  0x4b   :  { %v1429_v38 = vsel %vm10195_vm11, %v8597_v39, %v1428_v43  ;;  %v8588_v55 = vcombine.low %v1303_v40, %v1317_v48  ;;  %v525_v59 = vld [vmem:[#allocation3 + $0x60] sm:$0xf]  ;;  %v386_v63 = vor.u32 %v384_v28, %v383_v49  ;;  %v387_v0 = vrot.slane %v383_v49, 4  ;;  %521 = vst [vmem:[#allocation3 + $0x58] sm:$0xf] %v520_v58  ;;  %9266 = vmatprep.subr.bf16.mxu0 %v9874_v53  ;;  %v9875_v14 = vld [vmem:[%s12747_s1 + $0x188] sm:$0xff]  }
  0x4c   :  { %v8601_v62 = vcombine.low %v1425_v54, %v1429_v38  ;;  %v81_v1 = vsel %vm10114_vm2, 0, %v80_v60  ;;  %v142_v2 = vld [vmem:[#allocation3 + $0x6c] sm:$0x1]  ;;  %v145_v3 = vld [vmem:[#allocation3 + $0x74] sm:$0x1]  ;;  %v84_v6 = vsel %vm10114_vm2, 0, %v83_v61  ;;  %9199 = vmatpush3.bf16.msra.mxu1 %v9868_v46 }
  0x4d   :  { %1983 = vmatprep.mubr.bf16.mxu0 %v8588_v55  ;;  %v522_v4 = vld [vmem:[#allocation3 + $0x5c] sm:$0x1]  ;;  %v528_v5 = vld [vmem:[#allocation3 + $0x64] sm:$0x1]  ;;  %82 = vst [vmem:[#allocation3 + $0x68] sm:$0x1] %v81_v1  ;;  %v526_v9 = vsel %vm10155_vm6, %v386_v63, %v525_v59  ;;  %9600 = vmatprep.subr.bf16.mxu1 %v10332_v52 }
  0x4e   :  { %v143_v7 = vsel %vm10124_vm4, 0, %v142_v2  ;;  %9589 = vmatmul.mubr.bf16.gmra.mrb[4].mxu1 %v8601_v62  ;;  %v523_v8 = vsel %vm10114_vm2, %v379_v45, %v522_v4  ;;  %v529_v10 = vsel %vm10114_vm2, %v387_v0, %v528_v5  ;;  %1984 = vmatmul.mubr.bf16.gmra.mrb[8].mxu0 %v9859_v50  ;;  %85 = vst [vmem:[#allocation3 + $0x70] sm:$0x1] %v84_v6  ;;  %v146_v11 = vsel %vm10124_vm4, 0, %v145_v3  ;;  %v302_v12 = vld [vmem:[%s12748_s0 + $0x28] sm:$0xf] }
  0x4f   :  { %144 = vst [vmem:[#allocation3 + $0x6c] sm:$0x1] %v143_v7  ;;  %v303_v13 = vld [vmem:[%s12748_s0 + $0x2c] sm:$0xf]  ;;  %524 = vst [vmem:[#allocation3 + $0x5c] sm:$0x1] %v523_v8  ;;  %9267 = vmatpush3.bf16.msra.mxu0 %v9875_v14 }
  0x50   :  { %527 = vst [vmem:[#allocation3 + $0x60] sm:$0xf] %v526_v9  ;;  %530 = vst [vmem:[#allocation3 + $0x64] sm:$0x1] %v529_v10  ;;  %v389_v15 = vshrl.u32 %v302_v12, 16  ;;  %v392_v16 = vshll.u32 %v302_v12, 16 }
  0x51   :  { %147 = vst [vmem:[#allocation3 + $0x74] sm:$0x1] %v146_v11  ;;  %v397_v17 = vshrl.u32 %v303_v13, 16  ;;  %v400_v18 = vshll.u32 %v303_v13, 16  ;;  %v1230_v21 = vld [vmem:[#allocation3 + $0x38] sm:$0xf] }
  0x52   :  { %v391_v19 = vrot.slane %v389_v15, 7  ;;  %v1635_v22 = vld [vmem:[#allocation3 + $0x58] sm:$0xe]  ;;  %v1231_v28 = vld [vmem:[#allocation3 + $0x3c] sm:$0x1]  ;;  %v1319_v33 = vshrl.u32 %v1230_v21, 16 }
  0x53   :  { %v399_v20 = vrot.slane %v397_v17, 7  ;;  %v8610_v29 = vrot.slane %v1635_v22, 9  ;;  %v1232_v32 = vld [vmem:[#allocation3 + $0x40] sm:$0xf]  ;;  %v1233_v37 = vld [vmem:[#allocation3 + $0x44] sm:$0x1] }
  0x54   :  { %v394_v23 = vor.u32 %v392_v16, %v391_v19  ;;  %v395_v24 = vrot.slane %v391_v19, 4  ;;  %v531_v31 = vld [vmem:[#allocation3 + $0x68] sm:$0xf]  ;;  %v1321_v48 = vrot.slane %v1319_v33, 4  ;;  %v1322_v50 = vshll.u32 %v1230_v21, 16  ;;  %v9879_v4 = vld [vmem:[%s12747_s1 + $0x1d0] sm:$0xff]  }
  0x55   :  { %v402_v26 = vor.u32 %v400_v18, %v399_v20  ;;  %v403_v27 = vrot.slane %v399_v20, 4  ;;  %v537_v36 = vld [vmem:[#allocation3 + $0x70] sm:$0xf]  ;;  %v1328_v53 = vshll.u32 %v1231_v28, 16  ;;  %v1333_v54 = vshrl.u32 %v1232_v32, 16  ;;  %9268 = vmatprep.subr.bf16.mxu0 %v9879_v4  ;;  %v9881_v21 = vld [vmem:[%s12747_s1 + $0x1d8] sm:$0xff]  }
  0x56   :  { %v532_v34 = vsel %vm10155_vm6, %v394_v23, %v531_v31  ;;  %v534_v35 = vld [vmem:[#allocation3 + $0x6c] sm:$0x1]  ;;  %v1636_v39 = vld [vmem:[#allocation3 + $0x5c] sm:$0x1]  ;;  %v86_v38 = vld [vmem:[#allocation3 + $0x78] sm:$0x1] }
  0x57   :  { %v1637_v40 = vld [vmem:[#allocation3 + $0x60] sm:$0xe]  ;;  %v1638_v41 = vld [vmem:[#allocation3 + $0x64] sm:$0x1]  ;;  %533 = vst [vmem:[#allocation3 + $0x68] sm:$0xf] %v532_v34  ;;  %v535_v42 = vsel %vm10114_vm2, %v395_v24, %v534_v35  ;;  %v538_v43 = vsel %vm10155_vm6, %v402_v26, %v537_v36 }
  0x58   :  { %v1669_v44 = vrot.slane %v1636_v39, 5  ;;  %v8611_v45 = vrot.slane %v1637_v40, 9  ;;  %v1673_v46 = vrot.slane %v1638_v41, 5  ;;  %536 = vst [vmem:[#allocation3 + $0x6c] sm:$0x1] %v535_v42  ;;  %v1336_v59 = vshll.u32 %v1232_v32, 16 }
  0x59   :  { %539 = vst [vmem:[#allocation3 + $0x70] sm:$0xf] %v538_v43  ;;  %v540_v47 = vld [vmem:[#allocation3 + $0x74] sm:$0x1]  ;;  %v1342_v60 = vshll.u32 %v1233_v37, 16  ;;  %v1324_v0 = vrot.slane %v1322_v50, 5 }
  0x5a   :  { %v541_v49 = vsel %vm10114_vm2, %v403_v27, %v540_v47  ;;  %v1670_v55 = vsel %vm10195_vm11, %v8610_v29, %v1669_v44  ;;  %v1674_v58 = vsel %vm10195_vm11, %v8611_v45, %v1673_v46  ;;  %v89_v61 = vld [vmem:[#allocation3 + $0x80] sm:$0x1]  ;;  %v148_v62 = vld [vmem:[#allocation3 + $0x7c] sm:$0x1]  ;;  %v1330_v1 = vrot.slane %v1328_v53, 5  ;;  %v9880_v15 = vld [vmem:[%s12747_s1 + $0x190] sm:$0xff]  }
  0x5b   :  { %542 = vst [vmem:[#allocation3 + $0x74] sm:$0x1] %v541_v49  ;;  %v8618_v63 = vcombine.low %v1670_v55, %v1674_v58  ;;  %v1335_v2 = vrot.slane %v1333_v54, 4  ;;  %v151_v3 = vld [vmem:[#allocation3 + $0x84] sm:$0x1]  ;;  %v1338_v5 = vrot.slane %v1336_v59, 5  ;;  %v1325_v10 = vor.u32 %v1324_v0, %v1321_v48  ;;  %9269 = vmatpush3.bf16.msra.mxu0 %v9880_v15 }
  0x5c   :  { %v1344_v6 = vrot.slane %v1342_v60, 5  ;;  %v87_v7 = vsel %vm10114_vm2, 0, %v86_v38  ;;  %v90_v8 = vsel %vm10114_vm2, 0, %v89_v61  ;;  %v304_v9 = vld [vmem:[%s12748_s0 + $0x30] sm:$0xf]  ;;  %v149_v11 = vsel %vm10124_vm4, 0, %v148_v62  ;;  %9270 = vmatprep.subr.bf16.mxu0 %v9881_v21 }
  0x5d   :  { %9592 = vmatprep.mubr.bf16.mxu1 %v8618_v63  ;;  %88 = vst [vmem:[#allocation3 + $0x78] sm:$0x1] %v87_v7  ;;  %91 = vst [vmem:[#allocation3 + $0x80] sm:$0x1] %v90_v8  ;;  %v152_v12 = vsel %vm10124_vm4, 0, %v151_v3  ;;  %v405_v14 = vshrl.u32 %v304_v9, 16  ;;  %v1339_v17 = vor.u32 %v1338_v5, %v1335_v2 }
  0x5e   :  { %v305_v13 = vld [vmem:[%s12748_s0 + $0x34] sm:$0xf]  ;;  %v1639_v16 = vld [vmem:[#allocation3 + $0x68] sm:$0xe]  ;;  %150 = vst [vmem:[#allocation3 + $0x7c] sm:$0x1] %v149_v11 }
  0x5f   :  { %153 = vst [vmem:[#allocation3 + $0x84] sm:$0x1] %v152_v12  ;;  %v408_v18 = vshll.u32 %v304_v9, 16  ;;  %v413_v19 = vshrl.u32 %v305_v13, 16  ;;  %v416_v20 = vshll.u32 %v305_v13, 16  ;;  %v8612_v24 = vrot.slane %v1639_v16, 9 }
  0x60   :  { %v1640_v22 = vld [vmem:[#allocation3 + $0x6c] sm:$0x1]  ;;  %v1641_v23 = vld [vmem:[#allocation3 + $0x70] sm:$0xe]  ;;  %v1326_v26 = vrot.slane %v1325_v10, 4  ;;  %v1340_v29 = vrot.slane %v1339_v17, 4 }
  0x61   :  { %v1677_v27 = vrot.slane %v1640_v22, 5  ;;  %v8613_v28 = vrot.slane %v1641_v23, 9  ;;  %v407_v31 = vrot.slane %v405_v14, 7  ;;  %v415_v34 = vrot.slane %v413_v19, 7  ;;  %v9882_v35 = vld [vmem:[%s12747_s1 + $0x198] sm:$0xff]   ;;  %v9886_v63 = vld [vmem:[%s12747_s1 + $0x1e0] sm:$0xff]  }
  0x62   :  { %v1642_v32 = vld [vmem:[#allocation3 + $0x74] sm:$0x1]  ;;  %v1331_v33 = vsel %vm10201_vm12, %v1326_v26, %v1330_v1  ;;  %v1345_v39 = vsel %vm10201_vm12, %v1340_v29, %v1344_v6  ;;  %v9864_v41 = vld [vmem:[#allocation3 + $0x38] ss:$8 sps:$4 sm:$0xff]   ;;  %v92_v42 = vld [vmem:[#allocation3 + $0x88] sm:$0x1]  ;;  %9271 = vmatpush3.bf16.msra.mxu0 %v9882_v35 }
  0x63   :  { %v1678_v36 = vsel %vm10195_vm11, %v8612_v24, %v1677_v27  ;;  %v1681_v37 = vrot.slane %v1642_v32, 5  ;;  %v410_v40 = vor.u32 %v408_v18, %v407_v31  ;;  %v8589_v43 = vcombine.low %v1331_v33, %v1345_v39  ;;  %v95_v47 = vld [vmem:[#allocation3 + $0x90] sm:$0x1]  ;;  %v154_v48 = vld [vmem:[#allocation3 + $0x8c] sm:$0x1]  ;;  %9272 = vmatprep.subr.bf16.mxu0 %v9886_v63  ;;  %v9887_v10 = vld [vmem:[%s12747_s1 + $0x1a0] sm:$0xff]  }
  0x64   :  { %v411_v44 = vrot.slane %v407_v31, 4  ;;  %v418_v45 = vor.u32 %v416_v20, %v415_v34  ;;  %v419_v46 = vrot.slane %v415_v34, 4  ;;  %v543_v50 = vld [vmem:[#allocation3 + $0x78] sm:$0xf]  ;;  %v549_v53 = vld [vmem:[#allocation3 + $0x80] sm:$0xf] }
  0x65   :  { %v1682_v49 = vsel %vm10195_vm11, %v8613_v28, %v1681_v37  ;;  %v93_v54 = vsel %vm10114_vm2, 0, %v92_v42  ;;  %v96_v38 = vsel %vm10114_vm2, 0, %v95_v47  ;;  %1991 = vmatprep.mubr.bf16.mxu0 %v8589_v43  ;;  %v544_v58 = vsel %vm10155_vm6, %v410_v40, %v543_v50  ;;  %v546_v59 = vld [vmem:[#allocation3 + $0x7c] sm:$0x1]  ;;  %v157_v2 = vld [vmem:[#allocation3 + $0x94] sm:$0x1] }
  0x66   :  { %v8619_v55 = vcombine.low %v1678_v36, %v1682_v49  ;;  %v550_v60 = vsel %vm10155_vm6, %v418_v45, %v549_v53  ;;  %v552_v61 = vld [vmem:[#allocation3 + $0x84] sm:$0x1]  ;;  %94 = vst [vmem:[#allocation3 + $0x88] sm:$0x1] %v93_v54  ;;  %97 = vst [vmem:[#allocation3 + $0x90] sm:$0x1] %v96_v38  ;;  %v547_v0 = vsel %vm10114_vm2, %v411_v44, %v546_v59  ;;  %1992 = vmatmul.mubr.bf16.gmra.mrb[12].mxu0 %v9864_v41 }
  0x67   :  { %v155_v62 = vsel %vm10124_vm4, 0, %v154_v48  ;;  %545 = vst [vmem:[#allocation3 + $0x78] sm:$0xf] %v544_v58  ;;  %551 = vst [vmem:[#allocation3 + $0x80] sm:$0xf] %v550_v60  ;;  %v553_v1 = vsel %vm10114_vm2, %v419_v46, %v552_v61  ;;  %v158_v5 = vsel %vm10124_vm4, 0, %v157_v2  ;;  %9273 = vmatpush3.bf16.msra.mxu0 %v9887_v10 }
  0x68   :  { %156 = vst [vmem:[#allocation3 + $0x8c] sm:$0x1] %v155_v62  ;;  %v306_v3 = vld [vmem:[%s12748_s0 + $0x38] sm:$0xf]  ;;  %v307_v4 = vld [vmem:[%s12748_s0 + $0x3c] sm:$0xf]  ;;  %9593 = vmatmul.mubr.bf16.gmra.mrb[8].mxu1 %v8619_v55 }
  0x69   :  { %548 = vst [vmem:[#allocation3 + $0x7c] sm:$0x1] %v547_v0  ;;  %554 = vst [vmem:[#allocation3 + $0x84] sm:$0x1] %v553_v1  ;;  %v421_v6 = vshrl.u32 %v306_v3, 16  ;;  %v424_v7 = vshll.u32 %v306_v3, 16 }
  0x6a   :  { %v429_v8 = vshrl.u32 %v307_v4, 16  ;;  %159 = vst [vmem:[#allocation3 + $0x94] sm:$0x1] %v158_v5  ;;  %v432_v9 = vshll.u32 %v307_v4, 16  ;;  %v1487_v17 = vld [vmem:[#allocation3 + $0x58] sm:$0xf] }
  0x6b   :  { %v423_v11 = vrot.slane %v421_v6, 7  ;;  %v1488_v18 = vld [vmem:[#allocation3 + $0x5c] sm:$0x1]  ;;  %v1489_v21 = vld [vmem:[#allocation3 + $0x60] sm:$0xf]  ;;  %v1504_v40 = vshrl.u32 %v1487_v17, 16 }
  0x6c   :  { %v431_v12 = vrot.slane %v429_v8, 7  ;;  %v1490_v37 = vld [vmem:[#allocation3 + $0x64] sm:$0x1]  ;;  %v1507_v41 = vshll.u32 %v1487_v17, 16  ;;  %v1513_v42 = vshll.u32 %v1488_v18, 16  ;;  %v9888_v44 = vld [vmem:[%s12747_s1 + $0x1e8] sm:$0xff]  }
  0x6d   :  { %v426_v13 = vor.u32 %v424_v7, %v423_v11  ;;  %v427_v14 = vrot.slane %v423_v11, 4  ;;  %v555_v19 = vld [vmem:[#allocation3 + $0x88] sm:$0xf]  ;;  %v561_v20 = vld [vmem:[#allocation3 + $0x90] sm:$0xf]  ;;  %v1518_v47 = vshrl.u32 %v1489_v21, 16  ;;  %9274 = vmatprep.subr.bf16.mxu0 %v9888_v44 }
  0x6e   :  { %v434_v15 = vor.u32 %v432_v9, %v431_v12  ;;  %v435_v16 = vrot.slane %v431_v12, 4  ;;  %v1643_v22 = vld [vmem:[#allocation3 + $0x78] sm:$0xe]  ;;  %v1645_v23 = vld [vmem:[#allocation3 + $0x80] sm:$0xe]  ;;  %v1521_v48 = vshll.u32 %v1489_v21, 16 }
  0x6f   :  { %v556_v24 = vsel %vm10155_vm6, %v426_v13, %v555_v19  ;;  %v558_v26 = vld [vmem:[#allocation3 + $0x8c] sm:$0x1]  ;;  %v8614_v31 = vrot.slane %v1643_v22, 9  ;;  %v8615_v32 = vrot.slane %v1645_v23, 9  ;;  %v41_v43 = vld [vmem:[#allocation3] sm:$0x1] }
  0x70   :  { %v562_v27 = vsel %vm10155_vm6, %v434_v15, %v561_v20  ;;  %v1644_v28 = vld [vmem:[#allocation3 + $0x7c] sm:$0x1]  ;;  %v1646_v29 = vld [vmem:[#allocation3 + $0x84] sm:$0x1]  ;;  %557 = vst [vmem:[#allocation3 + $0x88] sm:$0xf] %v556_v24  ;;  %v559_v33 = vsel %vm10114_vm2, %v427_v14, %v558_v26 }
  0x71   :  { %563 = vst [vmem:[#allocation3 + $0x90] sm:$0xf] %v562_v27  ;;  %v1685_v34 = vrot.slane %v1644_v28, 5  ;;  %v1689_v35 = vrot.slane %v1646_v29, 5  ;;  %560 = vst [vmem:[#allocation3 + $0x8c] sm:$0x1] %v559_v33 }
  0x72   :  { %v564_v36 = vld [vmem:[#allocation3 + $0x94] sm:$0x1]  ;;  %v103_v49 = vld [vmem:[#allocation3 + $0x4] sm:$0x1]  ;;  %v605_v50 = vld [vmem:[#allocation3 + $0x8] sm:$0xf] }
  0x73   :  { %v565_v39 = vsel %vm10114_vm2, %v435_v16, %v564_v36  ;;  %v1686_v45 = vsel %vm10195_vm11, %v8614_v31, %v1685_v34  ;;  %v1690_v46 = vsel %vm10195_vm11, %v8615_v32, %v1689_v35  ;;  %v1506_v54 = vrot.slane %v1504_v40, 4  ;;  %v606_v58 = vld [vmem:[#allocation3 + $0xc] sm:$0x1]  ;;  %v9869_v17 = vld [vmem:[#allocation3 + $0x58] ss:$8 sps:$4 sm:$0xff]   ;;  %v9893_v24 = vld [vmem:[%s12747_s1 + $0x1f0] sm:$0xff]  }
  0x74   :  { %566 = vst [vmem:[#allocation3 + $0x94] sm:$0x1] %v565_v39  ;;  %v8620_v53 = vcombine.low %v1686_v45, %v1690_v46  ;;  %v1509_v38 = vrot.slane %v1507_v41, 5  ;;  %v1515_v55 = vrot.slane %v1513_v42, 5  ;;  %v9889_v59 = vld [vmem:[%s12747_s1 + $0x1a8] sm:$0xff]   ;;  %v1520_v60 = vrot.slane %v1518_v47, 4 }
  0x75   :  { %v1523_v61 = vrot.slane %v1521_v48, 5  ;;  %v1527_v62 = vshll.u32 %v1490_v37, 16  ;;  %v42_v63 = vsel %vm10114_vm2, 0, %v41_v43  ;;  %v104_v1 = vsel %vm10124_vm4, 0, %v103_v49  ;;  %9275 = vmatpush3.bf16.msra.mxu0 %v9889_v59  ;;  %v9894_v31 = vld [vmem:[%s12747_s1 + $0x1b0] sm:$0xff]   ;;  %v9895_v39 = vld [vmem:[%s12747_s1 + $0x1f8] sm:$0xff]  }
  0x76   :  { %9596 = vmatprep.mubr.bf16.mxu1 %v8620_v53  ;;  %v1510_v0 = vor.u32 %v1509_v38, %v1506_v54  ;;  %43 = vst [vmem:[#allocation3] sm:$0x1] %v42_v63  ;;  %v637_v2 = vshrl.u32 %v605_v50, 16  ;;  %v640_v3 = vshll.u32 %v605_v50, 16  ;;  %105 = vst [vmem:[#allocation3 + $0x4] sm:$0x1] %v104_v1  ;;  %9276 = vmatprep.subr.bf16.mxu0 %v9893_v24 }
  0x77   :  { %v1647_v4 = vld [vmem:[#allocation3 + $0x88] sm:$0xe]  ;;  %v1524_v6 = vor.u32 %v1523_v61, %v1520_v60  ;;  %v1529_v7 = vrot.slane %v1527_v62, 5  ;;  %v646_v12 = vshll.u32 %v606_v58, 16  ;;  %v1492_v44 = vld [vmem:[#allocation3 + $0x6c] sm:$0x1] }
  0x78   :  { %v1649_v5 = vld [vmem:[#allocation3 + $0x90] sm:$0xe]  ;;  %v1648_v8 = vld [vmem:[#allocation3 + $0x8c] sm:$0x1]  ;;  %v8616_v9 = vrot.slane %v1647_v4, 9  ;;  %v1511_v10 = vrot.slane %v1510_v0, 4 }
  0x79   :  { %v639_v11 = vrot.slane %v637_v2, 4  ;;  %v1693_v13 = vrot.slane %v1648_v8, 5  ;;  %v8617_v14 = vrot.slane %v1649_v5, 9  ;;  %v1525_v15 = vrot.slane %v1524_v6, 4  ;;  %9277 = vmatpush3.bf16.msra.mxu0 %v9894_v31  ;;  %v1491_v43 = vld [vmem:[#allocation3 + $0x68] sm:$0xf] }
  0x7a   :  { %v642_v16 = vrot.slane %v640_v3, 5  ;;  %v1516_v19 = vsel %vm10201_vm12, %v1511_v10, %v1515_v55  ;;  %v648_v29 = vrot.slane %v646_v12, 5  ;;  %9278 = vmatprep.subr.bf16.mxu0 %v9895_v39  ;;  %v9896_v45 = vld [vmem:[%s12747_s1 + $0x1b8] sm:$0xff]   ;;  %v1493_v48 = vld [vmem:[#allocation3 + $0x70] sm:$0xf]  ;;  %v1532_v50 = vshrl.u32 %v1491_v43, 16 }
  0x7b   :  { %v1650_v18 = vld [vmem:[#allocation3 + $0x94] sm:$0x1]  ;;  %v1694_v20 = vsel %vm10195_vm11, %v8616_v9, %v1693_v13  ;;  %v1530_v22 = vsel %vm10201_vm12, %v1525_v15, %v1529_v7  ;;  %v1535_v53 = vshll.u32 %v1491_v43, 16  ;;  %v1541_v54 = vshll.u32 %v1492_v44, 16  ;;  %v607_v59 = vld [vmem:[#allocation3 + $0x10] sm:$0xf] }
  0x7c   :  { %v1697_v21 = vrot.slane %v1650_v18, 5  ;;  %v643_v23 = vor.u32 %v642_v16, %v639_v11  ;;  %v8606_v26 = vcombine.low %v1516_v19, %v1530_v22  ;;  %v1494_v49 = vld [vmem:[#allocation3 + $0x74] sm:$0x1]  ;;  %v1546_v38 = vshrl.u32 %v1493_v48, 16  ;;  %v609_v6 = vld [vmem:[#allocation3 + $0x18] sm:$0xf] }
  0x7d   :  { %v603_v28 = vld [vmem:[#allocation3] sm:$0xf]  ;;  %v604_v33 = vld [vmem:[#allocation3 + $0x4] sm:$0x1]  ;;  %v1549_v55 = vshll.u32 %v1493_v48, 16  ;;  %v1555_v58 = vshll.u32 %v1494_v49, 16  ;;  %9279 = vmatpush3.bf16.msra.mxu0 %v9896_v45 }
  0x7e   :  { %v1698_v27 = vsel %vm10195_vm11, %v8617_v14, %v1697_v21  ;;  %1999 = vmatprep.mubr.bf16.mxu0 %v8606_v26  ;;  %v623_v34 = vshrl.u32 %v603_v28, 16  ;;  %v626_v35 = vshll.u32 %v603_v28, 16  ;;  %v644_v36 = vrot.slane %v643_v23, 4  ;;  %v9870_v61 = vld [vmem:[#allocation3] ss:$8 sps:$4 sm:$0xff]   ;;  %v9892_v48 = vld [vmem:[%s12747_s1 + $0x98] sm:$0xff]  }
  0x7f   :  { %v8621_v32 = vcombine.low %v1694_v20, %v1698_v27  ;;  %v632_v37 = vshll.u32 %v604_v33, 16  ;;  %2000 = vmatmul.mubr.bf16.gmra.mrb[16].mxu0 %v9869_v17  ;;  %v1534_v62 = vrot.slane %v1532_v50, 4  ;;  %v1537_v63 = vrot.slane %v1535_v53, 5  ;;  %v608_v0 = vld [vmem:[#allocation3 + $0x14] sm:$0x1]  ;;  %v9878_v16 = vld [vmem:[%s12747_s1 + $0x88] sm:$0xff]  }
  0x80   :  { %v625_v40 = vrot.slane %v623_v34, 4  ;;  %v628_v41 = vrot.slane %v626_v35, 5  ;;  %v649_v47 = vsel %vm10201_vm12, %v644_v36, %v648_v29  ;;  %v651_v1 = vshrl.u32 %v607_v59, 16  ;;  %v610_v9 = vld [vmem:[#allocation3 + $0x1c] sm:$0x1]  ;;  %v9885_v29 = vld [vmem:[%s12747_s1 + $0x90] sm:$0xff]  }
  0x81   :  { %9597 = vmatmul.mubr.bf16.gmra.mrb[12].mxu1 %v8621_v32  ;;  %v634_v42 = vrot.slane %v632_v37, 5  ;;  %v1543_v2 = vrot.slane %v1541_v54, 5  ;;  %v1548_v3 = vrot.slane %v1546_v38, 4  ;;  %v1551_v4 = vrot.slane %v1549_v55, 5  ;;  %v9876_v28 = vld [vmem:[#allocation3 + $0x68] ss:$8 sps:$4 sm:$0xff]  }
  0x82   :  { %v629_v46 = vor.u32 %v628_v41, %v625_v40  ;;  %v1557_v5 = vrot.slane %v1555_v58, 5  ;;  %v1538_v8 = vor.u32 %v1537_v63, %v1534_v62  ;;  %v653_v10 = vrot.slane %v651_v1, 4  ;;  %v9877_v39 = vld [vmem:[#allocation3 + $0x10] ss:$8 sps:$4 sm:$0xff]   ;;  %v1496_v41 = vld [vmem:[#allocation3 + $0x7c] sm:$0x1] }
  0x83   :  { %v654_v11 = vshll.u32 %v607_v59, 16  ;;  %v1552_v13 = vor.u32 %v1551_v4, %v1548_v3  ;;  %v660_v14 = vshll.u32 %v608_v0, 16  ;;  %v665_v15 = vshrl.u32 %v609_v6, 16  ;;  %v1495_v40 = vld [vmem:[#allocation3 + $0x78] sm:$0xf] }
  0x84   :  { %v630_v60 = vrot.slane %v629_v46, 4  ;;  %v1539_v17 = vrot.slane %v1538_v8, 4  ;;  %v668_v19 = vshll.u32 %v609_v6, 16  ;;  %v674_v20 = vshll.u32 %v610_v9, 16  ;;  %v612_v38 = vld [vmem:[#allocation3 + $0x24] sm:$0x1] }
  0x85   :  { %v656_v18 = vrot.slane %v654_v11, 5  ;;  %v1553_v21 = vrot.slane %v1552_v13, 4  ;;  %v667_v22 = vrot.slane %v665_v15, 4  ;;  %v662_v26 = vrot.slane %v660_v14, 5  ;;  %v614_v1 = vld [vmem:[#allocation3 + $0x2c] sm:$0x1] }
  0x86   :  { %v635_v7 = vsel %vm10201_vm12, %v630_v60, %v634_v42  ;;  %v1544_v23 = vsel %vm10201_vm12, %v1539_v17, %v1543_v2  ;;  %v670_v27 = vrot.slane %v668_v19, 5  ;;  %v676_v35 = vrot.slane %v674_v20, 5  ;;  %v1497_v42 = vld [vmem:[#allocation3 + $0x80] sm:$0xf]  ;;  %v613_v60 = vld [vmem:[#allocation3 + $0x28] sm:$0xf] }
  0x87   :  { %v8546_v12 = vcombine.low %v635_v7, %v649_v47  ;;  %v657_v24 = vor.u32 %v656_v18, %v653_v10  ;;  %v1558_v31 = vsel %vm10201_vm12, %v1553_v21, %v1557_v5  ;;  %v1560_v44 = vshrl.u32 %v1495_v40, 16  ;;  %v611_v47 = vld [vmem:[#allocation3 + $0x20] sm:$0xf]  ;;  %v9901_v18 = vld [vmem:[%s12747_s1 + $0xa8] sm:$0xff]  }
  0x88   :  { %v8607_v32 = vcombine.low %v1544_v23, %v1558_v31  ;;  %v671_v34 = vor.u32 %v670_v27, %v667_v22  ;;  %v1563_v45 = vshll.u32 %v1495_v40, 16  ;;  %v1569_v46 = vshll.u32 %v1496_v41, 16  ;;  %v9898_v7 = vld [vmem:[%s12747_s1 + $0xa0] sm:$0xff]   ;;  %v9904_v31 = vld [vmem:[%s12747_s1 + $0xb0] sm:$0xff]  }
  0x89   :  { %2305 = vmatprep.mubr.bf16.mxu1 %v8546_v12  ;;  %v658_v33 = vrot.slane %v657_v24, 4  ;;  %v1574_v50 = vshrl.u32 %v1497_v42, 16  ;;  %v1577_v53 = vshll.u32 %v1497_v42, 16  ;;  %v1562_v55 = vrot.slane %v1560_v44, 4  ;;  %v9883_v20 = vld [vmem:[#allocation3 + $0x78] ss:$8 sps:$4 sm:$0xff]  }
  0x8a   :  { %2306 = vmatmul.mubr.bf16.vlgmr.msra.gmra.mrb[16].mxu1 %v9870_v61  ;;  %2007 = vmatprep.mubr.bf16.mxu0 %v8607_v32  ;;  %v672_v37 = vrot.slane %v671_v34, 4  ;;  %v1565_v58 = vrot.slane %v1563_v45, 5  ;;  %v1571_v59 = vrot.slane %v1569_v46, 5  ;;  %v679_v61 = vshrl.u32 %v611_v47, 16  ;;  %v1499_v32 = vld [vmem:[#allocation3 + $0x88] sm:$0xf] }
  0x8b   :  { %9601 = vmatpush3.bf16.msra.mxu1 %v10332_v52  ;;  %v663_v36 = vsel %vm10201_vm12, %v658_v33, %v662_v26  ;;  %2008 = vmatmul.mubr.bf16.gmra.mrb[20].mxu0 %v9876_v28  ;;  %v1498_v52 = vld [vmem:[#allocation3 + $0x84] sm:$0x1]  ;;  %v1576_v62 = vrot.slane %v1574_v50, 4  ;;  %v1579_v63 = vrot.slane %v1577_v53, 5  ;;  %v682_v2 = vshll.u32 %v611_v47, 16  ;;  %v9907_v53 = vld [vmem:[%s12747_s1 + $0xb8] sm:$0xff]  }
  0x8c   :  { %9602 = vmatprep.subr.bf16.mxu1 %v9878_v16  ;;  %v677_v43 = vsel %vm10201_vm12, %v672_v37, %v676_v35  ;;  %v1583_v54 = vshll.u32 %v1498_v52, 16  ;;  %v1566_v3 = vor.u32 %v1565_v58, %v1562_v55  ;;  %v681_v4 = vrot.slane %v679_v61, 4  ;;  %v1500_v34 = vld [vmem:[#allocation3 + $0x8c] sm:$0x1]  ;;  %v1501_v35 = vld [vmem:[#allocation3 + $0x90] sm:$0xf] }
  0x8d   :  { %v8547_v49 = vcombine.low %v663_v36, %v677_v43  ;;  %v688_v5 = vshll.u32 %v612_v38, 16  ;;  %v693_v6 = vshrl.u32 %v613_v60, 16  ;;  %v1580_v8 = vor.u32 %v1579_v63, %v1576_v62  ;;  %v1502_v36 = vld [vmem:[#allocation3 + $0x94] sm:$0x1]  ;;  %v615_v42 = vld [vmem:[#allocation3 + $0x30] sm:$0xf] }
  0x8e   :  { %v1585_v0 = vrot.slane %v1583_v54, 5  ;;  %v684_v9 = vrot.slane %v682_v2, 5  ;;  %v696_v10 = vshll.u32 %v613_v60, 16  ;;  %v702_v11 = vshll.u32 %v614_v1, 16  ;;  %v616_v45 = vld [vmem:[#allocation3 + $0x34] sm:$0x1] }
  0x8f   :  { %9603 = vmatpush3.bf16.msra.mxu1 %v9878_v16  ;;  %2313 = vmatprep.mubr.bf16.mxu1 %v8547_v49  ;;  %v1567_v12 = vrot.slane %v1566_v3, 4  ;;  %v695_v13 = vrot.slane %v693_v6, 4  ;;  %v1581_v14 = vrot.slane %v1580_v8, 4  ;;  %v690_v16 = vrot.slane %v688_v5, 5  ;;  %v617_v49 = vld [vmem:[#allocation3 + $0x38] sm:$0xf] }
  0x90   :  { %9604 = vmatprep.subr.bf16.mxu1 %v9885_v29  ;;  %v685_v15 = vor.u32 %v684_v9, %v681_v4  ;;  %v698_v17 = vrot.slane %v696_v10, 5  ;;  %v704_v24 = vrot.slane %v702_v11, 5  ;;  %v1591_v40 = vshll.u32 %v1499_v32, 16  ;;  %v618_v58 = vld [vmem:[#allocation3 + $0x3c] sm:$0x1] }
  0x91   :  { %v1572_v19 = vsel %vm10201_vm12, %v1567_v12, %v1571_v59  ;;  %v1586_v21 = vsel %vm10201_vm12, %v1581_v14, %v1585_v0  ;;  %v1597_v41 = vshll.u32 %v1500_v34, 16  ;;  %v1602_v52 = vshrl.u32 %v1501_v35, 16  ;;  %v9890_v14 = vld [vmem:[#allocation3 + $0x88] ss:$8 sps:$4 sm:$0xff]  }
  0x92   :  { %2314 = vmatmul.mubr.bf16.gmra.mrb[20].mxu1 %v9877_v39  ;;  %v686_v22 = vrot.slane %v685_v15, 4  ;;  %v699_v23 = vor.u32 %v698_v17, %v695_v13  ;;  %v8608_v26 = vcombine.low %v1572_v19, %v1586_v21  ;;  %v1588_v39 = vshrl.u32 %v1499_v32, 16  ;;  %v71_v21 = vld [vmem:[#allocation3 + $0x50] sm:$0x1] }
  0x93   :  { %9605 = vmatpush3.bf16.msra.mxu1 %v9885_v29  ;;  %v9884_v29 = vld [vmem:[#allocation3 + $0x20] ss:$8 sps:$4 sm:$0xff]   ;;  %v1605_v43 = vshll.u32 %v1501_v35, 16  ;;  %v1611_v44 = vshll.u32 %v1502_v36, 16  ;;  %v707_v46 = vshrl.u32 %v615_v42, 16  ;;  %v710_v50 = vshll.u32 %v615_v42, 16 }
  0x94   :  { %9606 = vmatprep.subr.bf16.mxu1 %v9892_v48  ;;  %v691_v27 = vsel %vm10201_vm12, %v686_v22, %v690_v16  ;;  %v700_v28 = vrot.slane %v699_v23, 4  ;;  %2015 = vmatprep.mubr.bf16.mxu0 %v8608_v26  ;;  %v1590_v47 = vrot.slane %v1588_v39, 4  ;;  %v1599_v54 = vrot.slane %v1597_v41, 5  ;;  %v133_v22 = vld [vmem:[#allocation3 + $0x54] sm:$0x1] }
  0x95   :  { %2016 = vmatmul.mubr.bf16.gmra.mrb[24].mxu0 %v9883_v20  ;;  %v1604_v38 = vrot.slane %v1602_v52, 4  ;;  %v1607_v55 = vrot.slane %v1605_v43, 5  ;;  %v709_v59 = vrot.slane %v707_v46, 4  ;;  %v712_v61 = vrot.slane %v710_v50, 5  ;;  %v9891_v20 = vld [vmem:[#allocation3 + $0x30] ss:$8 sps:$4 sm:$0xff]  }
  0x96   :  { %v705_v33 = vsel %vm10201_vm12, %v700_v28, %v704_v24  ;;  %v716_v62 = vshll.u32 %v616_v45, 16  ;;  %v721_v63 = vshrl.u32 %v617_v49, 16  ;;  %v1613_v1 = vrot.slane %v1611_v44, 5  ;;  %v881_v28 = vld [vmem:[#allocation3 + $0x5c] sm:$0x1] }
  0x97   :  { %9607 = vmatpush3.bf16.msra.mxu1 %v9892_v48  ;;  %v8548_v37 = vcombine.low %v691_v27, %v705_v33  ;;  %v1593_v48 = vrot.slane %v1591_v40, 5  ;;  %v1608_v0 = vor.u32 %v1607_v55, %v1604_v38  ;;  %v724_v2 = vshll.u32 %v617_v49, 16  ;;  %v880_v27 = vld [vmem:[#allocation3 + $0x58] sm:$0xf]  ;;  %v2504_v34 = vld [vmem:[#allocation3 + $0x10] sm:$0xf] }
  0x98   :  { %9608 = vmatprep.subr.bf16.mxu1 %v9898_v7  ;;  %v730_v3 = vshll.u32 %v618_v58, 16  ;;  %v713_v5 = vor.u32 %v712_v61, %v709_v59  ;;  %v723_v6 = vrot.slane %v721_v63, 4  ;;  %v718_v9 = vrot.slane %v716_v62, 5  ;;  %v2505_v35 = vld [vmem:[#allocation3 + $0x14] sm:$0x1] }
  0x99   :  { %2321 = vmatprep.mubr.bf16.mxu1 %v8548_v37  ;;  %v1594_v60 = vor.u32 %v1593_v48, %v1590_v47  ;;  %v1609_v8 = vrot.slane %v1608_v0, 4  ;;  %v726_v10 = vrot.slane %v724_v2, 5  ;;  %v72_v24 = vsel %vm10114_vm2, 0, %v71_v21  ;;  %v2506_v36 = vld [vmem:[#allocation3 + $0x18] sm:$0xf] }
  0x9a   :  { %2322 = vmatmul.mubr.bf16.gmra.mrb[24].mxu1 %v9884_v29  ;;  %v714_v12 = vrot.slane %v713_v5, 4  ;;  %v732_v13 = vrot.slane %v730_v3, 5  ;;  %v134_v26 = vsel %vm10124_vm4, 0, %v133_v22  ;;  %73 = vst [vmem:[#allocation3 + $0x50] sm:$0x1] %v72_v24  ;;  %v912_v32 = vshll.u32 %v880_v27, 16 }
  0x9b   :  { %9609 = vmatpush3.bf16.msra.mxu1 %v9898_v7  ;;  %v1595_v4 = vrot.slane %v1594_v60, 4  ;;  %v10528_v7 = vld [vmem:[%s12747_s1 + $0x200] sm:$0xff]   ;;  %v1614_v15 = vsel %vm10201_vm12, %v1609_v8, %v1613_v1  ;;  %v727_v16 = vor.u32 %v726_v10, %v723_v6  ;;  %135 = vst [vmem:[#allocation3 + $0x54] sm:$0x1] %v134_v26  ;;  %v918_v33 = vshll.u32 %v881_v28, 16 }
  0x9c   :  { %9610 = vmatprep.subr.bf16.mxu1 %v9901_v18  ;;  %v2507_v37 = vld [vmem:[#allocation3 + $0x1c] sm:$0x1]  ;;  %v914_v40 = vrot.slane %v912_v32, 5  ;;  %v2521_v41 = vshrl.u32 %v2504_v34, 16  ;;  %v2524_v42 = vshll.u32 %v2504_v34, 16  ;;  %v2530_v52 = vshll.u32 %v2505_v35, 16 }
  0x9d   :  { %v1600_v11 = vsel %vm10201_vm12, %v1595_v4, %v1599_v54  ;;  %v728_v19 = vrot.slane %v727_v16, 4  ;;  %v2535_v43 = vshrl.u32 %v2506_v36, 16  ;;  %v2538_v44 = vshll.u32 %v2506_v36, 16  ;;  %v882_v58 = vld [vmem:[#allocation3 + $0x60] sm:$0xf] }
  0x9e   :  { %v8609_v17 = vcombine.low %v1600_v11, %v1614_v15  ;;  %v2523_v46 = vrot.slane %v2521_v41, 4  ;;  %v2544_v47 = vshll.u32 %v2507_v37, 16  ;;  %v920_v48 = vrot.slane %v918_v33, 5  ;;  %v883_v5 = vld [vmem:[#allocation3 + $0x64] sm:$0x1] }
  0x9f   :  { %9611 = vmatpush3.bf16.msra.mxu1 %v9901_v18  ;;  %v719_v18 = vsel %vm10201_vm12, %v714_v12, %v718_v9  ;;  %v733_v23 = vsel %vm10201_vm12, %v728_v19, %v732_v13  ;;  %v2526_v49 = vrot.slane %v2524_v42, 5  ;;  %v2537_v50 = vrot.slane %v2535_v43, 4  ;;  %v884_v6 = vld [vmem:[#allocation3 + $0x68] sm:$0xf]  ;;  %v885_v11 = vld [vmem:[#allocation3 + $0x6c] sm:$0x1] }
  0xa0   :  { %9612 = vmatprep.subr.bf16.mxu1 %v9904_v31  ;;  %2023 = vmatprep.mubr.bf16.mxu0 %v8609_v17  ;;  %v8549_v29 = vcombine.low %v719_v18, %v733_v23  ;;  %v2532_v38 = vrot.slane %v2530_v52, 5  ;;  %v2546_v55 = vrot.slane %v2544_v47, 5  ;;  %v923_v12 = vshrl.u32 %v882_v58, 16  ;;  %v9899_v15 = vld [vmem:[#allocation3 + $0x10] ss:$8 sps:$4 sm:$0xff]  }
  0xa1   :  { %2024 = vmatmul.mubr.bf16.gmra.mrb[28].mxu0 %v9890_v14  ;;  %v878_v59 = vld [vmem:[#allocation3 + $0x50] sm:$0xf]  ;;  %v2527_v61 = vor.u32 %v2526_v49, %v2523_v46  ;;  %v926_v16 = vshll.u32 %v882_v58, 16  ;;  %v932_v17 = vshll.u32 %v883_v5, 16  ;;  %v2508_v18 = vld [vmem:[#allocation3 + $0x20] sm:$0xf] }
  0xa2   :  { %2329 = vmatprep.mubr.bf16.mxu1 %v8549_v29  ;;  %v879_v60 = vld [vmem:[#allocation3 + $0x54] sm:$0x1]  ;;  %v895_v63 = vshrl.u32 %v878_v59, 16  ;;  %v898_v0 = vshll.u32 %v878_v59, 16  ;;  %v925_v21 = vrot.slane %v923_v12, 4  ;;  %v937_v22 = vshrl.u32 %v884_v6, 16 }
  0xa3   :  { %9613 = vmatpush3.bf16.msra.mxu1 %v9904_v31  ;;  %v909_v31 = vshrl.u32 %v880_v27, 16  ;;  %v904_v1 = vshll.u32 %v879_v60, 16  ;;  %v2528_v3 = vrot.slane %v2527_v61, 4  ;;  %v2509_v23 = vld [vmem:[#allocation3 + $0x24] sm:$0x1]  ;;  %v928_v26 = vrot.slane %v926_v16, 5 }
  0xa4   :  { %9614 = vmatprep.subr.bf16.mxu1 %v9907_v53  ;;  %2330 = vmatmul.mubr.bf16.gmra.mrb[28].mxu1 %v9891_v20  ;;  %v897_v8 = vrot.slane %v895_v63, 4  ;;  %v900_v9 = vrot.slane %v898_v0, 5  ;;  %v2510_v24 = vld [vmem:[#allocation3 + $0x28] sm:$0xf]  ;;  %v934_v27 = vrot.slane %v932_v17, 5  ;;  %v940_v28 = vshll.u32 %v884_v6, 16 }
  0xa5   :  { %v911_v39 = vrot.slane %v909_v31, 4  ;;  %v906_v10 = vrot.slane %v904_v1, 5  ;;  %v2533_v13 = vsel %vm10201_vm12, %v2528_v3, %v2532_v38  ;;  %v946_v29 = vshll.u32 %v885_v11, 16  ;;  %v9897_v32 = vld [vmem:[#allocation3 + $0x50] ss:$8 sps:$4 sm:$0xff]  }
  0xa6   :  { %v901_v19 = vor.u32 %v900_v9, %v897_v8  ;;  %v939_v33 = vrot.slane %v937_v22, 4  ;;  %v2549_v34 = vshrl.u32 %v2508_v18, 16  ;;  %v2552_v35 = vshll.u32 %v2508_v18, 16  ;;  %v886_v58 = vld [vmem:[#allocation3 + $0x70] sm:$0xf] }
  0xa7   :  { %9615 = vmatpush3.bf16.msra.mxu1 %v9907_v53  ;;  %v915_v45 = vor.u32 %v914_v40, %v911_v39  ;;  %v2540_v53 = vrot.slane %v2538_v44, 5  ;;  %v929_v36 = vor.u32 %v928_v26, %v925_v21  ;;  %v942_v37 = vrot.slane %v940_v28, 5  ;;  %v2511_v40 = vld [vmem:[#allocation3 + $0x2c] sm:$0x1]  ;;  %v888_v1 = vld [vmem:[#allocation3 + $0x78] sm:$0xf] }
  0xa8   :  { %9632 = vmatprep.subr.bf16.mxu1 %v10528_v7  ;;  %v902_v31 = vrot.slane %v901_v19, 4  ;;  %v948_v39 = vrot.slane %v946_v29, 5  ;;  %v2558_v41 = vshll.u32 %v2509_v23, 16  ;;  %v2551_v52 = vrot.slane %v2549_v34, 4  ;;  %v9900_v9 = vld [vmem:[#allocation3 + $0x60] ss:$8 sps:$4 sm:$0xff]  }
  0xa9   :  { %v916_v54 = vrot.slane %v915_v45, 4  ;;  %v2541_v62 = vor.u32 %v2540_v53, %v2537_v50  ;;  %v2554_v43 = vrot.slane %v2552_v35, 5  ;;  %v2563_v44 = vshrl.u32 %v2510_v24, 16  ;;  %v2512_v11 = vld [vmem:[#allocation3 + $0x30] sm:$0xf] }
  0xaa   :  { %v907_v42 = vsel %vm10201_vm12, %v902_v31, %v906_v10  ;;  %v930_v46 = vrot.slane %v929_v36, 4  ;;  %v943_v47 = vor.u32 %v942_v37, %v939_v33  ;;  %v2566_v53 = vshll.u32 %v2510_v24, 16  ;;  %v2513_v12 = vld [vmem:[#allocation3 + $0x34] sm:$0x1]  ;;  %v2514_v17 = vld [vmem:[#allocation3 + $0x38] sm:$0xf] }
  0xab   :  { %v921_v2 = vsel %vm10201_vm12, %v916_v54, %v920_v48  ;;  %v2542_v4 = vrot.slane %v2541_v62, 4  ;;  %v2560_v48 = vrot.slane %v2558_v41, 5  ;;  %v2555_v49 = vor.u32 %v2554_v43, %v2551_v52  ;;  %v887_v62 = vld [vmem:[#allocation3 + $0x74] sm:$0x1]  ;;  %v9902_v19 = vld [vmem:[#allocation3 + $0x20] ss:$8 sps:$4 sm:$0xff]  }
  0xac   :  { %v8566_v45 = vcombine.low %v907_v42, %v921_v2  ;;  %v2565_v50 = vrot.slane %v2563_v44, 4  ;;  %v2572_v54 = vshll.u32 %v2511_v40, 16  ;;  %v935_v38 = vsel %vm10201_vm12, %v930_v46, %v934_v27  ;;  %v889_v2 = vld [vmem:[#allocation3 + $0x7c] sm:$0x1] }
  0xad   :  { %v2547_v14 = vsel %vm10201_vm12, %v2542_v4, %v2546_v55  ;;  %v944_v55 = vrot.slane %v943_v47, 4  ;;  %v2556_v59 = vrot.slane %v2555_v49, 4  ;;  %v2568_v60 = vrot.slane %v2566_v53, 5  ;;  %v2515_v21 = vld [vmem:[#allocation3 + $0x3c] sm:$0x1] }
  0xae   :  { %v8674_v20 = vcombine.low %v2533_v13, %v2547_v14  ;;  %2337 = vmatprep.mubr.bf16.mxu1 %v8566_v45  ;;  %v2574_v61 = vrot.slane %v2572_v54, 5  ;;  %v951_v63 = vshrl.u32 %v886_v58, 16  ;;  %v954_v3 = vshll.u32 %v886_v58, 16  ;;  %v891_v53 = vld [vmem:[#allocation3 + $0x84] sm:$0x1] }
  0xaf   :  { %2338 = vmatmul.mubr.bf16.gmra.mrb[32].mxu1 %v9897_v32  ;;  %v949_v0 = vsel %vm10201_vm12, %v944_v55, %v948_v39  ;;  %v960_v4 = vshll.u32 %v887_v62, 16  ;;  %v2561_v6 = vsel %vm10201_vm12, %v2556_v59, %v2560_v48  ;;  %v2569_v8 = vor.u32 %v2568_v60, %v2565_v50  ;;  %v9903_v48 = vld [vmem:[#allocation3 + $0x70] ss:$8 sps:$4 sm:$0xff]   ;;  %v890_v50 = vld [vmem:[#allocation3 + $0x80] sm:$0xf] }
  0xb0   :  { %3253 = vmatprep.mubr.bf16.mxu0 %v8674_v20  ;;  %v8567_v5 = vcombine.low %v935_v38, %v949_v0  ;;  %v953_v10 = vrot.slane %v951_v63, 4  ;;  %v956_v13 = vrot.slane %v954_v3, 5  ;;  %v968_v16 = vshll.u32 %v888_v1, 16  ;;  %v892_v54 = vld [vmem:[#allocation3 + $0x88] sm:$0xf] }
  0xb1   :  { %3254 = vmatmul.mubr.bf16.vlgmr.msra.gmra.mrb[32].mxu0 %v9899_v15  ;;  %v962_v14 = vrot.slane %v960_v4, 5  ;;  %v965_v15 = vshrl.u32 %v888_v1, 16  ;;  %v2570_v18 = vrot.slane %v2569_v8, 4  ;;  %v974_v20 = vshll.u32 %v889_v2, 16  ;;  %v893_v59 = vld [vmem:[#allocation3 + $0x8c] sm:$0x1] }
  0xb2   :  { %2345 = vmatprep.mubr.bf16.mxu1 %v8567_v5  ;;  %v2577_v22 = vshrl.u32 %v2512_v11, 16  ;;  %v2580_v23 = vshll.u32 %v2512_v11, 16  ;;  %v957_v24 = vor.u32 %v956_v13, %v953_v10  ;;  %v970_v27 = vrot.slane %v968_v16, 5  ;;  %v130_v2 = vld [vmem:[#allocation3 + $0x4c] sm:$0x1] }
  0xb3   :  { %v967_v26 = vrot.slane %v965_v15, 4  ;;  %v2586_v28 = vshll.u32 %v2513_v12, 16  ;;  %v2575_v29 = vsel %vm10201_vm12, %v2570_v18, %v2574_v61  ;;  %v976_v31 = vrot.slane %v974_v20, 5  ;;  %v68_v61 = vld [vmem:[#allocation3 + $0x48] sm:$0x1] }
  0xb4   :  { %v2579_v32 = vrot.slane %v2577_v22, 4  ;;  %v2582_v33 = vrot.slane %v2580_v23, 5  ;;  %v8675_v34 = vcombine.low %v2561_v6, %v2575_v29  ;;  %v958_v35 = vrot.slane %v957_v24, 4  ;;  %v9905_v4 = vld [vmem:[#allocation3 + $0x30] ss:$8 sps:$4 sm:$0xff]  }
  0xb5   :  { %v971_v36 = vor.u32 %v970_v27, %v967_v26  ;;  %v2588_v37 = vrot.slane %v2586_v28, 5  ;;  %v2591_v40 = vshrl.u32 %v2514_v17, 16  ;;  %v2594_v41 = vshll.u32 %v2514_v17, 16  ;;  %v9906_v29 = vld [vmem:[#allocation3 + $0x80] ss:$8 sps:$4 sm:$0xff]  }
  0xb6   :  { %v2583_v39 = vor.u32 %v2582_v33, %v2579_v32  ;;  %v2600_v42 = vshll.u32 %v2515_v21, 16  ;;  %3261 = vmatprep.mubr.bf16.mxu0 %v8675_v34  ;;  %v963_v52 = vsel %vm10201_vm12, %v958_v35, %v962_v14  ;;  %v979_v60 = vshrl.u32 %v890_v50, 16  ;;  %v2517_v14 = vld [vmem:[#allocation3 + $0x44] sm:$0x1] }
  0xb7   :  { %2346 = vmatmul.mubr.bf16.gmra.mrb[36].mxu1 %v9900_v9  ;;  %v972_v43 = vrot.slane %v971_v36, 4  ;;  %v2593_v45 = vrot.slane %v2591_v40, 4  ;;  %v2596_v46 = vrot.slane %v2594_v41, 5  ;;  %v982_v62 = vshll.u32 %v890_v50, 16  ;;  %v2516_v9 = vld [vmem:[#allocation3 + $0x40] sm:$0xf] }
  0xb8   :  { %v2584_v44 = vrot.slane %v2583_v39, 4  ;;  %v2602_v47 = vrot.slane %v2600_v42, 5  ;;  %v988_v63 = vshll.u32 %v891_v53, 16  ;;  %v993_v0 = vshrl.u32 %v892_v54, 16  ;;  %v755_v32 = vld [vmem:[#allocation3 + $0x4] sm:$0x1] }
  0xb9   :  { %3262 = vmatmul.mubr.bf16.gmra.mrb[36].mxu0 %v9902_v19  ;;  %v977_v49 = vsel %vm10201_vm12, %v972_v43, %v976_v31  ;;  %v2597_v58 = vor.u32 %v2596_v46, %v2593_v45  ;;  %v996_v1 = vshll.u32 %v892_v54, 16  ;;  %v981_v5 = vrot.slane %v979_v60, 4  ;;  %v754_v31 = vld [vmem:[#allocation3] sm:$0xe]  ;;  %v757_v39 = vld [vmem:[#allocation3 + $0xc] sm:$0x1] }
  0xba   :  { %v8568_v38 = vcombine.low %v963_v52, %v977_v49  ;;  %v2589_v55 = vsel %vm10201_vm12, %v2584_v44, %v2588_v37  ;;  %v1002_v6 = vshll.u32 %v893_v59, 16  ;;  %v69_v8 = vsel %vm10114_vm2, 0, %v68_v61  ;;  %v756_v37 = vld [vmem:[#allocation3 + $0x8] sm:$0xe]  ;;  %v2773_v46 = vld [vmem:[#allocation3 + $0x60] sm:$0xf] }
  0xbb   :  { %v2598_v3 = vrot.slane %v2597_v58, 4  ;;  %v984_v10 = vrot.slane %v982_v62, 5  ;;  %v990_v11 = vrot.slane %v988_v63, 5  ;;  %v995_v12 = vrot.slane %v993_v0, 4  ;;  %70 = vst [vmem:[#allocation3 + $0x48] sm:$0x1] %v69_v8 }
  0xbc   :  { %2353 = vmatprep.mubr.bf16.mxu1 %v8568_v38  ;;  %v998_v13 = vrot.slane %v996_v1, 5  ;;  %v1004_v16 = vrot.slane %v1002_v6, 5  ;;  %v131_v17 = vsel %vm10124_vm4, 0, %v130_v2  ;;  %v2605_v18 = vshrl.u32 %v2516_v9, 16  ;;  %v2774_v50 = vld [vmem:[#allocation3 + $0x64] sm:$0x1] }
  0xbd   :  { %v2603_v15 = vsel %vm10201_vm12, %v2598_v3, %v2602_v47  ;;  %v985_v20 = vor.u32 %v984_v10, %v981_v5  ;;  %132 = vst [vmem:[#allocation3 + $0x4c] sm:$0x1] %v131_v17  ;;  %v2608_v22 = vshll.u32 %v2516_v9, 16  ;;  %v2614_v24 = vshll.u32 %v2517_v14, 16  ;;  %v2775_v58 = vld [vmem:[#allocation3 + $0x68] sm:$0xf] }
  0xbe   :  { %v8676_v19 = vcombine.low %v2589_v55, %v2603_v15  ;;  %v999_v21 = vor.u32 %v998_v13, %v995_v12  ;;  %v2607_v23 = vrot.slane %v2605_v18, 4  ;;  %v8550_v42 = vrot.slane %v754_v31, 9  ;;  %v2776_v61 = vld [vmem:[#allocation3 + $0x6c] sm:$0x1]  ;;  %v758_v0 = vld [vmem:[#allocation3 + $0x10] sm:$0xe] }
  0xbf   :  { %2354 = vmatmul.mubr.bf16.gmra.mrb[40].mxu1 %v9903_v48  ;;  %v986_v26 = vrot.slane %v985_v20, 4  ;;  %v2610_v28 = vrot.slane %v2608_v22, 5  ;;  %v2616_v36 = vrot.slane %v2614_v24, 5  ;;  %v791_v45 = vrot.slane %v755_v32, 5  ;;  %v759_v5 = vld [vmem:[#allocation3 + $0x14] sm:$0x1] }
  0xc0   :  { %3269 = vmatprep.mubr.bf16.mxu0 %v8676_v19  ;;  %v1000_v27 = vrot.slane %v999_v21, 4  ;;  %v8551_v48 = vrot.slane %v756_v37, 9  ;;  %v795_v49 = vrot.slane %v757_v39, 5  ;;  %v2790_v62 = vshrl.u32 %v2773_v46, 16  ;;  %v760_v6 = vld [vmem:[#allocation3 + $0x18] sm:$0xe] }
  0xc1   :  { %3270 = vmatmul.mubr.bf16.gmra.mrb[40].mxu0 %v9905_v4  ;;  %v991_v33 = vsel %vm10201_vm12, %v986_v26, %v990_v11  ;;  %v2611_v35 = vor.u32 %v2610_v28, %v2607_v23  ;;  %v792_v59 = vsel %vm10195_vm11, %v8550_v42, %v791_v45  ;;  %v2793_v63 = vshll.u32 %v2773_v46, 16  ;;  %v761_v12 = vld [vmem:[#allocation3 + $0x1c] sm:$0x1]  ;;  %v9911_v32 = vld [vmem:[%s12747_s1 + $0x208] sm:$0xff]   ;;  %v763_v39 = vld [vmem:[#allocation3 + $0x24] sm:$0x1] }
  0xc2   :  { %v1005_v34 = vsel %vm10201_vm12, %v1000_v27, %v1004_v16  ;;  %v2518_v41 = vld [vmem:[#allocation3 + $0x48] sm:$0xf]  ;;  %v796_v60 = vsel %vm10195_vm11, %v8551_v48, %v795_v49  ;;  %v2799_v4 = vshll.u32 %v2774_v50, 16  ;;  %v2792_v8 = vrot.slane %v2790_v62, 4  ;;  %v765_v42 = vld [vmem:[#allocation3 + $0x2c] sm:$0x1] }
  0xc3   :  { %v8569_v40 = vcombine.low %v991_v33, %v1005_v34  ;;  %v2612_v52 = vrot.slane %v2611_v35, 4  ;;  %v2619_v43 = vshrl.u32 %v2518_v41, 16  ;;  %v2622_v44 = vshll.u32 %v2518_v41, 16  ;;  %v9908_v22 = vld [vmem:[#allocation3 + $0x40] ss:$8 sps:$4 sm:$0xff]  }
  0xc4   :  { %v2519_v47 = vld [vmem:[#allocation3 + $0x4c] sm:$0x1]  ;;  %v8558_v3 = vcombine.low %v792_v59, %v796_v60  ;;  %v2795_v9 = vrot.slane %v2793_v63, 5  ;;  %v2804_v10 = vshrl.u32 %v2775_v58, 16  ;;  %v2807_v11 = vshll.u32 %v2775_v58, 16 }
  0xc5   :  { %2361 = vmatprep.mubr.bf16.mxu1 %v8569_v40  ;;  %v2617_v53 = vsel %vm10201_vm12, %v2612_v52, %v2616_v36  ;;  %v2621_v54 = vrot.slane %v2619_v43, 4  ;;  %v2624_v38 = vrot.slane %v2622_v44, 5  ;;  %v2628_v55 = vshll.u32 %v2519_v47, 16  ;;  %v762_v34 = vld [vmem:[#allocation3 + $0x20] sm:$0xe] }
  0xc6   :  { %v2801_v14 = vrot.slane %v2799_v4, 5  ;;  %v2813_v15 = vshll.u32 %v2776_v61, 16  ;;  %v8552_v16 = vrot.slane %v758_v0, 9  ;;  %v2796_v17 = vor.u32 %v2795_v9, %v2792_v8  ;;  %v764_v40 = vld [vmem:[#allocation3 + $0x28] sm:$0xe]  ;;  %v9913_v0 = vld [vmem:[%s12747_s1 + $0x210] sm:$0xff]  }
  0xc7   :  { %2362 = vmatmul.mubr.bf16.gmra.mrb[44].mxu1 %v9906_v29  ;;  %v2625_v1 = vor.u32 %v2624_v38, %v2621_v54  ;;  %v2630_v2 = vrot.slane %v2628_v55, 5  ;;  %v2806_v18 = vrot.slane %v2804_v10, 4  ;;  %v2809_v19 = vrot.slane %v2807_v11, 5  ;;  %v2777_v44 = vld [vmem:[#allocation3 + $0x70] sm:$0xf] }
  0xc8   :  { %9616 = vmatprep.mubr.bf16.mxu1 %v8558_v3  ;;  %v799_v20 = vrot.slane %v759_v5, 5  ;;  %v2815_v23 = vrot.slane %v2813_v15, 5  ;;  %v8553_v24 = vrot.slane %v760_v6, 9  ;;  %v803_v26 = vrot.slane %v761_v12, 5  ;;  %v2778_v47 = vld [vmem:[#allocation3 + $0x74] sm:$0x1] }
  0xc9   :  { %v2626_v13 = vrot.slane %v2625_v1, 4  ;;  %v2797_v28 = vrot.slane %v2796_v17, 4  ;;  %v2810_v29 = vor.u32 %v2809_v19, %v2806_v18  ;;  %v8554_v41 = vrot.slane %v762_v34, 9  ;;  %v2779_v48 = vld [vmem:[#allocation3 + $0x78] sm:$0xf] }
  0xca   :  { %v800_v31 = vsel %vm10195_vm11, %v8552_v16, %v799_v20  ;;  %v804_v33 = vsel %vm10195_vm11, %v8553_v24, %v803_v26  ;;  %v807_v52 = vrot.slane %v763_v39, 5  ;;  %v8555_v43 = vrot.slane %v764_v40, 9  ;;  %v2780_v54 = vld [vmem:[#allocation3 + $0x7c] sm:$0x1]  ;;  %v766_v58 = vld [vmem:[#allocation3 + $0x30] sm:$0xe] }
  0xcb   :  { %v2631_v21 = vsel %vm10201_vm12, %v2626_v13, %v2630_v2  ;;  %v2802_v35 = vsel %vm10201_vm12, %v2797_v28, %v2801_v14  ;;  %v2811_v36 = vrot.slane %v2810_v29, 4  ;;  %v8559_v37 = vcombine.low %v800_v31, %v804_v33  ;;  %v767_v63 = vld [vmem:[#allocation3 + $0x34] sm:$0x1]  ;;  %v768_v4 = vld [vmem:[#allocation3 + $0x38] sm:$0xe] }
  0xcc   :  { %v8677_v27 = vcombine.low %v2617_v53, %v2631_v21  ;;  %v811_v46 = vrot.slane %v765_v42, 5  ;;  %v2818_v49 = vshrl.u32 %v2777_v44, 16  ;;  %v808_v53 = vsel %vm10195_vm11, %v8554_v41, %v807_v52  ;;  %v769_v8 = vld [vmem:[#allocation3 + $0x3c] sm:$0x1]  ;;  %v9912_v26 = vld [vmem:[#allocation3 + $0x70] ss:$8 sps:$4 sm:$0xff]  }
  0xcd   :  { %v2816_v45 = vsel %vm10201_vm12, %v2811_v36, %v2815_v23  ;;  %v2821_v38 = vshll.u32 %v2777_v44, 16  ;;  %v2827_v55 = vshll.u32 %v2778_v47, 16  ;;  %v2832_v61 = vshrl.u32 %v2779_v48, 16  ;;  %v9914_v18 = vld [vmem:[%s12747_s1 + $0x218] sm:$0xff]   ;;  %v1026_v23 = vld [vmem:[#allocation3 + $0x50] sm:$0xe] }
  0xce   :  { %3277 = vmatprep.mubr.bf16.mxu0 %v8677_v27  ;;  %v8694_v50 = vcombine.low %v2802_v35, %v2816_v45  ;;  %v812_v59 = vsel %vm10195_vm11, %v8555_v43, %v811_v46  ;;  %v2820_v60 = vrot.slane %v2818_v49, 4  ;;  %v2835_v62 = vshll.u32 %v2779_v48, 16  ;;  %v1027_v27 = vld [vmem:[#allocation3 + $0x54] sm:$0x1]  ;;  %v1028_v28 = vld [vmem:[#allocation3 + $0x58] sm:$0xe] }
  0xcf   :  { %3278 = vmatmul.mubr.bf16.gmra.mrb[44].mxu0 %v9908_v22  ;;  %9617 = vmatmul.mubr.bf16.vlgmr.msra.gmra.mrb[0].mxu1 %v8559_v37  ;;  %v8560_v1 = vcombine.low %v808_v53, %v812_v59  ;;  %v2823_v2 = vrot.slane %v2821_v38, 5  ;;  %v2841_v3 = vshll.u32 %v2780_v54, 16  ;;  %v2834_v5 = vrot.slane %v2832_v61, 4  ;;  %v1029_v29 = vld [vmem:[#allocation3 + $0x5c] sm:$0x1]  ;;  %v9916_v36 = vld [vmem:[%s12747_s1 + $0x220] sm:$0xff]  }
  0xd0   :  { %9633 = vmatpush3.bf16.msra.mxu1 %v10528_v7  ;;  %3285 = vmatprep.mubr.bf16.mxu0 %v8694_v50  ;;  %v9909_v7 = vld [vmem:[#allocation3 + $0x60] ss:$8 sps:$4 sm:$0xff]   ;;  %v2837_v6 = vrot.slane %v2835_v62, 5  ;;  %v8556_v9 = vrot.slane %v766_v58, 9  ;;  %v815_v10 = vrot.slane %v767_v63, 5  ;;  %v2829_v12 = vrot.slane %v2827_v55, 5 }
  0xd1   :  { %9634 = vmatprep.subr.bf16.mxu1 %v9911_v32  ;;  %9620 = vmatprep.mubr.bf16.mxu1 %v8560_v1  ;;  %v2824_v11 = vor.u32 %v2823_v2, %v2820_v60  ;;  %v8557_v13 = vrot.slane %v768_v4, 9  ;;  %v819_v14 = vrot.slane %v769_v8, 5  ;;  %v2843_v16 = vrot.slane %v2841_v3, 5  ;;  %v2781_v35 = vld [vmem:[#allocation3 + $0x80] sm:$0xf]  ;;  %v9917_v59 = vld [vmem:[%s12747_s1 + $0x228] sm:$0xff]  }
  0xd2   :  { %v2838_v15 = vor.u32 %v2837_v6, %v2834_v5  ;;  %v816_v17 = vsel %vm10195_vm11, %v8556_v9, %v815_v10  ;;  %v1060_v33 = vrot.slane %v1027_v27, 5  ;;  %v8571_v34 = vrot.slane %v1028_v28, 9  ;;  %v2782_v40 = vld [vmem:[#allocation3 + $0x84] sm:$0x1]  ;;  %v2783_v41 = vld [vmem:[#allocation3 + $0x88] sm:$0xf] }
  0xd3   :  { %v2825_v19 = vrot.slane %v2824_v11, 4  ;;  %v820_v20 = vsel %vm10195_vm11, %v8557_v13, %v819_v14  ;;  %v1064_v39 = vrot.slane %v1029_v29, 5  ;;  %v2846_v42 = vshrl.u32 %v2781_v35, 16  ;;  %v2784_v43 = vld [vmem:[#allocation3 + $0x8c] sm:$0x1]  ;;  %v9919_v9 = vld [vmem:[%s12747_s1 + $0x230] sm:$0xff]  }
  0xd4   :  { %9635 = vmatpush3.bf16.msra.mxu1 %v9911_v32  ;;  %v2839_v21 = vrot.slane %v2838_v15, 4  ;;  %v8561_v22 = vcombine.low %v816_v17, %v820_v20  ;;  %v8570_v32 = vrot.slane %v1026_v23, 9  ;;  %v2849_v44 = vshll.u32 %v2781_v35, 16  ;;  %v1030_v53 = vld [vmem:[#allocation3 + $0x60] sm:$0xe]  ;;  %v9920_v28 = vld [vmem:[%s12747_s1 + $0x238] sm:$0xff]  }
  0xd5   :  { %9636 = vmatprep.subr.bf16.mxu1 %v9913_v0  ;;  %v2830_v24 = vsel %vm10201_vm12, %v2825_v19, %v2829_v12  ;;  %v2855_v45 = vshll.u32 %v2782_v40, 16  ;;  %v2860_v46 = vshrl.u32 %v2783_v41, 16  ;;  %v1065_v47 = vsel %vm10195_vm11, %v8571_v34, %v1064_v39  ;;  %v1031_v58 = vld [vmem:[#allocation3 + $0x64] sm:$0x1]  ;;  %v1032_v62 = vld [vmem:[#allocation3 + $0x68] sm:$0xe] }
  0xd6   :  { %v2844_v31 = vsel %vm10201_vm12, %v2839_v21, %v2843_v16  ;;  %v1061_v52 = vsel %vm10195_vm11, %v8570_v32, %v1060_v33  ;;  %v2848_v48 = vrot.slane %v2846_v42, 4  ;;  %v2863_v49 = vshll.u32 %v2783_v41, 16  ;;  %v1033_v63 = vld [vmem:[#allocation3 + $0x6c] sm:$0x1]  ;;  %v9915_v12 = vld [vmem:[#allocation3 + $0x80] ss:$8 sps:$4 sm:$0xff]  }
  0xd7   :  { %3286 = vmatmul.mubr.bf16.gmra.mrb[48].mxu0 %v9909_v7  ;;  %9621 = vmatmul.mubr.bf16.gmra.mrb[4].mxu1 %v8561_v22  ;;  %v8695_v37 = vcombine.low %v2830_v24, %v2844_v31  ;;  %v2869_v50 = vshll.u32 %v2784_v43, 16  ;;  %v8578_v54 = vcombine.low %v1061_v52, %v1065_v47  ;;  %v2851_v38 = vrot.slane %v2849_v44, 5  ;;  %v1034_v15 = vld [vmem:[#allocation3 + $0x70] sm:$0xe]  ;;  %v1035_v16 = vld [vmem:[#allocation3 + $0x74] sm:$0x1] }
  0xd8   :  { %9637 = vmatpush3.bf16.msra.mxu1 %v9913_v0  ;;  %v2862_v55 = vrot.slane %v2860_v46, 4  ;;  %v2857_v60 = vrot.slane %v2855_v45, 5  ;;  %v2865_v61 = vrot.slane %v2863_v49, 5  ;;  %v8572_v7 = vrot.slane %v1030_v53, 9  ;;  %v1036_v17 = vld [vmem:[#allocation3 + $0x78] sm:$0xe] }
  0xd9   :  { %9638 = vmatprep.subr.bf16.mxu1 %v9914_v18  ;;  %3293 = vmatprep.mubr.bf16.mxu0 %v8695_v37  ;;  %v2852_v0 = vor.u32 %v2851_v38, %v2848_v48  ;;  %v1068_v1 = vrot.slane %v1031_v58, 5  ;;  %v8573_v2 = vrot.slane %v1032_v62, 9  ;;  %v2871_v4 = vrot.slane %v2869_v50, 5  ;;  %v1037_v19 = vld [vmem:[#allocation3 + $0x7c] sm:$0x1] }
  0xda   :  { %9624 = vmatprep.mubr.bf16.mxu1 %v8578_v54  ;;  %v2866_v3 = vor.u32 %v2865_v61, %v2862_v55  ;;  %v1072_v5 = vrot.slane %v1033_v63, 5  ;;  %v8574_v20 = vrot.slane %v1034_v15, 9  ;;  %v1076_v21 = vrot.slane %v1035_v16, 5  ;;  %v160_v27 = vld [vmem:[#allocation3 + $0x9c] sm:$0x1] }
  0xdb   :  { %v2853_v6 = vrot.slane %v2852_v0, 4  ;;  %v1069_v8 = vsel %vm10195_vm11, %v8572_v7, %v1068_v1  ;;  %v8575_v22 = vrot.slane %v1036_v17, 9  ;;  %v1080_v24 = vrot.slane %v1037_v19, 5  ;;  %v2785_v33 = vld [vmem:[#allocation3 + $0x90] sm:$0xf] }
  0xdc   :  { %9639 = vmatpush3.bf16.msra.mxu1 %v9914_v18  ;;  %v2867_v10 = vrot.slane %v2866_v3, 4  ;;  %v1073_v11 = vsel %vm10195_vm11, %v8573_v2, %v1072_v5  ;;  %v1077_v29 = vsel %vm10195_vm11, %v8574_v20, %v1076_v21  ;;  %v161_v32 = vsel %vm10124_vm4, 0, %v160_v27  ;;  %v2786_v34 = vld [vmem:[#allocation3 + $0x94] sm:$0x1]  ;;  %v1038_v40 = vld [vmem:[#allocation3 + $0x80] sm:$0xe] }
  0xdd   :  { %9640 = vmatprep.subr.bf16.mxu1 %v9916_v36  ;;  %v2858_v13 = vsel %vm10201_vm12, %v2853_v6, %v2857_v60  ;;  %v8579_v14 = vcombine.low %v1069_v8, %v1073_v11  ;;  %v1081_v35 = vsel %vm10195_vm11, %v8575_v22, %v1080_v24  ;;  %162 = vst [vmem:[#allocation3 + $0x9c] sm:$0x1] %v161_v32  ;;  %v2877_v37 = vshll.u32 %v2785_v33, 16  ;;  %v1039_v42 = vld [vmem:[#allocation3 + $0x84] sm:$0x1] }
  0xde   :  { %v2872_v18 = vsel %vm10201_vm12, %v2867_v10, %v2871_v4  ;;  %v2883_v39 = vshll.u32 %v2786_v34, 16  ;;  %v8580_v41 = vcombine.low %v1077_v29, %v1081_v35  ;;  %v1040_v52 = vld [vmem:[#allocation3 + $0x88] sm:$0xe]  ;;  %v1041_v43 = vld [vmem:[#allocation3 + $0x8c] sm:$0x1]  ;;  %v8576_v46 = vrot.slane %v1038_v40, 9 }
  0xdf   :  { %3294 = vmatmul.mubr.bf16.gmra.mrb[52].mxu0 %v9912_v26  ;;  %v8696_v23 = vcombine.low %v2858_v13, %v2872_v18  ;;  %9625 = vmatmul.mubr.bf16.gmra.mrb[8].mxu1 %v8579_v14  ;;  %v98_v26 = vld [vmem:[#allocation3 + $0x98] sm:$0x1]  ;;  %v2879_v45 = vrot.slane %v2877_v37, 5  ;;  %v1084_v47 = vrot.slane %v1039_v42, 5  ;;  %v8577_v48 = vrot.slane %v1040_v52, 9 }
  0xe0   :  { %9641 = vmatpush3.bf16.msra.mxu1 %v9916_v36  ;;  %v99_v31 = vsel %vm10114_vm2, 0, %v98_v26  ;;  %v2874_v36 = vshrl.u32 %v2785_v33, 16  ;;  %9628 = vmatprep.mubr.bf16.mxu1 %v8580_v41  ;;  %v1088_v49 = vrot.slane %v1041_v43, 5  ;;  %v10645_v53 = vrot.slane %v2883_v39, 5  ;;  %v2652_v55 = vld [vmem:[#allocation3 + $0x10] sm:$0xe] }
  0xe1   :  { %9642 = vmatprep.subr.bf16.mxu1 %v9917_v59  ;;  %3301 = vmatprep.mubr.bf16.mxu0 %v8696_v23  ;;  %100 = vst [vmem:[#allocation3 + $0x98] sm:$0x1] %v99_v31  ;;  %v1085_v54 = vsel %vm10195_vm11, %v8576_v46, %v1084_v47  ;;  %v2653_v58 = vld [vmem:[#allocation3 + $0x14] sm:$0x1]  ;;  %v2654_v60 = vld [vmem:[#allocation3 + $0x18] sm:$0xe] }
  0xe2   :  { %v2876_v44 = vrot.slane %v2874_v36, 4  ;;  %v1089_v38 = vsel %vm10195_vm11, %v8577_v48, %v1088_v49  ;;  %v2655_v61 = vld [vmem:[#allocation3 + $0x1c] sm:$0x1]  ;;  %v8678_v62 = vrot.slane %v2652_v55, 9  ;;  %v2686_v63 = vrot.slane %v2653_v58, 5 }
  0xe3   :  { %v8679_v6 = vrot.slane %v2654_v60, 9  ;;  %v2690_v8 = vrot.slane %v2655_v61, 5  ;;  %v2657_v10 = vld [vmem:[#allocation3 + $0x24] sm:$0x1]  ;;  %v2658_v14 = vld [vmem:[#allocation3 + $0x28] sm:$0xe] }
  0xe4   :  { %9643 = vmatpush3.bf16.msra.mxu1 %v9917_v59  ;;  %v2880_v50 = vor.u32 %v2879_v45, %v2876_v44  ;;  %v8581_v59 = vcombine.low %v1085_v54, %v1089_v38  ;;  %v2788_v7 = vld [vmem:[#allocation3 + $0x9c] sm:$0x1]  ;;  %v2687_v5 = vsel %vm10195_vm11, %v8678_v62, %v2686_v63  ;;  %v2659_v17 = vld [vmem:[#allocation3 + $0x2c] sm:$0x1]  ;;  %v2694_v18 = vrot.slane %v2657_v10, 5 }
  0xe5   :  { %9644 = vmatprep.subr.bf16.mxu1 %v9919_v9  ;;  %v2897_v4 = vshll.u32 %v2788_v7, 16  ;;  %v2691_v16 = vsel %vm10195_vm11, %v8679_v6, %v2690_v8  ;;  %v8681_v19 = vrot.slane %v2658_v14, 9  ;;  %v2660_v20 = vld [vmem:[#allocation3 + $0x30] sm:$0xe]  ;;  %v2698_v23 = vrot.slane %v2659_v17, 5 }
  0xe6   :  { %v2881_v1 = vrot.slane %v2880_v50, 4  ;;  %v8686_v22 = vcombine.low %v2687_v5, %v2691_v16  ;;  %v2661_v24 = vld [vmem:[#allocation3 + $0x34] sm:$0x1]  ;;  %v2662_v26 = vld [vmem:[#allocation3 + $0x38] sm:$0xe]  ;;  %v8682_v27 = vrot.slane %v2660_v20, 9 }
  0xe7   :  { %3302 = vmatmul.mubr.bf16.gmra.mrb[56].mxu0 %v9915_v12  ;;  %9629 = vmatmul.mubr.bf16.gmra.mrb[12].mxu1 %v8581_v59  ;;  %v2899_v13 = vrot.slane %v2897_v4, 5  ;;  %v2663_v29 = vld [vmem:[#allocation3 + $0x3c] sm:$0x1]  ;;  %v2702_v31 = vrot.slane %v2661_v24, 5  ;;  %v8683_v32 = vrot.slane %v2662_v26, 9  ;;  %v2699_v37 = vsel %vm10195_vm11, %v8681_v19, %v2698_v23 }
  0xe8   :  { %9645 = vmatpush3.bf16.msra.mxu1 %v9919_v9  ;;  %v2787_v0 = vld [vmem:[#allocation3 + $0x98] sm:$0xf]  ;;  %v2656_v9 = vld [vmem:[#allocation3 + $0x20] sm:$0xe]  ;;  %v2886_v34 = vsel %vm10201_vm12, %v2881_v1, %v10645_v53  ;;  %9648 = vmatprep.mubr.bf16.mxu1 %v8686_v22  ;;  %v2706_v39 = vrot.slane %v2663_v29, 5 }
  0xe9   :  { %9646 = vmatprep.subr.bf16.mxu1 %v9920_v28  ;;  %v2888_v2 = vshrl.u32 %v2787_v0, 16  ;;  %v2891_v3 = vshll.u32 %v2787_v0, 16  ;;  %v8680_v15 = vrot.slane %v2656_v9, 9  ;;  %v2664_v33 = vld [vmem:[#allocation3 + $0x40] sm:$0xe]  ;;  %v2703_v52 = vsel %vm10195_vm11, %v8682_v27, %v2702_v31 }
  0xea   :  { %v9918_v36 = vld [vmem:[#allocation3 + $0x90] ss:$8 sps:$4 sm:$0xff]   ;;  %v2665_v40 = vld [vmem:[#allocation3 + $0x44] sm:$0x1]  ;;  %v2666_v41 = vld [vmem:[#allocation3 + $0x48] sm:$0xe]  ;;  %v2707_v48 = vsel %vm10195_vm11, %v8683_v32, %v2706_v39 }
  0xeb   :  { %v2890_v11 = vrot.slane %v2888_v2, 4  ;;  %v2893_v12 = vrot.slane %v2891_v3, 5  ;;  %v2667_v43 = vld [vmem:[#allocation3 + $0x4c] sm:$0x1]  ;;  %v8684_v44 = vrot.slane %v2664_v33, 9  ;;  %v2710_v45 = vrot.slane %v2665_v40, 5 }
  0xec   :  { %9647 = vmatpush3.bf16.msra.mxu1 %v9920_v28  ;;  %v2695_v28 = vsel %vm10195_vm11, %v8680_v15, %v2694_v18  ;;  %v2921_v46 = vld [vmem:[#allocation3 + $0x60] sm:$0xe]  ;;  %v8685_v49 = vrot.slane %v2666_v41, 9  ;;  %v2714_v50 = vrot.slane %v2667_v43, 5  ;;  %v2922_v53 = vld [vmem:[#allocation3 + $0x64] sm:$0x1]  ;;  %v8688_v55 = vcombine.low %v2703_v52, %v2707_v48 }
  0xed   :  { %v2894_v21 = vor.u32 %v2893_v12, %v2890_v11  ;;  %v8687_v42 = vcombine.low %v2695_v28, %v2699_v37  ;;  %v2923_v54 = vld [vmem:[#allocation3 + $0x68] sm:$0xe]  ;;  %v2711_v58 = vsel %vm10195_vm11, %v8684_v44, %v2710_v45  ;;  %v2924_v59 = vld [vmem:[#allocation3 + $0x6c] sm:$0x1]  ;;  %v8698_v60 = vrot.slane %v2921_v46, 9 }
  0xee   :  { %v2715_v62 = vsel %vm10195_vm11, %v8685_v49, %v2714_v50  ;;  %v2955_v63 = vrot.slane %v2922_v53, 5  ;;  %v8699_v0 = vrot.slane %v2923_v54, 9  ;;  %v2959_v7 = vrot.slane %v2924_v59, 5  ;;  %v2925_v1 = vld [vmem:[#allocation3 + $0x70] sm:$0xe] }
  0xef   :  { %v2895_v35 = vrot.slane %v2894_v21, 4  ;;  %9649 = vmatmul.mubr.bf16.vlgmr.msra.gmra.mrb[0].mxu1 %v8687_v42  ;;  %v2926_v3 = vld [vmem:[#allocation3 + $0x74] sm:$0x1]  ;;  %v2927_v4 = vld [vmem:[#allocation3 + $0x78] sm:$0xe]  ;;  %v8689_v12 = vcombine.low %v2711_v58, %v2715_v62 }
  0xf0   :  { %9652 = vmatprep.mubr.bf16.mxu1 %v8688_v55  ;;  %v2928_v5 = vld [vmem:[#allocation3 + $0x7c] sm:$0x1]  ;;  %v2956_v8 = vsel %vm10195_vm11, %v8698_v60, %v2955_v63  ;;  %v2960_v9 = vsel %vm10195_vm11, %v8699_v0, %v2959_v7  ;;  %v2929_v10 = vld [vmem:[#allocation3 + $0x80] sm:$0xe]  ;;  %v2930_v11 = vld [vmem:[#allocation3 + $0x84] sm:$0x1] }
  0xf1   :  { %v2900_v47 = vsel %vm10201_vm12, %v2895_v35, %v2899_v13  ;;  %v8700_v13 = vrot.slane %v2925_v1, 9  ;;  %v2931_v14 = vld [vmem:[#allocation3 + $0x88] sm:$0xe]  ;;  %v2932_v15 = vld [vmem:[#allocation3 + $0x8c] sm:$0x1]  ;;  %v8706_v16 = vcombine.low %v2956_v8, %v2960_v9  ;;  %v2963_v17 = vrot.slane %v2926_v3, 5 }
  0xf2   :  { %v8697_v38 = vcombine.low %v2886_v34, %v2900_v47  ;;  %v8701_v18 = vrot.slane %v2927_v4, 9  ;;  %v2967_v19 = vrot.slane %v2928_v5, 5  ;;  %v8702_v20 = vrot.slane %v2929_v10, 9  ;;  %v2933_v29 = vld [vmem:[#allocation3 + $0x90] sm:$0xe]  ;;  %v9922_v3 = vld [vmem:[%s12749_s3 + $0x80] sm:$0xff]  }
  0xf3   :  { %v2971_v21 = vrot.slane %v2930_v11, 5  ;;  %v8703_v22 = vrot.slane %v2931_v14, 9  ;;  %v2975_v23 = vrot.slane %v2932_v15, 5  ;;  %v2964_v27 = vsel %vm10195_vm11, %v8700_v13, %v2963_v17  ;;  %v2934_v31 = vld [vmem:[#allocation3 + $0x94] sm:$0x1]  ;;  %v9923_v4 = vld [vmem:[%s12749_s3 + $0xc8] sm:$0xff]  }
  0xf4   :  { %3309 = vmatprep.mubr.bf16.mxu0 %v8697_v38  ;;  %v2968_v28 = vsel %vm10195_vm11, %v8701_v18, %v2967_v19  ;;  %v2936_v37 = vld [vmem:[#allocation3 + $0x9c] sm:$0x1]  ;;  %v8704_v52 = vrot.slane %v2933_v29, 9  ;;  %v2979_v43 = vrot.slane %v2934_v31, 5  ;;  %v9924_v8 = vld [vmem:[%s12749_s3 + $0x88] sm:$0xff]   ;;  %v9926_v29 = vld [vmem:[%s12749_s3 + $0x90] sm:$0xff]  }
  0xf5   :  { %3310 = vmatmul.mubr.bf16.gmra.mrb[60].mxu0 %v9918_v36  ;;  %v2972_v34 = vsel %vm10195_vm11, %v8702_v20, %v2971_v21  ;;  %v2976_v35 = vsel %vm10195_vm11, %v8703_v22, %v2975_v23  ;;  %v2935_v36 = vld [vmem:[#allocation3 + $0x98] sm:$0xe]  ;;  %v8707_v42 = vcombine.low %v2964_v27, %v2968_v28  ;;  %v2983_v47 = vrot.slane %v2936_v37, 5 }
  0xf6   :  { %v8708_v45 = vcombine.low %v2972_v34, %v2976_v35  ;;  %v8705_v46 = vrot.slane %v2935_v36, 9  ;;  %v2980_v49 = vsel %vm10195_vm11, %v8704_v52, %v2979_v43 }
  0xf7   :  { %9653 = vmatmul.mubr.bf16.gmra.mrb[4].mxu1 %v8689_v12 }
  0xf8   :  { %9656 = vmatprep.mubr.bf16.mxu1 %v8706_v16  ;;  %v2984_v50 = vsel %vm10195_vm11, %v8705_v46, %v2983_v47  ;;  %v9927_v47 = vld [vmem:[%s12749_s3 + $0xd8] sm:$0xff]  }
  0xf9   :  { %v8709_v53 = vcombine.low %v2980_v49, %v2984_v50  ;;  %v175_v49 = vld [vmem:[#allocation4 + $0x8] sm:$0x1]  ;;  %v235_v50 = vld [vmem:[#allocation4 + $0xc] sm:$0x1] }
  0xff   :  { %9657 = vmatmul.mubr.bf16.gmra.mrb[8].mxu1 %v8707_v42 }
 0x100   :  { %9660 = vmatprep.mubr.bf16.mxu1 %v8708_v45  ;;  %v9930_v45 = vld [vmem:[%s12749_s3] sm:$0xff]  }
 0x102   :  { %v9120_v61 = vpop.f32.mrb[0].mxu0 }
 0x103   :  { %v9121_v2 = vpop.f32.mrb[1].mxu0 }
 0x104   :  { %v10672_v6 = vadd.f32 %v9121_v2, %v9120_v61  ;;  %v9123_v24 = vpop.f32.mrb[2].mxu0  ;;  %v9921_v2 = vld [vmem:[%s12749_s3 + $0xc0] sm:$0xff]  }
 0x105   :  { %v9124_v26 = vpop.f32.mrb[3].mxu0  ;;  %9344 = vmatprep.subr.bf16.mxu0 %v9921_v2  ;;  %v178_v2 = vld [vmem:[#allocation4 + $0x10] sm:$0x1] }
 0x106   :  { %v9125_v32 = vadd.f32 %v9124_v26, %v9123_v24  ;;  %9345 = vmatpush3.bf16.msra.mxu0 %v9922_v3  ;;  %v9925_v24 = vld [vmem:[%s12749_s3 + $0xd0] sm:$0xff]  }
 0x107   :  { %9661 = vmatmul.mubr.bf16.gmra.mrb[12].mxu1 %v8709_v53  ;;  %9346 = vmatprep.subr.bf16.mxu0 %v9923_v4 }
 0x10a   :  { %9347 = vmatpush3.bf16.msra.mxu0 %v9924_v8  ;;  %v179_v8 = vsel %vm10114_vm2, 0, %v178_v2  ;;  %v9942_v2 = vld [vmem:[%s12749_s3 + $0x20] sm:$0xff]  }
 0x10b   :  { %9348 = vmatprep.subr.bf16.mxu0 %v9925_v24  ;;  %180 = vst [vmem:[#allocation4 + $0x10] sm:$0x1] %v179_v8 }
 0x10c   :  { %v9126_v33 = vpop.f32.mrb[4].mxu0 }
 0x10d   :  { %v9127_v39 = vpop.f32.mrb[5].mxu0 }
 0x10e   :  { %v10686_v40 = vadd.f32 %v9127_v39, %v9126_v33  ;;  %v9129_v41 = vpop.f32.mrb[6].mxu0  ;;  %9349 = vmatpush3.bf16.msra.mxu0 %v9926_v29  ;;  %v241_v33 = vld [vmem:[#allocation4 + $0x1c] sm:$0x1] }
 0x10f   :  { %v9130_v44 = vpop.f32.mrb[7].mxu0  ;;  %v242_v36 = vsel %vm10124_vm4, 0, %v241_v33  ;;  %9350 = vmatprep.subr.bf16.mxu0 %v9927_v47 }
 0x110   :  { %v10688_v48 = vadd.f32 %v9130_v44, %v9129_v41  ;;  %243 = vst [vmem:[#allocation4 + $0x1c] sm:$0x1] %v242_v36  ;;  %v9929_v44 = vld [vmem:[%s12749_s3 + $0x40] sm:$0xff]  }
 0x111   :  { %9408 = vmatprep.subr.bf16.mxu1 %v9929_v44  ;;  %v9932_v36 = vld [vmem:[%s12749_s3 + $0xa0] sm:$0xff]  }
 0x112   :  { %9409 = vmatpush3.bf16.msra.mxu1 %v9930_v45 }
 0x121   :  { %v9132_v54 = vpop.f32.mrb[8].mxu0 }
 0x122   :  { %v9133_v38 = vpop.f32.mrb[9].mxu0 }
 0x123   :  { %v10694_v55 = vadd.f32 %v9133_v38, %v9132_v54  ;;  %v9135_v58 = vpop.f32.mrb[10].mxu0  ;;  %v176_v38 = vsel %vm10114_vm2, 0, %v175_v49  ;;  %v9940_v49 = vld [vmem:[%s12749_s3 + $0x18] sm:$0xff]  }
 0x124   :  { %v9136_v59 = vpop.f32.mrb[11].mxu0  ;;  %177 = vst [vmem:[#allocation4 + $0x8] sm:$0x1] %v176_v38 }
 0x125   :  { %v10696_v60 = vadd.f32 %v9136_v59, %v9135_v58  ;;  %v236_v58 = vsel %vm10124_vm4, 0, %v235_v50  ;;  %v184_v59 = vld [vmem:[#allocation4 + $0x20] sm:$0x1] }
 0x126   :  { %237 = vst [vmem:[#allocation4 + $0xc] sm:$0x1] %v236_v58  ;;  %v9941_v50 = vld [vmem:[%s12749_s3 + $0x60] sm:$0xff]   ;;  %v211_v58 = vld [vmem:[#allocation4 + $0x68] sm:$0x1] }
 0x139   :  { %v9138_v61 = vpop.f32.mrb[12].mxu0 }
 0x13a   :  { %v9139_v62 = vpop.f32.mrb[13].mxu0 }
 0x13b   :  { %v10698_v63 = vadd.f32 %v9139_v62, %v9138_v61  ;;  %v9141_v0 = vpop.f32.mrb[14].mxu0  ;;  %v9933_v61 = vld [vmem:[%s12749_s3 + $0x48] sm:$0xff]  }
 0x13c   :  { %v9142_v7 = vpop.f32.mrb[15].mxu0  ;;  %9410 = vmatprep.subr.bf16.mxu1 %v9933_v61 }
 0x13d   :  { %v10700_v1 = vadd.f32 %v9142_v7, %v9141_v0  ;;  %v185_v0 = vsel %vm10114_vm2, 0, %v184_v59  ;;  %v244_v7 = vld [vmem:[#allocation4 + $0x24] sm:$0x1]  ;;  %v271_v59 = vld [vmem:[#allocation4 + $0x6c] sm:$0x1] }
 0x13e   :  { %186 = vst [vmem:[#allocation4 + $0x20] sm:$0x1] %v185_v0  ;;  %v272_v0 = vsel %vm10124_vm4, 0, %v271_v59 }
 0x13f   :  { %273 = vst [vmem:[#allocation4 + $0x6c] sm:$0x1] %v272_v0 }
 0x152   :  { %v9144_v5 = vpop.f32.mrb[16].mxu0 }
 0x153   :  { %v9145_v9 = vpop.f32.mrb[17].mxu0 }
 0x154   :  { %v10714_v10 = vadd.f32 %v9145_v9, %v9144_v5  ;;  %v9147_v11 = vpop.f32.mrb[18].mxu0  ;;  %v245_v5 = vsel %vm10124_vm4, 0, %v244_v7  ;;  %v238_v9 = vld [vmem:[#allocation4 + $0x14] sm:$0x1]  ;;  %v205_v7 = vld [vmem:[#allocation4 + $0x58] sm:$0x1] }
 0x155   :  { %v9148_v12 = vpop.f32.mrb[19].mxu0  ;;  %246 = vst [vmem:[#allocation4 + $0x24] sm:$0x1] %v245_v5  ;;  %v206_v8 = vsel %vm10114_vm2, 0, %v205_v7  ;;  %v232_v7 = vld [vmem:[#allocation4 + $0x4] sm:$0x1] }
 0x156   :  { %v10716_v13 = vadd.f32 %v9148_v12, %v9147_v11  ;;  %v9934_v11 = vld [vmem:[%s12749_s3 + $0x8] sm:$0xff]   ;;  %207 = vst [vmem:[#allocation4 + $0x58] sm:$0x1] %v206_v8 }
 0x157   :  { %9411 = vmatpush3.bf16.msra.mxu1 %v9934_v11 }
 0x15d   :  { %v9200_v14 = vpop.f32.mrb[16].mxu1 }
 0x15e   :  { %v9201_v15 = vpop.f32.mrb[17].mxu1  ;;  %v9150_v21 = vpop.f32.mrb[20].mxu0 }
 0x15f   :  { %v9202_v16 = vadd.f32 %v9201_v15, %v9200_v14  ;;  %v9203_v17 = vpop.f32.mrb[18].mxu1  ;;  %v9151_v23 = vpop.f32.mrb[21].mxu0  ;;  %v239_v14 = vsel %vm10124_vm4, 0, %v238_v9  ;;  %v193_v15 = vld [vmem:[#allocation4 + $0x38] sm:$0x1] }
 0x160   :  { %v9204_v18 = vpop.f32.mrb[19].mxu1  ;;  %v10726_v26 = vadd.f32 %v9151_v23, %v9150_v21  ;;  %v9153_v27 = vpop.f32.mrb[22].mxu0  ;;  %240 = vst [vmem:[#allocation4 + $0x14] sm:$0x1] %v239_v14  ;;  %v9935_v23 = vld [vmem:[%s12749_s3 + $0x50] sm:$0xff]  }
 0x161   :  { %v10719_v19 = vadd.f32 %v9202_v16, %v10672_v6  ;;  %v9205_v20 = vadd.f32 %v9204_v18, %v9203_v17  ;;  %v9154_v28 = vpop.f32.mrb[23].mxu0  ;;  %v253_v16 = vld [vmem:[#allocation4 + $0x3c] sm:$0x1]  ;;  %9412 = vmatprep.subr.bf16.mxu1 %v9935_v23  ;;  %v214_v14 = vld [vmem:[#allocation4 + $0x70] sm:$0x1] }
 0x162   :  { %v10731_v6 = vadd.f32 %v9154_v28, %v9153_v27  ;;  %v254_v21 = vsel %vm10124_vm4, 0, %v253_v16  ;;  %v9936_v27 = vld [vmem:[%s12749_s3 + $0x10] sm:$0xff]   ;;  %v265_v9 = vld [vmem:[#allocation4 + $0x5c] sm:$0x1] }
 0x163   :  { %v10721_v22 = vadd.f32 %v9205_v20, %v9125_v32  ;;  %v181_v32 = vld [vmem:[#allocation4 + $0x18] sm:$0x1]  ;;  %v194_v20 = vsel %vm10114_vm2, 0, %v193_v15  ;;  %255 = vst [vmem:[#allocation4 + $0x3c] sm:$0x1] %v254_v21  ;;  %9413 = vmatpush3.bf16.msra.mxu1 %v9936_v27  ;;  %v9945_v27 = vld [vmem:[%s12749_s3 + $0x68] sm:$0xff]  }
 0x164   :  { %v182_v35 = vsel %vm10114_vm2, 0, %v181_v32  ;;  %195 = vst [vmem:[#allocation4 + $0x38] sm:$0x1] %v194_v20  ;;  %v247_v32 = vld [vmem:[#allocation4 + $0x2c] sm:$0x1]  ;;  %v215_v20 = vsel %vm10114_vm2, 0, %v214_v14 }
 0x165   :  { %v9206_v31 = vpop.f32.mrb[20].mxu1  ;;  %183 = vst [vmem:[#allocation4 + $0x18] sm:$0x1] %v182_v35  ;;  %216 = vst [vmem:[#allocation4 + $0x70] sm:$0x1] %v215_v20 }
 0x166   :  { %v9207_v34 = vpop.f32.mrb[21].mxu1  ;;  %v274_v23 = vld [vmem:[#allocation4 + $0x74] sm:$0x1]  ;;  %v220_v20 = vld [vmem:[#allocation4 + $0x80] sm:$0x1] }
 0x167   :  { %v9208_v37 = vadd.f32 %v9207_v34, %v9206_v31  ;;  %v9209_v39 = vpop.f32.mrb[22].mxu1  ;;  %v187_v31 = vld [vmem:[#allocation4 + $0x28] sm:$0x1]  ;;  %v9931_v34 = vld [vmem:[%s12749_s3 + $0xe0] sm:$0xff]  }
 0x168   :  { %v9210_v41 = vpop.f32.mrb[23].mxu1  ;;  %v9156_v46 = vpop.f32.mrb[24].mxu0  ;;  %v188_v35 = vsel %vm10114_vm2, 0, %v187_v31 }
 0x169   :  { %v10738_v42 = vadd.f32 %v9208_v37, %v10686_v40  ;;  %v9211_v52 = vadd.f32 %v9210_v41, %v9209_v39  ;;  %v9157_v40 = vpop.f32.mrb[25].mxu0  ;;  %189 = vst [vmem:[#allocation4 + $0x28] sm:$0x1] %v188_v35  ;;  %v196_v37 = vld [vmem:[#allocation4 + $0x40] sm:$0x1]  ;;  %v9939_v39 = vld [vmem:[%s12749_s3 + $0x58] sm:$0xff]  }
 0x16a   :  { %v10755_v53 = vadd.f32 %v9157_v40, %v9156_v46  ;;  %v9159_v54 = vpop.f32.mrb[26].mxu0  ;;  %v256_v41 = vld [vmem:[#allocation4 + $0x44] sm:$0x1]  ;;  %9414 = vmatprep.subr.bf16.mxu1 %v9939_v39  ;;  %v250_v40 = vld [vmem:[#allocation4 + $0x34] sm:$0x1] }
 0x16b   :  { %v10741_v43 = vadd.f32 %v9211_v52, %v10688_v48  ;;  %v9928_v48 = vld [vmem:[%s12749_s3 + $0x98] sm:$0xff]   ;;  %v9160_v62 = vpop.f32.mrb[27].mxu0  ;;  %v190_v52 = vld [vmem:[#allocation4 + $0x30] sm:$0x1]  ;;  %v257_v45 = vsel %vm10124_vm4, 0, %v256_v41  ;;  %v251_v38 = vsel %vm10124_vm4, 0, %v250_v40  ;;  %9415 = vmatpush3.bf16.msra.mxu1 %v9940_v49 }
 0x16c   :  { %9351 = vmatpush3.bf16.msra.mxu0 %v9928_v48  ;;  %v10766_v4 = vadd.f32 %v9160_v62, %v9159_v54  ;;  %258 = vst [vmem:[#allocation4 + $0x44] sm:$0x1] %v257_v45  ;;  %v191_v47 = vsel %vm10114_vm2, 0, %v190_v52  ;;  %252 = vst [vmem:[#allocation4 + $0x34] sm:$0x1] %v251_v38  ;;  %v212_v62 = vsel %vm10114_vm2, 0, %v211_v58  ;;  %9416 = vmatprep.subr.bf16.mxu1 %v9941_v50 }
 0x16d   :  { %v9212_v3 = vpop.f32.mrb[24].mxu1  ;;  %9352 = vmatprep.subr.bf16.mxu0 %v9931_v34  ;;  %192 = vst [vmem:[#allocation4 + $0x30] sm:$0x1] %v191_v47  ;;  %213 = vst [vmem:[#allocation4 + $0x68] sm:$0x1] %v212_v62  ;;  %v9943_v41 = vld [vmem:[%s12749_s3 + $0xf0] sm:$0xff]  }
 0x16e   :  { %v9213_v12 = vpop.f32.mrb[25].mxu1  ;;  %v268_v35 = vld [vmem:[#allocation4 + $0x64] sm:$0x1]  ;;  %v217_v52 = vld [vmem:[#allocation4 + $0x78] sm:$0x1]  ;;  %v9944_v45 = vld [vmem:[%s12749_s3 + $0xb0] sm:$0xff]  }
 0x16f   :  { %v9214_v17 = vadd.f32 %v9213_v12, %v9212_v3  ;;  %v9215_v18 = vpop.f32.mrb[26].mxu1  ;;  %v266_v12 = vsel %vm10124_vm4, 0, %v265_v9  ;;  %9417 = vmatpush3.bf16.msra.mxu1 %v9942_v2  ;;  %v226_v47 = vld [vmem:[#allocation4 + $0x90] sm:$0x1]  ;;  %v286_v49 = vld [vmem:[#allocation4 + $0x94] sm:$0x1] }
 0x170   :  { %v9216_v24 = vpop.f32.mrb[27].mxu1  ;;  %9353 = vmatpush3.bf16.msra.mxu0 %v9932_v36  ;;  %267 = vst [vmem:[#allocation4 + $0x5c] sm:$0x1] %v266_v12  ;;  %9418 = vmatprep.subr.bf16.mxu1 %v9945_v27  ;;  %v227_v40 = vsel %vm10114_vm2, 0, %v226_v47  ;;  %v9948_v27 = vld [vmem:[%s12749_s3 + $0x30] sm:$0xff]  }
 0x171   :  { %v10788_v28 = vadd.f32 %v9214_v17, %v10694_v55  ;;  %v9217_v29 = vadd.f32 %v9216_v24, %v9215_v18  ;;  %v248_v55 = vsel %vm10124_vm4, 0, %v247_v32  ;;  %v9937_v17 = vld [vmem:[%s12749_s3 + $0xe8] sm:$0xff]   ;;  %v208_v24 = vld [vmem:[#allocation4 + $0x60] sm:$0x1]  ;;  %v275_v32 = vsel %vm10124_vm4, 0, %v274_v23 }
 0x172   :  { %249 = vst [vmem:[#allocation4 + $0x2c] sm:$0x1] %v248_v55  ;;  %v9938_v18 = vld [vmem:[%s12749_s3 + $0xa8] sm:$0xff]   ;;  %9354 = vmatprep.subr.bf16.mxu0 %v9937_v17  ;;  %v209_v34 = vsel %vm10114_vm2, 0, %v208_v24  ;;  %276 = vst [vmem:[#allocation4 + $0x74] sm:$0x1] %v275_v32 }
 0x173   :  { %v10791_v33 = vadd.f32 %v9217_v29, %v10696_v60  ;;  %v197_v60 = vsel %vm10114_vm2, 0, %v196_v37  ;;  %210 = vst [vmem:[#allocation4 + $0x60] sm:$0x1] %v209_v34  ;;  %v269_v55 = vsel %vm10124_vm4, 0, %v268_v35  ;;  %v283_v37 = vld [vmem:[#allocation4 + $0x8c] sm:$0x1] }
 0x174   :  { %198 = vst [vmem:[#allocation4 + $0x40] sm:$0x1] %v197_v60  ;;  %v9162_v44 = vpop.f32.mrb[28].mxu0  ;;  %9355 = vmatpush3.bf16.msra.mxu0 %v9938_v18  ;;  %270 = vst [vmem:[#allocation4 + $0x64] sm:$0x1] %v269_v55  ;;  %v284_v39 = vsel %vm10124_vm4, 0, %v283_v37 }
 0x175   :  { %v9163_v46 = vpop.f32.mrb[29].mxu0  ;;  %285 = vst [vmem:[#allocation4 + $0x8c] sm:$0x1] %v284_v39  ;;  %9356 = vmatprep.subr.bf16.mxu0 %v9943_v41  ;;  %228 = vst [vmem:[#allocation4 + $0x90] sm:$0x1] %v227_v40  ;;  %v9950_v34 = vld [vmem:[%s12749_s3 + $0xb8] sm:$0xff]  }
 0x176   :  { %v10818_v48 = vadd.f32 %v9163_v46, %v9162_v44  ;;  %v9165_v54 = vpop.f32.mrb[30].mxu0  ;;  %v277_v44 = vld [vmem:[#allocation4 + $0x7c] sm:$0x1]  ;;  %v280_v23 = vld [vmem:[#allocation4 + $0x84] sm:$0x1] }
 0x177   :  { %v9166_v61 = vpop.f32.mrb[31].mxu0  ;;  %v9218_v3 = vpop.f32.mrb[28].mxu1  ;;  %v278_v46 = vsel %vm10124_vm4, 0, %v277_v44  ;;  %v9951_v35 = vld [vmem:[%s12749_s3 + $0x78] sm:$0xff]  }
 0x178   :  { %v10829_v5 = vadd.f32 %v9166_v61, %v9165_v54  ;;  %v9219_v11 = vpop.f32.mrb[29].mxu1  ;;  %279 = vst [vmem:[#allocation4 + $0x7c] sm:$0x1] %v278_v46  ;;  %9357 = vmatpush3.bf16.msra.mxu0 %v9944_v45  ;;  %v287_v54 = vsel %vm10124_vm4, 0, %v286_v49  ;;  %v9952_v45 = vld [vmem:[%s12749_s3 + $0x38] sm:$0xff]  }
 0x179   :  { %v9220_v15 = vadd.f32 %v9219_v11, %v9218_v3  ;;  %v9221_v16 = vpop.f32.mrb[30].mxu1  ;;  %288 = vst [vmem:[#allocation4 + $0x94] sm:$0x1] %v287_v54  ;;  %v233_v3 = vsel %vm10124_vm4, 0, %v232_v7 }
 0x17a   :  { %v9222_v21 = vpop.f32.mrb[31].mxu1  ;;  %234 = vst [vmem:[#allocation4 + $0x4] sm:$0x1] %v233_v3 }
 0x17b   :  { %v10847_v29 = vadd.f32 %v9220_v15, %v10698_v63  ;;  %v9223_v31 = vadd.f32 %v9222_v21, %v9221_v16  ;;  %v223_v63 = vld [vmem:[#allocation4 + $0x88] sm:$0x1]  ;;  %v172_v15 = vld [vmem:[#allocation4] sm:$0x1]  ;;  %v221_v21 = vsel %vm10114_vm2, 0, %v220_v20 }
 0x17c   :  { %v224_v60 = vsel %vm10114_vm2, 0, %v223_v63  ;;  %222 = vst [vmem:[#allocation4 + $0x80] sm:$0x1] %v221_v21 }
 0x17d   :  { %v10856_v36 = vadd.f32 %v9223_v31, %v10700_v1  ;;  %225 = vst [vmem:[#allocation4 + $0x88] sm:$0x1] %v224_v60  ;;  %v218_v1 = vsel %vm10114_vm2, 0, %v217_v52  ;;  %v9949_v31 = vld [vmem:[%s12749_s3 + $0xf8] sm:$0xff]  }
 0x17e   :  { %219 = vst [vmem:[#allocation4 + $0x78] sm:$0x1] %v218_v1  ;;  %9358 = vmatprep.subr.bf16.mxu0 %v9949_v31 }
 0x17f   :  { %9359 = vmatpush3.bf16.msra.mxu0 %v9950_v34 }
 0x182   :  { %v9224_v2 = vpop.f32.mrb[32].mxu1 }
 0x183   :  { %v9225_v8 = vpop.f32.mrb[33].mxu1 }
 0x184   :  { %v9280_v50 = vpop.f32.mrb[32].mxu0  ;;  %v9226_v11 = vadd.f32 %v9225_v8, %v9224_v2  ;;  %v9227_v12 = vpop.f32.mrb[34].mxu1 }
 0x185   :  { %v9281_v38 = vpop.f32.mrb[33].mxu0  ;;  %v9228_v14 = vpop.f32.mrb[35].mxu1 }
 0x186   :  { %v9282_v58 = vadd.f32 %v9281_v38, %v9280_v50  ;;  %v9283_v59 = vpop.f32.mrb[34].mxu0  ;;  %v10885_v16 = vadd.f32 %v9226_v11, %v10714_v10  ;;  %v9229_v17 = vadd.f32 %v9228_v14, %v9227_v12  ;;  %v9947_v10 = vld [vmem:[%s12749_s3 + $0x70] sm:$0xff]   ;;  %v10937_v12 = vld [vmem:[%s12749_s3 + $0x100] sm:$0xff]  }
 0x187   :  { %v9284_v61 = vpop.f32.mrb[35].mxu0  ;;  %9664 = vmatprep.subr.bf16.mxu0 %v10937_v12 }
 0x188   :  { %v9285_v62 = vadd.f32 %v9284_v61, %v9283_v59  ;;  %v10877_v0 = vadd.f32 %v10719_v19, %v9282_v58  ;;  %v173_v19 = vsel %vm10114_vm2, 0, %v172_v15  ;;  %v10890_v18 = vadd.f32 %v9229_v17, %v10716_v13 }
 0x189   :  { %174 = vst [vmem:[#allocation4] sm:$0x1] %v173_v19  ;;  %v281_v13 = vsel %vm10124_vm4, 0, %v280_v23 }
 0x18a   :  { %v10882_v9 = vadd.f32 %v10721_v22, %v9285_v62  ;;  %v9946_v22 = vld [vmem:[%s12749_s3 + $0x28] sm:$0xff]   ;;  %v9230_v24 = vpop.f32.mrb[36].mxu1  ;;  %282 = vst [vmem:[#allocation4 + $0x84] sm:$0x1] %v281_v13 }
 0x18b   :  { %9419 = vmatpush3.bf16.msra.mxu1 %v9946_v22  ;;  %v9231_v32 = vpop.f32.mrb[37].mxu1 }
 0x18c   :  { %9420 = vmatprep.subr.bf16.mxu1 %v9947_v10  ;;  %v9286_v55 = vpop.f32.mrb[36].mxu0  ;;  %v9232_v63 = vadd.f32 %v9231_v32, %v9230_v24  ;;  %v9233_v37 = vpop.f32.mrb[38].mxu1 }
 0x18d   :  { %v9287_v60 = vpop.f32.mrb[37].mxu0  ;;  %v9234_v39 = vpop.f32.mrb[39].mxu1 }
 0x18e   :  { %v10915_v41 = vadd.f32 %v9232_v63, %v10726_v26  ;;  %v9288_v52 = vadd.f32 %v9287_v60, %v9286_v55  ;;  %v9289_v1 = vpop.f32.mrb[38].mxu0  ;;  %v9235_v44 = vadd.f32 %v9234_v39, %v9233_v37  ;;  %v199_v37 = vld [vmem:[#allocation4 + $0x48] sm:$0x1]  ;;  %v259_v60 = vld [vmem:[#allocation4 + $0x4c] sm:$0x1] }
 0x18f   :  { %9421 = vmatpush3.bf16.msra.mxu1 %v9948_v27  ;;  %v9290_v46 = vpop.f32.mrb[39].mxu0 }
 0x190   :  { %9422 = vmatprep.subr.bf16.mxu1 %v9951_v35  ;;  %v9774_v47 = vadd.f32 %v9235_v44, %v10731_v6  ;;  %v9291_v40 = vadd.f32 %v9290_v46, %v9289_v1  ;;  %v10922_v49 = vadd.f32 %v10738_v42, %v9288_v52 }
 0x192   :  { %v9236_v50 = vpop.f32.mrb[40].mxu1  ;;  %v10925_v26 = vadd.f32 %v10741_v43, %v9291_v40 }
 0x193   :  { %9423 = vmatpush3.bf16.msra.mxu1 %v9952_v45  ;;  %v9237_v54 = vpop.f32.mrb[41].mxu1 }
 0x194   :  { %v9238_v38 = vadd.f32 %v9237_v54, %v9236_v50  ;;  %v9239_v58 = vpop.f32.mrb[42].mxu1  ;;  %v9292_v61 = vpop.f32.mrb[40].mxu0 }
 0x195   :  { %v9240_v59 = vpop.f32.mrb[43].mxu1  ;;  %v9293_v2 = vpop.f32.mrb[41].mxu0 }
 0x196   :  { %v10928_v62 = vadd.f32 %v9238_v38, %v10755_v53  ;;  %v9241_v7 = vadd.f32 %v9240_v59, %v9239_v58  ;;  %v9294_v6 = vadd.f32 %v9293_v2, %v9292_v61  ;;  %v9295_v3 = vpop.f32.mrb[42].mxu0  ;;  %v262_v59 = vld [vmem:[#allocation4 + $0x54] sm:$0x1] }
 0x197   :  { %v9296_v8 = vpop.f32.mrb[43].mxu0 }
 0x198   :  { %v9789_v42 = vadd.f32 %v9241_v7, %v10766_v4  ;;  %v9297_v11 = vadd.f32 %v9296_v8, %v9295_v3  ;;  %v10932_v43 = vadd.f32 %v10788_v28, %v9294_v6  ;;  %v263_v3 = vsel %vm10124_vm4, 0, %v262_v59 }
 0x199   :  { %264 = vst [vmem:[#allocation4 + $0x54] sm:$0x1] %v263_v3 }
 0x19a   :  { %v9242_v14 = vpop.f32.mrb[44].mxu1  ;;  %v10940_v53 = vadd.f32 %v10791_v33, %v9297_v11 }
 0x19b   :  { %v9243_v15 = vpop.f32.mrb[45].mxu1 }
 0x19c   :  { %v9244_v17 = vadd.f32 %v9243_v15, %v9242_v14  ;;  %v9245_v19 = vpop.f32.mrb[46].mxu1 }
 0x19d   :  { %v9246_v4 = vpop.f32.mrb[47].mxu1 }
 0x19e   :  { %v10944_v22 = vadd.f32 %v9244_v17, %v10818_v48  ;;  %v9247_v28 = vadd.f32 %v9246_v4, %v9245_v19  ;;  %v27_v17 = vlaneseq }
 0x1a0   :  { %v10947_v20 = vadd.f32 %v9247_v28, %v10829_v5  ;;  %v3798_v28 = vld [vmem:[#allocation4 + $0x4] sm:$0x1] }
 0x1a2   :  { %v9298_v21 = vpop.f32.mrb[44].mxu0 }
 0x1a3   :  { %v9299_v23 = vpop.f32.mrb[45].mxu0 }
 0x1a4   :  { %v9300_v10 = vadd.f32 %v9299_v23, %v9298_v21  ;;  %v9301_v24 = vpop.f32.mrb[46].mxu0 }
 0x1a5   :  { %v9302_v13 = vpop.f32.mrb[47].mxu0 }
 0x1a6   :  { %v9303_v27 = vadd.f32 %v9302_v13, %v9301_v24  ;;  %v10950_v33 = vadd.f32 %v10847_v29, %v9300_v10  ;;  %v200_v29 = vsel %vm10114_vm2, 0, %v199_v37  ;;  %v10985_v24 = vand.u32 127, %v27_v17  ;;  %v3963_v13 = vld [vmem:[#allocation4] sm:$0xe]  ;;  %v202_v37 = vld [vmem:[#allocation4 + $0x50] sm:$0x1] }
 0x1a7   :  { %201 = vst [vmem:[#allocation4 + $0x48] sm:$0x1] %v200_v29 }
 0x1a8   :  { %v10953_v31 = vadd.f32 %v10856_v36, %v9303_v27  ;;  %v260_v36 = vsel %vm10124_vm4, 0, %v259_v60  ;;  %v3964_v27 = vld [vmem:[#allocation4 + $0x4] sm:$0x1]  ;;  %vm3776_vm13 = vcmp.lt.s32.totalorder %v10985_v24, 64  ;;  %vm3795_vm15 = vcmp.ge.s32.totalorder %v10985_v24, 64 }
 0x1a9   :  { %261 = vst [vmem:[#allocation4 + $0x4c] sm:$0x1] %v260_v36  ;;  %v203_v36 = vsel %vm10114_vm2, 0, %v202_v37  ;;  %vm10999_vm14 = vmpackc.low %vm3776_vm13, %vm3776_vm13  ;;  %vm6469_vm1 = vcmp.lt.s32.totalorder %v10985_v24, 32  ;;  %vm6627_vm5 = vcmp.lt.s32.totalorder %v10985_v24, 96 }
 0x1aa   :  { %v9304_v32 = vpop.f32.mrb[48].mxu0  ;;  %204 = vst [vmem:[#allocation4 + $0x50] sm:$0x1] %v203_v36  ;;  %vm11030_vm0 = vmpackc.low %vm3795_vm15, %vm3795_vm15 }
 0x1ab   :  { %v9305_v34 = vpop.f32.mrb[49].mxu0  ;;  %vm11947_vm3 = vmpackc.low %vm6469_vm1, %vm6469_vm1 }
 0x1ac   :  { %v9306_v48 = vadd.f32 %v9305_v34, %v9304_v32  ;;  %v9307_v35 = vpop.f32.mrb[50].mxu0  ;;  %v3816_v34 = vshll.u32 %v3798_v28, 16  ;;  %vm12134_vm7 = vmand %vm3795_vm15, %vm6627_vm5 }
 0x1ad   :  { %v9308_v55 = vpop.f32.mrb[51].mxu0  ;;  %vm12166_vm9 = vmpackc.low %vm12134_vm7, %vm12134_vm7 }
 0x1ae   :  { %v9309_v63 = vadd.f32 %v9308_v55, %v9307_v35  ;;  %v10956_v5 = vadd.f32 %v10885_v16, %v9306_v48  ;;  %v10972_v38 = vld [vmem:[#allocation4 + $0x48] sm:$0xf]  ;;  %v4268_v55 = vld [vmem:[#allocation4 + $0x50] sm:$0xe]  ;;  %v3818_v29 = vrot.slane %v3816_v34, 5 }
 0x1af   :  { %v4812_v8 = vshll.u32 %v10972_v38, 16  ;;  %v4701_v3 = vsel %vm10999_vm14, %v10972_v38, 0 }
 0x1b0   :  { %v10959_v39 = vadd.f32 %v10890_v18, %v9309_v63  ;;  %v10970_v18 = vld [vmem:[#allocation4] sm:$0xf]  ;;  %v4709_v10 = vld [vmem:[#allocation4 + $0x4c] sm:$0x1]  ;;  %v8755_v63 = vrot.slane %v3963_v13, 9 }
 0x1b1   :  { %v3807_v2 = vshrl.u32 %v10970_v18, 16  ;;  %v3810_v6 = vshll.u32 %v10970_v18, 16  ;;  %v4814_v23 = vrot.slane %v4812_v8, 5  ;;  %v4818_v35 = vshll.u32 %v4709_v10, 16 }
 0x1b2   :  { %v9310_v52 = vpop.f32.mrb[52].mxu0 }
 0x1b3   :  { %v9311_v1 = vpop.f32.mrb[53].mxu0  ;;  %v3809_v19 = vrot.slane %v3807_v2, 4  ;;  %v3812_v4 = vrot.slane %v3810_v6, 5 }
 0x1b4   :  { %v9312_v44 = vadd.f32 %v9311_v1, %v9310_v52  ;;  %v9313_v45 = vpop.f32.mrb[54].mxu0  ;;  %v4820_v1 = vrot.slane %v4818_v35, 5  ;;  %v11050_v35 = vld [vmem:[#allocation4 + $0x50] sm:$0xf] }
 0x1b5   :  { %v9314_v46 = vpop.f32.mrb[55].mxu0  ;;  %v3813_v32 = vor.u32 %v3812_v4, %v3809_v19  ;;  %v4113_v36 = vshrl.u32 %v11050_v35, 16 }
 0x1b6   :  { %v9315_v16 = vadd.f32 %v9314_v46, %v9313_v45  ;;  %v10966_v40 = vadd.f32 %v10915_v41, %v9312_v44  ;;  %v8771_v44 = vrot.slane %v4268_v55, 9 }
 0x1b7   :  { %v3814_v60 = vrot.slane %v3813_v32, 4 }
 0x1b8   :  { %v10968_v50 = vadd.f32 %v9774_v47, %v9315_v16  ;;  %v4809_v47 = vshrl.u32 %v10972_v38, 16  ;;  %v10993_v16 = vld [vmem:[%s12750_s2] ss:$0 sm:$0xff] }
 0x1b9   :  { %v3819_v6 = vsel %vm10201_vm12, %v3814_v60, %v3818_v29 }
 0x1ba   :  { %v9316_v54 = vpop.f32.mrb[56].mxu0  ;;  %v4811_v21 = vrot.slane %v4809_v47, 4 }
 0x1bb   :  { %v9317_v58 = vpop.f32.mrb[57].mxu0 }
 0x1bc   :  { %v9318_v61 = vadd.f32 %v9317_v58, %v9316_v54  ;;  %v9319_v7 = vpop.f32.mrb[58].mxu0  ;;  %v4815_v48 = vor.u32 %v4814_v23, %v4811_v21 }
 0x1bd   :  { %v9320_v41 = vpop.f32.mrb[59].mxu0 }
 0x1be   :  { %v9321_v11 = vadd.f32 %v9320_v41, %v9319_v7  ;;  %v10981_v14 = vadd.f32 %v10928_v62, %v9318_v61  ;;  %v4269_v62 = vld [vmem:[#allocation4 + $0x54] sm:$0x1]  ;;  %v4816_v52 = vrot.slane %v4815_v48, 4 }
 0x1bf   :  { %v4302_v45 = vrot.slane %v4269_v62, 5 }
 0x1c0   :  { %v10983_v15 = vadd.f32 %v9789_v42, %v9321_v11  ;;  %v3997_v42 = vrot.slane %v3964_v27, 5 }
 0x1c1   :  { %v11023_v17 = vsel %vm10195_vm11, %v8771_v44, %v4302_v45 }
 0x1c2   :  { %v9650_v46 = vpop.f32.mrb[0].mxu1  ;;  %v11006_v61 = vsel %vm10195_vm11, %v8755_v63, %v3997_v42  ;;  %v4340_v48 = vsel %vm10999_vm14, %v11023_v17, 0 }
 0x1c3   :  { %v9746_v54 = vadd.f32 %v10922_v49, %v9650_v46  ;;  %v3352_v58 = vpop.f32.mrb[1].mxu1  ;;  %v3787_v49 = vsel %vm10999_vm14, %v10970_v18, 0 }
 0x1c4   :  { %v9749_v7 = vadd.f32 %v10877_v0, %v3352_v58  ;;  %v9651_v2 = vpop.f32.mrb[2].mxu1  ;;  %v4821_v0 = vsel %vm10201_vm12, %v4816_v52, %v4820_v1  ;;  %v11040_v13 = vsel %vm11030_vm0, %v3819_v6, %v3787_v49  ;;  %v4116_v52 = vshll.u32 %v11050_v35, 16  ;;  %v3691_v58 = vld [vmem:[#allocation4 + $0x18] sm:$0xf] }
 0x1c5   :  { %v3440_v47 = vadd.f32 %v9746_v54, %v10993_v16  ;;  %v9752_v8 = vadd.f32 %v10925_v26, %v9651_v2  ;;  %v3355_v11 = vpop.f32.mrb[3].mxu1  ;;  %v4035_v26 = vsel %vm10999_vm14, %v11006_v61, 0  ;;  %v11045_v34 = vsel %vm11030_vm0, %v4821_v0, %v4701_v3 }
 0x1c6   :  { %v3438_v19 = vadd.f32 %v9749_v7, %v10993_v16  ;;  %v9755_v4 = vadd.f32 %v10882_v9, %v3355_v11  ;;  %v3694_v7 = vld [vmem:[#allocation4 + $0x1c] sm:$0x1] }
 0x1c7   :  { %v3456_v23 = vmax.f32 %v3440_v47, 0.0  ;;  %v3441_v10 = vadd.f32 %v9752_v8, %v10993_v16  ;;  %v3679_v47 = vld [vmem:[#allocation4 + $0x8] sm:$0xf] }
 0x1c8   :  { %v9322_v41 = vpop.f32.mrb[60].mxu0  ;;  %v3454_v27 = vmax.f32 %v3438_v19, 0.0  ;;  %v3439_v32 = vadd.f32 %v9755_v4, %v10993_v16  ;;  %v3682_v4 = vld [vmem:[#allocation4 + $0xc] sm:$0x1] }
 0x1c9   :  { %v9323_v18 = vpop.f32.mrb[61].mxu0  ;;  %v9011_v62 = vpack.c.bf16 %v3456_v23, %v3456_v23  ;;  %v3457_v63 = vmax.f32 %v3441_v10, 0.0 }
 0x1ca   :  { %v9324_v28 = vadd.f32 %v9323_v18, %v9322_v41  ;;  %v9325_v21 = vpop.f32.mrb[62].mxu0  ;;  %v9009_v37 = vpack.c.bf16 %v3454_v27, %v3454_v27  ;;  %v3455_v60 = vmax.f32 %v3439_v32, 0.0  ;;  %v9654_v29 = vpop.f32.mrb[4].mxu1  ;;  %v3697_v27 = vld [vmem:[#allocation4 + $0x20] sm:$0xf] }
 0x1cb   :  { %v9326_v9 = vpop.f32.mrb[63].mxu0  ;;  %v3535_v1 = vshrl.u32 %v9011_v62, 16  ;;  %v3538_v44 = vshll.u32 %v9011_v62, 16  ;;  %v9012_v45 = vpack.c.bf16 %v3457_v63, %v3457_v63  ;;  %v9758_v46 = vadd.f32 %v10950_v33, %v9654_v29  ;;  %v3368_v54 = vpop.f32.mrb[5].mxu1  ;;  %v3700_v63 = vld [vmem:[#allocation4 + $0x24] sm:$0x1] }
 0x1cc   :  { %v11052_v55 = vadd.f32 %v9326_v9, %v9325_v21  ;;  %v11055_v42 = vadd.f32 %v10944_v22, %v9324_v28  ;;  %v3519_v2 = vshrl.u32 %v9009_v37, 16  ;;  %v3522_v49 = vshll.u32 %v9009_v37, 16  ;;  %v9655_v3 = vpop.f32.mrb[6].mxu1 }
 0x1cd   :  { %v9010_v6 = vpack.c.bf16 %v3455_v60, %v3455_v60  ;;  %v9761_v22 = vadd.f32 %v10932_v43, %v3368_v54  ;;  %v3537_v41 = vrot.slane %v3535_v1, 7  ;;  %v3543_v8 = vshrl.u32 %v9012_v45, 16  ;;  %v3371_v18 = vpop.f32.mrb[7].mxu1  ;;  %v3685_v54 = vld [vmem:[#allocation4 + $0x10] sm:$0xf] }
 0x1ce   :  { %v3546_v11 = vshll.u32 %v9012_v45, 16  ;;  %v3444_v0 = vadd.f32 %v9758_v46, %v10993_v16  ;;  %v3521_v19 = vrot.slane %v3519_v2, 7  ;;  %v3688_v2 = vld [vmem:[#allocation4 + $0x14] sm:$0x1] }
 0x1cf   :  { %v3527_v28 = vshrl.u32 %v9010_v6, 16  ;;  %v3530_v33 = vshll.u32 %v9010_v6, 16  ;;  %v3442_v21 = vadd.f32 %v9761_v22, %v10993_v16  ;;  %v3540_v23 = vor.u32 %v3538_v44, %v3537_v41 }
 0x1d0   :  { %v3541_v10 = vrot.slane %v3537_v41, 4  ;;  %v3545_v9 = vrot.slane %v3543_v8, 7  ;;  %v3460_v32 = vmax.f32 %v3444_v0, 0.0  ;;  %v3524_v43 = vor.u32 %v3522_v49, %v3521_v19 }
 0x1d1   :  { %v3525_v62 = vrot.slane %v3521_v19, 4  ;;  %v3529_v37 = vrot.slane %v3527_v28, 7  ;;  %v3458_v60 = vmax.f32 %v3442_v21, 0.0  ;;  %v3692_v29 = vsel %vm10155_vm6, %v3540_v23, %v3691_v58 }
 0x1d2   :  { %v3695_v1 = vsel %vm10114_vm2, %v3541_v10, %v3694_v7  ;;  %v3548_v45 = vor.u32 %v3546_v11, %v3545_v9  ;;  %v3549_v46 = vrot.slane %v3545_v9, 4  ;;  %3693 = vst [vmem:[#allocation4 + $0x18] sm:$0xf] %v3692_v29  ;;  %v3680_v44 = vsel %vm10155_vm6, %v3524_v43, %v3679_v47  ;;  %v9658_v41 = vpop.f32.mrb[8].mxu1  ;;  %v3703_v29 = vld [vmem:[#allocation4 + $0x28] sm:$0xf] }
 0x1d3   :  { %3696 = vst [vmem:[#allocation4 + $0x1c] sm:$0x1] %v3695_v1  ;;  %v3683_v49 = vsel %vm10114_vm2, %v3525_v62, %v3682_v4  ;;  %v3532_v6 = vor.u32 %v3530_v33, %v3529_v37  ;;  %v3533_v22 = vrot.slane %v3529_v37, 4  ;;  %3681 = vst [vmem:[#allocation4 + $0x8] sm:$0xf] %v3680_v44  ;;  %v9015_v8 = vpack.c.bf16 %v3460_v32, %v3460_v32  ;;  %v3384_v0 = vpop.f32.mrb[9].mxu1 }
 0x1d4   :  { %3684 = vst [vmem:[#allocation4 + $0xc] sm:$0x1] %v3683_v49  ;;  %v3698_v58 = vsel %vm10155_vm6, %v3548_v45, %v3697_v27  ;;  %v3701_v7 = vsel %vm10114_vm2, %v3549_v46, %v3700_v63  ;;  %v9013_v11 = vpack.c.bf16 %v3458_v60, %v3458_v60  ;;  %v9764_v4 = vadd.f32 %v10953_v31, %v9655_v3  ;;  %v9659_v33 = vpop.f32.mrb[10].mxu1  ;;  %v3715_v31 = vld [vmem:[#allocation4 + $0x38] sm:$0xf] }
 0x1d5   :  { %3699 = vst [vmem:[#allocation4 + $0x20] sm:$0xf] %v3698_v58  ;;  %3702 = vst [vmem:[#allocation4 + $0x24] sm:$0x1] %v3701_v7  ;;  %v3686_v47 = vsel %vm10155_vm6, %v3532_v6, %v3685_v54  ;;  %v3689_v19 = vsel %vm10114_vm2, %v3533_v22, %v3688_v2  ;;  %v9767_v28 = vadd.f32 %v10940_v53, %v3371_v18  ;;  %v3567_v21 = vshrl.u32 %v9015_v8, 16  ;;  %v3387_v27 = vpop.f32.mrb[11].mxu1 }
 0x1d6   :  { %3687 = vst [vmem:[#allocation4 + $0x10] sm:$0xf] %v3686_v47  ;;  %3690 = vst [vmem:[#allocation4 + $0x14] sm:$0x1] %v3689_v19  ;;  %v3570_v23 = vshll.u32 %v9015_v8, 16  ;;  %v3551_v10 = vshrl.u32 %v9013_v11, 16  ;;  %v3445_v32 = vadd.f32 %v9764_v4, %v10993_v16  ;;  %v9770_v62 = vadd.f32 %v10966_v40, %v9658_v41 }
 0x1d7   :  { %v3554_v9 = vshll.u32 %v9013_v11, 16  ;;  %v3443_v43 = vadd.f32 %v9767_v28, %v10993_v16  ;;  %v9773_v63 = vadd.f32 %v10956_v5, %v3384_v0  ;;  %v3569_v37 = vrot.slane %v3567_v21, 7  ;;  %v3718_v3 = vld [vmem:[#allocation4 + $0x3c] sm:$0x1]  ;;  %v3706_v1 = vld [vmem:[#allocation4 + $0x2c] sm:$0x1] }
 0x1d8   :  { %v3553_v53 = vrot.slane %v3551_v10, 7  ;;  %v9776_v18 = vadd.f32 %v10968_v50, %v9659_v33  ;;  %v9779_v60 = vadd.f32 %v10959_v39, %v3387_v27  ;;  %v3461_v45 = vmax.f32 %v3445_v32, 0.0  ;;  %v3721_v21 = vld [vmem:[#allocation4 + $0x40] sm:$0xf] }
 0x1d9   :  { %v3459_v46 = vmax.f32 %v3443_v43, 0.0  ;;  %v3448_v54 = vadd.f32 %v9770_v62, %v10993_v16  ;;  %v3446_v2 = vadd.f32 %v9773_v63, %v10993_v16  ;;  %v3572_v44 = vor.u32 %v3570_v23, %v3569_v37  ;;  %v3724_v62 = vld [vmem:[#allocation4 + $0x44] sm:$0x1] }
 0x1da   :  { %v3573_v40 = vrot.slane %v3569_v37, 4  ;;  %v3556_v49 = vor.u32 %v3554_v9, %v3553_v53  ;;  %v3557_v5 = vrot.slane %v3553_v53, 4  ;;  %v9016_v6 = vpack.c.bf16 %v3461_v45, %v3461_v45  ;;  %v9662_v7 = vpop.f32.mrb[12].mxu1  ;;  %v3709_v37 = vld [vmem:[#allocation4 + $0x30] sm:$0xf] }
 0x1db   :  { %v9014_v22 = vpack.c.bf16 %v3459_v46, %v3459_v46  ;;  %v3464_v41 = vmax.f32 %v3448_v54, 0.0  ;;  %v3462_v58 = vmax.f32 %v3446_v2, 0.0  ;;  %v3716_v39 = vsel %vm10155_vm6, %v3572_v44, %v3715_v31  ;;  %v3400_v0 = vpop.f32.mrb[13].mxu1  ;;  %v3712_v53 = vld [vmem:[#allocation4 + $0x34] sm:$0x1] }
 0x1dc   :  { %v3719_v50 = vsel %vm10114_vm2, %v3573_v40, %v3718_v3  ;;  %v3704_v8 = vsel %vm10155_vm6, %v3556_v49, %v3703_v29  ;;  %v3707_v11 = vsel %vm10114_vm2, %v3557_v5, %v3706_v1  ;;  %3717 = vst [vmem:[#allocation4 + $0x38] sm:$0xf] %v3716_v39  ;;  %v3575_v47 = vshrl.u32 %v9016_v6, 16  ;;  %v11097_v33 = vpop.f32.mrb[14].mxu1  ;;  %v3730_v39 = vld [vmem:[#allocation4 + $0x5c] sm:$0x1] }
 0x1dd   :  { %3720 = vst [vmem:[#allocation4 + $0x3c] sm:$0x1] %v3719_v50  ;;  %3705 = vst [vmem:[#allocation4 + $0x28] sm:$0xf] %v3704_v8  ;;  %v3578_v19 = vshll.u32 %v9016_v6, 16  ;;  %v3559_v4 = vshrl.u32 %v9014_v22, 16  ;;  %v9019_v23 = vpack.c.bf16 %v3464_v41, %v3464_v41  ;;  %v9017_v10 = vpack.c.bf16 %v3462_v58, %v3462_v58 }
 0x1de   :  { %3708 = vst [vmem:[#allocation4 + $0x2c] sm:$0x1] %v3707_v11  ;;  %v3562_v28 = vshll.u32 %v9014_v22, 16  ;;  %v3449_v9 = vadd.f32 %v9776_v18, %v10993_v16  ;;  %v3447_v27 = vadd.f32 %v9779_v60, %v10993_v16  ;;  %v3403_v32 = vpop.f32.mrb[15].mxu1  ;;  %v3577_v43 = vrot.slane %v3575_v47, 7 }
 0x1df   :  { %v3561_v63 = vrot.slane %v3559_v4, 7  ;;  %v9782_v31 = vadd.f32 %v11055_v42, %v9662_v7  ;;  %v9785_v3 = vadd.f32 %v10981_v14, %v3400_v0  ;;  %v3599_v29 = vshrl.u32 %v9019_v23, 16  ;;  %v3739_v60 = vld [vmem:[#allocation4 + $0x68] sm:$0xf]  ;;  %v3742_v58 = vld [vmem:[#allocation4 + $0x6c] sm:$0x1] }
 0x1e0   :  { %v3602_v1 = vshll.u32 %v9019_v23, 16  ;;  %v3583_v45 = vshrl.u32 %v9017_v10, 16  ;;  %v3586_v46 = vshll.u32 %v9017_v10, 16  ;;  %v3580_v54 = vor.u32 %v3578_v19, %v3577_v43  ;;  %v3727_v7 = vld [vmem:[#allocation4 + $0x58] sm:$0xf] }
 0x1e1   :  { %v3581_v2 = vrot.slane %v3577_v43, 4  ;;  %v3564_v44 = vor.u32 %v3562_v28, %v3561_v63  ;;  %v3565_v18 = vrot.slane %v3561_v63, 4  ;;  %v3601_v40 = vrot.slane %v3599_v29, 7  ;;  %v3966_v43 = vld [vmem:[#allocation4 + $0xc] sm:$0x1] }
 0x1e2   :  { %v3585_v49 = vrot.slane %v3583_v45, 7  ;;  %v3465_v5 = vmax.f32 %v3449_v9, 0.0  ;;  %v3463_v6 = vmax.f32 %v3447_v27, 0.0  ;;  %v3722_v22 = vsel %vm10155_vm6, %v3580_v54, %v3721_v21  ;;  %v3965_v27 = vld [vmem:[#allocation4 + $0x8] sm:$0xe] }
 0x1e3   :  { %v3725_v14 = vsel %vm10114_vm2, %v3581_v2, %v3724_v62  ;;  %v3710_v42 = vsel %vm10155_vm6, %v3564_v44, %v3709_v37  ;;  %v3713_v41 = vsel %vm10114_vm2, %v3565_v18, %v3712_v53  ;;  %3723 = vst [vmem:[#allocation4 + $0x40] sm:$0xf] %v3722_v22  ;;  %v3604_v50 = vor.u32 %v3602_v1, %v3601_v40  ;;  %v3748_v18 = vld [vmem:[#allocation4 + $0x74] sm:$0x1] }
 0x1e4   :  { %3726 = vst [vmem:[#allocation4 + $0x44] sm:$0x1] %v3725_v14  ;;  %3711 = vst [vmem:[#allocation4 + $0x30] sm:$0xf] %v3710_v42  ;;  %v3605_v8 = vrot.slane %v3601_v40, 4  ;;  %v3588_v11 = vor.u32 %v3586_v46, %v3585_v49  ;;  %v3589_v0 = vrot.slane %v3585_v49, 4  ;;  %v9020_v47 = vpack.c.bf16 %v3465_v5, %v3465_v5 }
 0x1e5   :  { %3714 = vst [vmem:[#allocation4 + $0x34] sm:$0x1] %v3713_v41  ;;  %v9018_v19 = vpack.c.bf16 %v3463_v6, %v3463_v6  ;;  %v3452_v4 = vadd.f32 %v9782_v31, %v10993_v16  ;;  %v3450_v28 = vadd.f32 %v9785_v3, %v10993_v16  ;;  %v3740_v21 = vsel %vm10155_vm6, %v3604_v50, %v3739_v60  ;;  %v3745_v46 = vld [vmem:[#allocation4 + $0x70] sm:$0xf]  ;;  %v3733_v40 = vld [vmem:[#allocation4 + $0x60] sm:$0xf] }
 0x1e6   :  { %v3743_v23 = vsel %vm10114_vm2, %v3605_v8, %v3742_v58  ;;  %v3728_v10 = vsel %vm10155_vm6, %v3588_v11, %v3727_v7  ;;  %v3731_v9 = vsel %vm10114_vm2, %v3589_v0, %v3730_v39  ;;  %3741 = vst [vmem:[#allocation4 + $0x68] sm:$0xf] %v3740_v21  ;;  %v3607_v62 = vshrl.u32 %v9020_v47, 16  ;;  %v3736_v60 = vld [vmem:[#allocation4 + $0x64] sm:$0x1] }
 0x1e7   :  { %3744 = vst [vmem:[#allocation4 + $0x6c] sm:$0x1] %v3743_v23  ;;  %3729 = vst [vmem:[#allocation4 + $0x58] sm:$0xf] %v3728_v10  ;;  %v3610_v63 = vshll.u32 %v9020_v47, 16  ;;  %v3591_v37 = vshrl.u32 %v9018_v19, 16  ;;  %v9787_v29 = vadd.f32 %v10947_v20, %v11052_v55  ;;  %v9791_v1 = vadd.f32 %v10983_v15, %v3403_v32 }
 0x1e8   :  { %3732 = vst [vmem:[#allocation4 + $0x5c] sm:$0x1] %v3731_v9  ;;  %v3594_v31 = vshll.u32 %v9018_v19, 16  ;;  %v3468_v3 = vmax.f32 %v3452_v4, 0.0  ;;  %v3466_v53 = vmax.f32 %v3450_v28, 0.0  ;;  %v3609_v45 = vrot.slane %v3607_v62, 7 }
 0x1e9   :  { %v3593_v54 = vrot.slane %v3591_v37, 7  ;;  %v8756_v2 = vrot.slane %v3965_v27, 9  ;;  %v4001_v44 = vrot.slane %v3966_v43, 5  ;;  %v9788_v6 = vadd.f32 %v9787_v29, %v11097_v33  ;;  %v4043_v55 = vld [vmem:[#allocation4 + $0x8] sm:$0xf] }
 0x1ea   :  { %v9023_v49 = vpack.c.bf16 %v3468_v3, %v3468_v3  ;;  %v9021_v5 = vpack.c.bf16 %v3466_v53, %v3466_v53  ;;  %v3451_v22 = vadd.f32 %v9791_v1, %v10993_v16  ;;  %v3612_v14 = vor.u32 %v3610_v63, %v3609_v45  ;;  %v11126_v39 = vld [vmem:[#allocation4 + $0x8] sm:$0xf]  ;;  %v3766_v19 = vld [vmem:[#allocation4 + $0x8c] sm:$0x1]  ;;  %v3751_v23 = vld [vmem:[#allocation4 + $0x78] sm:$0xf] }
 0x1eb   :  { %v3613_v42 = vrot.slane %v3609_v45, 4  ;;  %v3596_v41 = vor.u32 %v3594_v31, %v3593_v54  ;;  %v3597_v20 = vrot.slane %v3593_v54, 4  ;;  %v3763_v0 = vld [vmem:[#allocation4 + $0x88] sm:$0xf]  ;;  %v3453_v28 = vadd.f32 %v9788_v6, %v10993_v16  ;;  %v3754_v10 = vld [vmem:[#allocation4 + $0x7c] sm:$0x1] }
 0x1ec   :  { %v3631_v15 = vshrl.u32 %v9023_v49, 16  ;;  %v3634_v32 = vshll.u32 %v9023_v49, 16  ;;  %v3615_v58 = vshrl.u32 %v9021_v5, 16  ;;  %v3618_v7 = vshll.u32 %v9021_v5, 16  ;;  %v3799_v3 = vld [vmem:[#allocation4 + $0xc] sm:$0x1] }
 0x1ed   :  { %v3746_v50 = vsel %vm10155_vm6, %v3612_v14, %v3745_v46  ;;  %v3749_v8 = vsel %vm10114_vm2, %v3613_v42, %v3748_v18  ;;  %v3734_v33 = vsel %vm10155_vm6, %v3596_v41, %v3733_v40  ;;  %v3737_v11 = vsel %vm10114_vm2, %v3597_v20, %v3736_v60  ;;  %v3967_v45 = vld [vmem:[#allocation4 + $0x10] sm:$0xe]  ;;  %v3968_v18 = vld [vmem:[#allocation4 + $0x14] sm:$0x1]  ;;  %v3969_v6 = vld [vmem:[#allocation4 + $0x18] sm:$0xe] }
 0x1ee   :  { %3747 = vst [vmem:[#allocation4 + $0x70] sm:$0xf] %v3746_v50  ;;  %3750 = vst [vmem:[#allocation4 + $0x74] sm:$0x1] %v3749_v8  ;;  %v3633_v47 = vrot.slane %v3631_v15, 7  ;;  %v3617_v4 = vrot.slane %v3615_v58, 7  ;;  %v4002_v9 = vsel %vm10195_vm11, %v8756_v2, %v4001_v44  ;;  %v4051_v27 = vsel %vm11030_vm0, %v4043_v55, %v4035_v26 }
 0x1ef   :  { %3735 = vst [vmem:[#allocation4 + $0x60] sm:$0xf] %v3734_v33  ;;  %3738 = vst [vmem:[#allocation4 + $0x64] sm:$0x1] %v3737_v11  ;;  %v3467_v21 = vmax.f32 %v3451_v22, 0.0  ;;  %v3788_v43 = vsel %vm10999_vm14, %v11126_v39, 0 }
 0x1f0   :  { %v3821_v62 = vshrl.u32 %v11126_v39, 16  ;;  %v3636_v16 = vor.u32 %v3634_v32, %v3633_v47  ;;  %v3637_v63 = vrot.slane %v3633_v47, 4  ;;  %v3620_v37 = vor.u32 %v3618_v7, %v3617_v4  ;;  %v4044_v44 = vld [vmem:[#allocation4 + $0x10] sm:$0xf]  ;;  %v3970_v22 = vld [vmem:[#allocation4 + $0x1c] sm:$0x1] }
 0x1f1   :  { %v3621_v31 = vrot.slane %v3617_v4, 4  ;;  %v3469_v53 = vmax.f32 %v3453_v28, 0.0  ;;  %v9022_v29 = vpack.c.bf16 %v3467_v21, %v3467_v21  ;;  %v4036_v1 = vsel %vm10999_vm14, %v4002_v9, 0  ;;  %v3757_v14 = vld [vmem:[#allocation4 + $0x80] sm:$0xf] }
 0x1f2   :  { %v3823_v61 = vrot.slane %v3821_v62, 4  ;;  %v3764_v26 = vsel %vm10155_vm6, %v3636_v16, %v3763_v0  ;;  %v3767_v46 = vsel %vm10114_vm2, %v3637_v63, %v3766_v19  ;;  %v3752_v54 = vsel %vm10155_vm6, %v3620_v37, %v3751_v23  ;;  %v11162_v50 = vld [vmem:[#allocation4 + $0x10] sm:$0xf]  ;;  %v3760_v8 = vld [vmem:[#allocation4 + $0x84] sm:$0x1] }
 0x1f3   :  { %v3755_v2 = vsel %vm10114_vm2, %v3621_v31, %v3754_v10  ;;  %3765 = vst [vmem:[#allocation4 + $0x88] sm:$0xf] %v3764_v26  ;;  %3768 = vst [vmem:[#allocation4 + $0x8c] sm:$0x1] %v3767_v46  ;;  %v9024_v40 = vpack.c.bf16 %v3469_v53, %v3469_v53  ;;  %v3623_v60 = vshrl.u32 %v9022_v29, 16  ;;  %v3626_v49 = vshll.u32 %v9022_v29, 16 }
 0x1f4   :  { %3753 = vst [vmem:[#allocation4 + $0x78] sm:$0xf] %v3752_v54  ;;  %3756 = vst [vmem:[#allocation4 + $0x7c] sm:$0x1] %v3755_v2  ;;  %v4052_v5 = vsel %vm11030_vm0, %v4044_v44, %v4036_v1  ;;  %v3824_v41 = vshll.u32 %v11126_v39, 16  ;;  %v3830_v20 = vshll.u32 %v3799_v3, 16 }
 0x1f5   :  { %v8763_v42 = vcombine.low %v4051_v27, %v4052_v5  ;;  %v8757_v55 = vrot.slane %v3967_v45, 9  ;;  %v3639_v15 = vshrl.u32 %v9024_v40, 16  ;;  %v3642_v32 = vshll.u32 %v9024_v40, 16  ;;  %v11166_v23 = vld [vmem:[#allocation4 + $0x18] sm:$0xf] }
 0x1f6   :  { %v3625_v58 = vrot.slane %v3623_v60, 7  ;;  %v4005_v7 = vrot.slane %v3968_v18, 5  ;;  %v3826_v33 = vrot.slane %v3824_v41, 5  ;;  %v3832_v11 = vrot.slane %v3830_v20, 5  ;;  %v3769_v10 = vld [vmem:[#allocation4 + $0x90] sm:$0xf] }
 0x1f7   :  { %5660 = vmatprep.mubr.bf16.mxu1 %v8763_v42  ;;  %v8758_v0 = vrot.slane %v3969_v6, 9  ;;  %v4009_v47 = vrot.slane %v3970_v22, 5  ;;  %v3641_v19 = vrot.slane %v3639_v15, 7  ;;  %v3772_v9 = vld [vmem:[#allocation4 + $0x94] sm:$0x1]  ;;  %v4694_v63 = vsel %vm10999_vm14, %v11162_v50, 0 }
 0x1f8   :  { %v3628_v4 = vor.u32 %v3626_v49, %v3625_v58  ;;  %v3629_v28 = vrot.slane %v3625_v58, 4  ;;  %v4006_v21 = vsel %vm10195_vm11, %v8757_v55, %v4005_v7  ;;  %v3827_v27 = vor.u32 %v3826_v33, %v3823_v61  ;;  %v4045_v29 = vld [vmem:[#allocation4 + $0x18] sm:$0xf]  ;;  %v4702_v1 = vld [vmem:[#allocation4 + $0x14] sm:$0x1] }
 0x1f9   :  { %v4010_v62 = vsel %vm10195_vm11, %v8758_v0, %v4009_v47  ;;  %v4037_v16 = vsel %vm10999_vm14, %v4006_v21, 0  ;;  %v3644_v37 = vor.u32 %v3642_v32, %v3641_v19  ;;  %v3645_v31 = vrot.slane %v3641_v19, 4  ;;  %v4046_v26 = vld [vmem:[#allocation4 + $0x20] sm:$0xf]  ;;  %v4703_v40 = vld [vmem:[#allocation4 + $0x1c] sm:$0x1] }
 0x1fa   :  { %v3758_v3 = vsel %vm10155_vm6, %v3628_v4, %v3757_v14  ;;  %v3761_v53 = vsel %vm10114_vm2, %v3629_v28, %v3760_v8  ;;  %v3828_v61 = vrot.slane %v3827_v27, 4  ;;  %v4038_v45 = vsel %vm10999_vm14, %v4010_v62, 0  ;;  %v4441_v14 = vld [vmem:[#allocation4 + $0x8] sm:$0xf]  ;;  %v4442_v42 = vld [vmem:[#allocation4 + $0xc] sm:$0x1] }
 0x1fb   :  { %3759 = vst [vmem:[#allocation4 + $0x80] sm:$0xf] %v3758_v3  ;;  %3762 = vst [vmem:[#allocation4 + $0x84] sm:$0x1] %v3761_v53  ;;  %v4053_v46 = vsel %vm11030_vm0, %v4045_v29, %v4037_v16  ;;  %v4695_v54 = vsel %vm10999_vm14, %v11166_v23, 0  ;;  %v3770_v2 = vsel %vm10155_vm6, %v3644_v37, %v3769_v10  ;;  %v3773_v44 = vsel %vm10114_vm2, %v3645_v31, %v3772_v9 }
 0x1fc   :  { %v4054_v18 = vsel %vm11030_vm0, %v4046_v26, %v4038_v45  ;;  %v4711_v60 = vshrl.u32 %v11162_v50, 16  ;;  %3771 = vst [vmem:[#allocation4 + $0x90] sm:$0xf] %v3770_v2  ;;  %3774 = vst [vmem:[#allocation4 + $0x94] sm:$0x1] %v3773_v44  ;;  %v3833_v49 = vsel %vm10201_vm12, %v3828_v61, %v3832_v11  ;;  %v4714_v6 = vshll.u32 %v11162_v50, 16 }
 0x1fd   :  { %v8764_v5 = vcombine.low %v4053_v46, %v4054_v18  ;;  %v4720_v22 = vshll.u32 %v4702_v1, 16  ;;  %v3928_v41 = vsel %vm11030_vm0, %v3833_v49, %v3788_v43  ;;  %v4725_v55 = vshrl.u32 %v11166_v23, 16  ;;  %v4443_v32 = vld [vmem:[#allocation4 + $0x10] sm:$0xf]  ;;  %v4444_v47 = vld [vmem:[#allocation4 + $0x14] sm:$0x1] }
 0x1fe   :  { %v4713_v20 = vrot.slane %v4711_v60, 4  ;;  %v4728_v15 = vshll.u32 %v11166_v23, 16  ;;  %v8751_v58 = vcombine.low %v11040_v13, %v3928_v41  ;;  %v4716_v7 = vrot.slane %v4714_v6, 5  ;;  %v4585_v10 = vld [vmem:[#allocation4 + $0x8] sm:$0xe] }
 0x1ff   :  { %v4722_v8 = vrot.slane %v4720_v22, 5  ;;  %v4734_v33 = vshll.u32 %v4703_v40, 16  ;;  %v4727_v11 = vrot.slane %v4725_v55, 4  ;;  %v4458_v19 = vshrl.u32 %v4441_v14, 16  ;;  %v4586_v13 = vld [vmem:[#allocation4 + $0x10] sm:$0xe] }
 0x200   :  { %v4730_v0 = vrot.slane %v4728_v15, 5  ;;  %v4461_v4 = vshll.u32 %v4441_v14, 16  ;;  %5661 = vmatmul.mubr.bf16.vlgmr.msra.gmra.mrb[48].mxu1 %v8751_v58  ;;  %v4717_v39 = vor.u32 %v4716_v7, %v4713_v20  ;;  %v4467_v43 = vshll.u32 %v4442_v42, 16  ;;  %v11205_v45 = vld [vmem:[#allocation4 + $0x20] sm:$0xf] }
 0x201   :  { %v4736_v28 = vrot.slane %v4734_v33, 5  ;;  %v4472_v21 = vshrl.u32 %v4443_v32, 16  ;;  %5668 = vmatprep.mubr.bf16.mxu1 %v8764_v5  ;;  %v4460_v23 = vrot.slane %v4458_v19, 4  ;;  %v4475_v62 = vshll.u32 %v4443_v32, 16  ;;  %v11209_v18 = vld [vmem:[#allocation4 + $0x28] sm:$0xf] }
 0x202   :  { %v4731_v9 = vor.u32 %v4730_v0, %v4727_v11  ;;  %v4463_v27 = vrot.slane %v4461_v4, 5  ;;  %v4718_v16 = vrot.slane %v4717_v39, 4  ;;  %v4469_v37 = vrot.slane %v4467_v43, 5  ;;  %v4704_v41 = vld [vmem:[#allocation4 + $0x24] sm:$0x1] }
 0x203   :  { %v4474_v31 = vrot.slane %v4472_v21, 4  ;;  %v4481_v3 = vshll.u32 %v4444_v47, 16  ;;  %v4477_v1 = vrot.slane %v4475_v62, 5  ;;  %v8783_v61 = vrot.slane %v4585_v10, 9  ;;  %v4705_v32 = vld [vmem:[#allocation4 + $0x2c] sm:$0x1] }
 0x204   :  { %v4732_v53 = vrot.slane %v4731_v9, 4  ;;  %v4464_v29 = vor.u32 %v4463_v27, %v4460_v23  ;;  %v4723_v26 = vsel %vm10201_vm12, %v4718_v16, %v4722_v8  ;;  %v4611_v2 = vrot.slane %v4442_v42, 5  ;;  %v11247_v43 = vld [vmem:[#allocation4 + $0x18] sm:$0xf]  ;;  %v3800_v27 = vld [vmem:[#allocation4 + $0x14] sm:$0x1] }
 0x205   :  { %v4483_v46 = vrot.slane %v4481_v3, 5  ;;  %v8784_v44 = vrot.slane %v4586_v13, 9  ;;  %v4830_v60 = vsel %vm11030_vm0, %v4723_v26, %v4694_v63  ;;  %v4478_v5 = vor.u32 %v4477_v1, %v4474_v31  ;;  %v3801_v31 = vld [vmem:[#allocation4 + $0x1c] sm:$0x1]  ;;  %v9954_v3 = vld [vmem:[%s12749_s3 + $0x108] sm:$0xff]  }
 0x206   :  { %v4737_v40 = vsel %vm10201_vm12, %v4732_v53, %v4736_v28  ;;  %v4465_v49 = vrot.slane %v4464_v29, 4  ;;  %v4612_v22 = vsel %vm10195_vm11, %v8783_v61, %v4611_v2  ;;  %v4615_v14 = vrot.slane %v4444_v47, 5  ;;  %v11242_v47 = vld [vmem:[#allocation4 + $0x10] sm:$0xf] }
 0x207   :  { %v4831_v6 = vsel %vm11030_vm0, %v4737_v40, %v4695_v54  ;;  %v4696_v42 = vsel %vm10999_vm14, %v11205_v45, 0  ;;  %v4479_v55 = vrot.slane %v4478_v5, 4  ;;  %v4697_v63 = vsel %vm10999_vm14, %v11209_v18, 0 }
 0x208   :  { %v8795_v20 = vcombine.low %v4830_v60, %v4831_v6  ;;  %v4470_v50 = vsel %vm10201_vm12, %v4465_v49, %v4469_v37  ;;  %v4616_v15 = vsel %vm10195_vm11, %v8784_v44, %v4615_v14  ;;  %v4739_v58 = vshrl.u32 %v11205_v45, 16  ;;  %v3973_v6 = vld [vmem:[#allocation4 + $0x28] sm:$0xe] }
 0x209   :  { %v4577_v54 = vsel %vm10999_vm14, %v4470_v50, 0  ;;  %v4742_v7 = vshll.u32 %v11205_v45, 16  ;;  %v4484_v8 = vsel %vm10201_vm12, %v4479_v55, %v4483_v46  ;;  %v4748_v11 = vshll.u32 %v4704_v41, 16  ;;  %v3971_v45 = vld [vmem:[#allocation4 + $0x20] sm:$0xe]  ;;  %v9955_v55 = vld [vmem:[%s12749_s3 + $0x110] sm:$0xff]  }
 0x20a   :  { %5467 = vmatprep.mubr.bf16.mxu0 %v8795_v20  ;;  %v4649_v33 = vsel %vm11030_vm0, %v4612_v22, %v4577_v54  ;;  %v4753_v0 = vshrl.u32 %v11209_v18, 16  ;;  %v4578_v19 = vsel %vm10999_vm14, %v4484_v8, 0  ;;  %v4741_v4 = vrot.slane %v4739_v58, 4  ;;  %v3974_v50 = vld [vmem:[#allocation4 + $0x2c] sm:$0x1] }
 0x20b   :  { %v4744_v39 = vrot.slane %v4742_v7, 5  ;;  %v4756_v28 = vshll.u32 %v11209_v18, 16  ;;  %v4650_v21 = vsel %vm11030_vm0, %v4616_v15, %v4578_v19  ;;  %v4750_v10 = vrot.slane %v4748_v11, 5  ;;  %v3972_v18 = vld [vmem:[#allocation4 + $0x24] sm:$0x1] }
 0x20c   :  { %v4755_v9 = vrot.slane %v4753_v0, 4  ;;  %v4762_v23 = vshll.u32 %v4705_v32, 16  ;;  %v8791_v62 = vcombine.low %v4649_v33, %v4650_v21  ;;  %v3789_v37 = vsel %vm10999_vm14, %v11242_v47, 0  ;;  %v4445_v58 = vld [vmem:[#allocation4 + $0x18] sm:$0xf] }
 0x20d   :  { %v4745_v13 = vor.u32 %v4744_v39, %v4741_v4  ;;  %v4758_v16 = vrot.slane %v4756_v28, 5  ;;  %v3790_v29 = vsel %vm10999_vm14, %v11247_v43, 0  ;;  %v3835_v1 = vshrl.u32 %v11242_v47, 16  ;;  %v4047_v39 = vld [vmem:[#allocation4 + $0x28] sm:$0xf] }
 0x20e   :  { %v4764_v53 = vrot.slane %v4762_v23, 5  ;;  %v3838_v61 = vshll.u32 %v11242_v47, 16  ;;  %5468 = vmatmul.mubr.bf16.vlgmr.msra.gmra.mrb[64].mxu0 %v8791_v62  ;;  %v3844_v2 = vshll.u32 %v3800_v27, 16  ;;  %v3849_v44 = vshrl.u32 %v11247_v43, 16  ;;  %v4446_v21 = vld [vmem:[#allocation4 + $0x1c] sm:$0x1] }
 0x20f   :  { %v4746_v26 = vrot.slane %v4745_v13, 4  ;;  %v4759_v46 = vor.u32 %v4758_v16, %v4755_v9  ;;  %9665 = vmatpush3.bf16.msra.mxu0 %v10937_v12  ;;  %v3837_v40 = vrot.slane %v3835_v1, 4  ;;  %v3852_v49 = vshll.u32 %v11247_v43, 16  ;;  %v9956_v23 = vld [vmem:[%s12749_s3 + $0x118] sm:$0xff]   ;;  %v4447_v16 = vld [vmem:[#allocation4 + $0x20] sm:$0xf] }
 0x210   :  { %v3840_v60 = vrot.slane %v3838_v61, 5  ;;  %v3858_v5 = vshll.u32 %v3801_v31, 16  ;;  %v3846_v41 = vrot.slane %v3844_v2, 5  ;;  %v3851_v20 = vrot.slane %v3849_v44, 4  ;;  %9666 = vmatprep.subr.bf16.mxu0 %v9954_v3  ;;  %v4448_v61 = vld [vmem:[#allocation4 + $0x24] sm:$0x1] }
 0x211   :  { %v4751_v22 = vsel %vm10201_vm12, %v4746_v26, %v4750_v10  ;;  %v4760_v14 = vrot.slane %v4759_v46, 4  ;;  %v3854_v15 = vrot.slane %v3852_v49, 5  ;;  %v8759_v8 = vrot.slane %v3971_v45, 9 }
 0x212   :  { %v4832_v12 = vsel %vm11030_vm0, %v4751_v22, %v4696_v42  ;;  %v3841_v54 = vor.u32 %v3840_v60, %v3837_v40  ;;  %v3860_v32 = vrot.slane %v3858_v5, 5  ;;  %v4013_v33 = vrot.slane %v3972_v18, 5  ;;  %v4587_v18 = vld [vmem:[#allocation4 + $0x18] sm:$0xe]  ;;  %v4588_v5 = vld [vmem:[#allocation4 + $0x20] sm:$0xe] }
 0x213   :  { %v4765_v7 = vsel %vm10201_vm12, %v4760_v14, %v4764_v53  ;;  %v8760_v11 = vrot.slane %v3973_v6, 9  ;;  %v3855_v19 = vor.u32 %v3854_v15, %v3851_v20  ;;  %v4017_v4 = vrot.slane %v3974_v50, 5  ;;  %9667 = vmatpush3.bf16.msra.mxu0 %v9954_v3  ;;  %v4048_v53 = vld [vmem:[#allocation4 + $0x30] sm:$0xf]  ;;  %v9957_v6 = vld [vmem:[%s12749_s3 + $0x120] sm:$0xff]  }
 0x214   :  { %v4833_v0 = vsel %vm11030_vm0, %v4765_v7, %v4697_v63  ;;  %v3842_v47 = vrot.slane %v3841_v54, 4  ;;  %v4014_v42 = vsel %vm10195_vm11, %v8759_v8, %v4013_v33  ;;  %v4486_v10 = vshrl.u32 %v4445_v58, 16  ;;  %9668 = vmatprep.subr.bf16.mxu0 %v9955_v55  ;;  %v11306_v50 = vld [vmem:[#allocation4 + $0x30] sm:$0xf]  ;;  %v4706_v8 = vld [vmem:[#allocation4 + $0x34] sm:$0x1] }
 0x215   :  { %v8796_v28 = vcombine.low %v4832_v12, %v4833_v0  ;;  %v4489_v9 = vshll.u32 %v4445_v58, 16  ;;  %v3856_v27 = vrot.slane %v3855_v19, 4  ;;  %v4018_v62 = vsel %vm10195_vm11, %v8760_v11, %v4017_v4  ;;  %v9958_v19 = vld [vmem:[%s12749_s3 + $0x128] sm:$0xff]  }
 0x216   :  { %v3847_v63 = vsel %vm10201_vm12, %v3842_v47, %v3846_v41  ;;  %v4039_v13 = vsel %vm10999_vm14, %v4014_v42, 0  ;;  %v4040_v3 = vsel %vm10999_vm14, %v4018_v62, 0  ;;  %v4488_v45 = vrot.slane %v4486_v10, 4 }
 0x217   :  { %5475 = vmatprep.mubr.bf16.mxu0 %v8796_v28  ;;  %v3929_v31 = vsel %vm11030_vm0, %v3847_v63, %v3789_v37  ;;  %v4055_v1 = vsel %vm11030_vm0, %v4047_v39, %v4039_v13  ;;  %v3861_v26 = vsel %vm10201_vm12, %v3856_v27, %v3860_v32  ;;  %v4056_v46 = vsel %vm11030_vm0, %v4048_v53, %v4040_v3  ;;  %v4707_v28 = vld [vmem:[#allocation4 + $0x3c] sm:$0x1]  ;;  %v11330_v27 = vld [vmem:[#allocation4 + $0x20] sm:$0xf]  ;;  %v11335_v3 = vld [vmem:[#allocation4 + $0x28] sm:$0xf] }
 0x218   :  { %v4491_v2 = vrot.slane %v4489_v9, 5  ;;  %v4495_v44 = vshll.u32 %v4446_v21, 16  ;;  %9669 = vmatpush3.bf16.msra.mxu0 %v9955_v55  ;;  %v3930_v37 = vsel %vm11030_vm0, %v3861_v26, %v3790_v29  ;;  %v8765_v40 = vcombine.low %v4055_v1, %v4056_v46  ;;  %v11308_v55 = vld [vmem:[#allocation4 + $0x38] sm:$0xf]  ;;  %v3802_v26 = vld [vmem:[#allocation4 + $0x24] sm:$0x1] }
 0x219   :  { %v4500_v60 = vshrl.u32 %v4447_v16, 16  ;;  %v4503_v49 = vshll.u32 %v4447_v16, 16  ;;  %9670 = vmatprep.subr.bf16.mxu0 %v9956_v23  ;;  %v8752_v22 = vcombine.low %v3929_v31, %v3930_v37  ;;  %v4509_v20 = vshll.u32 %v4448_v61, 16  ;;  %v9959_v46 = vld [vmem:[%s12749_s3 + $0x130] sm:$0xff]  }
 0x21a   :  { %v4492_v14 = vor.u32 %v4491_v2, %v4488_v45  ;;  %v4497_v41 = vrot.slane %v4495_v44, 5  ;;  %v8785_v29 = vrot.slane %v4587_v18, 9  ;;  %v4619_v54 = vrot.slane %v4446_v21, 5 }
 0x21b   :  { %v4502_v43 = vrot.slane %v4500_v60, 4  ;;  %v4505_v12 = vrot.slane %v4503_v49, 5  ;;  %5669 = vmatmul.mubr.bf16.gmra.mrb[52].mxu1 %v8752_v22  ;;  %v4511_v32 = vrot.slane %v4509_v20, 5  ;;  %v8786_v58 = vrot.slane %v4588_v5, 9  ;;  %v3975_v22 = vld [vmem:[#allocation4 + $0x30] sm:$0xe] }
 0x21c   :  { %v4493_v15 = vrot.slane %v4492_v14, 4  ;;  %v4623_v7 = vrot.slane %v4448_v61, 5  ;;  %9671 = vmatpush3.bf16.msra.mxu0 %v9956_v23  ;;  %5676 = vmatprep.mubr.bf16.mxu1 %v8765_v40  ;;  %v4620_v11 = vsel %vm10195_vm11, %v8785_v29, %v4619_v54  ;;  %v4698_v0 = vsel %vm10999_vm14, %v11306_v50, 0  ;;  %v3803_v40 = vld [vmem:[#allocation4 + $0x2c] sm:$0x1] }
 0x21d   :  { %v4506_v33 = vor.u32 %v4505_v12, %v4502_v43  ;;  %v4699_v47 = vsel %vm10999_vm14, %v11308_v55, 0  ;;  %9672 = vmatprep.subr.bf16.mxu0 %v9957_v6  ;;  %v4767_v42 = vshrl.u32 %v11306_v50, 16  ;;  %v4770_v21 = vshll.u32 %v11306_v50, 16  ;;  %v3976_v43 = vld [vmem:[#allocation4 + $0x34] sm:$0x1] }
 0x21e   :  { %v4498_v4 = vsel %vm10201_vm12, %v4493_v15, %v4497_v41  ;;  %v4624_v39 = vsel %vm10195_vm11, %v8786_v58, %v4623_v7  ;;  %v4776_v23 = vshll.u32 %v4706_v8, 16  ;;  %v4781_v63 = vshrl.u32 %v11308_v55, 16  ;;  %v3977_v12 = vld [vmem:[#allocation4 + $0x38] sm:$0xe] }
 0x21f   :  { %v4507_v10 = vrot.slane %v4506_v33, 4  ;;  %v4579_v9 = vsel %vm10999_vm14, %v4498_v4, 0  ;;  %v4769_v13 = vrot.slane %v4767_v42, 4  ;;  %v4772_v16 = vrot.slane %v4770_v21, 5  ;;  %v9960_v58 = vld [vmem:[%s12749_s3 + $0x138] sm:$0xff]  }
 0x220   :  { %v4651_v62 = vsel %vm11030_vm0, %v4620_v11, %v4579_v9  ;;  %v4784_v31 = vshll.u32 %v11308_v55, 16  ;;  %9673 = vmatpush3.bf16.msra.mxu0 %v9957_v6  ;;  %v4778_v1 = vrot.slane %v4776_v23, 5  ;;  %v4783_v61 = vrot.slane %v4781_v63, 4  ;;  %v3978_v4 = vld [vmem:[#allocation4 + $0x3c] sm:$0x1] }
 0x221   :  { %v4512_v53 = vsel %vm10201_vm12, %v4507_v10, %v4511_v32  ;;  %v4790_v45 = vshll.u32 %v4707_v28, 16  ;;  %9674 = vmatprep.subr.bf16.mxu0 %v9958_v19  ;;  %v4773_v44 = vor.u32 %v4772_v16, %v4769_v13  ;;  %v3791_v37 = vsel %vm10999_vm14, %v11330_v27, 0  ;;  %v4449_v21 = vld [vmem:[#allocation4 + $0x28] sm:$0xf] }
 0x222   :  { %v4580_v2 = vsel %vm10999_vm14, %v4512_v53, 0  ;;  %v4786_v18 = vrot.slane %v4784_v31, 5  ;;  %v3792_v5 = vsel %vm10999_vm14, %v11335_v3, 0  ;;  %v3863_v6 = vshrl.u32 %v11330_v27, 16 }
 0x223   :  { %v4652_v60 = vsel %vm11030_vm0, %v4624_v39, %v4580_v2  ;;  %v4792_v49 = vrot.slane %v4790_v45, 5  ;;  %v4774_v41 = vrot.slane %v4773_v44, 4  ;;  %v3866_v50 = vshll.u32 %v11330_v27, 16  ;;  %v4450_v27 = vld [vmem:[#allocation4 + $0x2c] sm:$0x1] }
 0x224   :  { %v8792_v14 = vcombine.low %v4651_v62, %v4652_v60  ;;  %v4787_v20 = vor.u32 %v4786_v18, %v4783_v61  ;;  %9675 = vmatpush3.bf16.msra.mxu0 %v9958_v19  ;;  %v3865_v29 = vrot.slane %v3863_v6, 4  ;;  %v3872_v54 = vshll.u32 %v3802_v26, 16  ;;  %v4049_v26 = vld [vmem:[#allocation4 + $0x38] sm:$0xf]  ;;  %v4050_v18 = vld [vmem:[#allocation4 + $0x40] sm:$0xf] }
 0x225   :  { %v3877_v15 = vshrl.u32 %v11335_v3, 16  ;;  %v3880_v32 = vshll.u32 %v11335_v3, 16  ;;  %9676 = vmatprep.subr.bf16.mxu0 %v9959_v46  ;;  %v4779_v7 = vsel %vm10201_vm12, %v4774_v41, %v4778_v1  ;;  %v3868_v33 = vrot.slane %v3866_v50, 5  ;;  %v4452_v41 = vld [vmem:[#allocation4 + $0x34] sm:$0x1] }
 0x226   :  { %5476 = vmatmul.mubr.bf16.gmra.mrb[68].mxu0 %v8792_v14  ;;  %v4788_v8 = vrot.slane %v4787_v20, 4  ;;  %v3886_v11 = vshll.u32 %v3803_v40, 16  ;;  %v4834_v19 = vsel %vm11030_vm0, %v4779_v7, %v4698_v0  ;;  %v3874_v39 = vrot.slane %v3872_v54, 5  ;;  %v4451_v40 = vld [vmem:[#allocation4 + $0x30] sm:$0xf] }
 0x227   :  { %v3879_v28 = vrot.slane %v3877_v15, 4  ;;  %v3882_v42 = vrot.slane %v3880_v32, 5  ;;  %v3869_v9 = vor.u32 %v3868_v33, %v3865_v29  ;;  %v8761_v63 = vrot.slane %v3975_v22, 9  ;;  %v4589_v20 = vld [vmem:[#allocation4 + $0x28] sm:$0xe] }
 0x228   :  { %v4793_v10 = vsel %vm10201_vm12, %v4788_v8, %v4792_v49  ;;  %v3888_v23 = vrot.slane %v3886_v11, 5  ;;  %9677 = vmatpush3.bf16.msra.mxu0 %v9959_v46  ;;  %v4021_v13 = vrot.slane %v3976_v43, 5  ;;  %v8762_v16 = vrot.slane %v3977_v12, 9  ;;  %v4590_v54 = vld [vmem:[#allocation4 + $0x30] sm:$0xe] }
 0x229   :  { %v4835_v62 = vsel %vm11030_vm0, %v4793_v10, %v4699_v47  ;;  %v3883_v0 = vor.u32 %v3882_v42, %v3879_v28  ;;  %9678 = vmatprep.subr.bf16.mxu0 %v9960_v58  ;;  %v3870_v3 = vrot.slane %v3869_v9, 4  ;;  %v4025_v53 = vrot.slane %v3978_v4, 5  ;;  %v11391_v7 = vld [vmem:[#allocation4 + $0x40] sm:$0xf]  ;;  %v4708_v8 = vld [vmem:[#allocation4 + $0x44] sm:$0x1] }
 0x22a   :  { %v8797_v31 = vcombine.low %v4834_v19, %v4835_v62  ;;  %v4514_v1 = vshrl.u32 %v4449_v21, 16  ;;  %v4022_v45 = vsel %vm10195_vm11, %v8761_v63, %v4021_v13  ;;  %v4517_v46 = vshll.u32 %v4449_v21, 16  ;;  %v11395_v10 = vld [vmem:[#allocation4 + $0x38] sm:$0xf] }
 0x22b   :  { %v3884_v61 = vrot.slane %v3883_v0, 4  ;;  %v4523_v2 = vshll.u32 %v4450_v27, 16  ;;  %v3875_v55 = vsel %vm10201_vm12, %v3870_v3, %v3874_v39  ;;  %v4026_v47 = vsel %vm10195_vm11, %v8762_v16, %v4025_v53  ;;  %v11393_v39 = vld [vmem:[#allocation4 + $0x30] sm:$0xf] }
 0x22c   :  { %5483 = vmatprep.mubr.bf16.mxu0 %v8797_v31  ;;  %v4041_v44 = vsel %vm10999_vm14, %v4022_v45, 0  ;;  %v4516_v60 = vrot.slane %v4514_v1, 4  ;;  %9679 = vmatpush3.bf16.msra.mxu0 %v9960_v58  ;;  %v3931_v6 = vsel %vm11030_vm0, %v3875_v55, %v3791_v37  ;;  %v4042_v22 = vsel %vm10999_vm14, %v4026_v47, 0 }
 0x22d   :  { %v3889_v49 = vsel %vm10201_vm12, %v3884_v61, %v3888_v23  ;;  %v4057_v14 = vsel %vm11030_vm0, %v4049_v26, %v4041_v44  ;;  %v4058_v43 = vsel %vm11030_vm0, %v4050_v18, %v4042_v22  ;;  %v4519_v12 = vrot.slane %v4517_v46, 5  ;;  %v3804_v61 = vld [vmem:[#allocation4 + $0x34] sm:$0x1]  ;;  %v3805_v44 = vld [vmem:[#allocation4 + $0x3c] sm:$0x1] }
 0x22e   :  { %v3932_v50 = vsel %vm11030_vm0, %v3889_v49, %v3792_v5  ;;  %v4525_v29 = vrot.slane %v4523_v2, 5  ;;  %v8766_v32 = vcombine.low %v4057_v14, %v4058_v43  ;;  %v4528_v37 = vshrl.u32 %v4451_v40, 16  ;;  %v4270_v14 = vld [vmem:[#allocation4 + $0x58] sm:$0xe] }
 0x22f   :  { %v8753_v15 = vcombine.low %v3931_v6, %v3932_v50  ;;  %v4531_v58 = vshll.u32 %v4451_v40, 16  ;;  %v4520_v33 = vor.u32 %v4519_v12, %v4516_v60  ;;  %v4537_v11 = vshll.u32 %v4452_v41, 16 }
 0x230   :  { %v8787_v4 = vrot.slane %v4589_v20, 9  ;;  %v4627_v19 = vrot.slane %v4450_v27, 5  ;;  %v4530_v5 = vrot.slane %v4528_v37, 4  ;;  %v8788_v42 = vrot.slane %v4590_v54, 9 }
 0x231   :  { %5677 = vmatmul.mubr.bf16.gmra.mrb[56].mxu1 %v8753_v15  ;;  %v4533_v28 = vrot.slane %v4531_v58, 5  ;;  %v4631_v21 = vrot.slane %v4452_v41, 5  ;;  %v4521_v9 = vrot.slane %v4520_v33, 4  ;;  %v4539_v23 = vrot.slane %v4537_v11, 5  ;;  %v4271_v41 = vld [vmem:[#allocation4 + $0x5c] sm:$0x1] }
 0x232   :  { %5684 = vmatprep.mubr.bf16.mxu1 %v8766_v32  ;;  %v4628_v63 = vsel %vm10195_vm11, %v8787_v4, %v4627_v19  ;;  %v4700_v62 = vsel %vm10999_vm14, %v11391_v7, 0  ;;  %v4795_v13 = vshrl.u32 %v11391_v7, 16  ;;  %v4798_v16 = vshll.u32 %v11391_v7, 16  ;;  %v4453_v11 = vld [vmem:[#allocation4 + $0x38] sm:$0xf] }
 0x233   :  { %v4534_v27 = vor.u32 %v4533_v28, %v4530_v5  ;;  %v4632_v0 = vsel %vm10195_vm11, %v8788_v42, %v4631_v21  ;;  %v4526_v31 = vsel %vm10201_vm12, %v4521_v9, %v4525_v29  ;;  %v4804_v3 = vshll.u32 %v4708_v8, 16  ;;  %v4349_v29 = vld [vmem:[#allocation4 + $0x58] sm:$0xf]  ;;  %v4454_v28 = vld [vmem:[#allocation4 + $0x3c] sm:$0x1] }
 0x234   :  { %v3793_v53 = vsel %vm10999_vm14, %v11393_v39, 0  ;;  %v3794_v1 = vsel %vm10999_vm14, %v11395_v10, 0  ;;  %v4581_v26 = vsel %vm10999_vm14, %v4526_v31, 0  ;;  %v4797_v46 = vrot.slane %v4795_v13, 4  ;;  %v4455_v13 = vld [vmem:[#allocation4 + $0x40] sm:$0xf] }
 0x235   :  { %v4535_v45 = vrot.slane %v4534_v27, 4  ;;  %v4800_v2 = vrot.slane %v4798_v16, 5  ;;  %v4653_v55 = vsel %vm11030_vm0, %v4628_v63, %v4581_v26  ;;  %v4806_v47 = vrot.slane %v4804_v3, 5 }
 0x236   :  { %v3891_v18 = vshrl.u32 %v11393_v39, 16  ;;  %v3894_v40 = vshll.u32 %v11393_v39, 16  ;;  %v3900_v6 = vshll.u32 %v3804_v61, 16  ;;  %v3905_v22 = vshrl.u32 %v11395_v10, 16 }
 0x237   :  { %v4540_v60 = vsel %vm10201_vm12, %v4535_v45, %v4539_v23  ;;  %v4801_v49 = vor.u32 %v4800_v2, %v4797_v46  ;;  %v3908_v12 = vshll.u32 %v11395_v10, 16  ;;  %v3914_v33 = vshll.u32 %v3805_v44, 16  ;;  %v4591_v2 = vld [vmem:[#allocation4 + $0x38] sm:$0xe] }
 0x238   :  { %v4582_v20 = vsel %vm10999_vm14, %v4540_v60, 0  ;;  %v3893_v50 = vrot.slane %v3891_v18, 4  ;;  %v3896_v43 = vrot.slane %v3894_v40, 5  ;;  %v3902_v32 = vrot.slane %v3900_v6, 5  ;;  %v4592_v40 = vld [vmem:[#allocation4 + $0x40] sm:$0xe] }
 0x239   :  { %v4654_v54 = vsel %vm11030_vm0, %v4632_v0, %v4582_v20  ;;  %v4802_v15 = vrot.slane %v4801_v49, 4  ;;  %v3907_v37 = vrot.slane %v3905_v22, 4  ;;  %v3910_v8 = vrot.slane %v3908_v12, 5  ;;  %v4350_v0 = vld [vmem:[#allocation4 + $0x60] sm:$0xf] }
 0x23a   :  { %v8793_v58 = vcombine.low %v4653_v55, %v4654_v54  ;;  %v3897_v7 = vor.u32 %v3896_v43, %v3893_v50  ;;  %v8772_v19 = vrot.slane %v4270_v14, 9  ;;  %v4306_v39 = vrot.slane %v4271_v41, 5  ;;  %v11457_v22 = vld [vmem:[#allocation4 + $0x60] sm:$0xf]  ;;  %v11459_v14 = vld [vmem:[#allocation4 + $0x68] sm:$0xf] }
 0x23b   :  { %v4807_v4 = vsel %vm10201_vm12, %v4802_v15, %v4806_v47  ;;  %v4357_v5 = vsel %vm11030_vm0, %v4349_v29, %v4340_v48  ;;  %v3911_v9 = vor.u32 %v3910_v8, %v3907_v37  ;;  %v3916_v23 = vrot.slane %v3914_v33, 5  ;;  %v5128_v33 = vld [vmem:[#allocation4 + $0x6c] sm:$0x1] }
 0x23c   :  { %5484 = vmatmul.mubr.bf16.gmra.mrb[72].mxu0 %v8793_v58  ;;  %v4836_v42 = vsel %vm11030_vm0, %v4807_v4, %v4700_v62  ;;  %v3898_v21 = vrot.slane %v3897_v7, 4  ;;  %v4307_v27 = vsel %vm10195_vm11, %v8772_v19, %v4306_v39  ;;  %v4542_v16 = vshrl.u32 %v4453_v11, 16  ;;  %v4456_v62 = vld [vmem:[#allocation4 + $0x44] sm:$0x1] }
 0x23d   :  { %v8798_v63 = vcombine.low %v4836_v42, %v11045_v34  ;;  %v4545_v17 = vshll.u32 %v4453_v11, 16  ;;  %v3912_v31 = vrot.slane %v3911_v9, 4  ;;  %v4341_v3 = vsel %vm10999_vm14, %v4307_v27, 0  ;;  %v11478_v42 = vld [vmem:[#allocation4 + $0x58] sm:$0xf] }
 0x23e   :  { %v3903_v48 = vsel %vm10201_vm12, %v3898_v21, %v3902_v32  ;;  %v4551_v61 = vshll.u32 %v4454_v28, 16  ;;  %v4358_v45 = vsel %vm11030_vm0, %v4350_v0, %v4341_v3  ;;  %v4544_v26 = vrot.slane %v4542_v16, 4  ;;  %v5127_v32 = vld [vmem:[#allocation4 + $0x64] sm:$0x1]  ;;  %v9985_v3 = vld [vmem:[#allocation4 + $0x50] sm:$0xf] }
 0x23f   :  { %5491 = vmatprep.mubr.bf16.mxu0 %v8798_v63  ;;  %v3933_v34 = vsel %vm11030_vm0, %v3903_v48, %v3793_v53  ;;  %v4547_v46 = vrot.slane %v4545_v17, 5  ;;  %v3917_v55 = vsel %vm10201_vm12, %v3912_v31, %v3916_v23  ;;  %v8779_v47 = vcombine.low %v4357_v5, %v4358_v45  ;;  %v4104_v17 = vld [vmem:[#allocation4 + $0x54] sm:$0x1] }
 0x240   :  { %v4553_v44 = vrot.slane %v4551_v61, 5  ;;  %v4556_v18 = vshrl.u32 %v4455_v13, 16  ;;  %v3934_v53 = vsel %vm11030_vm0, %v3917_v55, %v3794_v1  ;;  %v4559_v49 = vshll.u32 %v4455_v13, 16 }
 0x241   :  { %v4548_v60 = vor.u32 %v4547_v46, %v4544_v26  ;;  %v4565_v6 = vshll.u32 %v4456_v62, 16  ;;  %v8754_v41 = vcombine.low %v3933_v34, %v3934_v53  ;;  %v8789_v50 = vrot.slane %v4591_v2, 9  ;;  %v4105_v46 = vld [vmem:[#allocation4 + $0x5c] sm:$0x1] }
 0x242   :  { %v4558_v20 = vrot.slane %v4556_v18, 4  ;;  %v4635_v43 = vrot.slane %v4454_v28, 5  ;;  %v4561_v29 = vrot.slane %v4559_v49, 5  ;;  %v8790_v15 = vrot.slane %v4592_v40, 9 }
 0x243   :  { %v4549_v12 = vrot.slane %v4548_v60, 4  ;;  %v4567_v54 = vrot.slane %v4565_v6, 5  ;;  %5685 = vmatmul.mubr.bf16.gmra.mrb[60].mxu1 %v8754_v41  ;;  %v4639_v1 = vrot.slane %v4456_v62, 5  ;;  %v5119_v37 = vsel %vm10999_vm14, %v11457_v22, 0  ;;  %v4272_v6 = vld [vmem:[#allocation4 + $0x60] sm:$0xe] }
 0x244   :  { %v4636_v10 = vsel %vm10195_vm11, %v8789_v50, %v4635_v43  ;;  %v5120_v58 = vsel %vm10999_vm14, %v11459_v14, 0  ;;  %5692 = vmatprep.mubr.bf16.mxu1 %v8779_v47  ;;  %v4562_v8 = vor.u32 %v4561_v29, %v4558_v20  ;;  %v5136_v11 = vshrl.u32 %v11457_v22, 16  ;;  %v4274_v50 = vld [vmem:[#allocation4 + $0x68] sm:$0xe]  ;;  %v4275_v43 = vld [vmem:[#allocation4 + $0x6c] sm:$0x1] }
 0x245   :  { %v4554_v7 = vsel %vm10201_vm12, %v4549_v12, %v4553_v44  ;;  %v5139_v4 = vshll.u32 %v11457_v22, 16  ;;  %v4640_v39 = vsel %vm10195_vm11, %v8790_v15, %v4639_v1  ;;  %v5145_v5 = vshll.u32 %v5127_v32, 16  ;;  %v4273_v22 = vld [vmem:[#allocation4 + $0x64] sm:$0x1] }
 0x246   :  { %v4583_v19 = vsel %vm10999_vm14, %v4554_v7, 0  ;;  %v5150_v28 = vshrl.u32 %v11459_v14, 16  ;;  %v4563_v21 = vrot.slane %v4562_v8, 4  ;;  %v5138_v23 = vrot.slane %v5136_v11, 4 }
 0x247   :  { %v4655_v9 = vsel %vm11030_vm0, %v4636_v10, %v4583_v19  ;;  %v5141_v63 = vrot.slane %v5139_v4, 5  ;;  %v5147_v27 = vrot.slane %v5145_v5, 5  ;;  %v5153_v13 = vshll.u32 %v11459_v14, 16  ;;  %v4867_v5 = vld [vmem:[#allocation4 + $0x5c] sm:$0x1] }
 0x248   :  { %v5152_v0 = vrot.slane %v5150_v28, 4  ;;  %v5159_v16 = vshll.u32 %v5128_v33, 16  ;;  %v4568_v48 = vsel %vm10201_vm12, %v4563_v21, %v4567_v54  ;;  %v4096_v62 = vsel %vm10999_vm14, %v9985_v3, 0  ;;  %v4866_v54 = vld [vmem:[#allocation4 + $0x58] sm:$0xf] }
 0x249   :  { %v5142_v31 = vor.u32 %v5141_v63, %v5138_v23  ;;  %v4097_v61 = vsel %vm10999_vm14, %v11478_v42, 0  ;;  %v4584_v34 = vsel %vm10999_vm14, %v4568_v48, 0  ;;  %v5155_v45 = vrot.slane %v5153_v13, 5  ;;  %v4352_v63 = vld [vmem:[#allocation4 + $0x70] sm:$0xf] }
 0x24a   :  { %v5161_v26 = vrot.slane %v5159_v16, 5  ;;  %v4115_v2 = vrot.slane %v4113_v36, 4  ;;  %v4656_v55 = vsel %vm11030_vm0, %v4640_v39, %v4584_v34  ;;  %v4118_v44 = vrot.slane %v4116_v52, 5  ;;  %v4351_v39 = vld [vmem:[#allocation4 + $0x68] sm:$0xf] }
 0x24b   :  { %v5143_v47 = vrot.slane %v5142_v31, 4  ;;  %v4122_v18 = vshll.u32 %v4104_v17, 16  ;;  %v8794_v40 = vcombine.low %v4655_v9, %v4656_v55  ;;  %v5156_v53 = vor.u32 %v5155_v45, %v5152_v0  ;;  %v4869_v13 = vld [vmem:[#allocation4 + $0x64] sm:$0x1]  ;;  %v5010_v34 = vld [vmem:[#allocation4 + $0x58] sm:$0xe] }
 0x24c   :  { %v4127_v60 = vshrl.u32 %v11478_v42, 16  ;;  %v4130_v49 = vshll.u32 %v11478_v42, 16  ;;  %v4119_v36 = vor.u32 %v4118_v44, %v4115_v2  ;;  %v4136_v20 = vshll.u32 %v4105_v46, 16  ;;  %v5011_v55 = vld [vmem:[#allocation4 + $0x60] sm:$0xe] }
 0x24d   :  { %v5148_v14 = vsel %vm10201_vm12, %v5143_v47, %v5147_v27  ;;  %v4124_v41 = vrot.slane %v4122_v18, 5  ;;  %5492 = vmatmul.mubr.bf16.gmra.mrb[76].mxu0 %v8794_v40  ;;  %v5157_v35 = vrot.slane %v5156_v53, 4  ;;  %v8773_v10 = vrot.slane %v4272_v6, 9  ;;  %v4868_v27 = vld [vmem:[#allocation4 + $0x60] sm:$0xf] }
 0x24e   :  { %v5255_v52 = vsel %vm11030_vm0, %v5148_v14, %v5119_v37  ;;  %v4129_v12 = vrot.slane %v4127_v60, 4  ;;  %v4132_v29 = vrot.slane %v4130_v49, 5  ;;  %v4120_v15 = vrot.slane %v4119_v36, 4  ;;  %v11528_v47 = vld [vmem:[#allocation4 + $0x70] sm:$0xf] }
 0x24f   :  { %v4138_v32 = vrot.slane %v4136_v20, 5  ;;  %v4310_v1 = vrot.slane %v4273_v22, 5  ;;  %v5162_v7 = vsel %vm10201_vm12, %v5157_v35, %v5161_v26  ;;  %v8774_v33 = vrot.slane %v4274_v50, 9  ;;  %v11530_v60 = vld [vmem:[#allocation4 + $0x78] sm:$0xf] }
 0x250   :  { %v4133_v8 = vor.u32 %v4132_v29, %v4129_v12  ;;  %v4314_v11 = vrot.slane %v4275_v43, 5  ;;  %v5256_v4 = vsel %vm11030_vm0, %v5162_v7, %v5120_v58  ;;  %v4125_v19 = vsel %vm10201_vm12, %v4120_v15, %v4124_v41  ;;  %v5129_v50 = vld [vmem:[#allocation4 + $0x74] sm:$0x1]  ;;  %v5130_v15 = vld [vmem:[#allocation4 + $0x7c] sm:$0x1] }
 0x251   :  { %v4311_v37 = vsel %vm10195_vm11, %v8773_v10, %v4310_v1  ;;  %v4883_v28 = vshrl.u32 %v4866_v54, 16  ;;  %v8811_v42 = vcombine.low %v5255_v52, %v5256_v4  ;;  %v4232_v9 = vsel %vm11030_vm0, %v4125_v19, %v4096_v62 }
 0x252   :  { %v4134_v21 = vrot.slane %v4133_v8, 4  ;;  %v4315_v23 = vsel %vm10195_vm11, %v8774_v33, %v4314_v11  ;;  %v4342_v58 = vsel %vm10999_vm14, %v4311_v37, 0  ;;  %v4886_v17 = vshll.u32 %v4866_v54, 16  ;;  %v11548_v11 = vld [vmem:[#allocation4 + $0x60] sm:$0xf] }
 0x253   :  { %v4343_v0 = vsel %vm10999_vm14, %v4315_v23, 0  ;;  %v4885_v16 = vrot.slane %v4883_v28, 4  ;;  %5499 = vmatprep.mubr.bf16.mxu0 %v8811_v42  ;;  %v4359_v31 = vsel %vm11030_vm0, %v4351_v39, %v4342_v58  ;;  %v4892_v62 = vshll.u32 %v4867_v5, 16 }
 0x254   :  { %v4139_v48 = vsel %vm10201_vm12, %v4134_v21, %v4138_v32  ;;  %v4360_v3 = vsel %vm11030_vm0, %v4352_v63, %v4343_v0  ;;  %v4888_v46 = vrot.slane %v4886_v17, 5  ;;  %v4897_v2 = vshrl.u32 %v4868_v27, 16  ;;  %v4106_v0 = vld [vmem:[#allocation4 + $0x64] sm:$0x1] }
 0x255   :  { %v4233_v45 = vsel %vm11030_vm0, %v4139_v48, %v4097_v61  ;;  %v8780_v26 = vcombine.low %v4359_v31, %v4360_v3  ;;  %v4894_v18 = vrot.slane %v4892_v62, 5  ;;  %v4900_v40 = vshll.u32 %v4868_v27, 16 }
 0x256   :  { %v8767_v44 = vcombine.low %v4232_v9, %v4233_v45  ;;  %v4906_v53 = vshll.u32 %v4869_v13, 16  ;;  %v4889_v49 = vor.u32 %v4888_v46, %v4885_v16  ;;  %v4899_v6 = vrot.slane %v4897_v2, 4 }
 0x257   :  { %v8799_v22 = vrot.slane %v5010_v34, 9  ;;  %v5036_v14 = vrot.slane %v4867_v5, 5  ;;  %v4902_v36 = vrot.slane %v4900_v40, 5  ;;  %v8800_v61 = vrot.slane %v5011_v55, 9  ;;  %v11552_v5 = vld [vmem:[#allocation4 + $0x68] sm:$0xf] }
 0x258   :  { %5693 = vmatmul.mubr.bf16.gmra.mrb[64].mxu1 %v8767_v44  ;;  %v4908_v41 = vrot.slane %v4906_v53, 5  ;;  %v5040_v20 = vrot.slane %v4869_v13, 5  ;;  %v4890_v43 = vrot.slane %v4889_v49, 4  ;;  %v5121_v52 = vsel %vm10999_vm14, %v11528_v47, 0  ;;  %v4107_v34 = vld [vmem:[#allocation4 + $0x6c] sm:$0x1] }
 0x259   :  { %5700 = vmatprep.mubr.bf16.mxu1 %v8780_v26  ;;  %v5037_v35 = vsel %vm10195_vm11, %v8799_v22, %v5036_v14  ;;  %v5122_v12 = vsel %vm10999_vm14, %v11530_v60, 0  ;;  %v4903_v29 = vor.u32 %v4902_v36, %v4899_v6  ;;  %v5164_v32 = vshrl.u32 %v11528_v47, 16  ;;  %v4278_v36 = vld [vmem:[#allocation4 + $0x78] sm:$0xe] }
 0x25a   :  { %v5041_v54 = vsel %vm10195_vm11, %v8800_v61, %v5040_v20  ;;  %v5167_v10 = vshll.u32 %v11528_v47, 16  ;;  %v4895_v1 = vsel %vm10201_vm12, %v4890_v43, %v4894_v18  ;;  %v5173_v7 = vshll.u32 %v5129_v50, 16  ;;  %v4276_v47 = vld [vmem:[#allocation4 + $0x70] sm:$0xe] }
 0x25b   :  { %v5178_v8 = vshrl.u32 %v11530_v60, 16  ;;  %v5181_v33 = vshll.u32 %v11530_v60, 16  ;;  %v4904_v4 = vrot.slane %v4903_v29, 4  ;;  %v5002_v19 = vsel %vm10999_vm14, %v4895_v1, 0  ;;  %v4277_v60 = vld [vmem:[#allocation4 + $0x74] sm:$0x1] }
 0x25c   :  { %v5166_v37 = vrot.slane %v5164_v32, 4  ;;  %v5169_v39 = vrot.slane %v5167_v10, 5  ;;  %v5074_v28 = vsel %vm11030_vm0, %v5037_v35, %v5002_v19  ;;  %v5175_v42 = vrot.slane %v5173_v7, 5  ;;  %v4870_v35 = vld [vmem:[#allocation4 + $0x68] sm:$0xf] }
 0x25d   :  { %v5180_v21 = vrot.slane %v5178_v8, 4  ;;  %v5183_v9 = vrot.slane %v5181_v33, 5  ;;  %v4909_v23 = vsel %vm10201_vm12, %v4904_v4, %v4908_v41  ;;  %v5187_v27 = vshll.u32 %v5130_v15, 16  ;;  %v4279_v41 = vld [vmem:[#allocation4 + $0x7c] sm:$0x1] }
 0x25e   :  { %v5170_v63 = vor.u32 %v5169_v39, %v5166_v37  ;;  %v4098_v58 = vsel %vm10999_vm14, %v11548_v11, 0  ;;  %v5003_v13 = vsel %vm10999_vm14, %v4909_v23, 0  ;;  %v4099_v17 = vsel %vm10999_vm14, %v11552_v5, 0  ;;  %v4871_v29 = vld [vmem:[#allocation4 + $0x6c] sm:$0x1] }
 0x25f   :  { %v5184_v16 = vor.u32 %v5183_v9, %v5180_v21  ;;  %v4141_v48 = vshrl.u32 %v11548_v11, 16  ;;  %v5075_v31 = vsel %vm11030_vm0, %v5041_v54, %v5003_v13  ;;  %v5189_v62 = vrot.slane %v5187_v27, 5  ;;  %v4353_v33 = vld [vmem:[#allocation4 + $0x78] sm:$0xf]  ;;  %v4872_v21 = vld [vmem:[#allocation4 + $0x70] sm:$0xf] }
 0x260   :  { %v5171_v3 = vrot.slane %v5170_v63, 4  ;;  %v4144_v45 = vshll.u32 %v11548_v11, 16  ;;  %v8807_v26 = vcombine.low %v5074_v28, %v5075_v31  ;;  %v4150_v55 = vshll.u32 %v4106_v0, 16  ;;  %v4873_v27 = vld [vmem:[#allocation4 + $0x74] sm:$0x1] }
 0x261   :  { %v5185_v46 = vrot.slane %v5184_v16, 4  ;;  %v4143_v2 = vrot.slane %v4141_v48, 4  ;;  %v4155_v40 = vshrl.u32 %v11552_v5, 16  ;;  %v4158_v53 = vshll.u32 %v11552_v5, 16  ;;  %v5012_v13 = vld [vmem:[#allocation4 + $0x68] sm:$0xe] }
 0x262   :  { %v5176_v44 = vsel %vm10201_vm12, %v5171_v3, %v5175_v42  ;;  %v4146_v18 = vrot.slane %v4144_v45, 5  ;;  %5500 = vmatmul.mubr.bf16.gmra.mrb[80].mxu0 %v8807_v26  ;;  %v4152_v22 = vrot.slane %v4150_v55, 5  ;;  %v4164_v14 = vshll.u32 %v4107_v34, 16  ;;  %v4354_v42 = vld [vmem:[#allocation4 + $0x80] sm:$0xf] }
 0x263   :  { %v5190_v49 = vsel %vm10201_vm12, %v5185_v46, %v5189_v62  ;;  %v5257_v6 = vsel %vm11030_vm0, %v5176_v44, %v5121_v52  ;;  %v4157_v50 = vrot.slane %v4155_v40, 4  ;;  %v4160_v43 = vrot.slane %v4158_v53, 5  ;;  %v5013_v62 = vld [vmem:[#allocation4 + $0x70] sm:$0xe]  ;;  %v11600_v46 = vld [vmem:[#allocation4 + $0x80] sm:$0xf] }
 0x264   :  { %v5258_v61 = vsel %vm11030_vm0, %v5190_v49, %v5122_v12  ;;  %v4147_v20 = vor.u32 %v4146_v18, %v4143_v2  ;;  %v4166_v15 = vrot.slane %v4164_v14, 5  ;;  %v8775_v32 = vrot.slane %v4276_v47, 9  ;;  %v11602_v18 = vld [vmem:[#allocation4 + $0x88] sm:$0xf] }
 0x265   :  { %v8812_v54 = vcombine.low %v5257_v6, %v5258_v61  ;;  %v4318_v10 = vrot.slane %v4277_v60, 5  ;;  %v4161_v7 = vor.u32 %v4160_v43, %v4157_v50  ;;  %v8776_v8 = vrot.slane %v4278_v36, 9  ;;  %v5131_v6 = vld [vmem:[#allocation4 + $0x84] sm:$0x1] }
 0x266   :  { %v4148_v1 = vrot.slane %v4147_v20, 4  ;;  %v4322_v52 = vrot.slane %v4279_v41, 5  ;;  %v4911_v4 = vshrl.u32 %v4870_v35, 16  ;;  %v4914_v12 = vshll.u32 %v4870_v35, 16 }
 0x267   :  { %5507 = vmatprep.mubr.bf16.mxu0 %v8812_v54  ;;  %v4319_v11 = vsel %vm10195_vm11, %v8775_v32, %v4318_v10  ;;  %v4920_v19 = vshll.u32 %v4871_v29, 16  ;;  %v4162_v39 = vrot.slane %v4161_v7, 4  ;;  %v4925_v45 = vshrl.u32 %v4872_v21, 16  ;;  %v11618_v32 = vld [vmem:[#allocation4 + $0x70] sm:$0xf] }
 0x268   :  { %v4153_v37 = vsel %vm10201_vm12, %v4148_v1, %v4152_v22  ;;  %v4323_v5 = vsel %vm10195_vm11, %v8776_v8, %v4322_v52  ;;  %v4344_v28 = vsel %vm10999_vm14, %v4319_v11, 0  ;;  %v4913_v0 = vrot.slane %v4911_v4, 4  ;;  %v11623_v52 = vld [vmem:[#allocation4 + $0x78] sm:$0xf] }
 0x269   :  { %v4234_v9 = vsel %vm11030_vm0, %v4153_v37, %v4098_v58  ;;  %v4345_v23 = vsel %vm10999_vm14, %v4323_v5, 0  ;;  %v4361_v63 = vsel %vm11030_vm0, %v4353_v33, %v4344_v28  ;;  %v4167_v16 = vsel %vm10201_vm12, %v4162_v39, %v4166_v15  ;;  %v4108_v28 = vld [vmem:[#allocation4 + $0x74] sm:$0x1] }
 0x26a   :  { %v4362_v48 = vsel %vm11030_vm0, %v4354_v42, %v4345_v23  ;;  %v4916_v31 = vrot.slane %v4914_v12, 5  ;;  %v4922_v3 = vrot.slane %v4920_v19, 5  ;;  %v4235_v58 = vsel %vm11030_vm0, %v4167_v16, %v4099_v17 }
 0x26b   :  { %v8781_v34 = vcombine.low %v4361_v63, %v4362_v48  ;;  %v4928_v26 = vshll.u32 %v4872_v21, 16  ;;  %v8768_v2 = vcombine.low %v4234_v9, %v4235_v58  ;;  %v4934_v47 = vshll.u32 %v4873_v27, 16  ;;  %v4280_v58 = vld [vmem:[#allocation4 + $0x80] sm:$0xe] }
 0x26c   :  { %v4917_v55 = vor.u32 %v4916_v31, %v4913_v0  ;;  %v8801_v44 = vrot.slane %v5012_v13, 9  ;;  %v4927_v40 = vrot.slane %v4925_v45, 4  ;;  %v5044_v60 = vrot.slane %v4871_v29, 5  ;;  %v5132_v29 = vld [vmem:[#allocation4 + $0x8c] sm:$0x1] }
 0x26d   :  { %v4930_v53 = vrot.slane %v4928_v26, 5  ;;  %v8802_v49 = vrot.slane %v5013_v62, 9  ;;  %5701 = vmatmul.mubr.bf16.gmra.mrb[68].mxu1 %v8768_v2  ;;  %v4936_v14 = vrot.slane %v4934_v47, 5  ;;  %v5048_v17 = vrot.slane %v4873_v27, 5  ;;  %v4109_v0 = vld [vmem:[#allocation4 + $0x7c] sm:$0x1] }
 0x26e   :  { %v4918_v22 = vrot.slane %v4917_v55, 4  ;;  %v5123_v36 = vsel %vm10999_vm14, %v11600_v46, 0  ;;  %5708 = vmatprep.mubr.bf16.mxu1 %v8781_v34  ;;  %v5045_v61 = vsel %vm10195_vm11, %v8801_v44, %v5044_v60  ;;  %v5124_v20 = vsel %vm10999_vm14, %v11602_v18, 0  ;;  %v4281_v2 = vld [vmem:[#allocation4 + $0x84] sm:$0x1] }
 0x26f   :  { %v4931_v41 = vor.u32 %v4930_v53, %v4927_v40  ;;  %v5192_v50 = vshrl.u32 %v11600_v46, 16  ;;  %v5049_v35 = vsel %vm10195_vm11, %v8802_v49, %v5048_v17  ;;  %v5195_v54 = vshll.u32 %v11600_v46, 16  ;;  %v4282_v40 = vld [vmem:[#allocation4 + $0x88] sm:$0xe] }
 0x270   :  { %v4923_v43 = vsel %vm10201_vm12, %v4918_v22, %v4922_v3  ;;  %v5201_v15 = vshll.u32 %v5131_v6, 16  ;;  %v5206_v8 = vshrl.u32 %v11602_v18, 16  ;;  %v5209_v12 = vshll.u32 %v11602_v18, 16  ;;  %v4283_v22 = vld [vmem:[#allocation4 + $0x8c] sm:$0x1] }
 0x271   :  { %v4932_v10 = vrot.slane %v4931_v41, 4  ;;  %v5004_v1 = vsel %vm10999_vm14, %v4923_v43, 0  ;;  %v5194_v7 = vrot.slane %v5192_v50, 4  ;;  %v5197_v11 = vrot.slane %v5195_v54, 5 }
 0x272   :  { %v5076_v33 = vsel %vm11030_vm0, %v5045_v61, %v5004_v1  ;;  %v5203_v4 = vrot.slane %v5201_v15, 5  ;;  %v5208_v37 = vrot.slane %v5206_v8, 4  ;;  %v5215_v39 = vshll.u32 %v5132_v29, 16  ;;  %v4875_v1 = vld [vmem:[#allocation4 + $0x7c] sm:$0x1] }
 0x273   :  { %v4937_v19 = vsel %vm10201_vm12, %v4932_v10, %v4936_v14  ;;  %v4100_v5 = vsel %vm10999_vm14, %v11618_v32, 0  ;;  %v5198_v21 = vor.u32 %v5197_v11, %v5194_v7  ;;  %v5211_v9 = vrot.slane %v5209_v12, 5  ;;  %v4874_v14 = vld [vmem:[#allocation4 + $0x78] sm:$0xf]  ;;  %v4355_v10 = vld [vmem:[#allocation4 + $0x88] sm:$0xf] }
 0x274   :  { %v5005_v42 = vsel %vm10999_vm14, %v4937_v19, 0  ;;  %v4101_v23 = vsel %vm10999_vm14, %v11623_v52, 0  ;;  %v5217_v27 = vrot.slane %v5215_v39, 5  ;;  %v4169_v13 = vshrl.u32 %v11618_v32, 16  ;;  %v4876_v11 = vld [vmem:[#allocation4 + $0x80] sm:$0xf] }
 0x275   :  { %v5077_v63 = vsel %vm11030_vm0, %v5049_v35, %v5005_v42  ;;  %v4172_v16 = vshll.u32 %v11618_v32, 16  ;;  %v5199_v31 = vrot.slane %v5198_v21, 4  ;;  %v5212_v3 = vor.u32 %v5211_v9, %v5208_v37  ;;  %v4356_v19 = vld [vmem:[#allocation4 + $0x90] sm:$0xf]  ;;  %v4877_v39 = vld [vmem:[#allocation4 + $0x84] sm:$0x1] }
 0x276   :  { %v8808_v48 = vcombine.low %v5076_v33, %v5077_v63  ;;  %v4178_v62 = vshll.u32 %v4108_v28, 16  ;;  %v4171_v34 = vrot.slane %v4169_v13, 4  ;;  %v4183_v26 = vshrl.u32 %v11623_v52, 16 }
 0x277   :  { %v4174_v45 = vrot.slane %v4172_v16, 5  ;;  %v4186_v46 = vshll.u32 %v11623_v52, 16  ;;  %v5204_v55 = vsel %vm10201_vm12, %v5199_v31, %v5203_v4  ;;  %v5213_v47 = vrot.slane %v5212_v3, 4  ;;  %v229_v31 = vld [vmem:[#allocation4 + $0x98] sm:$0x1] }
 0x278   :  { %5508 = vmatmul.mubr.bf16.gmra.mrb[84].mxu0 %v8808_v48  ;;  %v4180_v44 = vrot.slane %v4178_v62, 5  ;;  %v4192_v18 = vshll.u32 %v4109_v0, 16  ;;  %v5259_v53 = vsel %vm11030_vm0, %v5204_v55, %v5123_v36  ;;  %v4185_v49 = vrot.slane %v4183_v26, 4  ;;  %v5015_v48 = vld [vmem:[#allocation4 + $0x80] sm:$0xe] }
 0x279   :  { %v4175_v60 = vor.u32 %v4174_v45, %v4171_v34  ;;  %v4188_v6 = vrot.slane %v4186_v46, 5  ;;  %v5218_v17 = vsel %vm10201_vm12, %v5213_v47, %v5217_v27  ;;  %v8777_v61 = vrot.slane %v4280_v58, 9  ;;  %v5014_v27 = vld [vmem:[#allocation4 + $0x78] sm:$0xe]  ;;  %v289_v45 = vld [vmem:[#allocation4 + $0x9c] sm:$0x1] }
 0x27a   :  { %v4194_v41 = vrot.slane %v4192_v18, 5  ;;  %v4326_v50 = vrot.slane %v4281_v2, 5  ;;  %v5260_v43 = vsel %vm11030_vm0, %v5218_v17, %v5124_v20  ;;  %v8778_v54 = vrot.slane %v4282_v40, 9  ;;  %v11672_v26 = vld [vmem:[#allocation4 + $0x90] sm:$0xf] }
 0x27b   :  { %v4176_v35 = vrot.slane %v4175_v60, 4  ;;  %v4189_v29 = vor.u32 %v4188_v6, %v4185_v49  ;;  %v8813_v15 = vcombine.low %v5259_v53, %v5260_v43  ;;  %v4330_v32 = vrot.slane %v4283_v22, 5  ;;  %v11674_v60 = vld [vmem:[#allocation4 + $0x80] sm:$0xf]  ;;  %v11680_v17 = vld [vmem:[#allocation4 + $0x88] sm:$0xf] }
 0x27c   :  { %v4327_v36 = vsel %vm10195_vm11, %v8777_v61, %v4326_v50  ;;  %v4939_v7 = vshrl.u32 %v4874_v14, 16  ;;  %v4942_v20 = vshll.u32 %v4874_v14, 16  ;;  %v4948_v63 = vshll.u32 %v4875_v1, 16 }
 0x27d   :  { %v4181_v8 = vsel %vm10201_vm12, %v4176_v35, %v4180_v44  ;;  %v4190_v52 = vrot.slane %v4189_v29, 4  ;;  %v4346_v33 = vsel %vm10999_vm14, %v4327_v36, 0  ;;  %5515 = vmatprep.mubr.bf16.mxu0 %v8813_v15  ;;  %v4331_v12 = vsel %vm10195_vm11, %v8778_v54, %v4330_v32  ;;  %v5133_v44 = vld [vmem:[#allocation4 + $0x94] sm:$0x1]  ;;  %v4110_v15 = vld [vmem:[#allocation4 + $0x84] sm:$0x1] }
 0x27e   :  { %v4236_v4 = vsel %vm11030_vm0, %v4181_v8, %v4100_v5  ;;  %v4363_v37 = vsel %vm11030_vm0, %v4355_v10, %v4346_v33  ;;  %v4941_v28 = vrot.slane %v4939_v7, 4  ;;  %v4347_v21 = vsel %vm10999_vm14, %v4331_v12, 0 }
 0x27f   :  { %v4195_v42 = vsel %vm10201_vm12, %v4190_v52, %v4194_v41  ;;  %v4944_v9 = vrot.slane %v4942_v20, 5  ;;  %v4364_v0 = vsel %vm11030_vm0, %v4356_v19, %v4347_v21  ;;  %v4953_v13 = vshrl.u32 %v4876_v11, 16  ;;  %v4111_v21 = vld [vmem:[#allocation4 + $0x8c] sm:$0x1] }
 0x280   :  { %v4237_v5 = vsel %vm11030_vm0, %v4195_v42, %v4101_v23  ;;  %v4956_v16 = vshll.u32 %v4876_v11, 16  ;;  %v8782_v62 = vcombine.low %v4363_v37, %v4364_v0  ;;  %v4950_v34 = vrot.slane %v4948_v63, 5 }
 0x281   :  { %v8769_v3 = vcombine.low %v4236_v4, %v4237_v5  ;;  %v4945_v58 = vor.u32 %v4944_v9, %v4941_v28  ;;  %v4955_v46 = vrot.slane %v4953_v13, 4  ;;  %v4962_v55 = vshll.u32 %v4877_v39, 16 }
 0x282   :  { %v4958_v2 = vrot.slane %v4956_v16, 5  ;;  %v8803_v47 = vrot.slane %v5014_v27, 9  ;;  %v5052_v18 = vrot.slane %v4875_v1, 5  ;;  %v8804_v40 = vrot.slane %v5015_v48, 9 }
 0x283   :  { %5709 = vmatmul.mubr.bf16.gmra.mrb[72].mxu1 %v8769_v3  ;;  %v4946_v23 = vrot.slane %v4945_v58, 4  ;;  %v5056_v53 = vrot.slane %v4877_v39, 5  ;;  %v4964_v6 = vrot.slane %v4962_v55, 5  ;;  %v230_v22 = vsel %vm10114_vm2, 0, %v229_v31  ;;  %v4878_v58 = vld [vmem:[#allocation4 + $0x88] sm:$0xf] }
 0x284   :  { %5716 = vmatprep.mubr.bf16.mxu1 %v8782_v62  ;;  %v4959_v49 = vor.u32 %v4958_v2, %v4955_v46  ;;  %v290_v14 = vsel %vm10124_vm4, 0, %v289_v45  ;;  %v5053_v61 = vsel %vm10195_vm11, %v8803_v47, %v5052_v18  ;;  %231 = vst [vmem:[#allocation4 + $0x98] sm:$0x1] %v230_v22  ;;  %v5125_v43 = vsel %vm10999_vm14, %v11672_v26, 0  ;;  %v4879_v2 = vld [vmem:[#allocation4 + $0x8c] sm:$0x1] }
 0x285   :  { %v4951_v41 = vsel %vm10201_vm12, %v4946_v23, %v4950_v34  ;;  %v5057_v50 = vsel %vm10195_vm11, %v8804_v40, %v5056_v53  ;;  %291 = vst [vmem:[#allocation4 + $0x9c] sm:$0x1] %v290_v14  ;;  %v5220_v29 = vshrl.u32 %v11672_v26, 16  ;;  %v5223_v54 = vshll.u32 %v11672_v26, 16  ;;  %v4880_v55 = vld [vmem:[#allocation4 + $0x90] sm:$0xf] }
 0x286   :  { %v4960_v35 = vrot.slane %v4959_v49, 4  ;;  %v5006_v30 = vsel %vm10999_vm14, %v4951_v41, 0  ;;  %v5229_v32 = vshll.u32 %v5133_v44, 16  ;;  %v4102_v10 = vsel %vm10999_vm14, %v11674_v60, 0  ;;  %v4881_v22 = vld [vmem:[#allocation4 + $0x94] sm:$0x1] }
 0x287   :  { %v5078_v36 = vsel %vm11030_vm0, %v5053_v61, %v5006_v30  ;;  %v4103_v1 = vsel %vm10999_vm14, %v11680_v17, 0  ;;  %v5222_v8 = vrot.slane %v5220_v29, 4  ;;  %v5225_v52 = vrot.slane %v5223_v54, 5  ;;  %v5016_v54 = vld [vmem:[#allocation4 + $0x88] sm:$0xe] }
 0x288   :  { %v4965_v7 = vsel %vm10201_vm12, %v4960_v35, %v4964_v6  ;;  %v4197_v33 = vshrl.u32 %v11674_v60, 16  ;;  %v5231_v20 = vrot.slane %v5229_v32, 5  ;;  %v4200_v4 = vshll.u32 %v11674_v60, 16 }
 0x289   :  { %v5007_v11 = vsel %vm10999_vm14, %v4965_v7, 0  ;;  %v4206_v12 = vshll.u32 %v4110_v15, 16  ;;  %v5226_v37 = vor.u32 %v5225_v52, %v5222_v8  ;;  %v4211_v28 = vshrl.u32 %v11680_v17, 16 }
 0x28a   :  { %v5079_v19 = vsel %vm11030_vm0, %v5057_v50, %v5007_v11  ;;  %v4199_v39 = vrot.slane %v4197_v33, 4  ;;  %v4202_v9 = vrot.slane %v4200_v4, 5  ;;  %v4214_v27 = vshll.u32 %v11680_v17, 16  ;;  %v5017_v11 = vld [vmem:[#allocation4 + $0x90] sm:$0xe] }
 0x28b   :  { %v8809_v42 = vcombine.low %v5078_v36, %v5079_v19  ;;  %v4208_v63 = vrot.slane %v4206_v12, 5  ;;  %v5118_v5 = vld [vmem:[#allocation4 + $0x98] sm:$0xf]  ;;  %v5227_v13 = vrot.slane %v5226_v37, 4  ;;  %v4213_v16 = vrot.slane %v4211_v28, 4 }
 0x28c   :  { %v5134_v0 = vld [vmem:[#allocation4 + $0x9c] sm:$0x1]  ;;  %v5126_v48 = vsel %vm10999_vm14, %v5118_v5, 0  ;;  %v5234_v31 = vshrl.u32 %v5118_v5, 16  ;;  %v5237_v3 = vshll.u32 %v5118_v5, 16  ;;  %v4203_v45 = vor.u32 %v4202_v9, %v4199_v39 }
 0x28d   :  { %5516 = vmatmul.mubr.bf16.gmra.mrb[88].mxu0 %v8809_v42  ;;  %v5243_v62 = vshll.u32 %v5134_v0, 16  ;;  %v5232_v34 = vsel %vm10201_vm12, %v5227_v13, %v5231_v20  ;;  %v4216_v26 = vrot.slane %v4214_v27, 5  ;;  %v4220_v46 = vshll.u32 %v4111_v21, 16  ;;  %v5725_v19 = vld [vmem:[#allocation4 + $0x10] sm:$0xe] }
 0x28e   :  { %v5236_v47 = vrot.slane %v5234_v31, 4  ;;  %v5239_v44 = vrot.slane %v5237_v3, 5  ;;  %v5261_v18 = vsel %vm11030_vm0, %v5232_v34, %v5125_v43  ;;  %v4204_v40 = vrot.slane %v4203_v45, 4  ;;  %v5726_v37 = vld [vmem:[#allocation4 + $0x14] sm:$0x1] }
 0x28f   :  { %v5245_v23 = vrot.slane %v5243_v62, 5  ;;  %v4217_v53 = vor.u32 %v4216_v26, %v4213_v16  ;;  %v4222_v60 = vrot.slane %v4220_v46, 5  ;;  %v4967_v49 = vshrl.u32 %v4878_v58, 16  ;;  %v5727_v9 = vld [vmem:[#allocation4 + $0x18] sm:$0xe] }
 0x290   :  { %v5240_v6 = vor.u32 %v5239_v44, %v5236_v47  ;;  %v4970_v14 = vshll.u32 %v4878_v58, 16  ;;  %v4976_v41 = vshll.u32 %v4879_v2, 16  ;;  %v4981_v61 = vshrl.u32 %v4880_v55, 16  ;;  %v5729_v3 = vld [vmem:[#allocation4 + $0x20] sm:$0xe] }
 0x291   :  { %v4209_v50 = vsel %vm10201_vm12, %v4204_v40, %v4208_v63  ;;  %v4218_v35 = vrot.slane %v4217_v53, 4  ;;  %v4969_v30 = vrot.slane %v4967_v49, 4  ;;  %v4984_v29 = vshll.u32 %v4880_v55, 16  ;;  %v5728_v63 = vld [vmem:[#allocation4 + $0x1c] sm:$0x1] }
 0x292   :  { %v5241_v15 = vrot.slane %v5240_v6, 4  ;;  %v4238_v43 = vsel %vm11030_vm0, %v4209_v50, %v4102_v10  ;;  %v4972_v36 = vrot.slane %v4970_v14, 5  ;;  %v4978_v32 = vrot.slane %v4976_v41, 5  ;;  %v5730_v34 = vld [vmem:[#allocation4 + $0x24] sm:$0x1] }
 0x293   :  { %v4223_v7 = vsel %vm10201_vm12, %v4218_v35, %v4222_v60  ;;  %v4983_v8 = vrot.slane %v4981_v61, 4  ;;  %v4986_v52 = vrot.slane %v4984_v29, 5  ;;  %v4990_v33 = vshll.u32 %v4881_v22, 16  ;;  %v5731_v45 = vld [vmem:[#allocation4 + $0x28] sm:$0xe] }
 0x294   :  { %v5246_v20 = vsel %vm10201_vm12, %v5241_v15, %v5245_v23  ;;  %v4239_v4 = vsel %vm11030_vm0, %v4223_v7, %v4103_v1  ;;  %v4973_v10 = vor.u32 %v4972_v36, %v4969_v30  ;;  %v8805_v12 = vrot.slane %v5016_v54, 9  ;;  %v5732_v47 = vld [vmem:[#allocation4 + $0x2c] sm:$0x1]  ;;  %v5733_v44 = vld [vmem:[#allocation4 + $0x30] sm:$0xe] }
 0x295   :  { %v5262_v39 = vsel %vm11030_vm0, %v5246_v20, %v5126_v48  ;;  %v8770_v28 = vcombine.low %v4238_v43, %v4239_v4  ;;  %v4987_v42 = vor.u32 %v4986_v52, %v4983_v8  ;;  %v4992_v21 = vrot.slane %v4990_v33, 5  ;;  %v5734_v60 = vld [vmem:[#allocation4 + $0x34] sm:$0x1]  ;;  %v5735_v49 = vld [vmem:[#allocation4 + $0x38] sm:$0xe] }
 0x296   :  { %v8814_v27 = vcombine.low %v5261_v18, %v5262_v39  ;;  %v4974_v5 = vrot.slane %v4973_v10, 4  ;;  %v5060_v0 = vrot.slane %v4879_v2, 5  ;;  %v8806_v13 = vrot.slane %v5017_v11, 9  ;;  %v5736_v61 = vld [vmem:[#allocation4 + $0x3c] sm:$0x1] }
 0x297   :  { %5717 = vmatmul.mubr.bf16.gmra.mrb[76].mxu1 %v8770_v28  ;;  %v4988_v17 = vrot.slane %v4987_v42, 4  ;;  %v5064_v16 = vrot.slane %v4881_v22, 5  ;;  %v8847_v1 = vrot.slane %v5725_v19, 9  ;;  %v5759_v31 = vrot.slane %v5726_v37, 5  ;;  %v5738_v8 = vld [vmem:[#allocation4 + $0x44] sm:$0x1] }
 0x298   :  { %5523 = vmatprep.mubr.bf16.mxu0 %v8814_v27  ;;  %v4979_v62 = vsel %vm10201_vm12, %v4974_v5, %v4978_v32  ;;  %v8848_v48 = vrot.slane %v5727_v9, 9  ;;  %v5763_v58 = vrot.slane %v5728_v63, 5  ;;  %v5061_v2 = vsel %vm10195_vm11, %v8805_v12, %v5060_v0  ;;  %v5737_v32 = vld [vmem:[#allocation4 + $0x40] sm:$0xe]  ;;  %v5739_v52 = vld [vmem:[#allocation4 + $0x48] sm:$0xe] }
 0x299   :  { %v4993_v26 = vsel %vm10201_vm12, %v4988_v17, %v4992_v21  ;;  %v5008_v46 = vsel %vm10999_vm14, %v4979_v62, 0  ;;  %v5760_v55 = vsel %vm10195_vm11, %v8847_v1, %v5759_v31  ;;  %v5065_v18 = vsel %vm10195_vm11, %v8806_v13, %v5064_v16  ;;  %v5740_v11 = vld [vmem:[#allocation4 + $0x4c] sm:$0x1]  ;;  %v5833_v20 = vld [vmem:[#allocation4 + $0x60] sm:$0xe] }
 0x29a   :  { %v5009_v23 = vsel %vm10999_vm14, %v4993_v26, 0  ;;  %v5764_v40 = vsel %vm10195_vm11, %v8848_v48, %v5763_v58  ;;  %v5797_v53 = vsel %vm10999_vm14, %v5760_v55, 0  ;;  %v5080_v6 = vsel %vm11030_vm0, %v5061_v2, %v5008_v46  ;;  %v5834_v4 = vld [vmem:[#allocation4 + $0x64] sm:$0x1]  ;;  %v5835_v42 = vld [vmem:[#allocation4 + $0x68] sm:$0xe] }
 0x29b   :  { %v5081_v22 = vsel %vm11030_vm0, %v5065_v18, %v5009_v23  ;;  %v5798_v14 = vsel %vm10999_vm14, %v5764_v40, 0  ;;  %v8849_v41 = vrot.slane %v5729_v3, 9  ;;  %v5767_v35 = vrot.slane %v5730_v34, 5  ;;  %v5836_v63 = vld [vmem:[#allocation4 + $0x6c] sm:$0x1] }
 0x29c   :  { %v8810_v50 = vcombine.low %v5080_v6, %v5081_v22  ;;  %v8850_v30 = vrot.slane %v5731_v45, 9  ;;  %v5771_v29 = vrot.slane %v5732_v47, 5  ;;  %v8855_v54 = vcombine.low %v5797_v53, %v5798_v14  ;;  %v5839_v58 = vld [vmem:[#allocation4 + $0x78] sm:$0xe]  ;;  %v5840_v34 = vld [vmem:[#allocation4 + $0x7c] sm:$0x1] }
 0x29d   :  { %v8851_v15 = vrot.slane %v5733_v44, 9  ;;  %v5775_v43 = vrot.slane %v5734_v60, 5  ;;  %v8852_v36 = vrot.slane %v5735_v49, 9  ;;  %v5779_v38 = vrot.slane %v5736_v61, 5  ;;  %v5841_v45 = vld [vmem:[#allocation4 + $0x80] sm:$0xe] }
 0x29e   :  { %5524 = vmatmul.mubr.bf16.gmra.mrb[92].mxu0 %v8810_v50  ;;  %v5772_v7 = vsel %vm10195_vm11, %v8850_v30, %v5771_v29  ;;  %v5768_v10 = vsel %vm10195_vm11, %v8849_v41, %v5767_v35  ;;  %v8853_v12 = vrot.slane %v5737_v32, 9  ;;  %v5783_v39 = vrot.slane %v5738_v8, 5  ;;  %v5842_v26 = vld [vmem:[#allocation4 + $0x84] sm:$0x1]  ;;  %v5837_v46 = vld [vmem:[#allocation4 + $0x70] sm:$0xe] }
 0x29f   :  { %9680 = vmatprep.mubr.bf16.mxu0 %v8855_v54  ;;  %v5776_v33 = vsel %vm10195_vm11, %v8851_v15, %v5775_v43  ;;  %v5800_v19 = vsel %vm10999_vm14, %v5772_v7, 0  ;;  %v5780_v37 = vsel %vm10195_vm11, %v8852_v36, %v5779_v38  ;;  %v8854_v28 = vrot.slane %v5739_v52, 9  ;;  %v5838_v2 = vld [vmem:[#allocation4 + $0x74] sm:$0x1]  ;;  %v5843_v18 = vld [vmem:[#allocation4 + $0x88] sm:$0xe] }
 0x2a0   :  { %v5801_v21 = vsel %vm10999_vm14, %v5776_v33, 0  ;;  %v5787_v9 = vrot.slane %v5740_v11, 5  ;;  %v8859_v27 = vrot.slane %v5833_v20, 9  ;;  %v5867_v5 = vrot.slane %v5834_v4, 5  ;;  %v5844_v60 = vld [vmem:[#allocation4 + $0x8c] sm:$0x1] }
 0x2a1   :  { %v5799_v0 = vsel %vm10999_vm14, %v5768_v10, 0  ;;  %v5802_v17 = vsel %vm10999_vm14, %v5780_v37, 0  ;;  %v8860_v1 = vrot.slane %v5835_v42, 9  ;;  %v5871_v31 = vrot.slane %v5836_v63, 5  ;;  %v5845_v15 = vld [vmem:[#allocation4 + $0x90] sm:$0xe] }
 0x2a2   :  { %v8856_v13 = vcombine.low %v5799_v0, %v5800_v19  ;;  %v8857_v16 = vcombine.low %v5801_v21, %v5802_v17  ;;  %v5784_v3 = vsel %vm10195_vm11, %v8853_v12, %v5783_v39  ;;  %v5788_v62 = vsel %vm10195_vm11, %v8854_v28, %v5787_v9  ;;  %v5846_v43 = vld [vmem:[#allocation4 + $0x94] sm:$0x1]  ;;  %v5847_v36 = vld [vmem:[#allocation4 + $0x98] sm:$0xe]  ;;  %v5848_v32 = vld [vmem:[#allocation4 + $0x9c] sm:$0x1] }
 0x2a3   :  { %v5868_v48 = vsel %vm10195_vm11, %v8859_v27, %v5867_v5  ;;  %v5803_v55 = vsel %vm10999_vm14, %v5784_v3, 0  ;;  %v5804_v47 = vsel %vm10999_vm14, %v5788_v62, 0  ;;  %v5872_v44 = vsel %vm10195_vm11, %v8860_v1, %v5871_v31 }
 0x2a4   :  { %v5905_v23 = vsel %vm10999_vm14, %v5868_v48, 0  ;;  %v8862_v40 = vrot.slane %v5839_v58, 9  ;;  %v5879_v53 = vrot.slane %v5840_v34, 5  ;;  %v8863_v49 = vrot.slane %v5841_v45, 9  ;;  %v11818_v48 = vld [vmem:[%s12751_s5 + $0x40] sm:$0xff]  }
 0x2a5   :  { %v5883_v6 = vrot.slane %v5842_v26, 5  ;;  %v8858_v22 = vcombine.low %v5803_v55, %v5804_v47  ;;  %v5906_v14 = vsel %vm10999_vm14, %v5872_v44, 0  ;;  %v8861_v41 = vrot.slane %v5837_v46, 9  ;;  %v9962_v58 = vld [vmem:[%s12751_s5] sm:$0xff]   ;;  %9728 = vmatprep.subr.bf16.mxu1 %v11818_v48  ;;  %v11827_v47 = vld [vmem:[%s12751_s5 + $0x48] sm:$0xff]  }
 0x2a6   :  { %9681 = vmatmul.mubr.bf16.vlgmr.msra.gmra.mrb[96].mxu0 %v8856_v13  ;;  %v5875_v61 = vrot.slane %v5838_v2, 5  ;;  %v8867_v50 = vcombine.low %v5905_v23, %v5906_v14  ;;  %v8864_v35 = vrot.slane %v5843_v18, 9  ;;  %v5887_v30 = vrot.slane %v5844_v60, 5  ;;  %9736 = vmatpush3.bf16.msra.mxu1 %v9962_v58  ;;  %v9964_v44 = vld [vmem:[%s12751_s5 + $0x8] sm:$0xff]  }
 0x2a7   :  { %9684 = vmatprep.mubr.bf16.mxu0 %v8857_v16  ;;  %v5880_v29 = vsel %vm10195_vm11, %v8862_v40, %v5879_v53  ;;  %v5884_v54 = vsel %vm10195_vm11, %v8863_v49, %v5883_v6  ;;  %v8865_v33 = vrot.slane %v5845_v15, 9  ;;  %v5891_v11 = vrot.slane %v5846_v43, 5  ;;  %9729 = vmatprep.subr.bf16.mxu1 %v11827_v47  ;;  %v11844_v15 = vld [vmem:[%s12751_s5 + $0x50] sm:$0xff]  }
 0x2a8   :  { %v5876_v7 = vsel %vm10195_vm11, %v8861_v41, %v5875_v61  ;;  %v5908_v38 = vsel %vm10999_vm14, %v5880_v29, 0  ;;  %v5888_v8 = vsel %vm10195_vm11, %v8864_v35, %v5887_v30  ;;  %v5909_v52 = vsel %vm10999_vm14, %v5884_v54, 0  ;;  %v9966_v43 = vld [vmem:[%s12751_s5 + $0x10] sm:$0xff]  }
 0x2a9   :  { %v8866_v20 = vrot.slane %v5847_v36, 9  ;;  %v5895_v4 = vrot.slane %v5848_v32, 5  ;;  %v5907_v10 = vsel %vm10999_vm14, %v5876_v7, 0  ;;  %v5910_v19 = vsel %vm10999_vm14, %v5888_v8, 0  ;;  %v9967_v36 = vld [vmem:[%s12751_s5 + $0x80] sm:$0xff]  }
 0x2aa   :  { %v8868_v12 = vcombine.low %v5907_v10, %v5908_v38  ;;  %v8869_v37 = vcombine.low %v5909_v52, %v5910_v19  ;;  %v5892_v39 = vsel %vm10195_vm11, %v8865_v33, %v5891_v11  ;;  %9737 = vmatpush3.bf16.msra.mxu1 %v9964_v44  ;;  %9696 = vmatprep.subr.bf16.mxu0 %v9967_v36  ;;  %v9977_v44 = vld [vmem:[%s12751_s5 + $0x68] sm:$0xff]   ;;  %vm6488_vm4 = vcmp.ge.s32.totalorder %v10985_v24, 32 }
 0x2ab   :  { %v5896_v28 = vsel %vm10195_vm11, %v8866_v20, %v5895_v4  ;;  %v5911_v42 = vsel %vm10999_vm14, %v5892_v39, 0  ;;  %9730 = vmatprep.subr.bf16.mxu1 %v11844_v15  ;;  %9697 = vmatpush3.bf16.msra.mxu0 %v9967_v36 }
 0x2ac   :  { %v5912_v21 = vsel %vm10999_vm14, %v5896_v28, 0  ;;  %v9968_v28 = vld [vmem:[%s12751_s5 + $0x88] sm:$0xff]  }
 0x2ad   :  { %v8870_v9 = vcombine.low %v5911_v42, %v5912_v21  ;;  %v9969_v42 = vld [vmem:[%s12751_s5 + $0x58] sm:$0xff]   ;;  %9698 = vmatprep.subr.bf16.mxu0 %v9968_v28 }
 0x2ae   :  { %9685 = vmatmul.mubr.bf16.gmra.mrb[100].mxu0 %v8858_v22  ;;  %9738 = vmatpush3.bf16.msra.mxu1 %v9966_v43  ;;  %v9970_v21 = vld [vmem:[%s12751_s5 + $0x18] sm:$0xff]  }
 0x2af   :  { %9688 = vmatprep.mubr.bf16.mxu0 %v8867_v50  ;;  %9731 = vmatprep.subr.bf16.mxu1 %v9969_v42 }
 0x2b0   :  { %9699 = vmatpush3.bf16.msra.mxu0 %v9968_v28 }
 0x2b2   :  { %9739 = vmatpush3.bf16.msra.mxu1 %v9970_v21 }
 0x2b6   :  { %9689 = vmatmul.mubr.bf16.gmra.mrb[104].mxu0 %v8868_v12 }
 0x2b7   :  { %9692 = vmatprep.mubr.bf16.mxu0 %v8869_v37 }
 0x2be   :  { %9693 = vmatmul.mubr.bf16.gmra.mrb[108].mxu0 %v8870_v9  ;;  %v9971_v9 = vld [vmem:[%s12751_s5 + $0x90] sm:$0xff]  }
 0x2bf   :  { %9700 = vmatprep.subr.bf16.mxu0 %v9971_v9 }
 0x2c0   :  { %9701 = vmatpush3.bf16.msra.mxu0 %v9971_v9 }
 0x2d3   :  { %v9424_v63 = vpop.f32.mrb[48].mxu1 }
 0x2d4   :  { %v9425_v27 = vpop.f32.mrb[49].mxu1 }
 0x2d5   :  { %v9426_v5 = vadd.f32 %v9425_v27, %v9424_v63  ;;  %v9427_v0 = vpop.f32.mrb[50].mxu1 }
 0x2d6   :  { %v9428_v13 = vpop.f32.mrb[51].mxu1 }
 0x2d7   :  { %v9429_v17 = vadd.f32 %v9428_v13, %v9427_v0 }
 0x2e1   :  { %v9360_v16 = vpop.f32.mrb[64].mxu0 }
 0x2e2   :  { %v9361_v1 = vpop.f32.mrb[65].mxu0 }
 0x2e3   :  { %v9362_v31 = vadd.f32 %v9361_v1, %v9360_v16  ;;  %v9363_v3 = vpop.f32.mrb[66].mxu0  ;;  %v9972_v1 = vld [vmem:[%s12751_s5 + $0x98] sm:$0xff]  }
 0x2e4   :  { %v9364_v62 = vpop.f32.mrb[67].mxu0  ;;  %9702 = vmatprep.subr.bf16.mxu0 %v9972_v1 }
 0x2e5   :  { %v9365_v59 = vadd.f32 %v9364_v62, %v9363_v3  ;;  %v11835_v22 = vadd.f32 %v9426_v5, %v9362_v31  ;;  %v9973_v31 = vld [vmem:[%s12751_s5 + $0x60] sm:$0xff]   ;;  %9703 = vmatpush3.bf16.msra.mxu0 %v9972_v1 }
 0x2e6   :  { %v9974_v3 = vld [vmem:[%s12751_s5 + $0x20] sm:$0xff]   ;;  %9732 = vmatprep.subr.bf16.mxu1 %v9973_v31 }
 0x2e7   :  { %v11837_v14 = vadd.f32 %v9429_v17, %v9365_v59  ;;  %v9975_v62 = vld [vmem:[%s12751_s5 + $0xa0] sm:$0xff]   ;;  %9740 = vmatpush3.bf16.msra.mxu1 %v9974_v3 }
 0x2e8   :  { %9704 = vmatprep.subr.bf16.mxu0 %v9975_v62  ;;  %9733 = vmatprep.subr.bf16.mxu1 %v9977_v44 }
 0x2e9   :  { %9705 = vmatpush3.bf16.msra.mxu0 %v9975_v62 }
 0x2ee   :  { %v9430_v34 = vpop.f32.mrb[52].mxu1 }
 0x2ef   :  { %v9431_v45 = vpop.f32.mrb[53].mxu1 }
 0x2f0   :  { %v9432_v26 = vadd.f32 %v9431_v45, %v9430_v34  ;;  %v9433_v46 = vpop.f32.mrb[54].mxu1 }
 0x2f1   :  { %v9434_v2 = vpop.f32.mrb[55].mxu1 }
 0x2f2   :  { %v9435_v55 = vadd.f32 %v9434_v2, %v9433_v46 }
 0x2f9   :  { %v9366_v23 = vpop.f32.mrb[68].mxu0 }
 0x2fa   :  { %v9367_v18 = vpop.f32.mrb[69].mxu0 }
 0x2fb   :  { %v9368_v40 = vadd.f32 %v9367_v18, %v9366_v23  ;;  %v9369_v53 = vpop.f32.mrb[70].mxu0  ;;  %v9978_v23 = vld [vmem:[%s12751_s5 + $0x28] sm:$0xff]   ;;  %v9979_v18 = vld [vmem:[%s12751_s5 + $0xb0] sm:$0xff]  }
 0x2fc   :  { %v9370_v60 = vpop.f32.mrb[71].mxu0  ;;  %9741 = vmatpush3.bf16.msra.mxu1 %v9978_v23 }
 0x2fd   :  { %v9371_v49 = vadd.f32 %v9370_v60, %v9369_v53  ;;  %v11833_v6 = vadd.f32 %v9432_v26, %v9368_v40  ;;  %v9981_v40 = vld [vmem:[%s12751_s5 + $0x70] sm:$0xff]  }
 0x2fe   :  { %v9982_v53 = vld [vmem:[%s12751_s5 + $0x30] sm:$0xff]   ;;  %9734 = vmatprep.subr.bf16.mxu1 %v9981_v40 }
 0x2ff   :  { %v11839_v54 = vadd.f32 %v9435_v55, %v9371_v49  ;;  %v9976_v55 = vld [vmem:[%s12751_s5 + $0xa8] sm:$0xff]   ;;  %v9980_v49 = vld [vmem:[%s12751_s5 + $0xb8] sm:$0xff]  }
 0x300   :  { %9706 = vmatprep.subr.bf16.mxu0 %v9976_v55  ;;  %9742 = vmatpush3.bf16.msra.mxu1 %v9982_v53 }
 0x301   :  { %9707 = vmatpush3.bf16.msra.mxu0 %v9976_v55  ;;  %v6972_v55 = vld [vmem:[#allocation3 + $0x48] sm:$0xf] }
 0x302   :  { %9708 = vmatprep.subr.bf16.mxu0 %v9979_v18  ;;  %v7091_v40 = vshll.u32 %v6972_v55, 16 }
 0x304   :  { %v9436_v41 = vpop.f32.mrb[56].mxu1 }
 0x305   :  { %v9437_v61 = vpop.f32.mrb[57].mxu1  ;;  %9709 = vmatpush3.bf16.msra.mxu0 %v9979_v18  ;;  %v7088_v18 = vshrl.u32 %v6972_v55, 16 }
 0x306   :  { %v9438_v50 = vadd.f32 %v9437_v61, %v9436_v41  ;;  %v9439_v35 = vpop.f32.mrb[58].mxu1  ;;  %v9983_v41 = vld [vmem:[%s12751_s5 + $0x78] sm:$0xff]   ;;  %9710 = vmatprep.subr.bf16.mxu0 %v9980_v49 }
 0x307   :  { %v9440_v30 = vpop.f32.mrb[59].mxu1  ;;  %9735 = vmatprep.subr.bf16.mxu1 %v9983_v41 }
 0x308   :  { %v9441_v29 = vadd.f32 %v9440_v30, %v9439_v35 }
 0x309   :  { %9711 = vmatpush3.bf16.msra.mxu0 %v9980_v49  ;;  %v7871_v49 = vld [vmem:[#allocation3 + $0x48] sm:$0xe] }
 0x30a   :  { %9504 = vmatprep.subr.bf16.mxu0 %v11818_v48 }
 0x30f   :  { %v9372_v32 = vpop.f32.mrb[72].mxu0 }
 0x310   :  { %v9373_v7 = vpop.f32.mrb[73].mxu0 }
 0x311   :  { %v9374_v38 = vadd.f32 %v9373_v7, %v9372_v32  ;;  %v9375_v8 = vpop.f32.mrb[74].mxu0 }
 0x312   :  { %v9376_v52 = vpop.f32.mrb[75].mxu0 }
 0x313   :  { %v9377_v33 = vadd.f32 %v9376_v52, %v9375_v8  ;;  %v11853_v11 = vadd.f32 %v9438_v50, %v9374_v38 }
 0x315   :  { %v11855_v20 = vadd.f32 %v9441_v29, %v9377_v33  ;;  %v9984_v29 = vld [vmem:[%s12751_s5 + $0x38] sm:$0xff]  }
 0x316   :  { %v9442_v4 = vpop.f32.mrb[60].mxu1  ;;  %9743 = vmatpush3.bf16.msra.mxu1 %v9984_v29 }
 0x317   :  { %v9443_v10 = vpop.f32.mrb[61].mxu1 }
 0x318   :  { %v9444_v12 = vadd.f32 %v9443_v10, %v9442_v4  ;;  %v9445_v19 = vpop.f32.mrb[62].mxu1 }
 0x319   :  { %v9446_v37 = vpop.f32.mrb[63].mxu1 }
 0x31a   :  { %v9447_v39 = vadd.f32 %v9446_v37, %v9445_v19 }
 0x320   :  { %v9378_v63 = vpop.f32.mrb[76].mxu0 }
 0x321   :  { %v9379_v27 = vpop.f32.mrb[77].mxu0 }
 0x322   :  { %v9380_v5 = vadd.f32 %v9379_v27, %v9378_v63  ;;  %v9381_v0 = vpop.f32.mrb[78].mxu0 }
 0x323   :  { %v9382_v13 = vpop.f32.mrb[79].mxu0 }
 0x324   :  { %v9383_v17 = vadd.f32 %v9382_v13, %v9381_v0  ;;  %v11869_v16 = vadd.f32 %v9444_v12, %v9380_v5 }
 0x326   :  { %v11883_v59 = vadd.f32 %v9447_v39, %v9383_v17 }
 0x32b   :  { %v9448_v58 = vpop.f32.mrb[64].mxu1 }
 0x32c   :  { %v9449_v34 = vpop.f32.mrb[65].mxu1 }
 0x32d   :  { %v9450_v45 = vadd.f32 %v9449_v34, %v9448_v58  ;;  %v9451_v26 = vpop.f32.mrb[66].mxu1 }
 0x32e   :  { %v9452_v46 = vpop.f32.mrb[67].mxu1 }
 0x32f   :  { %v9453_v2 = vadd.f32 %v9452_v46, %v9451_v26 }
 0x335   :  { %v9384_v60 = vpop.f32.mrb[80].mxu0 }
 0x336   :  { %v9385_v61 = vpop.f32.mrb[81].mxu0 }
 0x337   :  { %v9386_v50 = vadd.f32 %v9385_v61, %v9384_v60  ;;  %v9387_v35 = vpop.f32.mrb[82].mxu0 }
 0x338   :  { %v9388_v30 = vpop.f32.mrb[83].mxu0 }
 0x339   :  { %v9389_v43 = vadd.f32 %v9388_v30, %v9387_v35  ;;  %v11912_v36 = vadd.f32 %v9450_v45, %v9386_v50  ;;  %v7872_v50 = vld [vmem:[#allocation3 + $0x4c] sm:$0x1]  ;;  %v7090_v35 = vrot.slane %v7088_v18, 4  ;;  %v7093_v30 = vrot.slane %v7091_v40, 5 }
 0x33b   :  { %v11914_v32 = vadd.f32 %v9453_v2, %v9389_v43  ;;  %v6988_v43 = vld [vmem:[#allocation3 + $0x4c] sm:$0x1] }
 0x340   :  { %v9454_v7 = vpop.f32.mrb[68].mxu1 }
 0x341   :  { %v9455_v38 = vpop.f32.mrb[69].mxu1 }
 0x342   :  { %v9456_v8 = vadd.f32 %v9455_v38, %v9454_v7  ;;  %v9457_v52 = vpop.f32.mrb[70].mxu1 }
 0x343   :  { %v9458_v33 = vpop.f32.mrb[71].mxu1 }
 0x344   :  { %v9459_v4 = vadd.f32 %v9458_v33, %v9457_v52  ;;  %v7980_v52 = vld [vmem:[#allocation3 + $0x9c] sm:$0x1]  ;;  %v8951_v33 = vrot.slane %v7871_v49, 9 }
 0x34b   :  { %v9390_v10 = vpop.f32.mrb[84].mxu0 }
 0x34c   :  { %v9391_v12 = vpop.f32.mrb[85].mxu0 }
 0x34d   :  { %v9392_v19 = vadd.f32 %v9391_v12, %v9390_v10  ;;  %v9393_v37 = vpop.f32.mrb[86].mxu0  ;;  %v7094_v12 = vor.u32 %v7093_v30, %v7090_v35 }
 0x34e   :  { %v9394_v39 = vpop.f32.mrb[87].mxu0 }
 0x34f   :  { %v9395_v28 = vadd.f32 %v9394_v39, %v9393_v37  ;;  %v11917_v42 = vadd.f32 %v9456_v8, %v9392_v19  ;;  %v7979_v8 = vld [vmem:[#allocation3 + $0x98] sm:$0xe]  ;;  %v7097_v19 = vshll.u32 %v6988_v43, 16  ;;  %v8027_v39 = vrot.slane %v7980_v52, 5 }
 0x350   :  { %v8963_v37 = vrot.slane %v7979_v8, 9 }
 0x351   :  { %v11919_v21 = vadd.f32 %v9459_v4, %v9395_v28  ;;  %v7919_v4 = vrot.slane %v7872_v50, 5 }
 0x356   :  { %v9460_v9 = vpop.f32.mrb[72].mxu1 }
 0x357   :  { %v9461_v63 = vpop.f32.mrb[73].mxu1 }
 0x358   :  { %v9462_v27 = vadd.f32 %v9461_v63, %v9460_v9  ;;  %v9463_v48 = vpop.f32.mrb[74].mxu1  ;;  %v11932_v9 = vld [vmem:[%s12752_s4] ss:$0 sm:$0xff] }
 0x359   :  { %v9464_v5 = vpop.f32.mrb[75].mxu1 }
 0x35a   :  { %v9465_v0 = vadd.f32 %v9464_v5, %v9463_v48  ;;  %v11938_v48 = vsel %vm10195_vm11, %v8951_v33, %v7919_v4 }
 0x360   :  { %v9396_v13 = vpop.f32.mrb[88].mxu0 }
 0x361   :  { %v9397_v17 = vpop.f32.mrb[89].mxu0 }
 0x362   :  { %v9398_v1 = vadd.f32 %v9397_v17, %v9396_v13  ;;  %v9399_v31 = vpop.f32.mrb[90].mxu0  ;;  %v11941_v13 = vrot.slane %v7094_v12, 4  ;;  %v11943_v17 = vrot.slane %v7097_v19, 5  ;;  %v6385_v12 = vld [vmem:[#allocation3 + $0x18] sm:$0xf] }
 0x363   :  { %v9400_v3 = vpop.f32.mrb[91].mxu0  ;;  %v6388_v19 = vld [vmem:[#allocation3 + $0x1c] sm:$0x1] }
 0x364   :  { %v9401_v62 = vadd.f32 %v9400_v3, %v9399_v31  ;;  %v11921_v58 = vadd.f32 %v9462_v27, %v9398_v1 }
 0x366   :  { %v11923_v34 = vadd.f32 %v9465_v0, %v9401_v62 }
 0x36a   :  { %v9466_v45 = vpop.f32.mrb[76].mxu1 }
 0x36b   :  { %v9467_v26 = vpop.f32.mrb[77].mxu1 }
 0x36c   :  { %v9468_v46 = vadd.f32 %v9467_v26, %v9466_v45  ;;  %v9469_v2 = vpop.f32.mrb[78].mxu1  ;;  %v7936_v26 = vsel %vm11947_vm3, %v11938_v48, 0 }
 0x36d   :  { %v9470_v44 = vpop.f32.mrb[79].mxu1 }
 0x36e   :  { %v9471_v23 = vadd.f32 %v9470_v44, %v9469_v2 }
 0x371   :  { %v9402_v53 = vpop.f32.mrb[92].mxu0 }
 0x372   :  { %v9403_v60 = vpop.f32.mrb[93].mxu0 }
 0x373   :  { %v9404_v41 = vadd.f32 %v9403_v60, %v9402_v53  ;;  %v9405_v61 = vpop.f32.mrb[94].mxu0 }
 0x374   :  { %v9406_v29 = vpop.f32.mrb[95].mxu0 }
 0x375   :  { %v9407_v7 = vadd.f32 %v9406_v29, %v9405_v61  ;;  %v11925_v38 = vadd.f32 %v9468_v46, %v9404_v41  ;;  %v7145_v46 = vld [vmem:[#allocation3 + $0x50] sm:$0xf] }
 0x376   :  { %v7170_v55 = vshrl.u32 %v7145_v46, 16  ;;  %v7173_v44 = vshll.u32 %v7145_v46, 16  ;;  %v6376_v46 = vld [vmem:[#allocation3 + $0xc] sm:$0x1] }
 0x377   :  { %v11927_v10 = vadd.f32 %v9471_v23, %v9407_v7  ;;  %v11961_v23 = vld [vmem:[#allocation3] sm:$0xf] }
 0x378   :  { %v11971_v41 = vrot.slane %v7170_v55, 4  ;;  %v6480_v61 = vsel %vm11947_vm3, %v11961_v23, 0  ;;  %v11976_v29 = vrot.slane %v7173_v44, 5  ;;  %v6499_v43 = vshrl.u32 %v11961_v23, 16 }
 0x379   :  { %v9682_v28 = vpop.f32.mrb[96].mxu0 }
 0x37a   :  { %v6112_v63 = vadd.f32 %v9682_v28, %v11833_v6  ;;  %v6047_v27 = vpop.f32.mrb[97].mxu0  ;;  %v11953_v6 = vsel %vm10195_vm11, %v8963_v37, %v8027_v39 }
 0x37b   :  { %v6110_v5 = vadd.f32 %v6047_v27, %v11835_v22  ;;  %v9683_v0 = vpop.f32.mrb[98].mxu0  ;;  %v8044_v53 = vsel %vm11947_vm3, %v11953_v6, 0 }
 0x37c   :  { %v6135_v1 = vadd.f32 %v11932_v9, %v6112_v63  ;;  %v6113_v31 = vadd.f32 %v9683_v0, %v11839_v54  ;;  %v6050_v3 = vpop.f32.mrb[99].mxu0  ;;  %v6373_v0 = vld [vmem:[#allocation3 + $0x8] sm:$0xf] }
 0x37d   :  { %v6133_v22 = vadd.f32 %v11932_v9, %v6110_v5  ;;  %v6111_v45 = vadd.f32 %v6050_v3, %v11837_v14  ;;  %v7100_v14 = vsel %vm10201_vm12, %v11941_v13, %v11943_v17 }
 0x37e   :  { %v6151_v2 = vmax.f32 %v6135_v1, 0.0  ;;  %v6136_v54 = vadd.f32 %v11932_v9, %v6113_v31 }
 0x37f   :  { %v6149_v18 = vmax.f32 %v6133_v22, 0.0  ;;  %v6134_v40 = vadd.f32 %v11932_v9, %v6111_v45 }
 0x380   :  { %v9027_v60 = vpack.c.bf16 %v6151_v2, %v6151_v2  ;;  %v6152_v49 = vmax.f32 %v6136_v54, 0.0 }
 0x381   :  { %v9025_v50 = vpack.c.bf16 %v6149_v18, %v6149_v18  ;;  %v6150_v35 = vmax.f32 %v6134_v40, 0.0  ;;  %v9686_v30 = vpop.f32.mrb[100].mxu0  ;;  %v6391_v40 = vld [vmem:[#allocation3 + $0x20] sm:$0xf] }
 0x382   :  { %v6230_v7 = vshrl.u32 %v9027_v60, 16  ;;  %v6233_v8 = vshll.u32 %v9027_v60, 16  ;;  %v9028_v52 = vpack.c.bf16 %v6152_v49, %v6152_v49  ;;  %v6116_v33 = vadd.f32 %v9686_v30, %v11869_v16  ;;  %v6063_v4 = vpop.f32.mrb[101].mxu0 }
 0x383   :  { %v6214_v37 = vshrl.u32 %v9025_v50, 16  ;;  %v6217_v39 = vshll.u32 %v9025_v50, 16  ;;  %v9026_v28 = vpack.c.bf16 %v6150_v35, %v6150_v35  ;;  %v6114_v63 = vadd.f32 %v6063_v4, %v11853_v11  ;;  %v9687_v27 = vpop.f32.mrb[102].mxu0  ;;  %v6394_v50 = vld [vmem:[#allocation3 + $0x24] sm:$0x1] }
 0x384   :  { %v6232_v5 = vrot.slane %v6230_v7, 7  ;;  %v6238_v1 = vshrl.u32 %v9028_v52, 16  ;;  %v6241_v31 = vshll.u32 %v9028_v52, 16  ;;  %v6139_v3 = vadd.f32 %v11932_v9, %v6116_v33  ;;  %v6066_v22 = vpop.f32.mrb[103].mxu0 }
 0x385   :  { %v6216_v45 = vrot.slane %v6214_v37, 7  ;;  %v6222_v2 = vshrl.u32 %v9026_v28, 16  ;;  %v6225_v16 = vshll.u32 %v9026_v28, 16  ;;  %v6137_v54 = vadd.f32 %v11932_v9, %v6114_v63  ;;  %v6379_v37 = vld [vmem:[#allocation3 + $0x10] sm:$0xf] }
 0x386   :  { %v6235_v55 = vor.u32 %v6233_v8, %v6232_v5  ;;  %v6236_v44 = vrot.slane %v6232_v5, 4  ;;  %v6240_v18 = vrot.slane %v6238_v1, 7  ;;  %v6155_v60 = vmax.f32 %v6139_v3, 0.0  ;;  %v6382_v28 = vld [vmem:[#allocation3 + $0x14] sm:$0x1] }
 0x387   :  { %v6219_v11 = vor.u32 %v6217_v39, %v6216_v45  ;;  %v6220_v49 = vrot.slane %v6216_v45, 4  ;;  %v6224_v35 = vrot.slane %v6222_v2, 7  ;;  %v6153_v30 = vmax.f32 %v6137_v54, 0.0 }
 0x388   :  { %v6386_v7 = vsel %vm10155_vm6, %v6235_v55, %v6385_v12  ;;  %v6389_v52 = vsel %vm10114_vm2, %v6236_v44, %v6388_v19  ;;  %v6243_v33 = vor.u32 %v6241_v31, %v6240_v18  ;;  %v6244_v4 = vrot.slane %v6240_v18, 4 }
 0x389   :  { %6387 = vst [vmem:[#allocation3 + $0x18] sm:$0xf] %v6386_v7  ;;  %6390 = vst [vmem:[#allocation3 + $0x1c] sm:$0x1] %v6389_v52  ;;  %v6374_v8 = vsel %vm10155_vm6, %v6219_v11, %v6373_v0  ;;  %v6377_v39 = vsel %vm10114_vm2, %v6220_v49, %v6376_v46  ;;  %v6227_v63 = vor.u32 %v6225_v16, %v6224_v35  ;;  %v6228_v5 = vrot.slane %v6224_v35, 4  ;;  %v9690_v1 = vpop.f32.mrb[104].mxu0 }
 0x38a   :  { %6375 = vst [vmem:[#allocation3 + $0x8] sm:$0xf] %v6374_v8  ;;  %6378 = vst [vmem:[#allocation3 + $0xc] sm:$0x1] %v6377_v39  ;;  %v6392_v12 = vsel %vm10155_vm6, %v6243_v33, %v6391_v40  ;;  %v6395_v19 = vsel %vm10114_vm2, %v6244_v4, %v6394_v50  ;;  %v9031_v31 = vpack.c.bf16 %v6155_v60, %v6155_v60  ;;  %v6079_v45 = vpop.f32.mrb[105].mxu0 }
 0x38b   :  { %v9029_v3 = vpack.c.bf16 %v6153_v30, %v6153_v30  ;;  %6396 = vst [vmem:[#allocation3 + $0x24] sm:$0x1] %v6395_v19  ;;  %6393 = vst [vmem:[#allocation3 + $0x20] sm:$0xf] %v6392_v12  ;;  %v6380_v0 = vsel %vm10155_vm6, %v6227_v63, %v6379_v37  ;;  %v6383_v46 = vsel %vm10114_vm2, %v6228_v5, %v6382_v28  ;;  %v9691_v54 = vpop.f32.mrb[106].mxu0 }
 0x38c   :  { %v6117_v2 = vadd.f32 %v9687_v27, %v11883_v59  ;;  %v6115_v16 = vadd.f32 %v6066_v22, %v11855_v20  ;;  %6381 = vst [vmem:[#allocation3 + $0x10] sm:$0xf] %v6380_v0  ;;  %6384 = vst [vmem:[#allocation3 + $0x14] sm:$0x1] %v6383_v46  ;;  %v6262_v55 = vshrl.u32 %v9031_v31, 16  ;;  %v6265_v44 = vshll.u32 %v9031_v31, 16 }
 0x38d   :  { %v6246_v18 = vshrl.u32 %v9029_v3, 16  ;;  %v6249_v40 = vshll.u32 %v9029_v3, 16  ;;  %v6082_v60 = vpop.f32.mrb[107].mxu0  ;;  %v6120_v50 = vadd.f32 %v9690_v1, %v11917_v42  ;;  %v6118_v35 = vadd.f32 %v6079_v45, %v11912_v36  ;;  %v6409_v59 = vld [vmem:[#allocation3 + $0x38] sm:$0xf] }
 0x38e   :  { %v6140_v11 = vadd.f32 %v11932_v9, %v6117_v2  ;;  %v6138_v49 = vadd.f32 %v11932_v9, %v6115_v16  ;;  %v6264_v30 = vrot.slane %v6262_v55, 7  ;;  %v6412_v27 = vld [vmem:[#allocation3 + $0x3c] sm:$0x1]  ;;  %v6121_v22 = vadd.f32 %v9691_v54, %v11919_v21  ;;  %v6397_v52 = vld [vmem:[#allocation3 + $0x28] sm:$0xf] }
 0x38f   :  { %v6248_v20 = vrot.slane %v6246_v18, 7  ;;  %v6119_v7 = vadd.f32 %v6082_v60, %v11914_v32  ;;  %v6400_v33 = vld [vmem:[#allocation3 + $0x2c] sm:$0x1]  ;;  %v6143_v28 = vadd.f32 %v11932_v9, %v6120_v50  ;;  %v6141_v8 = vadd.f32 %v11932_v9, %v6118_v35  ;;  %v6418_v35 = vld [vmem:[#allocation3 + $0x44] sm:$0x1] }
 0x390   :  { %v6156_v4 = vmax.f32 %v6140_v11, 0.0  ;;  %v6154_v37 = vmax.f32 %v6138_v49, 0.0  ;;  %v6267_v39 = vor.u32 %v6265_v44, %v6264_v30  ;;  %v6268_v42 = vrot.slane %v6264_v30, 4  ;;  %v6415_v44 = vld [vmem:[#allocation3 + $0x40] sm:$0xf] }
 0x391   :  { %v6251_v63 = vor.u32 %v6249_v40, %v6248_v20  ;;  %v6252_v36 = vrot.slane %v6248_v20, 4  ;;  %v6159_v12 = vmax.f32 %v6143_v28, 0.0  ;;  %v6157_v19 = vmax.f32 %v6141_v8, 0.0  ;;  %v9694_v31 = vpop.f32.mrb[108].mxu0 }
 0x392   :  { %v9032_v5 = vpack.c.bf16 %v6156_v4, %v6156_v4  ;;  %v9030_v1 = vpack.c.bf16 %v6154_v37, %v6154_v37  ;;  %v6410_v32 = vsel %vm10155_vm6, %v6267_v39, %v6409_v59  ;;  %v6413_v21 = vsel %vm10114_vm2, %v6268_v42, %v6412_v27  ;;  %v6095_v0 = vpop.f32.mrb[109].mxu0  ;;  %v6403_v59 = vld [vmem:[#allocation3 + $0x30] sm:$0xf] }
 0x393   :  { %v6398_v3 = vsel %vm10155_vm6, %v6251_v63, %v6397_v52  ;;  %v6401_v45 = vsel %vm10114_vm2, %v6252_v36, %v6400_v33  ;;  %6411 = vst [vmem:[#allocation3 + $0x38] sm:$0xf] %v6410_v32  ;;  %6414 = vst [vmem:[#allocation3 + $0x3c] sm:$0x1] %v6413_v21  ;;  %v9695_v55 = vpop.f32.mrb[110].mxu0  ;;  %v9035_v18 = vpack.c.bf16 %v6159_v12, %v6159_v12 }
 0x394   :  { %6402 = vst [vmem:[#allocation3 + $0x2c] sm:$0x1] %v6401_v45  ;;  %6399 = vst [vmem:[#allocation3 + $0x28] sm:$0xf] %v6398_v3  ;;  %v6270_v46 = vshrl.u32 %v9032_v5, 16  ;;  %v6273_v2 = vshll.u32 %v9032_v5, 16  ;;  %v9033_v40 = vpack.c.bf16 %v6157_v19, %v6157_v19  ;;  %v6144_v60 = vadd.f32 %v11932_v9, %v6121_v22 }
 0x395   :  { %v6254_v16 = vshrl.u32 %v9030_v1, 16  ;;  %v6257_v54 = vshll.u32 %v9030_v1, 16  ;;  %v6142_v11 = vadd.f32 %v11932_v9, %v6119_v7  ;;  %v6098_v49 = vpop.f32.mrb[111].mxu0  ;;  %v6124_v27 = vadd.f32 %v9694_v31, %v11925_v38  ;;  %v6406_v52 = vld [vmem:[#allocation3 + $0x34] sm:$0x1] }
 0x396   :  { %v6272_v50 = vrot.slane %v6270_v46, 7  ;;  %v6122_v20 = vadd.f32 %v6095_v0, %v11921_v58  ;;  %v6294_v33 = vshrl.u32 %v9035_v18, 16  ;;  %v6297_v4 = vshll.u32 %v9035_v18, 16  ;;  %v6433_v7 = vld [vmem:[#allocation3 + $0x68] sm:$0xf] }
 0x397   :  { %v6256_v30 = vrot.slane %v6254_v16, 7  ;;  %v6278_v37 = vshrl.u32 %v9033_v40, 16  ;;  %v6281_v28 = vshll.u32 %v9033_v40, 16  ;;  %v6160_v5 = vmax.f32 %v6144_v60, 0.0  ;;  %v6436_v31 = vld [vmem:[#allocation3 + $0x6c] sm:$0x1] }
 0x398   :  { %v6275_v8 = vor.u32 %v6273_v2, %v6272_v50  ;;  %v6276_v39 = vrot.slane %v6272_v50, 4  ;;  %v6296_v63 = vrot.slane %v6294_v33, 7  ;;  %v6158_v1 = vmax.f32 %v6142_v11, 0.0  ;;  %v6421_v32 = vld [vmem:[#allocation3 + $0x58] sm:$0xf] }
 0x399   :  { %v6259_v42 = vor.u32 %v6257_v54, %v6256_v30  ;;  %v6260_v22 = vrot.slane %v6256_v30, 4  ;;  %v6280_v36 = vrot.slane %v6278_v37, 7  ;;  %v6424_v21 = vld [vmem:[#allocation3 + $0x5c] sm:$0x1]  ;;  %v9036_v2 = vpack.c.bf16 %v6160_v5, %v6160_v5  ;;  %v7857_v50 = vld [vmem:[#allocation3 + $0x10] sm:$0xe] }
 0x39a   :  { %v6416_v12 = vsel %vm10155_vm6, %v6275_v8, %v6415_v44  ;;  %v6419_v58 = vsel %vm10114_vm2, %v6276_v39, %v6418_v35  ;;  %v6299_v3 = vor.u32 %v6297_v4, %v6296_v63  ;;  %v6300_v45 = vrot.slane %v6296_v63, 4  ;;  %v7858_v35 = vld [vmem:[#allocation3 + $0x14] sm:$0x1]  ;;  %v6439_v8 = vld [vmem:[#allocation3 + $0x70] sm:$0xf] }
 0x39b   :  { %v6404_v38 = vsel %vm10155_vm6, %v6259_v42, %v6403_v59  ;;  %v6407_v19 = vsel %vm10114_vm2, %v6260_v22, %v6406_v52  ;;  %6417 = vst [vmem:[#allocation3 + $0x40] sm:$0xf] %v6416_v12  ;;  %6420 = vst [vmem:[#allocation3 + $0x44] sm:$0x1] %v6419_v58  ;;  %v6283_v0 = vor.u32 %v6281_v28, %v6280_v36  ;;  %v6284_v46 = vrot.slane %v6280_v36, 4 }
 0x39c   :  { %6405 = vst [vmem:[#allocation3 + $0x30] sm:$0xf] %v6404_v38  ;;  %6408 = vst [vmem:[#allocation3 + $0x34] sm:$0x1] %v6407_v19  ;;  %v9034_v16 = vpack.c.bf16 %v6158_v1, %v6158_v1  ;;  %v6147_v54 = vadd.f32 %v11932_v9, %v6124_v27  ;;  %v6145_v44 = vadd.f32 %v11932_v9, %v6122_v20  ;;  %v6302_v30 = vshrl.u32 %v9036_v2, 16 }
 0x39d   :  { %v6434_v18 = vsel %vm10155_vm6, %v6299_v3, %v6433_v7  ;;  %v6437_v40 = vsel %vm10114_vm2, %v6300_v45, %v6436_v31  ;;  %v6422_v60 = vsel %vm10155_vm6, %v6283_v0, %v6421_v32  ;;  %v6425_v11 = vsel %vm10114_vm2, %v6284_v46, %v6424_v21  ;;  %v6442_v63 = vld [vmem:[#allocation3 + $0x74] sm:$0x1]  ;;  %v6427_v7 = vld [vmem:[#allocation3 + $0x60] sm:$0xf]  ;;  %v6430_v36 = vld [vmem:[#allocation3 + $0x64] sm:$0x1] }
 0x39e   :  { %6435 = vst [vmem:[#allocation3 + $0x68] sm:$0xf] %v6434_v18  ;;  %6438 = vst [vmem:[#allocation3 + $0x6c] sm:$0x1] %v6437_v40  ;;  %v6305_v59 = vshll.u32 %v9036_v2, 16  ;;  %v6286_v27 = vshrl.u32 %v9034_v16, 16  ;;  %v6125_v4 = vadd.f32 %v9695_v55, %v11927_v10  ;;  %v6123_v37 = vadd.f32 %v6098_v49, %v11923_v34 }
 0x39f   :  { %6423 = vst [vmem:[#allocation3 + $0x58] sm:$0xf] %v6422_v60  ;;  %6426 = vst [vmem:[#allocation3 + $0x5c] sm:$0x1] %v6425_v11  ;;  %v6289_v20 = vshll.u32 %v9034_v16, 16  ;;  %v6163_v52 = vmax.f32 %v6147_v54, 0.0 }
 0x3a0   :  { %v6161_v33 = vmax.f32 %v6145_v44, 0.0  ;;  %v6304_v28 = vrot.slane %v6302_v30, 7  ;;  %v6288_v39 = vrot.slane %v6286_v27, 7  ;;  %v8944_v42 = vrot.slane %v7857_v50, 9  ;;  %v7859_v55 = vld [vmem:[#allocation3 + $0x18] sm:$0xe] }
 0x3a1   :  { %v7891_v22 = vrot.slane %v7858_v35, 5  ;;  %v9039_v5 = vpack.c.bf16 %v6163_v52, %v6163_v52  ;;  %v6148_v12 = vadd.f32 %v11932_v9, %v6125_v4  ;;  %v6146_v58 = vadd.f32 %v11932_v9, %v6123_v37  ;;  %v7860_v34 = vld [vmem:[#allocation3 + $0x1c] sm:$0x1]  ;;  %v7861_v45 = vld [vmem:[#allocation3 + $0x20] sm:$0xe] }
 0x3a2   :  { %v9037_v1 = vpack.c.bf16 %v6161_v33, %v6161_v33  ;;  %v6307_v38 = vor.u32 %v6305_v59, %v6304_v28  ;;  %v6308_v19 = vrot.slane %v6304_v28, 4  ;;  %v6291_v31 = vor.u32 %v6289_v20, %v6288_v39  ;;  %v6457_v16 = vld [vmem:[#allocation3 + $0x88] sm:$0xf]  ;;  %v6460_v54 = vld [vmem:[#allocation3 + $0x8c] sm:$0x1] }
 0x3a3   :  { %v6292_v10 = vrot.slane %v6288_v39, 4  ;;  %v6326_v49 = vshrl.u32 %v9039_v5, 16  ;;  %v6329_v32 = vshll.u32 %v9039_v5, 16  ;;  %v6445_v40 = vld [vmem:[#allocation3 + $0x78] sm:$0xf]  ;;  %v6164_v60 = vmax.f32 %v6148_v12, 0.0 }
 0x3a4   :  { %v6310_v21 = vshrl.u32 %v9037_v1, 16  ;;  %v6313_v3 = vshll.u32 %v9037_v1, 16  ;;  %v6440_v0 = vsel %vm10155_vm6, %v6307_v38, %v6439_v8  ;;  %v6443_v46 = vsel %vm10114_vm2, %v6308_v19, %v6442_v63  ;;  %v6448_v50 = vld [vmem:[#allocation3 + $0x7c] sm:$0x1]  ;;  %v7862_v37 = vld [vmem:[#allocation3 + $0x24] sm:$0x1] }
 0x3a5   :  { %v6428_v9 = vsel %vm10155_vm6, %v6291_v31, %v6427_v7  ;;  %v6431_v2 = vsel %vm10114_vm2, %v6292_v10, %v6430_v36  ;;  %6441 = vst [vmem:[#allocation3 + $0x70] sm:$0xf] %v6440_v0  ;;  %6444 = vst [vmem:[#allocation3 + $0x74] sm:$0x1] %v6443_v46  ;;  %v6328_v44 = vrot.slane %v6326_v49, 7  ;;  %v6162_v11 = vmax.f32 %v6146_v58, 0.0 }
 0x3a6   :  { %6429 = vst [vmem:[#allocation3 + $0x60] sm:$0xf] %v6428_v9  ;;  %6432 = vst [vmem:[#allocation3 + $0x64] sm:$0x1] %v6431_v2  ;;  %v6312_v18 = vrot.slane %v6310_v21, 7  ;;  %v7892_v35 = vsel %vm10195_vm11, %v8944_v42, %v7891_v22  ;;  %v8945_v30 = vrot.slane %v7859_v55, 9  ;;  %v9040_v28 = vpack.c.bf16 %v6164_v60, %v6164_v60 }
 0x3a7   :  { %v7895_v59 = vrot.slane %v7860_v34, 5  ;;  %v8946_v27 = vrot.slane %v7861_v45, 9  ;;  %v6331_v20 = vor.u32 %v6329_v32, %v6328_v44  ;;  %v6332_v52 = vrot.slane %v6328_v44, 4  ;;  %v7863_v7 = vld [vmem:[#allocation3 + $0x28] sm:$0xe] }
 0x3a8   :  { %v6315_v33 = vor.u32 %v6313_v3, %v6312_v18  ;;  %v6316_v4 = vrot.slane %v6312_v18, 4  ;;  %v9038_v8 = vpack.c.bf16 %v6162_v11, %v6162_v11  ;;  %v7929_v63 = vsel %vm11947_vm3, %v7892_v35, 0  ;;  %v7864_v36 = vld [vmem:[#allocation3 + $0x2c] sm:$0x1]  ;;  %v7865_v12 = vld [vmem:[#allocation3 + $0x30] sm:$0xe] }
 0x3a9   :  { %v7896_v39 = vsel %vm10195_vm11, %v8945_v30, %v7895_v59  ;;  %v6458_v42 = vsel %vm10155_vm6, %v6331_v20, %v6457_v16  ;;  %v6461_v22 = vsel %vm10114_vm2, %v6332_v52, %v6460_v54  ;;  %v7867_v58 = vld [vmem:[#allocation3 + $0x38] sm:$0xe]  ;;  %v6334_v38 = vshrl.u32 %v9040_v28, 16  ;;  %v7866_v55 = vld [vmem:[#allocation3 + $0x34] sm:$0x1] }
 0x3aa   :  { %v6446_v5 = vsel %vm10155_vm6, %v6315_v33, %v6445_v40  ;;  %v6449_v1 = vsel %vm10114_vm2, %v6316_v4, %v6448_v50  ;;  %6459 = vst [vmem:[#allocation3 + $0x88] sm:$0xf] %v6458_v42  ;;  %6462 = vst [vmem:[#allocation3 + $0x8c] sm:$0x1] %v6461_v22  ;;  %v6337_v19 = vshll.u32 %v9040_v28, 16  ;;  %v6318_v31 = vshrl.u32 %v9038_v8, 16 }
 0x3ab   :  { %6447 = vst [vmem:[#allocation3 + $0x78] sm:$0xf] %v6446_v5  ;;  %6450 = vst [vmem:[#allocation3 + $0x7c] sm:$0x1] %v6449_v1  ;;  %v6321_v10 = vshll.u32 %v9038_v8, 16  ;;  %v7930_v21 = vsel %vm11947_vm3, %v7896_v39, 0 }
 0x3ac   :  { %v6463_v34 = vld [vmem:[#allocation3 + $0x90] sm:$0xf]  ;;  %v6466_v49 = vld [vmem:[#allocation3 + $0x94] sm:$0x1]  ;;  %v6451_v32 = vld [vmem:[#allocation3 + $0x80] sm:$0xf]  ;;  %v8952_v2 = vcombine.low %v7929_v63, %v7930_v21 }
 0x3ad   :  { %v7899_v3 = vrot.slane %v7862_v37, 5  ;;  %v8947_v45 = vrot.slane %v7863_v7, 9  ;;  %v7903_v0 = vrot.slane %v7864_v36, 5  ;;  %v6336_v46 = vrot.slane %v6334_v38, 7  ;;  %v7868_v16 = vld [vmem:[#allocation3 + $0x3c] sm:$0x1] }
 0x3ae   :  { %v6320_v9 = vrot.slane %v6318_v31, 7  ;;  %v8948_v54 = vrot.slane %v7865_v12, 9  ;;  %v6454_v44 = vld [vmem:[#allocation3 + $0x84] sm:$0x1]  ;;  %v7907_v60 = vrot.slane %v7866_v55, 5  ;;  %v8949_v11 = vrot.slane %v7867_v58, 9  ;;  %9712 = vmatprep.mubr.bf16.mxu0 %v8952_v2 }
 0x3af   :  { %v7900_v18 = vsel %vm10195_vm11, %v8946_v27, %v7899_v3  ;;  %v7904_v40 = vsel %vm10195_vm11, %v8947_v45, %v7903_v0  ;;  %v7869_v50 = vld [vmem:[#allocation3 + $0x40] sm:$0xe]  ;;  %v6339_v35 = vor.u32 %v6337_v19, %v6336_v46  ;;  %v6340_v30 = vrot.slane %v6336_v46, 4  ;;  %v7870_v52 = vld [vmem:[#allocation3 + $0x44] sm:$0x1] }
 0x3b0   :  { %v6323_v59 = vor.u32 %v6321_v10, %v6320_v9  ;;  %v6324_v20 = vrot.slane %v6320_v9, 4  ;;  %v7965_v33 = vld [vmem:[#allocation3 + $0x60] sm:$0xe]  ;;  %v7931_v4 = vsel %vm11947_vm3, %v7900_v18, 0  ;;  %v7932_v37 = vsel %vm11947_vm3, %v7904_v40, 0 }
 0x3b1   :  { %v7908_v27 = vsel %vm10195_vm11, %v8948_v54, %v7907_v60  ;;  %v7911_v28 = vrot.slane %v7868_v16, 5  ;;  %v7966_v8 = vld [vmem:[#allocation3 + $0x64] sm:$0x1]  ;;  %v6464_v39 = vsel %vm10155_vm6, %v6339_v35, %v6463_v34  ;;  %v6467_v63 = vsel %vm10114_vm2, %v6340_v30, %v6466_v49  ;;  %v7967_v42 = vld [vmem:[#allocation3 + $0x68] sm:$0xe] }
 0x3b2   :  { %v6452_v7 = vsel %vm10155_vm6, %v6323_v59, %v6451_v32  ;;  %v6455_v36 = vsel %vm10114_vm2, %v6324_v20, %v6454_v44  ;;  %v7968_v22 = vld [vmem:[#allocation3 + $0x6c] sm:$0x1]  ;;  %v6757_v5 = vld [vmem:[#allocation3 + $0x28] sm:$0xf]  ;;  %6465 = vst [vmem:[#allocation3 + $0x90] sm:$0xf] %v6464_v39  ;;  %v8953_v1 = vcombine.low %v7931_v4, %v7932_v37  ;;  %vm12124_vm6 = vmand %vm6488_vm4, %vm3776_vm13 }
 0x3b3   :  { %6468 = vst [vmem:[#allocation3 + $0x94] sm:$0x1] %v6467_v63  ;;  %6453 = vst [vmem:[#allocation3 + $0x80] sm:$0xf] %v6452_v7  ;;  %v7912_v12 = vsel %vm10195_vm11, %v8949_v11, %v7911_v28  ;;  %v7933_v56 = vsel %vm11947_vm3, %v7908_v27, 0  ;;  %v8950_v58 = vrot.slane %v7869_v50, 9 }
 0x3b4   :  { %6456 = vst [vmem:[#allocation3 + $0x84] sm:$0x1] %v6455_v36  ;;  %v6758_v38 = vld [vmem:[#allocation3 + $0x2c] sm:$0x1]  ;;  %v7934_v25 = vsel %vm11947_vm3, %v7912_v12, 0  ;;  %v7915_v19 = vrot.slane %v7870_v52, 5  ;;  %9713 = vmatmul.mubr.bf16.vlgmr.msra.gmra.mrb[112].mxu0 %v8953_v1  ;;  %vm12154_vm8 = vmpackc.low %vm12124_vm6, %vm12124_vm6 }
 0x3b5   :  { %v8956_v31 = vrot.slane %v7965_v33, 9  ;;  %v7999_v10 = vrot.slane %v7966_v8, 5  ;;  %v8954_v55 = vcombine.low %v7933_v56, %v7934_v25  ;;  %v8957_v34 = vrot.slane %v7967_v42, 9  ;;  %v6897_v21 = vld [vmem:[#allocation3 + $0x28] sm:$0xe]  ;;  %v9986_v3 = vld [vmem:[%s12751_s5] sm:$0xff]  }
 0x3b6   :  { %v8003_v49 = vrot.slane %v7968_v22, 5  ;;  %v6822_v32 = vshrl.u32 %v6757_v5, 16  ;;  %9505 = vmatpush3.bf16.msra.mxu0 %v9986_v3  ;;  %v7916_v45 = vsel %vm10195_vm11, %v8950_v58, %v7915_v19  ;;  %v6759_v46 = vld [vmem:[#allocation3 + $0x30] sm:$0xf]  ;;  %v6760_v9 = vld [vmem:[#allocation3 + $0x34] sm:$0x1] }
 0x3b7   :  { %v8000_v0 = vsel %vm10195_vm11, %v8956_v31, %v7999_v10  ;;  %v6825_v2 = vshll.u32 %v6757_v5, 16  ;;  %v6831_v16 = vshll.u32 %v6758_v38, 16  ;;  %9716 = vmatprep.mubr.bf16.mxu0 %v8954_v55  ;;  %9506 = vmatprep.subr.bf16.mxu0 %v11827_v47  ;;  %v7935_v54 = vsel %vm11947_vm3, %v7916_v45, 0  ;;  %v6898_v60 = vld [vmem:[#allocation3 + $0x30] sm:$0xe]  ;;  %v9987_v37 = vld [vmem:[%s12751_s5 + $0x8] sm:$0xff]  }
 0x3b8   :  { %v8004_v44 = vsel %vm10195_vm11, %v8957_v34, %v8003_v49  ;;  %v8037_v18 = vsel %vm11947_vm3, %v8000_v0, 0  ;;  %v6824_v40 = vrot.slane %v6822_v32, 4  ;;  %v8955_v11 = vcombine.low %v7935_v54, %v7936_v26  ;;  %v12113_v30 = vld [vmem:[#allocation3 + $0x38] sm:$0xf]  ;;  %v6969_v4 = vld [vmem:[#allocation3 + $0x30] sm:$0xf] }
 0x3b9   :  { %v8038_v50 = vsel %vm11947_vm3, %v8004_v44, 0  ;;  %v6827_v47 = vrot.slane %v6825_v2, 5  ;;  %v6833_v35 = vrot.slane %v6831_v16, 5  ;;  %vm6702_vm2 = vcmp.ge.s32.totalorder %v10985_v24, 96  ;;  %v6985_v8 = vld [vmem:[#allocation3 + $0x34] sm:$0x1] }
 0x3ba   :  { %v8964_v59 = vcombine.low %v8037_v18, %v8038_v50  ;;  %v6836_v20 = vshrl.u32 %v6759_v46, 16  ;;  %v6839_v52 = vshll.u32 %v6759_v46, 16  ;;  %v6845_v33 = vshll.u32 %v6760_v9, 16  ;;  %9507 = vmatpush3.bf16.msra.mxu0 %v9987_v37  ;;  %v12141_v31 = vld [vmem:[#allocation3 + $0x20] sm:$0xf]  ;;  %v9988_v10 = vld [vmem:[%s12751_s5 + $0x10] sm:$0xff]   ;;  %vm12197_vm10 = vmpackc.low %vm6702_vm2, %vm6702_vm2 }
 0x3bb   :  { %v6828_v48 = vor.u32 %v6827_v47, %v6824_v40  ;;  %v8912_v26 = vrot.slane %v6897_v21, 9  ;;  %v6935_v27 = vrot.slane %v6758_v38, 5  ;;  %v8913_v28 = vrot.slane %v6898_v60, 9  ;;  %9508 = vmatprep.subr.bf16.mxu0 %v11844_v15  ;;  %v6986_v38 = vld [vmem:[#allocation3 + $0x3c] sm:$0x1] }
 0x3bc   :  { %v6838_v39 = vrot.slane %v6836_v20, 4  ;;  %v6841_v63 = vrot.slane %v6839_v52, 5  ;;  %v6847_v7 = vrot.slane %v6845_v33, 5  ;;  %v6939_v36 = vrot.slane %v6760_v9, 5  ;;  %9717 = vmatmul.mubr.bf16.gmra.mrb[116].mxu0 %v8955_v11  ;;  %v12149_v21 = vld [vmem:[#allocation3 + $0x28] sm:$0xf] }
 0x3bd   :  { %v6829_v22 = vrot.slane %v6828_v48, 4  ;;  %v6936_v5 = vsel %vm10195_vm11, %v8912_v26, %v6935_v27  ;;  %v7046_v1 = vshrl.u32 %v6969_v4, 16  ;;  %v7049_v12 = vshll.u32 %v6969_v4, 16  ;;  %9720 = vmatprep.mubr.bf16.mxu0 %v8964_v59  ;;  %v9989_v2 = vld [vmem:[%s12751_s5 + $0x58] sm:$0xff]   ;;  %v6494_v60 = vld [vmem:[#allocation3 + $0x24] sm:$0x1] }
 0x3be   :  { %v6842_v56 = vor.u32 %v6841_v63, %v6838_v39  ;;  %v6940_v58 = vsel %vm10195_vm11, %v8913_v28, %v6939_v36  ;;  %v7055_v25 = vshll.u32 %v6985_v8, 16  ;;  %v7060_v19 = vshrl.u32 %v12113_v30, 16  ;;  %9509 = vmatpush3.bf16.msra.mxu0 %v9988_v10  ;;  %v9990_v37 = vld [vmem:[%s12751_s5 + $0x18] sm:$0xff]   ;;  %v6495_v48 = vld [vmem:[#allocation3 + $0x2c] sm:$0x1]  ;;  %v9991_v8 = vld [vmem:[%s12751_s5 + $0x60] sm:$0xff]  }
 0x3bf   :  { %v6834_v55 = vsel %vm10201_vm12, %v6829_v22, %v6833_v35  ;;  %v7048_v34 = vrot.slane %v7046_v1, 4  ;;  %v7051_v49 = vrot.slane %v7049_v12, 5  ;;  %v7063_v32 = vshll.u32 %v12113_v30, 16  ;;  %9510 = vmatprep.subr.bf16.mxu0 %v9989_v2  ;;  %v6633_v22 = vld [vmem:[#allocation3 + $0x20] sm:$0xe] }
 0x3c0   :  { %v6843_v45 = vrot.slane %v6842_v56, 4  ;;  %v6889_v0 = vsel %vm11947_vm3, %v6834_v55, 0  ;;  %v7057_v46 = vrot.slane %v7055_v25, 5  ;;  %v7062_v9 = vrot.slane %v7060_v19, 4  ;;  %v6634_v15 = vld [vmem:[#allocation3 + $0x28] sm:$0xe] }
 0x3c1   :  { %v6961_v54 = vsel %vm12154_vm8, %v6936_v5, %v6889_v0  ;;  %v7052_v44 = vor.u32 %v7051_v49, %v7048_v34  ;;  %v7065_v18 = vrot.slane %v7063_v32, 5  ;;  %v7069_v40 = vshll.u32 %v6986_v38, 16  ;;  %v6761_v25 = vld [vmem:[#allocation3 + $0x38] sm:$0xf]  ;;  %v9992_v19 = vld [vmem:[%s12751_s5 + $0x20] sm:$0xff]   ;;  %v9993_v0 = vld [vmem:[%s12751_s5 + $0x68] sm:$0xff]  }
 0x3c2   :  { %v6848_v11 = vsel %vm10201_vm12, %v6843_v45, %v6847_v7  ;;  %v6977_v50 = vsel %vm12166_vm9, %v6969_v4, %v6961_v54  ;;  %v6484_v47 = vsel %vm11947_vm3, %v12141_v31, 0  ;;  %v6485_v35 = vsel %vm11947_vm3, %v12149_v21, 0  ;;  %9511 = vmatpush3.bf16.msra.mxu0 %v9990_v37  ;;  %v6762_v32 = vld [vmem:[#allocation3 + $0x3c] sm:$0x1]  ;;  %v6763_v45 = vld [vmem:[#allocation3 + $0x40] sm:$0xf] }
 0x3c3   :  { %v6890_v59 = vsel %vm11947_vm3, %v6848_v11, 0  ;;  %v7053_v20 = vrot.slane %v7052_v44, 4  ;;  %v7066_v52 = vor.u32 %v7065_v18, %v7062_v9  ;;  %v7071_v33 = vrot.slane %v7069_v40, 5  ;;  %9512 = vmatprep.subr.bf16.mxu0 %v9991_v8  ;;  %v7375_v62 = vld [vmem:[#allocation3 + $0x88] sm:$0xf] }
 0x3c4   :  { %v6962_v4 = vsel %vm12154_vm8, %v6940_v58, %v6890_v59  ;;  %v6555_v26 = vshrl.u32 %v12141_v31, 16  ;;  %v6558_v27 = vshll.u32 %v12141_v31, 16  ;;  %v6564_v28 = vshll.u32 %v6494_v60, 16 }
 0x3c5   :  { %v6978_v63 = vsel %vm12166_vm9, %v12113_v30, %v6962_v4  ;;  %v7058_v7 = vsel %vm10201_vm12, %v7053_v20, %v7057_v46  ;;  %v7067_v36 = vrot.slane %v7066_v52, 4  ;;  %v6569_v42 = vshrl.u32 %v12149_v21, 16 }
 0x3c6   :  { %v7113_v5 = vsel %vm12197_vm10, %v7058_v7, %v6977_v50  ;;  %v6557_v24 = vrot.slane %v6555_v26, 4  ;;  %v6560_v1 = vrot.slane %v6558_v27, 5  ;;  %v6566_v12 = vrot.slane %v6564_v28, 5  ;;  %9513 = vmatpush3.bf16.msra.mxu0 %v9992_v19  ;;  %v6899_v27 = vld [vmem:[#allocation3 + $0x38] sm:$0xe]  ;;  %v9995_v28 = vld [vmem:[%s12751_s5 + $0x70] sm:$0xff]  }
 0x3c7   :  { %v7072_v56 = vsel %vm10201_vm12, %v7067_v36, %v7071_v33  ;;  %v6571_v58 = vrot.slane %v6569_v42, 4  ;;  %v6572_v30 = vshll.u32 %v12149_v21, 16  ;;  %v6578_v38 = vshll.u32 %v6495_v48, 16  ;;  %9514 = vmatprep.subr.bf16.mxu0 %v9993_v0  ;;  %v9994_v33 = vld [vmem:[%s12751_s5 + $0x28] sm:$0xff]  }
 0x3c8   :  { %v7114_v10 = vsel %vm12197_vm10, %v7072_v56, %v6978_v63  ;;  %v6561_v55 = vor.u32 %v6560_v1, %v6557_v24  ;;  %v8900_v34 = vrot.slane %v6633_v22, 9  ;;  %v6671_v49 = vrot.slane %v6494_v60, 5  ;;  %v6764_v60 = vld [vmem:[#allocation3 + $0x44] sm:$0x1]  ;;  %v6708_v7 = vld [vmem:[#allocation3 + $0x28] sm:$0xf] }
 0x3c9   :  { %v8918_v46 = vcombine.low %v7113_v5, %v7114_v10  ;;  %v6574_v9 = vrot.slane %v6572_v30, 5  ;;  %v6580_v2 = vrot.slane %v6578_v38, 5  ;;  %v8901_v54 = vrot.slane %v6634_v15, 9  ;;  %v6971_v30 = vld [vmem:[#allocation3 + $0x40] sm:$0xf] }
 0x3ca   :  { %v6562_v44 = vrot.slane %v6561_v55, 4  ;;  %v6672_v18 = vsel %vm10195_vm11, %v8900_v34, %v6671_v49  ;;  %v6675_v40 = vrot.slane %v6495_v48, 5  ;;  %v6850_v11 = vshrl.u32 %v6761_v25, 16  ;;  %9515 = vmatpush3.bf16.msra.mxu0 %v9994_v33  ;;  %v9997_v34 = vld [vmem:[%s12751_s5 + $0x78] sm:$0xff]  }
 0x3cb   :  { %8386 = vmatprep.mubr.bf16.mxu1 %v8918_v46  ;;  %v6575_v50 = vor.u32 %v6574_v9, %v6571_v58  ;;  %v6853_v59 = vshll.u32 %v6761_v25, 16  ;;  %v6859_v20 = vshll.u32 %v6762_v32, 16  ;;  %v6864_v52 = vshrl.u32 %v6763_v45, 16  ;;  %9516 = vmatprep.subr.bf16.mxu0 %v9995_v28  ;;  %v6709_v25 = vld [vmem:[#allocation3 + $0x30] sm:$0xf] }
 0x3cc   :  { %v6567_v37 = vsel %vm10201_vm12, %v6562_v44, %v6566_v12  ;;  %v6676_v4 = vsel %vm10195_vm11, %v8901_v54, %v6675_v40  ;;  %v6852_v26 = vrot.slane %v6850_v11, 4  ;;  %v6867_v48 = vshll.u32 %v6763_v45, 16  ;;  %v6900_v12 = vld [vmem:[#allocation3 + $0x40] sm:$0xe]  ;;  %v6987_v9 = vld [vmem:[#allocation3 + $0x44] sm:$0x1] }
 0x3cd   :  { %v6576_v8 = vrot.slane %v6575_v50, 4  ;;  %v6623_v63 = vsel %vm12154_vm8, %v6567_v37, %v6484_v47  ;;  %v6855_v36 = vrot.slane %v6853_v59, 5  ;;  %v6861_v42 = vrot.slane %v6859_v20, 5  ;;  %v9996_v47 = vld [vmem:[%s12751_s5 + $0x30] sm:$0xff]   ;;  %v7972_v59 = vld [vmem:[#allocation3 + $0x7c] sm:$0x1] }
 0x3ce   :  { %v6698_v22 = vsel %vm12166_vm9, %v6672_v18, %v6623_v63  ;;  %v6866_v5 = vrot.slane %v6864_v52, 4  ;;  %v6869_v24 = vrot.slane %v6867_v48, 5  ;;  %v6873_v1 = vshll.u32 %v6764_v60, 16  ;;  %9517 = vmatpush3.bf16.msra.mxu0 %v9996_v47  ;;  %v7969_v54 = vld [vmem:[#allocation3 + $0x70] sm:$0xe]  ;;  %v9998_v20 = vld [vmem:[%s12751_s5 + $0x38] sm:$0xff]  }
 0x3cf   :  { %v6581_v15 = vsel %vm10201_vm12, %v6576_v8, %v6580_v2  ;;  %v6717_v56 = vsel %vm12197_vm10, %v6708_v7, %v6698_v22  ;;  %v6856_v31 = vor.u32 %v6855_v36, %v6852_v26  ;;  %v8914_v58 = vrot.slane %v6899_v27, 9  ;;  %9518 = vmatprep.subr.bf16.mxu0 %v9997_v34  ;;  %v7970_v44 = vld [vmem:[#allocation3 + $0x74] sm:$0x1]  ;;  %v7973_v26 = vld [vmem:[#allocation3 + $0x80] sm:$0xe] }
 0x3d0   :  { %v6624_v38 = vsel %vm12154_vm8, %v6581_v15, %v6485_v35  ;;  %v6870_v19 = vor.u32 %v6869_v24, %v6866_v5  ;;  %v6875_v10 = vrot.slane %v6873_v1, 5  ;;  %v6943_v55 = vrot.slane %v6762_v32, 5  ;;  %v7974_v63 = vld [vmem:[#allocation3 + $0x84] sm:$0x1]  ;;  %v7975_v5 = vld [vmem:[#allocation3 + $0x88] sm:$0xe] }
 0x3d1   :  { %v6699_v49 = vsel %vm12166_vm9, %v6676_v4, %v6624_v38  ;;  %v6857_v45 = vrot.slane %v6856_v31, 4  ;;  %v8915_v0 = vrot.slane %v6900_v12, 9  ;;  %v6947_v46 = vrot.slane %v6764_v60, 5  ;;  %v7971_v60 = vld [vmem:[#allocation3 + $0x78] sm:$0xe] }
 0x3d2   :  { %v6718_v21 = vsel %vm12197_vm10, %v6709_v25, %v6699_v49  ;;  %v6871_v35 = vrot.slane %v6870_v19, 4  ;;  %v6944_v2 = vsel %vm10195_vm11, %v8914_v58, %v6943_v55  ;;  %v7074_v32 = vshrl.u32 %v6971_v30, 16  ;;  %9519 = vmatpush3.bf16.msra.mxu0 %v9998_v20  ;;  %v9999_v24 = vld [vmem:[#allocation3 + $0x48] sm:$0xf]  ;;  %v7976_v31 = vld [vmem:[#allocation3 + $0x8c] sm:$0x1] }
 0x3d3   :  { %v8906_v18 = vcombine.low %v6717_v56, %v6718_v21  ;;  %v6862_v40 = vsel %vm10201_vm12, %v6857_v45, %v6861_v42  ;;  %v6948_v11 = vsel %vm10195_vm11, %v8915_v0, %v6947_v46  ;;  %v7077_v50 = vshll.u32 %v6971_v30, 16  ;;  %v12283_v58 = vld [vmem:[#allocation3 + $0x30] sm:$0xf]  ;;  %v12294_v19 = vld [vmem:[#allocation3 + $0x38] sm:$0xf] }
 0x3d4   :  { %v6876_v52 = vsel %vm10201_vm12, %v6871_v35, %v6875_v10  ;;  %v6891_v33 = vsel %vm11947_vm3, %v6862_v40, 0  ;;  %v7076_v37 = vrot.slane %v7074_v32, 4  ;;  %v7083_v4 = vshll.u32 %v6987_v9, 16  ;;  %v6496_v0 = vld [vmem:[#allocation3 + $0x34] sm:$0x1] }
 0x3d5   :  { %8387 = vmatmul.mubr.bf16.vlgmr.msra.gmra.mrb[80].mxu1 %v8906_v18  ;;  %v6892_v48 = vsel %vm11947_vm3, %v6876_v52, 0  ;;  %v6963_v27 = vsel %vm12154_vm8, %v6944_v2, %v6891_v33  ;;  %v7079_v28 = vrot.slane %v7077_v50, 5  ;;  %v8958_v8 = vrot.slane %v7969_v54, 9  ;;  %v6497_v54 = vld [vmem:[#allocation3 + $0x3c] sm:$0x1] }
 0x3d6   :  { %v6964_v7 = vsel %vm12154_vm8, %v6948_v11, %v6892_v48  ;;  %v6979_v36 = vsel %vm12166_vm9, %v6971_v30, %v6963_v27  ;;  %v7085_v42 = vrot.slane %v7083_v4, 5  ;;  %v8007_v22 = vrot.slane %v7970_v44, 5  ;;  %v6635_v40 = vld [vmem:[#allocation3 + $0x30] sm:$0xe]  ;;  %v6636_v20 = vld [vmem:[#allocation3 + $0x38] sm:$0xe] }
 0x3d7   :  { %v6980_v1 = vsel %vm12166_vm9, %v9999_v24, %v6964_v7  ;;  %v7080_v12 = vor.u32 %v7079_v28, %v7076_v37  ;;  %v8959_v15 = vrot.slane %v7971_v60, 9  ;;  %v8011_v56 = vrot.slane %v7972_v59, 5 }
 0x3d8   :  { %v7116_v30 = vsel %vm12197_vm10, %v7100_v14, %v6980_v1  ;;  %v8008_v47 = vsel %vm10195_vm11, %v8958_v8, %v8007_v22  ;;  %v8960_v38 = vrot.slane %v7973_v26, 9  ;;  %v8015_v25 = vrot.slane %v7974_v63, 5  ;;  %v7413_v26 = vld [vmem:[#allocation3 + $0x58] sm:$0xf]  ;;  %v7414_v63 = vld [vmem:[#allocation3 + $0x5c] sm:$0x1] }
 0x3d9   :  { %v7081_v10 = vrot.slane %v7080_v12, 4  ;;  %v8012_v55 = vsel %vm10195_vm11, %v8959_v15, %v8011_v56  ;;  %v8039_v34 = vsel %vm11947_vm3, %v8008_v47, 0  ;;  %v8961_v49 = vrot.slane %v7975_v5, 9  ;;  %v7415_v5 = vld [vmem:[#allocation3 + $0x60] sm:$0xf] }
 0x3da   :  { %v8040_v13 = vsel %vm11947_vm3, %v8012_v55, 0  ;;  %v8016_v17 = vsel %vm10195_vm11, %v8960_v38, %v8015_v25  ;;  %v8019_v14 = vrot.slane %v7976_v31, 5  ;;  %v6486_v45 = vsel %vm11947_vm3, %v12283_v58, 0  ;;  %v7557_v55 = vld [vmem:[#allocation3 + $0x58] sm:$0xe] }
 0x3db   :  { %v7086_v46 = vsel %vm10201_vm12, %v7081_v10, %v7085_v42  ;;  %v8965_v9 = vcombine.low %v8039_v34, %v8040_v13  ;;  %v8041_v21 = vsel %vm11947_vm3, %v8016_v17, 0  ;;  %v6487_v35 = vsel %vm11947_vm3, %v12294_v19, 0 }
 0x3dc   :  { %v7115_v2 = vsel %vm12197_vm10, %v7086_v46, %v6979_v36  ;;  %v8020_v32 = vsel %vm10195_vm11, %v8961_v49, %v8019_v14  ;;  %v6583_v44 = vshrl.u32 %v12283_v58, 16  ;;  %v6586_v18 = vshll.u32 %v12283_v58, 16 }
 0x3dd   :  { %v8919_v11 = vcombine.low %v7115_v2, %v7116_v30  ;;  %9721 = vmatmul.mubr.bf16.gmra.mrb[120].mxu0 %v8965_v9  ;;  %v8042_v50 = vsel %vm11947_vm3, %v8020_v32, 0  ;;  %v6592_v60 = vshll.u32 %v6496_v0, 16  ;;  %v6597_v59 = vshrl.u32 %v12294_v19, 16  ;;  %v7416_v30 = vld [vmem:[#allocation3 + $0x64] sm:$0x1] }
 0x3de   :  { %v8966_v52 = vcombine.low %v8041_v21, %v8042_v50  ;;  %v6585_v33 = vrot.slane %v6583_v44, 4  ;;  %v6588_v37 = vrot.slane %v6586_v18, 5  ;;  %v6600_v4 = vshll.u32 %v12294_v19, 16  ;;  %v7558_v21 = vld [vmem:[#allocation3 + $0x60] sm:$0xe] }
 0x3df   :  { %8394 = vmatprep.mubr.bf16.mxu1 %v8919_v11  ;;  %v6594_v48 = vrot.slane %v6592_v60, 5  ;;  %v6599_v27 = vrot.slane %v6597_v59, 4  ;;  %v6606_v28 = vshll.u32 %v6497_v54, 16  ;;  %v8902_v8 = vrot.slane %v6635_v40, 9  ;;  %v7629_v40 = vld [vmem:[#allocation3 + $0x60] sm:$0xf] }
 0x3e0   :  { %9724 = vmatprep.mubr.bf16.mxu0 %v8966_v52  ;;  %v6589_v7 = vor.u32 %v6588_v37, %v6585_v33  ;;  %v6602_v36 = vrot.slane %v6600_v4, 5  ;;  %v6679_v42 = vrot.slane %v6496_v0, 5  ;;  %v8903_v22 = vrot.slane %v6636_v20, 9  ;;  %v6711_v20 = vld [vmem:[#allocation3 + $0x40] sm:$0xf] }
 0x3e1   :  { %v6608_v24 = vrot.slane %v6606_v28, 5  ;;  %v6683_v1 = vrot.slane %v6497_v54, 5  ;;  %v7430_v12 = vshrl.u32 %v7413_v26, 16  ;;  %v7433_v15 = vshll.u32 %v7413_v26, 16  ;;  %v6710_v54 = vld [vmem:[#allocation3 + $0x38] sm:$0xf] }
 0x3e2   :  { %v6590_v56 = vrot.slane %v6589_v7, 4  ;;  %v6603_v31 = vor.u32 %v6602_v36, %v6599_v27  ;;  %v6680_v58 = vsel %vm10195_vm11, %v8902_v8, %v6679_v42  ;;  %v7439_v47 = vshll.u32 %v7414_v63, 16  ;;  %v7645_v27 = vld [vmem:[#allocation3 + $0x64] sm:$0x1] }
 0x3e3   :  { %v6684_v38 = vsel %vm10195_vm11, %v8903_v22, %v6683_v1  ;;  %v7432_v25 = vrot.slane %v7430_v12, 4  ;;  %v7435_v19 = vrot.slane %v7433_v15, 5  ;;  %v7444_v10 = vshrl.u32 %v7415_v5, 16  ;;  %v7646_v22 = vld [vmem:[#allocation3 + $0x6c] sm:$0x1] }
 0x3e4   :  { %v6595_v34 = vsel %vm10201_vm12, %v6590_v56, %v6594_v48  ;;  %v6604_v49 = vrot.slane %v6603_v31, 4  ;;  %v7441_v13 = vrot.slane %v7439_v47, 5  ;;  %v7447_v17 = vshll.u32 %v7415_v5, 16  ;;  %v7977_v1 = vld [vmem:[#allocation3 + $0x90] sm:$0xe] }
 0x3e5   :  { %v6625_v14 = vsel %vm12154_vm8, %v6595_v34, %v6486_v45  ;;  %v7436_v0 = vor.u32 %v7435_v19, %v7432_v25  ;;  %v7446_v46 = vrot.slane %v7444_v10, 4  ;;  %v7453_v9 = vshll.u32 %v7416_v30, 16  ;;  %v7978_v10 = vld [vmem:[#allocation3 + $0x94] sm:$0x1] }
 0x3e6   :  { %v6609_v2 = vsel %vm10201_vm12, %v6604_v49, %v6608_v24  ;;  %v6700_v32 = vsel %vm12166_vm9, %v6680_v58, %v6625_v14  ;;  %v7449_v44 = vrot.slane %v7447_v17, 5  ;;  %v8932_v18 = vrot.slane %v7557_v55, 9  ;;  %v6749_v58 = vld [vmem:[#allocation3 + $0x8] sm:$0xf]  ;;  %v6751_v17 = vld [vmem:[#allocation3 + $0x10] sm:$0xf] }
 0x3e7   :  { %v6626_v11 = vsel %vm12154_vm8, %v6609_v2, %v6487_v35  ;;  %v6719_v45 = vsel %vm12197_vm10, %v6710_v54, %v6700_v32  ;;  %v7437_v50 = vrot.slane %v7436_v0, 4  ;;  %v7455_v60 = vrot.slane %v7453_v9, 5  ;;  %v7630_v35 = vld [vmem:[#allocation3 + $0x68] sm:$0xf] }
 0x3e8   :  { %v6701_v59 = vsel %vm12166_vm9, %v6684_v38, %v6626_v11  ;;  %v7450_v52 = vor.u32 %v7449_v44, %v7446_v46  ;;  %v7583_v33 = vrot.slane %v7414_v63, 5  ;;  %v8933_v37 = vrot.slane %v7558_v21, 9 }
 0x3e9   :  { %v6720_v4 = vsel %vm12197_vm10, %v6711_v20, %v6701_v59  ;;  %v7442_v26 = vsel %vm10201_vm12, %v7437_v50, %v7441_v13  ;;  %v7587_v48 = vrot.slane %v7416_v30, 5  ;;  %v7654_v28 = vshrl.u32 %v7629_v40, 16  ;;  %v6750_v30 = vld [vmem:[#allocation3 + $0xc] sm:$0x1] }
 0x3ea   :  { %v8907_v8 = vcombine.low %v6719_v45, %v6720_v4  ;;  %v7451_v7 = vrot.slane %v7450_v52, 4  ;;  %v7549_v36 = vsel %vm11947_vm3, %v7442_v26, 0  ;;  %v7584_v42 = vsel %vm10195_vm11, %v8932_v18, %v7583_v33  ;;  %v6893_v52 = vld [vmem:[#allocation3 + $0x8] sm:$0xe] }
 0x3eb   :  { %v7621_v63 = vsel %vm12154_vm8, %v7584_v42, %v7549_v36  ;;  %v7656_v5 = vrot.slane %v7654_v28, 4  ;;  %v7657_v24 = vshll.u32 %v7629_v40, 16  ;;  %v7588_v15 = vsel %vm10195_vm11, %v8933_v37, %v7587_v48 }
 0x3ec   :  { %8395 = vmatmul.mubr.bf16.gmra.mrb[84].mxu1 %v8907_v8  ;;  %v7456_v12 = vsel %vm10201_vm12, %v7451_v7, %v7455_v60  ;;  %v7663_v56 = vshll.u32 %v7645_v27, 16  ;;  %v7668_v31 = vshrl.u32 %v7630_v35, 16  ;;  %v7637_v38 = vsel %vm12166_vm9, %v7629_v40, %v7621_v63  ;;  %v6752_v40 = vld [vmem:[#allocation3 + $0x14] sm:$0x1]  ;;  %v6894_v8 = vld [vmem:[#allocation3 + $0x10] sm:$0xe] }
 0x3ed   :  { %v7550_v47 = vsel %vm11947_vm3, %v7456_v12, 0  ;;  %v7659_v25 = vrot.slane %v7657_v24, 5  ;;  %v7671_v19 = vshll.u32 %v7630_v35, 16  ;;  %v7677_v49 = vshll.u32 %v7646_v22, 16  ;;  %v6965_v22 = vld [vmem:[#allocation3 + $0x10] sm:$0xf] }
 0x3ee   :  { %v7622_v55 = vsel %vm12154_vm8, %v7588_v15, %v7550_v47  ;;  %v7670_v34 = vrot.slane %v7668_v31, 4  ;;  %v8962_v13 = vrot.slane %v7977_v1, 9  ;;  %v7665_v46 = vrot.slane %v7663_v56, 5  ;;  %v6966_v1 = vld [vmem:[#allocation3 + $0x18] sm:$0xf] }
 0x3ef   :  { %v7638_v14 = vsel %vm12166_vm9, %v7630_v35, %v7622_v55  ;;  %v7660_v0 = vor.u32 %v7659_v25, %v7656_v5  ;;  %v7673_v9 = vrot.slane %v7671_v19, 5  ;;  %v8023_v21 = vrot.slane %v7978_v10, 5  ;;  %v6981_v12 = vld [vmem:[#allocation3 + $0x14] sm:$0x1] }
 0x3f0   :  { %v6766_v2 = vshrl.u32 %v6749_v58, 16  ;;  %v6769_v32 = vshll.u32 %v6749_v58, 16  ;;  %v6775_v54 = vshll.u32 %v6750_v30, 16  ;;  %v6780_v11 = vshrl.u32 %v6751_v17, 16 }
 0x3f1   :  { %v7661_v44 = vrot.slane %v7660_v0, 4  ;;  %v7674_v18 = vor.u32 %v7673_v9, %v7670_v34  ;;  %v6783_v45 = vshll.u32 %v6751_v17, 16  ;;  %v7679_v50 = vrot.slane %v7677_v49, 5  ;;  %v6982_v17 = vld [vmem:[#allocation3 + $0x1c] sm:$0x1] }
 0x3f2   :  { %v8024_v60 = vsel %vm10195_vm11, %v8962_v13, %v8023_v21  ;;  %v6768_v59 = vrot.slane %v6766_v2, 4  ;;  %v6771_v20 = vrot.slane %v6769_v32, 5  ;;  %v6782_v26 = vrot.slane %v6780_v11, 4  ;;  %v12396_v32 = vld [vmem:[#allocation3 + $0x58] sm:$0xf] }
 0x3f3   :  { %v7666_v33 = vsel %vm10201_vm12, %v7661_v44, %v7665_v46  ;;  %v7675_v37 = vrot.slane %v7674_v18, 4  ;;  %v8043_v4 = vsel %vm11947_vm3, %v8024_v60, 0  ;;  %v6777_v27 = vrot.slane %v6775_v54, 5  ;;  %v7161_v54 = vld [vmem:[#allocation3 + $0x54] sm:$0x1] }
 0x3f4   :  { %v8967_v48 = vcombine.low %v8043_v4, %v8044_v53  ;;  %v6772_v35 = vor.u32 %v6771_v20, %v6768_v59  ;;  %v6785_v28 = vrot.slane %v6783_v45, 5  ;;  %v6789_v36 = vshll.u32 %v6752_v40, 16  ;;  %v7162_v45 = vld [vmem:[#allocation3 + $0x5c] sm:$0x1]  ;;  %v10000_v59 = vld [vmem:[#allocation3 + $0x50] sm:$0xf] }
 0x3f5   :  { %v7680_v7 = vsel %vm10201_vm12, %v7675_v37, %v7679_v50  ;;  %v8908_v42 = vrot.slane %v6893_v52, 9  ;;  %v6919_v63 = vrot.slane %v6750_v30, 5  ;;  %v7773_v5 = vsel %vm12197_vm10, %v7666_v33, %v7637_v38  ;;  %v7297_v33 = vld [vmem:[#allocation3 + $0x50] sm:$0xe] }
 0x3f6   :  { %v7774_v24 = vsel %vm12197_vm10, %v7680_v7, %v7638_v14  ;;  %9725 = vmatmul.mubr.bf16.gmra.mrb[124].mxu0 %v8967_v48  ;;  %v6773_v6 = vrot.slane %v6772_v35, 4  ;;  %v6786_v53 = vor.u32 %v6785_v28, %v6782_v26  ;;  %v6791_v56 = vrot.slane %v6789_v36, 5  ;;  %v7298_v7 = vld [vmem:[#allocation3 + $0x58] sm:$0xe] }
 0x3f7   :  { %v8940_v15 = vcombine.low %v7773_v5, %v7774_v24  ;;  %v8909_v31 = vrot.slane %v6894_v8, 9  ;;  %v6923_v58 = vrot.slane %v6752_v40, 5  ;;  %v6990_v25 = vshrl.u32 %v6965_v22, 16 }
 0x3f8   :  { %v6778_v47 = vsel %vm10201_vm12, %v6773_v6, %v6777_v27  ;;  %v6787_v30 = vrot.slane %v6786_v53, 4  ;;  %v6993_v19 = vshll.u32 %v6965_v22, 16  ;;  %v6920_v10 = vsel %vm10195_vm11, %v8908_v42, %v6919_v63  ;;  %v7417_v63 = vld [vmem:[#allocation3 + $0x68] sm:$0xf] }
 0x3f9   :  { %8402 = vmatprep.mubr.bf16.mxu1 %v8940_v15  ;;  %v6885_v38 = vsel %vm11947_vm3, %v6778_v47, 0  ;;  %v6999_v55 = vshll.u32 %v6981_v12, 16  ;;  %v7004_v34 = vshrl.u32 %v6966_v1, 16  ;;  %v6992_v14 = vrot.slane %v6990_v25, 4 }
 0x3fa   :  { %v6792_v49 = vsel %vm10201_vm12, %v6787_v30, %v6791_v56  ;;  %v6957_v13 = vsel %vm12154_vm8, %v6920_v10, %v6885_v38  ;;  %v6995_v0 = vrot.slane %v6993_v19, 5  ;;  %v6924_v9 = vsel %vm10195_vm11, %v8909_v31, %v6923_v58  ;;  %v7418_v56 = vld [vmem:[#allocation3 + $0x6c] sm:$0x1]  ;;  %v7369_v10 = vld [vmem:[#allocation3 + $0x58] sm:$0xf] }
 0x3fb   :  { %v6886_v46 = vsel %vm11947_vm3, %v6792_v49, 0  ;;  %v6973_v21 = vsel %vm12166_vm9, %v6965_v22, %v6957_v13  ;;  %v7001_v2 = vrot.slane %v6999_v55, 5  ;;  %v7006_v40 = vrot.slane %v7004_v34, 4  ;;  %v7419_v55 = vld [vmem:[#allocation3 + $0x70] sm:$0xf] }
 0x3fc   :  { %v6958_v44 = vsel %vm12154_vm8, %v6924_v9, %v6886_v46  ;;  %v6996_v18 = vor.u32 %v6995_v0, %v6992_v14  ;;  %v7007_v11 = vshll.u32 %v6966_v1, 16  ;;  %v7013_v60 = vshll.u32 %v6982_v17, 16  ;;  %v7420_v14 = vld [vmem:[#allocation3 + $0x74] sm:$0x1]  ;;  %v7559_v46 = vld [vmem:[#allocation3 + $0x68] sm:$0xe] }
 0x3fd   :  { %v6974_v50 = vsel %vm12166_vm9, %v6966_v1, %v6958_v44  ;;  %v7153_v20 = vsel %vm11947_vm3, %v10000_v59, 0  ;;  %v7176_v52 = vor.u32 %v11976_v29, %v11971_v41  ;;  %v7154_v26 = vsel %vm11947_vm3, %v12396_v32, 0 }
 0x3fe   :  { %v6997_v37 = vrot.slane %v6996_v18, 4  ;;  %v7009_v4 = vrot.slane %v7007_v11, 5  ;;  %v7179_v48 = vshll.u32 %v7161_v54, 16  ;;  %v7184_v27 = vshrl.u32 %v12396_v32, 16  ;;  %v7560_v11 = vld [vmem:[#allocation3 + $0x70] sm:$0xe] }
 0x3ff   :  { %v7177_v35 = vrot.slane %v7176_v52, 4  ;;  %v7187_v28 = vshll.u32 %v12396_v32, 16  ;;  %v7193_v8 = vshll.u32 %v7162_v45, 16  ;;  %v8920_v29 = vrot.slane %v7297_v33, 9  ;;  %v7631_v52 = vld [vmem:[#allocation3 + $0x70] sm:$0xf] }
 0x400   :  { %v7002_v36 = vsel %vm10201_vm12, %v6997_v37, %v7001_v2  ;;  %v7010_v42 = vor.u32 %v7009_v4, %v7006_v40  ;;  %v7181_v41 = vrot.slane %v7179_v48, 5  ;;  %v7015_v22 = vrot.slane %v7013_v60, 5 }
 0x401   :  { %v7109_v5 = vsel %vm12197_vm10, %v7002_v36, %v6973_v21  ;;  %v7186_v24 = vrot.slane %v7184_v27, 4  ;;  %v7189_v6 = vrot.slane %v7187_v28, 5  ;;  %v7323_v12 = vrot.slane %v7161_v54, 5  ;;  %v7632_v36 = vld [vmem:[#allocation3 + $0x78] sm:$0xf] }
 0x402   :  { %v7011_v53 = vrot.slane %v7010_v42, 4  ;;  %v7182_v1 = vsel %vm10201_vm12, %v7177_v35, %v7181_v41  ;;  %v8921_v15 = vrot.slane %v7298_v7, 9  ;;  %v7327_v47 = vrot.slane %v7162_v45, 5  ;;  %v7647_v35 = vld [vmem:[#allocation3 + $0x74] sm:$0x1] }
 0x403   :  { %v7190_v31 = vor.u32 %v7189_v6, %v7186_v24  ;;  %v7289_v58 = vsel %vm12154_vm8, %v7182_v1, %v7153_v20  ;;  %v7458_v30 = vshrl.u32 %v7417_v63, 16  ;;  %v7195_v19 = vrot.slane %v7193_v8, 5 }
 0x404   :  { %v7016_v25 = vsel %vm10201_vm12, %v7011_v53, %v7015_v22  ;;  %v7324_v38 = vsel %vm10195_vm11, %v8920_v29, %v7323_v12  ;;  %v7461_v34 = vshll.u32 %v7417_v63, 16  ;;  %v7467_v0 = vshll.u32 %v7418_v56, 16  ;;  %v7648_v12 = vld [vmem:[#allocation3 + $0x7c] sm:$0x1] }
 0x405   :  { %v7110_v49 = vsel %vm12197_vm10, %v7016_v25, %v6974_v50  ;;  %v7191_v13 = vrot.slane %v7190_v31, 4  ;;  %v7361_v17 = vsel %vm12166_vm9, %v7324_v38, %v7289_v58  ;;  %v7328_v21 = vsel %vm10195_vm11, %v8921_v15, %v7327_v47  ;;  %v7370_v50 = vld [vmem:[#allocation3 + $0x60] sm:$0xf] }
 0x406   :  { %v8916_v9 = vcombine.low %v7109_v5, %v7110_v49  ;;  %v7460_v2 = vrot.slane %v7458_v30, 4  ;;  %v7463_v32 = vrot.slane %v7461_v34, 5  ;;  %v7377_v44 = vsel %vm12197_vm10, %v7369_v10, %v7361_v17  ;;  %v6490_v30 = vld [vmem:[#allocation3 + $0x4] sm:$0x1] }
 0x407   :  { %v7196_v54 = vsel %vm10201_vm12, %v7191_v13, %v7195_v19  ;;  %v7472_v18 = vshrl.u32 %v7419_v55, 16  ;;  %v7475_v40 = vshll.u32 %v7419_v55, 16  ;;  %v7481_v59 = vshll.u32 %v7420_v14, 16  ;;  %v12451_v55 = vld [vmem:[#allocation3 + $0x8] sm:$0xf] }
 0x408   :  { %8370 = vmatprep.mubr.bf16.mxu0 %v8916_v9  ;;  %v7290_v45 = vsel %vm12154_vm8, %v7196_v54, %v7154_v26  ;;  %v7464_v60 = vor.u32 %v7463_v32, %v7460_v2  ;;  %v8934_v20 = vrot.slane %v7559_v46, 9  ;;  %v7591_v48 = vrot.slane %v7418_v56, 5  ;;  %v10001_v9 = vld [vmem:[#allocation3] sm:$0xf] }
 0x409   :  { %v7362_v33 = vsel %vm12166_vm9, %v7328_v21, %v7290_v45  ;;  %v7474_v37 = vrot.slane %v7472_v18, 4  ;;  %v7477_v4 = vrot.slane %v7475_v40, 5  ;;  %v7469_v8 = vrot.slane %v7467_v0, 5  ;;  %v6629_v2 = vld [vmem:[#allocation3] sm:$0xe] }
 0x40a   :  { %v7378_v27 = vsel %vm12197_vm10, %v7370_v50, %v7362_v33  ;;  %v7465_v28 = vrot.slane %v7464_v60, 4  ;;  %v8935_v7 = vrot.slane %v7560_v11, 9  ;;  %v7483_v41 = vrot.slane %v7481_v59, 5  ;;  %v6491_v18 = vld [vmem:[#allocation3 + $0xc] sm:$0x1] }
 0x40b   :  { %v8928_v26 = vcombine.low %v7377_v44, %v7378_v27  ;;  %v7478_v42 = vor.u32 %v7477_v4, %v7474_v37  ;;  %v7595_v29 = vrot.slane %v7420_v14, 5  ;;  %v7682_v22 = vshrl.u32 %v7631_v52, 16  ;;  %v6753_v37 = vld [vmem:[#allocation3 + $0x18] sm:$0xf] }
 0x40c   :  { %v7470_v63 = vsel %vm10201_vm12, %v7465_v28, %v7469_v8  ;;  %v7685_v5 = vshll.u32 %v7631_v52, 16  ;;  %v7691_v24 = vshll.u32 %v7647_v35, 16  ;;  %v7592_v1 = vsel %vm10195_vm11, %v8934_v20, %v7591_v48 }
 0x40d   :  { %8403 = vmatmul.mubr.bf16.gmra.mrb[88].mxu1 %v8928_v26  ;;  %v7479_v6 = vrot.slane %v7478_v42, 4  ;;  %v7551_v53 = vsel %vm11947_vm3, %v7470_v63, 0  ;;  %v7696_v15 = vshrl.u32 %v7632_v36, 16  ;;  %v7596_v56 = vsel %vm10195_vm11, %v8935_v7, %v7595_v29  ;;  %v6754_v29 = vld [vmem:[#allocation3 + $0x1c] sm:$0x1] }
 0x40e   :  { %v7623_v31 = vsel %vm12154_vm8, %v7592_v1, %v7551_v53  ;;  %v7684_v58 = vrot.slane %v7682_v22, 4  ;;  %v7687_v47 = vrot.slane %v7685_v5, 5  ;;  %v7693_v19 = vrot.slane %v7691_v24, 5 }
 0x40f   :  { %v7484_v25 = vsel %vm10201_vm12, %v7479_v6, %v7483_v41  ;;  %v7698_v38 = vrot.slane %v7696_v15, 4  ;;  %v7699_v10 = vshll.u32 %v7632_v36, 16  ;;  %v7639_v49 = vsel %vm12166_vm9, %v7631_v52, %v7623_v31  ;;  %v6755_v6 = vld [vmem:[#allocation3 + $0x20] sm:$0xf]  ;;  %v6756_v31 = vld [vmem:[#allocation3 + $0x24] sm:$0x1] }
 0x410   :  { %v7552_v34 = vsel %vm11947_vm3, %v7484_v25, 0  ;;  %v7688_v13 = vor.u32 %v7687_v47, %v7684_v58  ;;  %v7705_v17 = vshll.u32 %v7648_v12, 16  ;;  %v6501_v46 = vrot.slane %v6499_v43, 4  ;;  %v6630_v43 = vld [vmem:[#allocation3 + $0x8] sm:$0xe] }
 0x411   :  { %v7624_v14 = vsel %vm12154_vm8, %v7596_v56, %v7552_v34  ;;  %v7701_v0 = vrot.slane %v7699_v10, 5  ;;  %v6502_v21 = vshll.u32 %v10001_v9, 16  ;;  %v6481_v44 = vsel %vm11947_vm3, %v12451_v55, 0  ;;  %v6704_v56 = vld [vmem:[#allocation3 + $0x8] sm:$0xf] }
 0x412   :  { %v7640_v32 = vsel %vm12166_vm9, %v7632_v36, %v7624_v14  ;;  %v7689_v54 = vrot.slane %v7688_v13, 4  ;;  %v6508_v40 = vshll.u32 %v6490_v30, 16  ;;  %v6513_v50 = vshrl.u32 %v12451_v55, 16  ;;  %v6896_v14 = vld [vmem:[#allocation3 + $0x20] sm:$0xe] }
 0x413   :  { %v7702_v11 = vor.u32 %v7701_v0, %v7698_v38  ;;  %v6504_v45 = vrot.slane %v6502_v21, 5  ;;  %v6516_v60 = vshll.u32 %v12451_v55, 16  ;;  %v7707_v20 = vrot.slane %v7705_v17, 5 }
 0x414   :  { %v7694_v59 = vsel %vm10201_vm12, %v7689_v54, %v7693_v19  ;;  %v6510_v52 = vrot.slane %v6508_v40, 5  ;;  %v8896_v33 = vrot.slane %v6629_v2, 9  ;;  %v6515_v35 = vrot.slane %v6513_v50, 4  ;;  %v6967_v2 = vld [vmem:[#allocation3 + $0x20] sm:$0xf] }
 0x415   :  { %v7703_v4 = vrot.slane %v7702_v11, 4  ;;  %v6505_v48 = vor.u32 %v6504_v45, %v6501_v46  ;;  %v6522_v27 = vshll.u32 %v6491_v18, 16  ;;  %v7775_v28 = vsel %vm12197_vm10, %v7694_v59, %v7639_v49  ;;  %v6895_v49 = vld [vmem:[#allocation3 + $0x18] sm:$0xe]  ;;  %v6705_v54 = vld [vmem:[#allocation3 + $0x10] sm:$0xf] }
 0x416   :  { %v6518_v8 = vrot.slane %v6516_v60, 5  ;;  %v6655_v7 = vrot.slane %v6490_v30, 5  ;;  %v8897_v36 = vrot.slane %v6630_v43, 9  ;;  %v6659_v41 = vrot.slane %v6491_v18, 5  ;;  %v6968_v59 = vld [vmem:[#allocation3 + $0x28] sm:$0xf] }
 0x417   :  { %v7708_v26 = vsel %vm10201_vm12, %v7703_v4, %v7707_v20  ;;  %v6506_v42 = vrot.slane %v6505_v48, 4  ;;  %v6794_v63 = vshrl.u32 %v6753_v37, 16  ;;  %v6797_v53 = vshll.u32 %v6753_v37, 16  ;;  %v6983_v20 = vld [vmem:[#allocation3 + $0x24] sm:$0x1] }
 0x418   :  { %v7776_v22 = vsel %vm12197_vm10, %v7708_v26, %v7640_v32  ;;  %v6519_v5 = vor.u32 %v6518_v8, %v6515_v35  ;;  %v6656_v24 = vsel %vm10195_vm11, %v8896_v33, %v6655_v7  ;;  %v6524_v15 = vrot.slane %v6522_v27, 5  ;;  %v6984_v27 = vld [vmem:[#allocation3 + $0x2c] sm:$0x1] }
 0x419   :  { %v8941_v1 = vcombine.low %v7775_v28, %v7776_v22  ;;  %v6511_v12 = vsel %vm10201_vm12, %v6506_v42, %v6510_v52  ;;  %v6796_v58 = vrot.slane %v6794_v63, 4  ;;  %v6799_v25 = vrot.slane %v6797_v53, 5  ;;  %v7147_v22 = vld [vmem:[#allocation3 + $0x60] sm:$0xf] }
 0x41a   :  { %v6520_v47 = vrot.slane %v6519_v5, 4  ;;  %v6619_v30 = vsel %vm12154_vm8, %v6511_v12, %v6480_v61  ;;  %v6803_v19 = vshll.u32 %v6754_v29, 16  ;;  %v6660_v38 = vsel %vm10195_vm11, %v8897_v36, %v6659_v41 }
 0x41b   :  { %8410 = vmatprep.mubr.bf16.mxu1 %v8941_v1  ;;  %v6694_v10 = vsel %vm12166_vm9, %v6656_v24, %v6619_v30  ;;  %v6808_v55 = vshrl.u32 %v6755_v6, 16  ;;  %v6811_v34 = vshll.u32 %v6755_v6, 16  ;;  %v6800_v17 = vor.u32 %v6799_v25, %v6796_v58  ;;  %v7163_v1 = vld [vmem:[#allocation3 + $0x64] sm:$0x1]  ;;  %v7148_v58 = vld [vmem:[#allocation3 + $0x68] sm:$0xf] }
 0x41c   :  { %v6525_v13 = vsel %vm10201_vm12, %v6520_v47, %v6524_v15  ;;  %v6713_v23 = vsel %vm12197_vm10, %v6704_v56, %v6694_v10  ;;  %v6817_v61 = vshll.u32 %v6756_v31, 16  ;;  %v6805_v46 = vrot.slane %v6803_v19, 5  ;;  %v7164_v19 = vld [vmem:[#allocation3 + $0x6c] sm:$0x1] }
 0x41d   :  { %v6620_v0 = vsel %vm12154_vm8, %v6525_v13, %v6481_v44  ;;  %v6810_v9 = vrot.slane %v6808_v55, 4  ;;  %v6813_v21 = vrot.slane %v6811_v34, 5  ;;  %v6801_v18 = vrot.slane %v6800_v17, 4 }
 0x41e   :  { %v6695_v32 = vsel %vm12166_vm9, %v6660_v38, %v6620_v0  ;;  %v8910_v40 = vrot.slane %v6895_v49, 9  ;;  %v6927_v11 = vrot.slane %v6754_v29, 5  ;;  %v8911_v60 = vrot.slane %v6896_v14, 9  ;;  %v7299_v14 = vld [vmem:[#allocation3 + $0x60] sm:$0xe] }
 0x41f   :  { %v6714_v45 = vsel %vm12197_vm10, %v6705_v54, %v6695_v32  ;;  %v6814_v50 = vor.u32 %v6813_v21, %v6810_v9  ;;  %v6931_v43 = vrot.slane %v6756_v31, 5  ;;  %v6806_v52 = vsel %vm10201_vm12, %v6801_v18, %v6805_v46 }
 0x420   :  { %v8904_v44 = vcombine.low %v6713_v23, %v6714_v45  ;;  %v6819_v33 = vrot.slane %v6817_v61, 5  ;;  %v7018_v37 = vshrl.u32 %v6967_v2, 16  ;;  %v6887_v48 = vsel %vm11947_vm3, %v6806_v52, 0 }
 0x421   :  { %v6815_v4 = vrot.slane %v6814_v50, 4  ;;  %v6928_v35 = vsel %vm10195_vm11, %v8910_v40, %v6927_v11  ;;  %v7021_v28 = vshll.u32 %v6967_v2, 16  ;;  %v7027_v36 = vshll.u32 %v6983_v20, 16  ;;  %v7421_v11 = vld [vmem:[#allocation3 + $0x78] sm:$0xf] }
 0x422   :  { %8371 = vmatmul.mubr.bf16.vlgmr.msra.gmra.mrb[128].mxu0 %v8904_v44  ;;  %v6959_v8 = vsel %vm12154_vm8, %v6928_v35, %v6887_v48  ;;  %v7020_v7 = vrot.slane %v7018_v37, 4  ;;  %v7032_v26 = vshrl.u32 %v6968_v59, 16  ;;  %v6932_v41 = vsel %vm10195_vm11, %v8911_v60, %v6931_v43  ;;  %v7422_v35 = vld [vmem:[#allocation3 + $0x7c] sm:$0x1] }
 0x423   :  { %v6820_v42 = vsel %vm10201_vm12, %v6815_v4, %v6819_v33  ;;  %v7023_v29 = vrot.slane %v7021_v28, 5  ;;  %v7035_v63 = vshll.u32 %v6968_v59, 16  ;;  %v6975_v24 = vsel %vm12166_vm9, %v6967_v2, %v6959_v8  ;;  %v7300_v2 = vld [vmem:[#allocation3 + $0x68] sm:$0xe]  ;;  %v7423_v33 = vld [vmem:[#allocation3 + $0x80] sm:$0xf] }
 0x424   :  { %v6888_v5 = vsel %vm11947_vm3, %v6820_v42, 0  ;;  %v7034_v6 = vrot.slane %v7032_v26, 4  ;;  %v7041_v53 = vshll.u32 %v6984_v27, 16  ;;  %v7029_v56 = vrot.slane %v7027_v36, 5  ;;  %v7424_v42 = vld [vmem:[#allocation3 + $0x84] sm:$0x1] }
 0x425   :  { %v6960_v12 = vsel %vm12154_vm8, %v6932_v41, %v6888_v5  ;;  %v7024_v15 = vor.u32 %v7023_v29, %v7020_v7  ;;  %v7037_v31 = vrot.slane %v7035_v63, 5  ;;  %v7155_v25 = vsel %vm11947_vm3, %v7147_v22, 0 }
 0x426   :  { %v6976_v47 = vsel %vm12166_vm9, %v6968_v59, %v6960_v12  ;;  %v7043_v30 = vrot.slane %v7041_v53, 5  ;;  %v7198_v38 = vshrl.u32 %v7147_v22, 16  ;;  %v7201_v34 = vshll.u32 %v7147_v22, 16  ;;  %v7561_v53 = vld [vmem:[#allocation3 + $0x78] sm:$0xe] }
 0x427   :  { %v7025_v10 = vrot.slane %v7024_v15, 4  ;;  %v7038_v55 = vor.u32 %v7037_v31, %v7034_v6  ;;  %v7207_v49 = vshll.u32 %v7163_v1, 16  ;;  %v7156_v13 = vsel %vm11947_vm3, %v7148_v58, 0  ;;  %v7371_v15 = vld [vmem:[#allocation3 + $0x68] sm:$0xf] }
 0x428   :  { %v7200_v23 = vrot.slane %v7198_v38, 4  ;;  %v7212_v17 = vshrl.u32 %v7148_v58, 16  ;;  %v7215_v61 = vshll.u32 %v7148_v58, 16  ;;  %v7203_v9 = vrot.slane %v7201_v34, 5  ;;  %v7562_v58 = vld [vmem:[#allocation3 + $0x80] sm:$0xe] }
 0x429   :  { %v7030_v0 = vsel %vm10201_vm12, %v7025_v10, %v7029_v56  ;;  %v7039_v46 = vrot.slane %v7038_v55, 4  ;;  %v7221_v21 = vshll.u32 %v7164_v19, 16  ;;  %v7209_v54 = vrot.slane %v7207_v49, 5  ;;  %v7633_v10 = vld [vmem:[#allocation3 + $0x80] sm:$0xf] }
 0x42a   :  { %v7111_v32 = vsel %vm12197_vm10, %v7030_v0, %v6975_v24  ;;  %v7214_v18 = vrot.slane %v7212_v17, 4  ;;  %v7217_v40 = vrot.slane %v7215_v61, 5  ;;  %v7204_v50 = vor.u32 %v7203_v9, %v7200_v23  ;;  %v7634_v23 = vld [vmem:[#allocation3 + $0x88] sm:$0xf]  ;;  %v7649_v17 = vld [vmem:[#allocation3 + $0x84] sm:$0x1] }
 0x42b   :  { %v7044_v45 = vsel %vm10201_vm12, %v7039_v46, %v7043_v30  ;;  %v8922_v60 = vrot.slane %v7299_v14, 9  ;;  %v7331_v43 = vrot.slane %v7163_v1, 5  ;;  %v8923_v44 = vrot.slane %v7300_v2, 9  ;;  %v7372_v30 = vld [vmem:[#allocation3 + $0x70] sm:$0xf] }
 0x42c   :  { %v7112_v59 = vsel %vm12197_vm10, %v7044_v45, %v6976_v47  ;;  %v7218_v20 = vor.u32 %v7217_v40, %v7214_v18  ;;  %v7335_v52 = vrot.slane %v7164_v19, 5  ;;  %v7205_v4 = vrot.slane %v7204_v50, 4 }
 0x42d   :  { %v8917_v37 = vcombine.low %v7111_v32, %v7112_v59  ;;  %v7223_v48 = vrot.slane %v7221_v21, 5  ;;  %v7486_v27 = vshrl.u32 %v7421_v11, 16  ;;  %v7332_v8 = vsel %vm10195_vm11, %v8922_v60, %v7331_v43  ;;  %v7650_v43 = vld [vmem:[#allocation3 + $0x8c] sm:$0x1] }
 0x42e   :  { %v7219_v28 = vrot.slane %v7218_v20, 4  ;;  %v7336_v7 = vsel %vm10195_vm11, %v8923_v44, %v7335_v52  ;;  %v7489_v36 = vshll.u32 %v7421_v11, 16  ;;  %v7210_v26 = vsel %vm10201_vm12, %v7205_v4, %v7209_v54  ;;  %v12566_v4 = vld [vmem:[#allocation3 + $0x18] sm:$0xf] }
 0x42f   :  { %8378 = vmatprep.mubr.bf16.mxu0 %v8917_v37  ;;  %v7488_v41 = vrot.slane %v7486_v27, 4  ;;  %v7500_v29 = vshrl.u32 %v7423_v33, 16  ;;  %v7503_v63 = vshll.u32 %v7423_v33, 16  ;;  %v7291_v5 = vsel %vm12154_vm8, %v7210_v26, %v7155_v25  ;;  %v6473_v37 = vld [vmem:[#allocation3 + $0x10] sm:$0xf] }
 0x430   :  { %v7224_v22 = vsel %vm10201_vm12, %v7219_v28, %v7223_v48  ;;  %v7491_v24 = vrot.slane %v7489_v36, 5  ;;  %v7495_v6 = vshll.u32 %v7422_v35, 16  ;;  %v7363_v12 = vsel %vm12166_vm9, %v7332_v8, %v7291_v5  ;;  %v6492_v8 = vld [vmem:[#allocation3 + $0x14] sm:$0x1] }
 0x431   :  { %v7292_v1 = vsel %vm12154_vm8, %v7224_v22, %v7156_v13  ;;  %v7502_v56 = vrot.slane %v7500_v29, 4  ;;  %v7505_v31 = vrot.slane %v7503_v63, 5  ;;  %v7379_v25 = vsel %vm12197_vm10, %v7371_v15, %v7363_v12  ;;  %v6493_v63 = vld [vmem:[#allocation3 + $0x1c] sm:$0x1]  ;;  %v6631_v12 = vld [vmem:[#allocation3 + $0x10] sm:$0xe] }
 0x432   :  { %v7364_v47 = vsel %vm12166_vm9, %v7336_v7, %v7292_v1  ;;  %v7492_v19 = vor.u32 %v7491_v24, %v7488_v41  ;;  %v7509_v38 = vshll.u32 %v7424_v42, 16  ;;  %v8936_v49 = vrot.slane %v7561_v53, 9 }
 0x433   :  { %v7380_v55 = vsel %vm12197_vm10, %v7372_v30, %v7364_v47  ;;  %v7506_v34 = vor.u32 %v7505_v31, %v7502_v56  ;;  %v7599_v13 = vrot.slane %v7422_v35, 5  ;;  %v7497_v0 = vrot.slane %v7495_v6, 5  ;;  %v6632_v47 = vld [vmem:[#allocation3 + $0x18] sm:$0xe] }
 0x434   :  { %v8929_v61 = vcombine.low %v7379_v25, %v7380_v55  ;;  %v7493_v14 = vrot.slane %v7492_v19, 4  ;;  %v8937_v46 = vrot.slane %v7562_v58, 9  ;;  %v7511_v21 = vrot.slane %v7509_v38, 5 }
 0x435   :  { %v7507_v9 = vrot.slane %v7506_v34, 4  ;;  %v7603_v2 = vrot.slane %v7424_v42, 5  ;;  %v7710_v32 = vshrl.u32 %v7633_v10, 16  ;;  %v7713_v18 = vshll.u32 %v7633_v10, 16 }
 0x436   :  { %8411 = vmatmul.mubr.bf16.gmra.mrb[92].mxu1 %v8929_v61  ;;  %v7498_v54 = vsel %vm10201_vm12, %v7493_v14, %v7497_v0  ;;  %v7719_v40 = vshll.u32 %v7649_v17, 16  ;;  %v7724_v11 = vshrl.u32 %v7634_v23, 16  ;;  %v7600_v60 = vsel %vm10195_vm11, %v8936_v49, %v7599_v13  ;;  %v12583_v13 = vld [vmem:[#allocation3 + $0x70] sm:$0xf] }
 0x437   :  { %v7512_v45 = vsel %vm10201_vm12, %v7507_v9, %v7511_v21  ;;  %v7553_v50 = vsel %vm11947_vm3, %v7498_v54, 0  ;;  %v7712_v59 = vrot.slane %v7710_v32, 4  ;;  %v7604_v44 = vsel %vm10195_vm11, %v8937_v46, %v7603_v2  ;;  %v7165_v2 = vld [vmem:[#allocation3 + $0x74] sm:$0x1] }
 0x438   :  { %v7554_v20 = vsel %vm11947_vm3, %v7512_v45, 0  ;;  %v7625_v52 = vsel %vm12154_vm8, %v7600_v60, %v7553_v50  ;;  %v7715_v33 = vrot.slane %v7713_v18, 5  ;;  %v7721_v35 = vrot.slane %v7719_v40, 5  ;;  %v7150_v40 = vld [vmem:[#allocation3 + $0x78] sm:$0xf] }
 0x439   :  { %v7626_v48 = vsel %vm12154_vm8, %v7604_v44, %v7554_v20  ;;  %v7726_v27 = vrot.slane %v7724_v11, 4  ;;  %v7727_v28 = vshll.u32 %v7634_v23, 16  ;;  %v7641_v7 = vsel %vm12166_vm9, %v7633_v10, %v7625_v52  ;;  %v6706_v20 = vld [vmem:[#allocation3 + $0x18] sm:$0xf] }
 0x43a   :  { %v7642_v36 = vsel %vm12166_vm9, %v7634_v23, %v7626_v48  ;;  %v7716_v26 = vor.u32 %v7715_v33, %v7712_v59  ;;  %v7733_v42 = vshll.u32 %v7650_v43, 16  ;;  %v6482_v29 = vsel %vm11947_vm3, %v6473_v37, 0  ;;  %v7166_v48 = vld [vmem:[#allocation3 + $0x7c] sm:$0x1] }
 0x43b   :  { %v7729_v41 = vrot.slane %v7727_v28, 5  ;;  %v6527_v22 = vshrl.u32 %v6473_v37, 16  ;;  %v6530_v5 = vshll.u32 %v6473_v37, 16  ;;  %v6483_v6 = vsel %vm11947_vm3, %v12566_v4, 0  ;;  %v7301_v28 = vld [vmem:[#allocation3 + $0x70] sm:$0xe] }
 0x43c   :  { %v7717_v24 = vrot.slane %v7716_v26, 4  ;;  %v6536_v53 = vshll.u32 %v6492_v8, 16  ;;  %v6541_v1 = vshrl.u32 %v12566_v4, 16  ;;  %v6544_v58 = vshll.u32 %v12566_v4, 16 }
 0x43d   :  { %v7730_v15 = vor.u32 %v7729_v41, %v7726_v27  ;;  %v6529_v56 = vrot.slane %v6527_v22, 4  ;;  %v6532_v31 = vrot.slane %v6530_v5, 5  ;;  %v7735_v25 = vrot.slane %v7733_v42, 5  ;;  %v7302_v41 = vld [vmem:[#allocation3 + $0x78] sm:$0xe] }
 0x43e   :  { %v7722_v30 = vsel %vm10201_vm12, %v7717_v24, %v7721_v35  ;;  %v6543_v19 = vrot.slane %v6541_v1, 4  ;;  %v6550_v38 = vshll.u32 %v6493_v63, 16  ;;  %v6538_v34 = vrot.slane %v6536_v53, 5  ;;  %v7425_v24 = vld [vmem:[#allocation3 + $0x88] sm:$0xf] }
 0x43f   :  { %v7731_v10 = vrot.slane %v7730_v15, 4  ;;  %v6533_v55 = vor.u32 %v6532_v31, %v6529_v56  ;;  %v6546_v49 = vrot.slane %v6544_v58, 5  ;;  %v7777_v23 = vsel %vm12197_vm10, %v7722_v30, %v7641_v7  ;;  %v6707_v7 = vld [vmem:[#allocation3 + $0x20] sm:$0xf]  ;;  %v7427_v30 = vld [vmem:[#allocation3 + $0x90] sm:$0xf] }
 0x440   :  { %v8898_v17 = vrot.slane %v6631_v12, 9  ;;  %v6663_v61 = vrot.slane %v6492_v8, 5  ;;  %v8899_v14 = vrot.slane %v6632_v47, 9  ;;  %v6667_v21 = vrot.slane %v6493_v63, 5  ;;  %v7426_v47 = vld [vmem:[#allocation3 + $0x8c] sm:$0x1] }
 0x441   :  { %v7736_v0 = vsel %vm10201_vm12, %v7731_v10, %v7735_v25  ;;  %v6534_v46 = vrot.slane %v6533_v55, 4  ;;  %v6547_v9 = vor.u32 %v6546_v49, %v6543_v19  ;;  %v6552_v54 = vrot.slane %v6550_v38, 5 }
 0x442   :  { %v7778_v32 = vsel %vm12197_vm10, %v7736_v0, %v7642_v36  ;;  %v6664_v18 = vsel %vm10195_vm11, %v8898_v17, %v6663_v61  ;;  %v7157_v11 = vsel %vm11947_vm3, %v12583_v13, 0  ;;  %v6668_v43 = vsel %vm10195_vm11, %v8899_v14, %v6667_v21  ;;  %v7428_v17 = vld [vmem:[#allocation3 + $0x94] sm:$0x1] }
 0x443   :  { %v8942_v45 = vcombine.low %v7777_v23, %v7778_v32  ;;  %v6539_v50 = vsel %vm10201_vm12, %v6534_v46, %v6538_v34  ;;  %v6548_v60 = vrot.slane %v6547_v9, 4  ;;  %v7226_v44 = vshrl.u32 %v12583_v13, 16 }
 0x444   :  { %v6621_v59 = vsel %vm12154_vm8, %v6539_v50, %v6482_v29  ;;  %v7229_v52 = vshll.u32 %v12583_v13, 16  ;;  %v7235_v33 = vshll.u32 %v7165_v2, 16  ;;  %v7240_v35 = vshrl.u32 %v7150_v40, 16 }
 0x445   :  { %8418 = vmatprep.mubr.bf16.mxu1 %v8942_v45  ;;  %v6553_v37 = vsel %vm10201_vm12, %v6548_v60, %v6552_v54  ;;  %v6696_v4 = vsel %vm12166_vm9, %v6664_v18, %v6621_v59  ;;  %v7243_v27 = vshll.u32 %v7150_v40, 16  ;;  %v7228_v26 = vrot.slane %v7226_v44, 4  ;;  %v7563_v54 = vld [vmem:[#allocation3 + $0x88] sm:$0xe]  ;;  %v7374_v45 = vld [vmem:[#allocation3 + $0x80] sm:$0xf] }
 0x446   :  { %v6622_v8 = vsel %vm12154_vm8, %v6553_v37, %v6483_v6  ;;  %v6715_v36 = vsel %vm12197_vm10, %v6706_v20, %v6696_v4  ;;  %v7231_v42 = vrot.slane %v7229_v52, 5  ;;  %v7158_v63 = vsel %vm11947_vm3, %v7150_v40, 0  ;;  %v7635_v52 = vld [vmem:[#allocation3 + $0x90] sm:$0xf] }
 0x447   :  { %v6697_v29 = vsel %vm12166_vm9, %v6668_v43, %v6622_v8  ;;  %v7242_v22 = vrot.slane %v7240_v35, 4  ;;  %v7245_v5 = vrot.slane %v7243_v27, 5  ;;  %v7249_v1 = vshll.u32 %v7166_v48, 16  ;;  %v7564_v43 = vld [vmem:[#allocation3 + $0x90] sm:$0xe] }
 0x448   :  { %v6716_v53 = vsel %vm12197_vm10, %v6707_v7, %v6697_v29  ;;  %v7232_v6 = vor.u32 %v7231_v42, %v7228_v26  ;;  %v8924_v12 = vrot.slane %v7301_v28, 9  ;;  %v7339_v31 = vrot.slane %v7165_v2, 5  ;;  %v7373_v2 = vld [vmem:[#allocation3 + $0x78] sm:$0xf]  ;;  %v7651_v27 = vld [vmem:[#allocation3 + $0x94] sm:$0x1] }
 0x449   :  { %v8905_v15 = vcombine.low %v6715_v36, %v6716_v53  ;;  %v7246_v56 = vor.u32 %v7245_v5, %v7242_v22  ;;  %v8925_v58 = vrot.slane %v7302_v41, 9  ;;  %v7237_v19 = vrot.slane %v7235_v33, 5  ;;  %v7636_v33 = vld [vmem:[#allocation3 + $0x98] sm:$0xf]  ;;  %v7652_v22 = vld [vmem:[#allocation3 + $0x9c] sm:$0x1] }
 0x44a   :  { %v7233_v25 = vrot.slane %v7232_v6, 4  ;;  %v7343_v38 = vrot.slane %v7166_v48, 5  ;;  %v7514_v10 = vshrl.u32 %v7425_v24, 16  ;;  %v7251_v34 = vrot.slane %v7249_v1, 5 }
 0x44b   :  { %8379 = vmatmul.mubr.bf16.gmra.mrb[132].mxu0 %v8905_v15  ;;  %v7247_v55 = vrot.slane %v7246_v56, 4  ;;  %v7340_v49 = vsel %vm10195_vm11, %v8924_v12, %v7339_v31  ;;  %v7517_v13 = vshll.u32 %v7425_v24, 16  ;;  %v7523_v14 = vshll.u32 %v7426_v47, 16 }
 0x44c   :  { %v7238_v23 = vsel %vm10201_vm12, %v7233_v25, %v7237_v19  ;;  %v7516_v61 = vrot.slane %v7514_v10, 4  ;;  %v7528_v0 = vshrl.u32 %v7427_v30, 16  ;;  %v7344_v21 = vsel %vm10195_vm11, %v8925_v58, %v7343_v38  ;;  %v7151_v58 = vld [vmem:[#allocation3 + $0x80] sm:$0xf]  ;;  %v7167_v38 = vld [vmem:[#allocation3 + $0x84] sm:$0x1] }
 0x44d   :  { %v7252_v46 = vsel %vm10201_vm12, %v7247_v55, %v7251_v34  ;;  %v7293_v9 = vsel %vm12154_vm8, %v7238_v23, %v7157_v11  ;;  %v7519_v32 = vrot.slane %v7517_v13, 5  ;;  %v7531_v60 = vshll.u32 %v7427_v30, 16  ;;  %v7152_v13 = vld [vmem:[#allocation3 + $0x88] sm:$0xf] }
 0x44e   :  { %v7294_v18 = vsel %vm12154_vm8, %v7252_v46, %v7158_v63  ;;  %v7365_v40 = vsel %vm12166_vm9, %v7340_v49, %v7293_v9  ;;  %v7530_v50 = vrot.slane %v7528_v0, 4  ;;  %v7537_v44 = vshll.u32 %v7428_v17, 16  ;;  %v7168_v9 = vld [vmem:[#allocation3 + $0x8c] sm:$0x1] }
 0x44f   :  { %v7366_v59 = vsel %vm12166_vm9, %v7344_v21, %v7294_v18  ;;  %v7381_v11 = vsel %vm12197_vm10, %v7373_v2, %v7365_v40  ;;  %v7520_v20 = vor.u32 %v7519_v32, %v7516_v61  ;;  %v7533_v4 = vrot.slane %v7531_v60, 5 }
 0x450   :  { %v7382_v37 = vsel %vm12197_vm10, %v7374_v45, %v7366_v59  ;;  %v8938_v48 = vrot.slane %v7563_v54, 9  ;;  %v7607_v35 = vrot.slane %v7426_v47, 5  ;;  %v7525_v7 = vrot.slane %v7523_v14, 5 }
 0x451   :  { %v8930_v28 = vcombine.low %v7381_v11, %v7382_v37  ;;  %v7521_v8 = vrot.slane %v7520_v20, 4  ;;  %v7539_v36 = vrot.slane %v7537_v44, 5  ;;  %v7534_v26 = vor.u32 %v7533_v4, %v7530_v50 }
 0x452   :  { %v8939_v42 = vrot.slane %v7564_v43, 9  ;;  %v7611_v41 = vrot.slane %v7428_v17, 5  ;;  %v7738_v29 = vshrl.u32 %v7635_v52, 16  ;;  %v7741_v5 = vshll.u32 %v7635_v52, 16  ;;  %v7303_v43 = vld [vmem:[#allocation3 + $0x80] sm:$0xe] }
 0x453   :  { %8419 = vmatmul.mubr.bf16.gmra.mrb[96].mxu1 %v8930_v28  ;;  %v7526_v63 = vsel %vm10201_vm12, %v7521_v8, %v7525_v7  ;;  %v7747_v24 = vshll.u32 %v7651_v27, 16  ;;  %v7752_v53 = vshrl.u32 %v7636_v33, 16  ;;  %v7535_v6 = vrot.slane %v7534_v26, 4 }
 0x454   :  { %v7555_v1 = vsel %vm11947_vm3, %v7526_v63, 0  ;;  %v7608_v12 = vsel %vm10195_vm11, %v8938_v48, %v7607_v35  ;;  %v7740_v15 = vrot.slane %v7738_v29, 4  ;;  %v7743_v31 = vrot.slane %v7741_v5, 5 }
 0x455   :  { %v7627_v56 = vsel %vm12154_vm8, %v7608_v12, %v7555_v1  ;;  %v7540_v47 = vsel %vm10201_vm12, %v7535_v6, %v7539_v36  ;;  %v7754_v30 = vrot.slane %v7752_v53, 4  ;;  %v7755_v25 = vshll.u32 %v7636_v33, 16 }
 0x456   :  { %v7761_v19 = vshll.u32 %v7652_v22, 16  ;;  %v7556_v10 = vsel %vm11947_vm3, %v7540_v47, 0  ;;  %v7612_v55 = vsel %vm10195_vm11, %v8939_v42, %v7611_v41  ;;  %v7744_v34 = vor.u32 %v7743_v31, %v7740_v15 }
 0x457   :  { %v7749_v49 = vrot.slane %v7747_v24, 5  ;;  %v7628_v23 = vsel %vm12154_vm8, %v7612_v55, %v7556_v10  ;;  %v7643_v17 = vsel %vm12166_vm9, %v7635_v52, %v7627_v56  ;;  %v7757_v61 = vrot.slane %v7755_v25, 5  ;;  %v7304_v52 = vld [vmem:[#allocation3 + $0x88] sm:$0xe]  ;;  %v7376_v56 = vld [vmem:[#allocation3 + $0x90] sm:$0xf] }
 0x458   :  { %v7254_v14 = vshrl.u32 %v7151_v58, 16  ;;  %v7745_v0 = vrot.slane %v7744_v34, 4  ;;  %v7763_v46 = vrot.slane %v7761_v19, 5  ;;  %v7257_v21 = vshll.u32 %v7151_v58, 16 }
 0x459   :  { %v7263_v2 = vshll.u32 %v7167_v38, 16  ;;  %v7758_v32 = vor.u32 %v7757_v61, %v7754_v30  ;;  %v7268_v18 = vshrl.u32 %v7152_v13, 16  ;;  %v7271_v40 = vshll.u32 %v7152_v13, 16  ;;  %v12697_v61 = vld [vmem:[%s12753_s6] ss:$0 sm:$0xff] }
 0x45a   :  { %v7256_v54 = vrot.slane %v7254_v14, 4  ;;  %v7644_v45 = vsel %vm12166_vm9, %v7636_v33, %v7628_v23  ;;  %v7750_v50 = vsel %vm10201_vm12, %v7745_v0, %v7749_v49  ;;  %v7259_v60 = vrot.slane %v7257_v21, 5 }
 0x45b   :  { %v7759_v59 = vrot.slane %v7758_v32, 4  ;;  %v7270_v11 = vrot.slane %v7268_v18, 4  ;;  %v7273_v20 = vrot.slane %v7271_v40, 5  ;;  %v7277_v44 = vshll.u32 %v7168_v9, 16 }
 0x45c   :  { %v7779_v37 = vsel %vm12197_vm10, %v7750_v50, %v7643_v17  ;;  %v7260_v4 = vor.u32 %v7259_v60, %v7256_v54  ;;  %v7265_v48 = vrot.slane %v7263_v2, 5  ;;  %v8926_v33 = vrot.slane %v7303_v43, 9 }
 0x45d   :  { %v7764_v35 = vsel %vm10201_vm12, %v7759_v59, %v7763_v46  ;;  %v7274_v27 = vor.u32 %v7273_v20, %v7270_v11  ;;  %v7347_v28 = vrot.slane %v7167_v38, 5  ;;  %v8927_v36 = vrot.slane %v7304_v52, 9 }
 0x45e   :  { %v7780_v8 = vsel %vm12197_vm10, %v7764_v35, %v7644_v45  ;;  %v7261_v7 = vrot.slane %v7260_v4, 4  ;;  %v7351_v26 = vrot.slane %v7168_v9, 5  ;;  %v7279_v29 = vrot.slane %v7277_v44, 5 }
 0x45f   :  { %v8943_v42 = vcombine.low %v7779_v37, %v7780_v8  ;;  %v7275_v41 = vrot.slane %v7274_v27, 4  ;;  %v7159_v63 = vsel %vm11947_vm3, %v7151_v58, 0  ;;  %v7160_v5 = vsel %vm11947_vm3, %v7152_v13, 0 }
 0x460   :  { %v7266_v22 = vsel %vm10201_vm12, %v7261_v7, %v7265_v48  ;;  %v7348_v6 = vsel %vm10195_vm11, %v8926_v33, %v7347_v28  ;;  %v7352_v12 = vsel %vm10195_vm11, %v8927_v36, %v7351_v26 }
 0x461   :  { %8426 = vmatprep.mubr.bf16.mxu1 %v8943_v42  ;;  %v7280_v24 = vsel %vm10201_vm12, %v7275_v41, %v7279_v29  ;;  %v7295_v53 = vsel %vm12154_vm8, %v7266_v22, %v7159_v63 }
 0x462   :  { %v7296_v1 = vsel %vm12154_vm8, %v7280_v24, %v7160_v5  ;;  %v7367_v15 = vsel %vm12166_vm9, %v7348_v6, %v7295_v53 }
 0x463   :  { %v7368_v57 = vsel %vm12166_vm9, %v7352_v12, %v7296_v1  ;;  %v7383_v31 = vsel %vm12197_vm10, %v7375_v62, %v7367_v15 }
 0x464   :  { %v7384_v58 = vsel %vm12197_vm10, %v7376_v56, %v7368_v57 }
 0x465   :  { %v8931_v47 = vcombine.low %v7383_v31, %v7384_v58 }
 0x467   :  { %8427 = vmatmul.mubr.bf16.gmra.mrb[100].mxu1 %v8931_v47 }
 0x487   :  { %v12690_v3 = vpop.f32.mrb[112].mxu0 }
 0x488   :  { %v8179_v51 = vpop.f32.mrb[113].mxu0 }
 0x489   :  { %v12692_v30 = vpop.f32.mrb[114].mxu0 }
 0x48a   :  { %v8182_v25 = vpop.f32.mrb[115].mxu0 }
 0x48f   :  { %v9718_v19 = vpop.f32.mrb[116].mxu0 }
 0x490   :  { %v8195_v38 = vpop.f32.mrb[117].mxu0 }
 0x491   :  { %v9719_v10 = vpop.f32.mrb[118].mxu0 }
 0x492   :  { %v8198_v16 = vpop.f32.mrb[119].mxu0 }
 0x4a8   :  { %v9532_v55 = vpop.f32.mrb[80].mxu1 }
 0x4a9   :  { %v9533_v34 = vpop.f32.mrb[81].mxu1 }
 0x4aa   :  { %v9534_v49 = vadd.f32 %v9533_v34, %v9532_v55  ;;  %v9535_v13 = vpop.f32.mrb[82].mxu1 }
 0x4ab   :  { %v9536_v23 = vpop.f32.mrb[83].mxu1 }
 0x4ac   :  { %v8389_v17 = vadd.f32 %v9534_v49, %v8195_v38  ;;  %v9537_v39 = vadd.f32 %v9536_v23, %v9535_v13 }
 0x4ae   :  { %v8392_v14 = vadd.f32 %v9537_v39, %v8198_v16  ;;  %v8446_v0 = vadd.f32 %v12697_v61, %v8389_v17 }
 0x4b0   :  { %v8447_v46 = vadd.f32 %v12697_v61, %v8392_v14  ;;  %v9722_v9 = vpop.f32.mrb[120].mxu0 }
 0x4b1   :  { %v8211_v21 = vpop.f32.mrb[121].mxu0 }
 0x4b2   :  { %v9070_v2 = vpack.c.bf16 %v8447_v46, %v8446_v0  ;;  %v9723_v32 = vpop.f32.mrb[122].mxu0 }
 0x4b3   :  { %v8214_v54 = vpop.f32.mrb[123].mxu0 }
 0x4b4   :  { %9098 = vst [vmem:[%s12754_s7 + $0x10] sm:$0xff] %v9070_v2  }
 0x4bf   :  { %v9538_v18 = vpop.f32.mrb[84].mxu1 }
 0x4c0   :  { %v9539_v40 = vpop.f32.mrb[85].mxu1 }
 0x4c1   :  { %v9540_v45 = vadd.f32 %v9539_v40, %v9538_v18  ;;  %v9541_v50 = vpop.f32.mrb[86].mxu1 }
 0x4c2   :  { %v9542_v60 = vpop.f32.mrb[87].mxu1 }
 0x4c3   :  { %v8397_v43 = vadd.f32 %v9718_v19, %v9540_v45  ;;  %v9543_v59 = vadd.f32 %v9542_v60, %v9541_v50 }
 0x4c5   :  { %v8400_v11 = vadd.f32 %v9719_v10, %v9543_v59  ;;  %v8448_v20 = vadd.f32 %v12697_v61, %v8397_v43 }
 0x4c7   :  { %v8449_v44 = vadd.f32 %v12697_v61, %v8400_v11 }
 0x4c9   :  { %v9075_v52 = vpack.c.bf16 %v8449_v44, %v8448_v20  ;;  %v12706_v37 = vpop.f32.mrb[124].mxu0 }
 0x4ca   :  { %v8227_v4 = vpop.f32.mrb[125].mxu0 }
 0x4cb   :  { %9099 = vst [vmem:[%s12754_s7 + $0x18] sm:$0xff] %v9075_v52   ;;  %v12711_v48 = vpop.f32.mrb[126].mxu0 }
 0x4cc   :  { %v8230_v35 = vpop.f32.mrb[127].mxu0 }
 0x4e0   :  { %v9544_v27 = vpop.f32.mrb[88].mxu1 }
 0x4e1   :  { %v9545_v33 = vpop.f32.mrb[89].mxu1 }
 0x4e2   :  { %v9546_v28 = vadd.f32 %v9545_v33, %v9544_v27  ;;  %v9547_v8 = vpop.f32.mrb[90].mxu1 }
 0x4e3   :  { %v9548_v7 = vpop.f32.mrb[91].mxu1 }
 0x4e4   :  { %v8405_v36 = vadd.f32 %v9546_v28, %v8211_v21  ;;  %v9549_v26 = vadd.f32 %v9548_v7, %v9547_v8 }
 0x4e6   :  { %v8408_v42 = vadd.f32 %v9549_v26, %v8214_v54  ;;  %v8450_v41 = vadd.f32 %v12697_v61, %v8405_v36 }
 0x4e8   :  { %v8451_v29 = vadd.f32 %v12697_v61, %v8408_v42 }
 0x4ea   :  { %v9080_v63 = vpack.c.bf16 %v8451_v29, %v8450_v41 }
 0x4ec   :  { %9100 = vst [vmem:[%s12754_s7 + $0x20] sm:$0xff] %v9080_v63  }
 0x4f5   :  { %v9520_v22 = vpop.f32.mrb[128].mxu0 }
 0x4f6   :  { %v9521_v5 = vpop.f32.mrb[129].mxu0 }
 0x4f7   :  { %v9522_v24 = vadd.f32 %v9521_v5, %v9520_v22  ;;  %v9523_v53 = vpop.f32.mrb[130].mxu0 }
 0x4f8   :  { %v9524_v6 = vpop.f32.mrb[131].mxu0 }
 0x4f9   :  { %v8373_v1 = vadd.f32 %v9522_v24, %v8179_v51  ;;  %v9525_v12 = vadd.f32 %v9524_v6, %v9523_v53 }
 0x4fb   :  { %v8376_v15 = vadd.f32 %v9525_v12, %v8182_v25  ;;  %v8442_v62 = vadd.f32 %v12697_v61, %v8373_v1 }
 0x4fd   :  { %v8443_v57 = vadd.f32 %v12697_v61, %v8376_v15 }
 0x4ff   :  { %v9060_v56 = vpack.c.bf16 %v8443_v57, %v8442_v62 }
 0x501   :  { %9061 = vst [vmem:[%s12754_s7] sm:$0xff] %v9060_v56  }
 0x509   :  { %v9550_v31 = vpop.f32.mrb[92].mxu1 }
 0x50a   :  { %v9551_v58 = vpop.f32.mrb[93].mxu1 }
 0x50b   :  { %v9552_v47 = vadd.f32 %v9551_v58, %v9550_v31  ;;  %v9553_v19 = vpop.f32.mrb[94].mxu1 }
 0x50c   :  { %v9554_v38 = vpop.f32.mrb[95].mxu1 }
 0x50d   :  { %v8413_v10 = vadd.f32 %v9722_v9, %v9552_v47  ;;  %v9555_v16 = vadd.f32 %v9554_v38, %v9553_v19 }
 0x50f   :  { %v8416_v55 = vadd.f32 %v9723_v32, %v9555_v16  ;;  %v8452_v51 = vadd.f32 %v12697_v61, %v8413_v10 }
 0x511   :  { %v8453_v25 = vadd.f32 %v12697_v61, %v8416_v55 }
 0x513   :  { %v9085_v34 = vpack.c.bf16 %v8453_v25, %v8452_v51 }
 0x515   :  { %9101 = vst [vmem:[%s12754_s7 + $0x28] sm:$0xff] %v9085_v34  }
 0x51e   :  { %v9526_v49 = vpop.f32.mrb[132].mxu0 }
 0x51f   :  { %v9527_v13 = vpop.f32.mrb[133].mxu0 }
 0x520   :  { %v9528_v23 = vadd.f32 %v9527_v13, %v9526_v49  ;;  %v9529_v17 = vpop.f32.mrb[134].mxu0 }
 0x521   :  { %v9530_v39 = vpop.f32.mrb[135].mxu0 }
 0x522   :  { %v8381_v14 = vadd.f32 %v12690_v3, %v9528_v23  ;;  %v9531_v0 = vadd.f32 %v9530_v39, %v9529_v17 }
 0x524   :  { %v8384_v46 = vadd.f32 %v12692_v30, %v9531_v0  ;;  %v8444_v9 = vadd.f32 %v12697_v61, %v8381_v14 }
 0x526   :  { %v8445_v21 = vadd.f32 %v12697_v61, %v8384_v46  ;;  %v9556_v2 = vpop.f32.mrb[96].mxu1 }
 0x527   :  { %v9557_v32 = vpop.f32.mrb[97].mxu1 }
 0x528   :  { %v9065_v54 = vpack.c.bf16 %v8445_v21, %v8444_v9  ;;  %v9558_v18 = vadd.f32 %v9557_v32, %v9556_v2  ;;  %v9559_v40 = vpop.f32.mrb[98].mxu1 }
 0x529   :  { %v9560_v45 = vpop.f32.mrb[99].mxu1 }
 0x52a   :  { %9097 = vst [vmem:[%s12754_s7 + $0x8] sm:$0xff] %v9065_v54   ;;  %v8421_v50 = vadd.f32 %v9558_v18, %v8227_v4  ;;  %v9561_v60 = vadd.f32 %v9560_v45, %v9559_v40 }
 0x52c   :  { %v8424_v3 = vadd.f32 %v9561_v60, %v8230_v35  ;;  %v8454_v43 = vadd.f32 %v12697_v61, %v8421_v50 }
 0x52e   :  { %v8455_v30 = vadd.f32 %v12697_v61, %v8424_v3 }
 0x530   :  { %v9090_v59 = vpack.c.bf16 %v8455_v30, %v8454_v43 }
 0x532   :  { %9102 = vst [vmem:[%s12754_s7 + $0x30] sm:$0xff] %v9090_v59  }
 0x53a   :  { %v9562_v11 = vpop.f32.mrb[100].mxu1 }
 0x53b   :  { %v9563_v20 = vpop.f32.mrb[101].mxu1 }
 0x53c   :  { %v9564_v44 = vadd.f32 %v9563_v20, %v9562_v11  ;;  %v9565_v52 = vpop.f32.mrb[102].mxu1 }
 0x53d   :  { %v9566_v27 = vpop.f32.mrb[103].mxu1 }
 0x53e   :  { %v8429_v33 = vadd.f32 %v12706_v37, %v9564_v44  ;;  %v9567_v28 = vadd.f32 %v9566_v27, %v9565_v52 }
 0x540   :  { %v8432_v4 = vadd.f32 %v12711_v48, %v9567_v28  ;;  %v8456_v35 = vadd.f32 %v12697_v61, %v8429_v33 }
 0x542   :  { %v8457_v8 = vadd.f32 %v12697_v61, %v8432_v4 }
 0x544   :  { %v9095_v7 = vpack.c.bf16 %v8457_v8, %v8456_v35 }
 0x546   :  { %9103 = vst [vmem:[%s12754_s7 + $0x38] sm:$0xff] %v9095_v7  }

</bundles_post_ra>
